<compile_context>
chip_gen: v5e
topology: v5e:2x2
jax: 0.10.0
libtpu: 0.0.40
codegen_flags: <defaults>
</compile_context>

<pallas_src>
import jax
import jax.numpy as jnp
import numpy as np
from jax.experimental import pallas as pl
from jax.experimental.pallas import tpu as pltpu

NUM_PATCHES = 25
GRID = 5                    # 5 x 5 patch grid
PATCH = 64                  # recovered patch is 64 x 64
STRIDE = 48                 # 4 * 48 + 64 = 256
OVERLAP = PATCH - STRIDE    # 16 overlapping rows between adjacent bands
FULL = 256                  # full phase image is 256 x 256
HIDDEN = 256                # PatchRecoveryNet hidden width
OUT_PATCH = PATCH * PATCH   # 4096
JPAD = 6                    # column groups padded 5 -> 6 (lane dim 384 = 3*128)
SLAB_W = JPAD * PATCH       # 384
TM = 32                     # MLP rows per grid step (multiple of 8/16)
CW = 1024                   # layer-2 output column chunk inside the kernel


# --------------------------------------------------------------------------
# Kernel 1: 2-layer MLP (PatchRecoveryNet), weights fully resident in VMEM.
#   x:(TM,K)bf16 @ w1:(K,256)bf16 -> relu -> h (registers, 8 vregs)
#   h @ w2:(256,4096)bf16, emitted in 1024-wide column chunks.
# --------------------------------------------------------------------------
def _mlp_kernel(x_ref, w1_ref, b1_ref, w2_ref, b2_ref, o_ref):
    h = jnp.dot(x_ref[...], w1_ref[...], preferred_element_type=jnp.float32)
    h = jnp.maximum(h + b1_ref[...], 0.0).astype(jnp.bfloat16)
    for c in range(OUT_PATCH // CW):           # bound f32 result liveness
        lo, hi = c * CW, (c + 1) * CW
        acc = jnp.dot(h, w2_ref[:, lo:hi], preferred_element_type=jnp.float32)
        o_ref[:, lo:hi] = (acc + b2_ref[:, lo:hi]).astype(o_ref.dtype)


def mlp_pallas(x, w1, b1, w2, b2):
    M, K = x.shape
    N2 = w2.shape[1]
    assert M % TM == 0 and K % 128 == 0
    flops = 2 * M * (K * HIDDEN + HIDDEN * N2)
    bytes_accessed = ((x.size + w1.size + w2.size + M * N2) * 2
                      + (b1.size + b2.size) * 4)
    return pl.pallas_call(
        _mlp_kernel,
        out_shape=jax.ShapeDtypeStruct((M, N2), jnp.bfloat16),
        grid=(M // TM,),
        in_specs=[
            pl.BlockSpec((TM, K), lambda i: (i, 0)),        # x tile
            pl.BlockSpec((K, HIDDEN), lambda i: (0, 0)),    # w1 (resident)
            pl.BlockSpec((1, HIDDEN), lambda i: (0, 0)),    # b1
            pl.BlockSpec((HIDDEN, N2), lambda i: (0, 0)),   # w2 (resident)
            pl.BlockSpec((1, N2), lambda i: (0, 0)),        # b2
        ],
        out_specs=pl.BlockSpec((TM, N2), lambda i: (i, 0)),
        compiler_params=pltpu.CompilerParams(
            dimension_semantics=("parallel",)),             # rows independent
        cost_estimate=pl.CostEstimate(flops=flops, transcendentals=0,
                                      bytes_accessed=bytes_accessed),
    )(x, w1, b1.reshape(1, HIDDEN), w2, b2.reshape(1, N2))


# --------------------------------------------------------------------------
# Kernel 2: phase stitching (one batch element per grid step).
# slab: (B, 320, 384) bf16  -- row r*64+pr, lane j*64+pc = patch(r,j)[pr,pc]
#                              (column group j=5 is zero padding).
# Per row band r (5 bands): band = slab[r*64:(r+1)*64, :] @ Cstack  (64,256).
# Overlapping 16 rows between adjacent bands are merged via a register carry,
# so each of the 256 output rows is written exactly once (no init, no RMW).
# Epilogue folded into the stores: o = band_sum * (inv_count*scale) + bias.
# --------------------------------------------------------------------------
def _stitch_kernel(slab_ref, c_ref, aff_ref, bias_ref, o_ref):
    carry = jnp.zeros((OVERLAP, FULL), jnp.float32)
    for r in range(GRID):
        band = jnp.dot(slab_ref[0, r * PATCH:(r + 1) * PATCH, :], c_ref[...],
                       preferred_element_type=jnp.float32)       # (64, 256)
        ro = r * STRIDE                                          # 0/48/96/144/192
        top = band[:OVERLAP] + carry                             # finalized rows
        o_ref[0, ro:ro + OVERLAP, :] = (top * aff_ref[ro:ro + OVERLAP, :]
                                        + bias_ref[ro:ro + OVERLAP, :])
        lo = ro + OVERLAP
        hi = ro + (PATCH if r == GRID - 1 else STRIDE)
        o_ref[0, lo:hi, :] = (band[OVERLAP:hi - ro] * aff_ref[lo:hi, :]
                              + bias_ref[lo:hi, :])
        if r < GRID - 1:
            carry = band[STRIDE:]                                # next band's overlap


def stitch_pallas(slab, cstack, affine, bias):
    B = slab.shape[0]
    flops = 2 * B * GRID * PATCH * SLAB_W * FULL
    bytes_accessed = (slab.size * 2 + cstack.size * 2
                      + (affine.size + bias.size + B * FULL * FULL) * 4)
    return pl.pallas_call(
        _stitch_kernel,
        out_shape=jax.ShapeDtypeStruct((B, FULL, FULL), jnp.float32),
        grid=(B,),
        in_specs=[
            pl.BlockSpec((1, GRID * PATCH, SLAB_W), lambda b: (b, 0, 0)),
            pl.BlockSpec((SLAB_W, FULL), lambda b: (0, 0)),      # Cstack (resident)
            pl.BlockSpec((FULL, FULL), lambda b: (0, 0)),        # affine
            pl.BlockSpec((FULL, FULL), lambda b: (0, 0)),        # bias
        ],
        out_specs=pl.BlockSpec((1, FULL, FULL), lambda b: (b, 0, 0)),
        compiler_params=pltpu.CompilerParams(
            dimension_semantics=("parallel",)),                  # batches independent
        cost_estimate=pl.CostEstimate(flops=flops, transcendentals=0,
                                      bytes_accessed=bytes_accessed),
    )(slab, cstack, affine, bias)


# --------------------------------------------------------------------------
# Parameter / constant construction (deterministic).
# --------------------------------------------------------------------------
def make_params(dp_h, dp_w, key):
    k1, k2, k3, k4, k5, k6 = jax.random.split(key, 6)
    k_in = 14 * 14 * dp_h * dp_w
    params = {
        "w1": 0.02 * jax.random.normal(k1, (k_in, HIDDEN), jnp.float32),
        "b1": 0.01 * jax.random.normal(k2, (HIDDEN,), jnp.float32),
        "w2": 0.02 * jax.random.normal(k3, (HIDDEN, OUT_PATCH), jnp.float32),
        "b2": 0.01 * jax.random.normal(k4, (OUT_PATCH,), jnp.float32),
        "scale": 1.0 + 0.01 * jax.random.normal(k5, (FULL, FULL), jnp.float32),
        "bias": 0.01 * jax.random.normal(k6, (FULL, FULL), jnp.float32),
    }

    # Stacked column-placement matrix: slab lane (j*64 + pc) -> output col j*48+pc.
    # Rows for the padded column group j=5 stay zero.  Exact in bf16 (0/1 values).
    cstack = np.zeros((SLAB_W, FULL), np.float32)
    for j in range(GRID):
        for pc in range(PATCH):
            cstack[j * PATCH + pc, j * STRIDE + pc] = 1.0
    params["cstack"] = jnp.asarray(cstack, jnp.bfloat16)

    # Overlap-count normalization map, pre-folded with the learned scale.
    cov1d = np.zeros(FULL, np.float32)
    for j in range(GRID):
        cov1d[j * STRIDE:j * STRIDE + PATCH] += 1.0
    count = cov1d[:, None] * cov1d[None, :]
    params["inv_count"] = jnp.asarray(1.0 / count)               # (256, 256)
    params["affine"] = params["inv_count"] * params["scale"]     # pre-folded
    return params


# --------------------------------------------------------------------------
# End-to-end forward (Pallas) and pure-jnp reference.
# --------------------------------------------------------------------------
def end2end_forward(dp_patches, params):
    B = dp_patches.shape[0]
    K = int(np.prod(dp_patches.shape[2:]))          # 14*14*H*W
    K_pad = ((K + 127) // 128) * 128                # K padded to a 128 multiple
    M = B * NUM_PATCHES
    M_pad = ((M + TM - 1) // TM) * TM               # rows padded to a TM multiple

    x = dp_patches.reshape(M, K).astype(jnp.bfloat16)
    x = jnp.pad(x, ((0, M_pad - M), (0, K_pad - K)))
    w1 = jnp.pad(params["w1"].astype(jnp.bfloat16), ((0, K_pad - K), (0, 0)))
    w2 = params["w2"].astype(jnp.bfloat16)

    rec = mlp_pallas(x, w1, params["b1"], w2, params["b2"])      # (M_pad, 4096) bf16

    # Host-side (XLA) relayout to the lane-dense stitch slab:
    # (M,4096) -> (B, row r, col j, pr, pc) -> pad j 5->6 -> (B, r*64+pr, j*64+pc).
    rec = rec[:M].reshape(B, GRID, GRID, PATCH, PATCH)
    rec = jnp.pad(rec, ((0, 0), (0, 0), (0, JPAD - GRID), (0, 0), (0, 0)))
    slab = rec.transpose(0, 1, 3, 2, 4).reshape(B, GRID * PATCH, SLAB_W)

    return stitch_pallas(slab, params["cstack"], params["affine"], params["bias"])


def end2end_reference(dp_patches, params):
    B = dp_patches.shape[0]
    x = dp_patches.reshape(B * NUM_PATCHES, -1).astype(jnp.float32)
    h = jnp.maximum(x @ params["w1"] + params["b1"], 0.0)
    rec = (h @ params["w2"] + params["b2"]).reshape(B, NUM_PATCHES, PATCH, PATCH)
    acc = jnp.zeros((B, FULL, FULL), jnp.float32)
    for i in range(NUM_PATCHES):
        ro = (i // GRID) * STRIDE
        co = (i % GRID) * STRIDE
        acc = acc.at[:, ro:ro + PATCH, co:co + PATCH].add(rec[:, i])
    return acc * params["inv_count"] * params["scale"] + params["bias"]


if __name__ == "__main__":
    B, H, W = 2, 4, 4                               # small DP patch size
    key = jax.random.PRNGKey(0)
    k_x, k_p = jax.random.split(key)
    dp_patches = jax.random.normal(k_x, (B, NUM_PATCHES, 14, 14, H, W),
                                   jnp.float32)
    params = make_params(H, W, k_p)

    fwd = jax.jit(end2end_forward)
    out = jax.block_until_ready(fwd(dp_patches, params))
    assert out.shape == (B, FULL, FULL) and out.dtype == jnp.float32

    ref = jax.block_until_ready(end2end_reference(dp_patches, params))
    np.testing.assert_allclose(np.asarray(out), np.asarray(ref),
                               rtol=5e-2, atol=5e-2)
    print("KERNEL_OK")
</pallas_src>

<mosaic_0001>
module attributes {stable_mosaic.version = 11 : i64} {
  func.func @_mlp_kernel(%arg0: i32, %arg1: memref<32x3200xbf16, #tpu.memory_space<vmem>>, %arg2: memref<3200x256xbf16, #tpu.memory_space<vmem>>, %arg3: memref<1x256xf32, #tpu.memory_space<vmem>>, %arg4: memref<256x4096xbf16, #tpu.memory_space<vmem>>, %arg5: memref<1x4096xf32, #tpu.memory_space<vmem>>, %arg6: memref<32x4096xbf16, #tpu.memory_space<vmem>>) attributes {dimension_semantics = [#tpu.dimension_semantics<parallel>], iteration_bounds = array<i64: 2>, scalar_prefetch = 0 : i64, scratch_operands = 0 : i64, tpu.core_type = #tpu.core_type<tc>, window_params = [{transform_indices = @transform_0, window_bounds = array<i64: 32, 3200>}, {pipeline_mode = #tpu.pipeline_mode<synchronous>, transform_indices = @transform_1, window_bounds = array<i64: 3200, 256>}, {pipeline_mode = #tpu.pipeline_mode<synchronous>, transform_indices = @transform_2, window_bounds = array<i64: 1, 256>}, {pipeline_mode = #tpu.pipeline_mode<synchronous>, transform_indices = @transform_3, window_bounds = array<i64: 256, 4096>}, {pipeline_mode = #tpu.pipeline_mode<synchronous>, transform_indices = @transform_4, window_bounds = array<i64: 1, 4096>}, {transform_indices = @transform_5, window_bounds = array<i64: 32, 4096>}]} {
    %c0 = arith.constant 0 : index
    %c0_0 = arith.constant 0 : index
    %0 = vector.load %arg1[%c0, %c0_0] : memref<32x3200xbf16, #tpu.memory_space<vmem>>, vector<32x3200xbf16>
    %c0_1 = arith.constant 0 : index
    %c0_2 = arith.constant 0 : index
    %1 = vector.load %arg2[%c0_1, %c0_2] : memref<3200x256xbf16, #tpu.memory_space<vmem>>, vector<3200x256xbf16>
    %cst = arith.constant dense<0.000000e+00> : vector<32x256xf32>
    %2 = tpu.matmul %0, %1, %cst {dimension_numbers = #tpu.dot_dimension_numbers<[1], [0], [0], [1], [0, 0, 1, 1], [], []>} : vector<32x3200xbf16>, vector<3200x256xbf16>, vector<32x256xf32> -> vector<32x256xf32>
    %c0_3 = arith.constant 0 : index
    %c0_4 = arith.constant 0 : index
    %3 = vector.load %arg3[%c0_3, %c0_4] : memref<1x256xf32, #tpu.memory_space<vmem>>, vector<1x256xf32>
    %4 = vector.broadcast %3 : vector<1x256xf32> to vector<32x256xf32>
    %5 = arith.addf %2, %4 : vector<32x256xf32>
    %cst_5 = arith.constant 0.000000e+00 : f32
    %6 = vector.broadcast %cst_5 : f32 to vector<32x256xf32>
    %7 = arith.maximumf %5, %6 : vector<32x256xf32>
    %8 = arith.truncf %7 : vector<32x256xf32> to vector<32x256xbf16>
    %c0_6 = arith.constant 0 : index
    %c0_7 = arith.constant 0 : index
    %9 = vector.load %arg4[%c0_6, %c0_7] : memref<256x4096xbf16, #tpu.memory_space<vmem>>, vector<256x1024xbf16>
    %cst_8 = arith.constant dense<0.000000e+00> : vector<32x1024xf32>
    %10 = tpu.matmul %8, %9, %cst_8 {dimension_numbers = #tpu.dot_dimension_numbers<[1], [0], [0], [1], [0, 0, 1, 1], [], []>} : vector<32x256xbf16>, vector<256x1024xbf16>, vector<32x1024xf32> -> vector<32x1024xf32>
    %c0_9 = arith.constant 0 : index
    %c0_10 = arith.constant 0 : index
    %11 = vector.load %arg5[%c0_9, %c0_10] : memref<1x4096xf32, #tpu.memory_space<vmem>>, vector<1x1024xf32>
    %12 = vector.broadcast %11 : vector<1x1024xf32> to vector<32x1024xf32>
    %13 = arith.addf %10, %12 : vector<32x1024xf32>
    %14 = arith.truncf %13 : vector<32x1024xf32> to vector<32x1024xbf16>
    %c0_11 = arith.constant 0 : index
    %c0_12 = arith.constant 0 : index
    %15 = vector.load %arg6[%c0_11, %c0_12] : memref<32x4096xbf16, #tpu.memory_space<vmem>>, vector<32x1024xbf16>
    tpu.vector_store %arg6[%c0_11, %c0_12], %14 {strides = array<i32>} : memref<32x4096xbf16, #tpu.memory_space<vmem>>, vector<32x1024xbf16>,
    %c0_13 = arith.constant 0 : index
    %c1024 = arith.constant 1024 : index
    %16 = vector.load %arg4[%c0_13, %c1024] : memref<256x4096xbf16, #tpu.memory_space<vmem>>, vector<256x1024xbf16>
    %cst_14 = arith.constant dense<0.000000e+00> : vector<32x1024xf32>
    %17 = tpu.matmul %8, %16, %cst_14 {dimension_numbers = #tpu.dot_dimension_numbers<[1], [0], [0], [1], [0, 0, 1, 1], [], []>} : vector<32x256xbf16>, vector<256x1024xbf16>, vector<32x1024xf32> -> vector<32x1024xf32>
    %c0_15 = arith.constant 0 : index
    %c1024_16 = arith.constant 1024 : index
    %18 = vector.load %arg5[%c0_15, %c1024_16] : memref<1x4096xf32, #tpu.memory_space<vmem>>, vector<1x1024xf32>
    %19 = vector.broadcast %18 : vector<1x1024xf32> to vector<32x1024xf32>
    %20 = arith.addf %17, %19 : vector<32x1024xf32>
    %21 = arith.truncf %20 : vector<32x1024xf32> to vector<32x1024xbf16>
    %c0_17 = arith.constant 0 : index
    %c1024_18 = arith.constant 1024 : index
    %22 = vector.load %arg6[%c0_17, %c1024_18] : memref<32x4096xbf16, #tpu.memory_space<vmem>>, vector<32x1024xbf16>
    tpu.vector_store %arg6[%c0_17, %c1024_18], %21 {strides = array<i32>} : memref<32x4096xbf16, #tpu.memory_space<vmem>>, vector<32x1024xbf16>,
    %c0_19 = arith.constant 0 : index
    %c2048 = arith.constant 2048 : index
    %23 = vector.load %arg4[%c0_19, %c2048] : memref<256x4096xbf16, #tpu.memory_space<vmem>>, vector<256x1024xbf16>
    %cst_20 = arith.constant dense<0.000000e+00> : vector<32x1024xf32>
    %24 = tpu.matmul %8, %23, %cst_20 {dimension_numbers = #tpu.dot_dimension_numbers<[1], [0], [0], [1], [0, 0, 1, 1], [], []>} : vector<32x256xbf16>, vector<256x1024xbf16>, vector<32x1024xf32> -> vector<32x1024xf32>
    %c0_21 = arith.constant 0 : index
    %c2048_22 = arith.constant 2048 : index
    %25 = vector.load %arg5[%c0_21, %c2048_22] : memref<1x4096xf32, #tpu.memory_space<vmem>>, vector<1x1024xf32>
    %26 = vector.broadcast %25 : vector<1x1024xf32> to vector<32x1024xf32>
    %27 = arith.addf %24, %26 : vector<32x1024xf32>
    %28 = arith.truncf %27 : vector<32x1024xf32> to vector<32x1024xbf16>
    %c0_23 = arith.constant 0 : index
    %c2048_24 = arith.constant 2048 : index
    %29 = vector.load %arg6[%c0_23, %c2048_24] : memref<32x4096xbf16, #tpu.memory_space<vmem>>, vector<32x1024xbf16>
    tpu.vector_store %arg6[%c0_23, %c2048_24], %28 {strides = array<i32>} : memref<32x4096xbf16, #tpu.memory_space<vmem>>, vector<32x1024xbf16>,
    %c0_25 = arith.constant 0 : index
    %c3072 = arith.constant 3072 : index
    %30 = vector.load %arg4[%c0_25, %c3072] : memref<256x4096xbf16, #tpu.memory_space<vmem>>, vector<256x1024xbf16>
    %cst_26 = arith.constant dense<0.000000e+00> : vector<32x1024xf32>
    %31 = tpu.matmul %8, %30, %cst_26 {dimension_numbers = #tpu.dot_dimension_numbers<[1], [0], [0], [1], [0, 0, 1, 1], [], []>} : vector<32x256xbf16>, vector<256x1024xbf16>, vector<32x1024xf32> -> vector<32x1024xf32>
    %c0_27 = arith.constant 0 : index
    %c3072_28 = arith.constant 3072 : index
    %32 = vector.load %arg5[%c0_27, %c3072_28] : memref<1x4096xf32, #tpu.memory_space<vmem>>, vector<1x1024xf32>
    %33 = vector.broadcast %32 : vector<1x1024xf32> to vector<32x1024xf32>
    %34 = arith.addf %31, %33 : vector<32x1024xf32>
    %35 = arith.truncf %34 : vector<32x1024xf32> to vector<32x1024xbf16>
    %c0_29 = arith.constant 0 : index
    %c3072_30 = arith.constant 3072 : index
    %36 = vector.load %arg6[%c0_29, %c3072_30] : memref<32x4096xbf16, #tpu.memory_space<vmem>>, vector<32x1024xbf16>
    tpu.vector_store %arg6[%c0_29, %c3072_30], %35 {strides = array<i32>} : memref<32x4096xbf16, #tpu.memory_space<vmem>>, vector<32x1024xbf16>,
    return
  }
  func.func @transform_0(%arg0: i32) -> (i32, i32) {
    %c0_i32 = arith.constant 0 : i32
    %c0_i32_0 = arith.constant 0 : i32
    return %arg0, %c0_i32 : i32, i32
  }
  func.func @transform_1(%arg0: i32) -> (i32, i32) {
    %c0_i32 = arith.constant 0 : i32
    %c0_i32_0 = arith.constant 0 : i32
    %c0_i32_1 = arith.constant 0 : i32
    return %c0_i32, %c0_i32_0 : i32, i32
  }
  func.func @transform_2(%arg0: i32) -> (i32, i32) {
    %c0_i32 = arith.constant 0 : i32
    %c0_i32_0 = arith.constant 0 : i32
    %c0_i32_1 = arith.constant 0 : i32
    return %c0_i32, %c0_i32_0 : i32, i32
  }
  func.func @transform_3(%arg0: i32) -> (i32, i32) {
    %c0_i32 = arith.constant 0 : i32
    %c0_i32_0 = arith.constant 0 : i32
    %c0_i32_1 = arith.constant 0 : i32
    return %c0_i32, %c0_i32_0 : i32, i32
  }
  func.func @transform_4(%arg0: i32) -> (i32, i32) {
    %c0_i32 = arith.constant 0 : i32
    %c0_i32_0 = arith.constant 0 : i32
    %c0_i32_1 = arith.constant 0 : i32
    return %c0_i32, %c0_i32_0 : i32, i32
  }
  func.func @transform_5(%arg0: i32) -> (i32, i32) {
    %c0_i32 = arith.constant 0 : i32
    %c0_i32_0 = arith.constant 0 : i32
    return %arg0, %c0_i32 : i32, i32
  }
}

module attributes {stable_mosaic.version = 11 : i64} {
  func.func @_stitch_kernel(%arg0: i32, %arg1: memref<1x320x384xbf16, #tpu.memory_space<vmem>>, %arg2: memref<384x256xbf16, #tpu.memory_space<vmem>>, %arg3: memref<256x256xf32, #tpu.memory_space<vmem>>, %arg4: memref<256x256xf32, #tpu.memory_space<vmem>>, %arg5: memref<1x256x256xf32, #tpu.memory_space<vmem>>) attributes {dimension_semantics = [#tpu.dimension_semantics<parallel>], iteration_bounds = array<i64: 2>, scalar_prefetch = 0 : i64, scratch_operands = 0 : i64, tpu.core_type = #tpu.core_type<tc>, window_params = [{transform_indices = @transform_0, window_bounds = array<i64: 1, 320, 384>}, {pipeline_mode = #tpu.pipeline_mode<synchronous>, transform_indices = @transform_1, window_bounds = array<i64: 384, 256>}, {pipeline_mode = #tpu.pipeline_mode<synchronous>, transform_indices = @transform_2, window_bounds = array<i64: 256, 256>}, {pipeline_mode = #tpu.pipeline_mode<synchronous>, transform_indices = @transform_3, window_bounds = array<i64: 256, 256>}, {transform_indices = @transform_4, window_bounds = array<i64: 1, 256, 256>}]} {
    %cst = arith.constant 0.000000e+00 : f32
    %0 = vector.broadcast %cst : f32 to vector<16x256xf32>
    %c0 = arith.constant 0 : index
    %c0_0 = arith.constant 0 : index
    %c0_1 = arith.constant 0 : index
    %1 = vector.load %arg1[%c0, %c0_0, %c0_1] : memref<1x320x384xbf16, #tpu.memory_space<vmem>>, vector<1x64x384xbf16>
    %2 = vector.shape_cast %1 : vector<1x64x384xbf16> to vector<64x384xbf16>
    %c0_2 = arith.constant 0 : index
    %c0_3 = arith.constant 0 : index
    %3 = vector.load %arg2[%c0_2, %c0_3] : memref<384x256xbf16, #tpu.memory_space<vmem>>, vector<384x256xbf16>
    %cst_4 = arith.constant dense<0.000000e+00> : vector<64x256xf32>
    %4 = tpu.matmul %2, %3, %cst_4 {dimension_numbers = #tpu.dot_dimension_numbers<[1], [0], [0], [1], [0, 0, 1, 1], [], []>} : vector<64x384xbf16>, vector<384x256xbf16>, vector<64x256xf32> -> vector<64x256xf32>
    %5 = vector.extract_strided_slice %4 {offsets = [0, 0], sizes = [16, 256], strides = [1, 1]} : vector<64x256xf32> to vector<16x256xf32>
    %6 = arith.addf %5, %0 : vector<16x256xf32>
    %c0_5 = arith.constant 0 : index
    %c0_6 = arith.constant 0 : index
    %7 = vector.load %arg3[%c0_5, %c0_6] : memref<256x256xf32, #tpu.memory_space<vmem>>, vector<16x256xf32>
    %8 = arith.mulf %6, %7 : vector<16x256xf32>
    %c0_7 = arith.constant 0 : index
    %c0_8 = arith.constant 0 : index
    %9 = vector.load %arg4[%c0_7, %c0_8] : memref<256x256xf32, #tpu.memory_space<vmem>>, vector<16x256xf32>
    %10 = arith.addf %8, %9 : vector<16x256xf32>
    %c0_9 = arith.constant 0 : index
    %c0_10 = arith.constant 0 : index
    %c0_11 = arith.constant 0 : index
    %11 = vector.load %arg5[%c0_9, %c0_10, %c0_11] : memref<1x256x256xf32, #tpu.memory_space<vmem>>, vector<1x16x256xf32>
    %12 = vector.shape_cast %11 : vector<1x16x256xf32> to vector<16x256xf32>
    %13 = vector.shape_cast %10 : vector<16x256xf32> to vector<1x16x256xf32>
    tpu.vector_store %arg5[%c0_9, %c0_10, %c0_11], %13 {strides = array<i32>} : memref<1x256x256xf32, #tpu.memory_space<vmem>>, vector<1x16x256xf32>,
    %14 = vector.extract_strided_slice %4 {offsets = [16, 0], sizes = [32, 256], strides = [1, 1]} : vector<64x256xf32> to vector<32x256xf32>
    %c16 = arith.constant 16 : index
    %c0_12 = arith.constant 0 : index
    %15 = vector.load %arg3[%c16, %c0_12] : memref<256x256xf32, #tpu.memory_space<vmem>>, vector<32x256xf32>
    %16 = arith.mulf %14, %15 : vector<32x256xf32>
    %c16_13 = arith.constant 16 : index
    %c0_14 = arith.constant 0 : index
    %17 = vector.load %arg4[%c16_13, %c0_14] : memref<256x256xf32, #tpu.memory_space<vmem>>, vector<32x256xf32>
    %18 = arith.addf %16, %17 : vector<32x256xf32>
    %c0_15 = arith.constant 0 : index
    %c16_16 = arith.constant 16 : index
    %c0_17 = arith.constant 0 : index
    %19 = vector.load %arg5[%c0_15, %c16_16, %c0_17] : memref<1x256x256xf32, #tpu.memory_space<vmem>>, vector<1x32x256xf32>
    %20 = vector.shape_cast %19 : vector<1x32x256xf32> to vector<32x256xf32>
    %21 = vector.shape_cast %18 : vector<32x256xf32> to vector<1x32x256xf32>
    tpu.vector_store %arg5[%c0_15, %c16_16, %c0_17], %21 {strides = array<i32>} : memref<1x256x256xf32, #tpu.memory_space<vmem>>, vector<1x32x256xf32>,
    %22 = vector.extract_strided_slice %4 {offsets = [48, 0], sizes = [16, 256], strides = [1, 1]} : vector<64x256xf32> to vector<16x256xf32>
    %c0_18 = arith.constant 0 : index
    %c64 = arith.constant 64 : index
    %c0_19 = arith.constant 0 : index
    %23 = vector.load %arg1[%c0_18, %c64, %c0_19] : memref<1x320x384xbf16, #tpu.memory_space<vmem>>, vector<1x64x384xbf16>
    %24 = vector.shape_cast %23 : vector<1x64x384xbf16> to vector<64x384xbf16>
    %c0_20 = arith.constant 0 : index
    %c0_21 = arith.constant 0 : index
    %25 = vector.load %arg2[%c0_20, %c0_21] : memref<384x256xbf16, #tpu.memory_space<vmem>>, vector<384x256xbf16>
    %cst_22 = arith.constant dense<0.000000e+00> : vector<64x256xf32>
    %26 = tpu.matmul %24, %25, %cst_22 {dimension_numbers = #tpu.dot_dimension_numbers<[1], [0], [0], [1], [0, 0, 1, 1], [], []>} : vector<64x384xbf16>, vector<384x256xbf16>, vector<64x256xf32> -> vector<64x256xf32>
    %27 = vector.extract_strided_slice %26 {offsets = [0, 0], sizes = [16, 256], strides = [1, 1]} : vector<64x256xf32> to vector<16x256xf32>
    %28 = arith.addf %27, %22 : vector<16x256xf32>
    %c48 = arith.constant 48 : index
    %c0_23 = arith.constant 0 : index
    %29 = vector.load %arg3[%c48, %c0_23] : memref<256x256xf32, #tpu.memory_space<vmem>>, vector<16x256xf32>
    %30 = arith.mulf %28, %29 : vector<16x256xf32>
    %c48_24 = arith.constant 48 : index
    %c0_25 = arith.constant 0 : index
    %31 = vector.load %arg4[%c48_24, %c0_25] : memref<256x256xf32, #tpu.memory_space<vmem>>, vector<16x256xf32>
    %32 = arith.addf %30, %31 : vector<16x256xf32>
    %c0_26 = arith.constant 0 : index
    %c48_27 = arith.constant 48 : index
    %c0_28 = arith.constant 0 : index
    %33 = vector.load %arg5[%c0_26, %c48_27, %c0_28] : memref<1x256x256xf32, #tpu.memory_space<vmem>>, vector<1x16x256xf32>
    %34 = vector.shape_cast %33 : vector<1x16x256xf32> to vector<16x256xf32>
    %35 = vector.shape_cast %32 : vector<16x256xf32> to vector<1x16x256xf32>
    tpu.vector_store %arg5[%c0_26, %c48_27, %c0_28], %35 {strides = array<i32>} : memref<1x256x256xf32, #tpu.memory_space<vmem>>, vector<1x16x256xf32>,
    %36 = vector.extract_strided_slice %26 {offsets = [16, 0], sizes = [32, 256], strides = [1, 1]} : vector<64x256xf32> to vector<32x256xf32>
    %c64_29 = arith.constant 64 : index
    %c0_30 = arith.constant 0 : index
    %37 = vector.load %arg3[%c64_29, %c0_30] : memref<256x256xf32, #tpu.memory_space<vmem>>, vector<32x256xf32>
    %38 = arith.mulf %36, %37 : vector<32x256xf32>
    %c64_31 = arith.constant 64 : index
    %c0_32 = arith.constant 0 : index
    %39 = vector.load %arg4[%c64_31, %c0_32] : memref<256x256xf32, #tpu.memory_space<vmem>>, vector<32x256xf32>
    %40 = arith.addf %38, %39 : vector<32x256xf32>
    %c0_33 = arith.constant 0 : index
    %c64_34 = arith.constant 64 : index
    %c0_35 = arith.constant 0 : index
    %41 = vector.load %arg5[%c0_33, %c64_34, %c0_35] : memref<1x256x256xf32, #tpu.memory_space<vmem>>, vector<1x32x256xf32>
    %42 = vector.shape_cast %41 : vector<1x32x256xf32> to vector<32x256xf32>
    %43 = vector.shape_cast %40 : vector<32x256xf32> to vector<1x32x256xf32>
    tpu.vector_store %arg5[%c0_33, %c64_34, %c0_35], %43 {strides = array<i32>} : memref<1x256x256xf32, #tpu.memory_space<vmem>>, vector<1x32x256xf32>,
    %44 = vector.extract_strided_slice %26 {offsets = [48, 0], sizes = [16, 256], strides = [1, 1]} : vector<64x256xf32> to vector<16x256xf32>
    %c0_36 = arith.constant 0 : index
    %c128 = arith.constant 128 : index
    %c0_37 = arith.constant 0 : index
    %45 = vector.load %arg1[%c0_36, %c128, %c0_37] : memref<1x320x384xbf16, #tpu.memory_space<vmem>>, vector<1x64x384xbf16>
    %46 = vector.shape_cast %45 : vector<1x64x384xbf16> to vector<64x384xbf16>
    %c0_38 = arith.constant 0 : index
    %c0_39 = arith.constant 0 : index
    %47 = vector.load %arg2[%c0_38, %c0_39] : memref<384x256xbf16, #tpu.memory_space<vmem>>, vector<384x256xbf16>
    %cst_40 = arith.constant dense<0.000000e+00> : vector<64x256xf32>
    %48 = tpu.matmul %46, %47, %cst_40 {dimension_numbers = #tpu.dot_dimension_numbers<[1], [0], [0], [1], [0, 0, 1, 1], [], []>} : vector<64x384xbf16>, vector<384x256xbf16>, vector<64x256xf32> -> vector<64x256xf32>
    %49 = vector.extract_strided_slice %48 {offsets = [0, 0], sizes = [16, 256], strides = [1, 1]} : vector<64x256xf32> to vector<16x256xf32>
    %50 = arith.addf %49, %44 : vector<16x256xf32>
    %c96 = arith.constant 96 : index
    %c0_41 = arith.constant 0 : index
    %51 = vector.load %arg3[%c96, %c0_41] : memref<256x256xf32, #tpu.memory_space<vmem>>, vector<16x256xf32>
    %52 = arith.mulf %50, %51 : vector<16x256xf32>
    %c96_42 = arith.constant 96 : index
    %c0_43 = arith.constant 0 : index
    %53 = vector.load %arg4[%c96_42, %c0_43] : memref<256x256xf32, #tpu.memory_space<vmem>>, vector<16x256xf32>
    %54 = arith.addf %52, %53 : vector<16x256xf32>
    %c0_44 = arith.constant 0 : index
    %c96_45 = arith.constant 96 : index
    %c0_46 = arith.constant 0 : index
    %55 = vector.load %arg5[%c0_44, %c96_45, %c0_46] : memref<1x256x256xf32, #tpu.memory_space<vmem>>, vector<1x16x256xf32>
    %56 = vector.shape_cast %55 : vector<1x16x256xf32> to vector<16x256xf32>
    %57 = vector.shape_cast %54 : vector<16x256xf32> to vector<1x16x256xf32>
    tpu.vector_store %arg5[%c0_44, %c96_45, %c0_46], %57 {strides = array<i32>} : memref<1x256x256xf32, #tpu.memory_space<vmem>>, vector<1x16x256xf32>,
    %58 = vector.extract_strided_slice %48 {offsets = [16, 0], sizes = [32, 256], strides = [1, 1]} : vector<64x256xf32> to vector<32x256xf32>
    %c112 = arith.constant 112 : index
    %c0_47 = arith.constant 0 : index
    %59 = vector.load %arg3[%c112, %c0_47] : memref<256x256xf32, #tpu.memory_space<vmem>>, vector<32x256xf32>
    %60 = arith.mulf %58, %59 : vector<32x256xf32>
    %c112_48 = arith.constant 112 : index
    %c0_49 = arith.constant 0 : index
    %61 = vector.load %arg4[%c112_48, %c0_49] : memref<256x256xf32, #tpu.memory_space<vmem>>, vector<32x256xf32>
    %62 = arith.addf %60, %61 : vector<32x256xf32>
    %c0_50 = arith.constant 0 : index
    %c112_51 = arith.constant 112 : index
    %c0_52 = arith.constant 0 : index
    %63 = vector.load %arg5[%c0_50, %c112_51, %c0_52] : memref<1x256x256xf32, #tpu.memory_space<vmem>>, vector<1x32x256xf32>
    %64 = vector.shape_cast %63 : vector<1x32x256xf32> to vector<32x256xf32>
    %65 = vector.shape_cast %62 : vector<32x256xf32> to vector<1x32x256xf32>
    tpu.vector_store %arg5[%c0_50, %c112_51, %c0_52], %65 {strides = array<i32>} : memref<1x256x256xf32, #tpu.memory_space<vmem>>, vector<1x32x256xf32>,
    %66 = vector.extract_strided_slice %48 {offsets = [48, 0], sizes = [16, 256], strides = [1, 1]} : vector<64x256xf32> to vector<16x256xf32>
    %c0_53 = arith.constant 0 : index
    %c192 = arith.constant 192 : index
    %c0_54 = arith.constant 0 : index
    %67 = vector.load %arg1[%c0_53, %c192, %c0_54] : memref<1x320x384xbf16, #tpu.memory_space<vmem>>, vector<1x64x384xbf16>
    %68 = vector.shape_cast %67 : vector<1x64x384xbf16> to vector<64x384xbf16>
    %c0_55 = arith.constant 0 : index
    %c0_56 = arith.constant 0 : index
    %69 = vector.load %arg2[%c0_55, %c0_56] : memref<384x256xbf16, #tpu.memory_space<vmem>>, vector<384x256xbf16>
    %cst_57 = arith.constant dense<0.000000e+00> : vector<64x256xf32>
    %70 = tpu.matmul %68, %69, %cst_57 {dimension_numbers = #tpu.dot_dimension_numbers<[1], [0], [0], [1], [0, 0, 1, 1], [], []>} : vector<64x384xbf16>, vector<384x256xbf16>, vector<64x256xf32> -> vector<64x256xf32>
    %71 = vector.extract_strided_slice %70 {offsets = [0, 0], sizes = [16, 256], strides = [1, 1]} : vector<64x256xf32> to vector<16x256xf32>
    %72 = arith.addf %71, %66 : vector<16x256xf32>
    %c144 = arith.constant 144 : index
    %c0_58 = arith.constant 0 : index
    %73 = vector.load %arg3[%c144, %c0_58] : memref<256x256xf32, #tpu.memory_space<vmem>>, vector<16x256xf32>
    %74 = arith.mulf %72, %73 : vector<16x256xf32>
    %c144_59 = arith.constant 144 : index
    %c0_60 = arith.constant 0 : index
    %75 = vector.load %arg4[%c144_59, %c0_60] : memref<256x256xf32, #tpu.memory_space<vmem>>, vector<16x256xf32>
    %76 = arith.addf %74, %75 : vector<16x256xf32>
    %c0_61 = arith.constant 0 : index
    %c144_62 = arith.constant 144 : index
    %c0_63 = arith.constant 0 : index
    %77 = vector.load %arg5[%c0_61, %c144_62, %c0_63] : memref<1x256x256xf32, #tpu.memory_space<vmem>>, vector<1x16x256xf32>
    %78 = vector.shape_cast %77 : vector<1x16x256xf32> to vector<16x256xf32>
    %79 = vector.shape_cast %76 : vector<16x256xf32> to vector<1x16x256xf32>
    tpu.vector_store %arg5[%c0_61, %c144_62, %c0_63], %79 {strides = array<i32>} : memref<1x256x256xf32, #tpu.memory_space<vmem>>, vector<1x16x256xf32>,
    %80 = vector.extract_strided_slice %70 {offsets = [16, 0], sizes = [32, 256], strides = [1, 1]} : vector<64x256xf32> to vector<32x256xf32>
    %c160 = arith.constant 160 : index
    %c0_64 = arith.constant 0 : index
    %81 = vector.load %arg3[%c160, %c0_64] : memref<256x256xf32, #tpu.memory_space<vmem>>, vector<32x256xf32>
    %82 = arith.mulf %80, %81 : vector<32x256xf32>
    %c160_65 = arith.constant 160 : index
    %c0_66 = arith.constant 0 : index
    %83 = vector.load %arg4[%c160_65, %c0_66] : memref<256x256xf32, #tpu.memory_space<vmem>>, vector<32x256xf32>
    %84 = arith.addf %82, %83 : vector<32x256xf32>
    %c0_67 = arith.constant 0 : index
    %c160_68 = arith.constant 160 : index
    %c0_69 = arith.constant 0 : index
    %85 = vector.load %arg5[%c0_67, %c160_68, %c0_69] : memref<1x256x256xf32, #tpu.memory_space<vmem>>, vector<1x32x256xf32>
    %86 = vector.shape_cast %85 : vector<1x32x256xf32> to vector<32x256xf32>
    %87 = vector.shape_cast %84 : vector<32x256xf32> to vector<1x32x256xf32>
    tpu.vector_store %arg5[%c0_67, %c160_68, %c0_69], %87 {strides = array<i32>} : memref<1x256x256xf32, #tpu.memory_space<vmem>>, vector<1x32x256xf32>,
    %88 = vector.extract_strided_slice %70 {offsets = [48, 0], sizes = [16, 256], strides = [1, 1]} : vector<64x256xf32> to vector<16x256xf32>
    %c0_70 = arith.constant 0 : index
    %c256 = arith.constant 256 : index
    %c0_71 = arith.constant 0 : index
    %89 = vector.load %arg1[%c0_70, %c256, %c0_71] : memref<1x320x384xbf16, #tpu.memory_space<vmem>>, vector<1x64x384xbf16>
    %90 = vector.shape_cast %89 : vector<1x64x384xbf16> to vector<64x384xbf16>
    %c0_72 = arith.constant 0 : index
    %c0_73 = arith.constant 0 : index
    %91 = vector.load %arg2[%c0_72, %c0_73] : memref<384x256xbf16, #tpu.memory_space<vmem>>, vector<384x256xbf16>
    %cst_74 = arith.constant dense<0.000000e+00> : vector<64x256xf32>
    %92 = tpu.matmul %90, %91, %cst_74 {dimension_numbers = #tpu.dot_dimension_numbers<[1], [0], [0], [1], [0, 0, 1, 1], [], []>} : vector<64x384xbf16>, vector<384x256xbf16>, vector<64x256xf32> -> vector<64x256xf32>
    %93 = vector.extract_strided_slice %92 {offsets = [0, 0], sizes = [16, 256], strides = [1, 1]} : vector<64x256xf32> to vector<16x256xf32>
    %94 = arith.addf %93, %88 : vector<16x256xf32>
    %c192_75 = arith.constant 192 : index
    %c0_76 = arith.constant 0 : index
    %95 = vector.load %arg3[%c192_75, %c0_76] : memref<256x256xf32, #tpu.memory_space<vmem>>, vector<16x256xf32>
    %96 = arith.mulf %94, %95 : vector<16x256xf32>
    %c192_77 = arith.constant 192 : index
    %c0_78 = arith.constant 0 : index
    %97 = vector.load %arg4[%c192_77, %c0_78] : memref<256x256xf32, #tpu.memory_space<vmem>>, vector<16x256xf32>
    %98 = arith.addf %96, %97 : vector<16x256xf32>
    %c0_79 = arith.constant 0 : index
    %c192_80 = arith.constant 192 : index
    %c0_81 = arith.constant 0 : index
    %99 = vector.load %arg5[%c0_79, %c192_80, %c0_81] : memref<1x256x256xf32, #tpu.memory_space<vmem>>, vector<1x16x256xf32>
    %100 = vector.shape_cast %99 : vector<1x16x256xf32> to vector<16x256xf32>
    %101 = vector.shape_cast %98 : vector<16x256xf32> to vector<1x16x256xf32>
    tpu.vector_store %arg5[%c0_79, %c192_80, %c0_81], %101 {strides = array<i32>} : memref<1x256x256xf32, #tpu.memory_space<vmem>>, vector<1x16x256xf32>,
    %102 = vector.extract_strided_slice %92 {offsets = [16, 0], sizes = [48, 256], strides = [1, 1]} : vector<64x256xf32> to vector<48x256xf32>
    %c208 = arith.constant 208 : index
    %c0_82 = arith.constant 0 : index
    %103 = vector.load %arg3[%c208, %c0_82] : memref<256x256xf32, #tpu.memory_space<vmem>>, vector<48x256xf32>
    %104 = arith.mulf %102, %103 : vector<48x256xf32>
    %c208_83 = arith.constant 208 : index
    %c0_84 = arith.constant 0 : index
    %105 = vector.load %arg4[%c208_83, %c0_84] : memref<256x256xf32, #tpu.memory_space<vmem>>, vector<48x256xf32>
    %106 = arith.addf %104, %105 : vector<48x256xf32>
    %c0_85 = arith.constant 0 : index
    %c208_86 = arith.constant 208 : index
    %c0_87 = arith.constant 0 : index
    %107 = vector.load %arg5[%c0_85, %c208_86, %c0_87] : memref<1x256x256xf32, #tpu.memory_space<vmem>>, vector<1x48x256xf32>
    %108 = vector.shape_cast %107 : vector<1x48x256xf32> to vector<48x256xf32>
    %109 = vector.shape_cast %106 : vector<48x256xf32> to vector<1x48x256xf32>
    tpu.vector_store %arg5[%c0_85, %c208_86, %c0_87], %109 {strides = array<i32>} : memref<1x256x256xf32, #tpu.memory_space<vmem>>, vector<1x48x256xf32>,
    return
  }
  func.func @transform_0(%arg0: i32) -> (i32, i32, i32) {
    %c0_i32 = arith.constant 0 : i32
    %c0_i32_0 = arith.constant 0 : i32
    %c0_i32_1 = arith.constant 0 : i32
    return %arg0, %c0_i32, %c0_i32_0 : i32, i32, i32
  }
  func.func @transform_1(%arg0: i32) -> (i32, i32) {
    %c0_i32 = arith.constant 0 : i32
    %c0_i32_0 = arith.constant 0 : i32
    %c0_i32_1 = arith.constant 0 : i32
    return %c0_i32, %c0_i32_0 : i32, i32
  }
  func.func @transform_2(%arg0: i32) -> (i32, i32) {
    %c0_i32 = arith.constant 0 : i32
    %c0_i32_0 = arith.constant 0 : i32
    %c0_i32_1 = arith.constant 0 : i32
    return %c0_i32, %c0_i32_0 : i32, i32
  }
  func.func @transform_3(%arg0: i32) -> (i32, i32) {
    %c0_i32 = arith.constant 0 : i32
    %c0_i32_0 = arith.constant 0 : i32
    %c0_i32_1 = arith.constant 0 : i32
    return %c0_i32, %c0_i32_0 : i32, i32
  }
  func.func @transform_4(%arg0: i32) -> (i32, i32, i32) {
    %c0_i32 = arith.constant 0 : i32
    %c0_i32_0 = arith.constant 0 : i32
    %c0_i32_1 = arith.constant 0 : i32
    return %arg0, %c0_i32, %c0_i32_0 : i32, i32, i32
  }
}

</mosaic_0001>

<bundles_post_ra>
// kernel: end2end_forward.2
= control target key start
LH: loop header
LB: loop body
LE: loop exit
PB: predicated region body
PF: predicated region fallthrough
CT: control target
= control target key end

     0   :  { %s13339_s18 = smov 0   ;;  %s20105_s0 = inlined_call_operand.vmem [shape: bf16[64,3200], index: 0, kind: input, shape index: {}]   ;;  %s20106_s1 = inlined_call_operand.vmem [shape: bf16[3200,256], index: 1, kind: input, shape index: {}]   ;;  %s20107_s2 = inlined_call_operand.vmem [shape: f32[1,256], index: 2, kind: input, shape index: {}]   ;;  %s20108_s3 = inlined_call_operand.vmem [shape: bf16[256,4096], index: 3, kind: input, shape index: {}]   ;;  %s20109_s4 = inlined_call_operand.vmem [shape: f32[1,4096], index: 4, kind: input, shape index: {}]   ;;  %s20110_s5 = inlined_call_operand.vmem [shape: bf16[64,4096], index: 5, kind: output, shape index: {}]  }
   0x1 LB: > { %s8451_s19 = sadd.s32 4294967295, %s13307_s18   ;;  %p8455_p0 = scmp.ge.s32.totalorder %s13307_s18, 1  ;;  %s13307_s18 = sphi %s13339_s18, %s15_s18  }
   0x2   : > { %p189_p1 = scmp.lt.s32.totalorder %s13307_s18, 3 }
   0x4   : > { %p190_p2 = pnand %p8455_p0, %p189_p1 }
   0x6   : > { %193 = sbr.rel (%p190_p2) target bundleno = 1252 (0x4e4), region = 40 }
   0xb   : > { %v8719_v0 = vld [vmem:[%s20106_s1 + $0x70] sm:$0xf]  ;;  %v12377_v1 = vld [vmem:[%s20106_s1 + $0x74] sm:$0xf0]  ;;  %v8711_v11 = vld [vmem:[%s20106_s1 + $0x60] sm:$0xf] }
   0xc   : > { %v8783_v2 = vld [vmem:[%s20106_s1 + $0xf0] sm:$0xf]  ;;  %v8720_v3 = vor.u32 %v12377_v1, %v8719_v0  ;;  %v12393_v4 = vld [vmem:[%s20106_s1 + $0xf4] sm:$0xf0]  ;;  %v12375_v13 = vld [vmem:[%s20106_s1 + $0x64] sm:$0xf0] }
   0xd   : > { %v8847_v5 = vld [vmem:[%s20106_s1 + $0x170] sm:$0xf]  ;;  %v12409_v6 = vld [vmem:[%s20106_s1 + $0x174] sm:$0xf0]  ;;  %v8784_v7 = vor.u32 %v12393_v4, %v8783_v2  ;;  %v8775_v14 = vld [vmem:[%s20106_s1 + $0xe0] sm:$0xf]  ;;  %v8712_v16 = vor.u32 %v12375_v13, %v8711_v11 }
   0xe   : > { %v8848_v8 = vor.u32 %v12409_v6, %v8847_v5  ;;  %v8911_v9 = vld [vmem:[%s20106_s1 + $0x1f0] sm:$0xf]  ;;  %v12425_v10 = vld [vmem:[%s20106_s1 + $0x1f4] sm:$0xf0]  ;;  %2943 = vmatpush.bf16.msra.mxu0 %v8720_v3  ;;  %v12391_v15 = vld [vmem:[%s20106_s1 + $0xe4] sm:$0xf0] }
   0xf   : > { %v8912_v12 = vor.u32 %v12425_v10, %v8911_v9  ;;  %2962 = vmatpush.bf16.msra.mxu1 %v8784_v7  ;;  %v8776_v17 = vor.u32 %v12391_v15, %v8775_v14  ;;  %v8839_v18 = vld [vmem:[%s20106_s1 + $0x160] sm:$0xf]  ;;  %v12407_v19 = vld [vmem:[%s20106_s1 + $0x164] sm:$0xf0]  ;;  %v8703_v23 = vld [vmem:[%s20106_s1 + $0x50] sm:$0xf] }
  0x10   : > { %2981 = vmatpush.bf16.msra.mxu2 %v8848_v8  ;;  %v8903_v20 = vld [vmem:[%s20106_s1 + $0x1e0] sm:$0xf]  ;;  %v8840_v21 = vor.u32 %v12407_v19, %v8839_v18  ;;  %v12423_v22 = vld [vmem:[%s20106_s1 + $0x1e4] sm:$0xf0]  ;;  %v12373_v24 = vld [vmem:[%s20106_s1 + $0x54] sm:$0xf0] }
  0x11   : > { %3000 = vmatpush.bf16.msra.mxu3 %v8912_v12  ;;  %v8904_v25 = vor.u32 %v12423_v22, %v8903_v20  ;;  %v8767_v26 = vld [vmem:[%s20106_s1 + $0xd0] sm:$0xf]  ;;  %v12389_v27 = vld [vmem:[%s20106_s1 + $0xd4] sm:$0xf0]  ;;  %v8704_v29 = vor.u32 %v12373_v24, %v8703_v23  ;;  %v8695_v35 = vld [vmem:[%s20106_s1 + $0x40] sm:$0xf] }
  0x12   : > { %v8831_v28 = vld [vmem:[%s20106_s1 + $0x150] sm:$0xf]  ;;  %2944 = vmatpush.bf16.msra.mxu0 %v8712_v16  ;;  %v12405_v30 = vld [vmem:[%s20106_s1 + $0x154] sm:$0xf0]  ;;  %v8768_v33 = vor.u32 %v12389_v27, %v8767_v26  ;;  %v12371_v36 = vld [vmem:[%s20106_s1 + $0x44] sm:$0xf0] }
  0x13   : > { %v8895_v31 = vld [vmem:[%s20106_s1 + $0x1d0] sm:$0xf]  ;;  %v12421_v32 = vld [vmem:[%s20106_s1 + $0x1d4] sm:$0xf0]  ;;  %2963 = vmatpush.bf16.msra.mxu1 %v8776_v17  ;;  %v8832_v34 = vor.u32 %v12405_v30, %v8831_v28  ;;  %v8759_v37 = vld [vmem:[%s20106_s1 + $0xc0] sm:$0xf]  ;;  %v8696_v44 = vor.u32 %v12371_v36, %v8695_v35 }
  0x14   : > { %2982 = vmatpush.bf16.msra.mxu2 %v8840_v21  ;;  %v8896_v38 = vor.u32 %v12421_v32, %v8895_v31  ;;  %v12387_v39 = vld [vmem:[%s20106_s1 + $0xc4] sm:$0xf0]  ;;  %v8823_v40 = vld [vmem:[%s20106_s1 + $0x140] sm:$0xf]  ;;  %v8687_v47 = vld [vmem:[%s20106_s1 + $0x30] sm:$0xf] }
  0x15   : > { %3001 = vmatpush.bf16.msra.mxu3 %v8904_v25  ;;  %v12403_v41 = vld [vmem:[%s20106_s1 + $0x144] sm:$0xf0]  ;;  %v8887_v42 = vld [vmem:[%s20106_s1 + $0x1c0] sm:$0xf]  ;;  %v8760_v45 = vor.u32 %v12387_v39, %v8759_v37  ;;  %v12369_v48 = vld [vmem:[%s20106_s1 + $0x34] sm:$0xf0] }
  0x16   : > { %v12419_v43 = vld [vmem:[%s20106_s1 + $0x1c4] sm:$0xf0]  ;;  %2945 = vmatpush.bf16.msra.mxu0 %v8704_v29  ;;  %v8824_v46 = vor.u32 %v12403_v41, %v8823_v40  ;;  %v8751_v49 = vld [vmem:[%s20106_s1 + $0xb0] sm:$0xf]  ;;  %v12385_v51 = vld [vmem:[%s20106_s1 + $0xb4] sm:$0xf0]  ;;  %v8688_v56 = vor.u32 %v12369_v48, %v8687_v47 }
  0x17   : > { %2964 = vmatpush.bf16.msra.mxu1 %v8768_v33  ;;  %v8888_v50 = vor.u32 %v12419_v43, %v8887_v42  ;;  %v8815_v52 = vld [vmem:[%s20106_s1 + $0x130] sm:$0xf]  ;;  %v12401_v53 = vld [vmem:[%s20106_s1 + $0x134] sm:$0xf0]  ;;  %v8752_v57 = vor.u32 %v12385_v51, %v8751_v49  ;;  %v8679_v59 = vld [vmem:[%s20106_s1 + $0x20] sm:$0xf] }
  0x18   : > { %2983 = vmatpush.bf16.msra.mxu2 %v8832_v34  ;;  %v8879_v54 = vld [vmem:[%s20106_s1 + $0x1b0] sm:$0xf]  ;;  %v12417_v55 = vld [vmem:[%s20106_s1 + $0x1b4] sm:$0xf0]  ;;  %v8816_v58 = vor.u32 %v12401_v53, %v8815_v52  ;;  %v12367_v60 = vld [vmem:[%s20106_s1 + $0x24] sm:$0xf0] }
  0x19   : > { %3002 = vmatpush.bf16.msra.mxu3 %v8896_v38  ;;  %v8743_v61 = vld [vmem:[%s20106_s1 + $0xa0] sm:$0xf]  ;;  %v8880_v62 = vor.u32 %v12417_v55, %v8879_v54  ;;  %v12383_v63 = vld [vmem:[%s20106_s1 + $0xa4] sm:$0xf0]  ;;  %v8680_v4 = vor.u32 %v12367_v60, %v8679_v59  ;;  %v8671_v5 = vld [vmem:[%s20106_s1 + $0x10] sm:$0xf] }
  0x1a   : > { %2946 = vmatpush.bf16.msra.mxu0 %v8696_v44  ;;  %v8807_v0 = vld [vmem:[%s20106_s1 + $0x120] sm:$0xf]  ;;  %v12399_v1 = vld [vmem:[%s20106_s1 + $0x124] sm:$0xf0]  ;;  %v12365_v6 = vld [vmem:[%s20106_s1 + $0x14] sm:$0xf0]  ;;  %v8744_v7 = vor.u32 %v12383_v63, %v8743_v61 }
  0x1b   : > { %2965 = vmatpush.bf16.msra.mxu1 %v8760_v45  ;;  %v8871_v2 = vld [vmem:[%s20106_s1 + $0x1a0] sm:$0xf]  ;;  %v12415_v3 = vld [vmem:[%s20106_s1 + $0x1a4] sm:$0xf0]  ;;  %v8808_v8 = vor.u32 %v12399_v1, %v8807_v0  ;;  %v8735_v9 = vld [vmem:[%s20106_s1 + $0x90] sm:$0xf]  ;;  %v8672_v17 = vor.u32 %v12365_v6, %v8671_v5 }
  0x1c   : > { %2984 = vmatpush.bf16.msra.mxu2 %v8824_v46  ;;  %v12381_v10 = vld [vmem:[%s20106_s1 + $0x94] sm:$0xf0]  ;;  %v8799_v11 = vld [vmem:[%s20106_s1 + $0x110] sm:$0xf]  ;;  %v8872_v12 = vor.u32 %v12415_v3, %v8871_v2  ;;  %s8456_s13 = sshll.u32 %s8451_s19, 2 }
  0x1d   : > { %3003 = vmatpush.bf16.msra.mxu3 %v8888_v50  ;;  %v12397_v13 = vld [vmem:[%s20106_s1 + $0x114] sm:$0xf0]  ;;  %v8863_v14 = vld [vmem:[%s20106_s1 + $0x190] sm:$0xf]  ;;  %v8663_v16 = vld [vmem:[%s20106_s1] sm:$0xf]  ;;  %v8736_v21 = vor.u32 %v12381_v10, %v8735_v9 }
  0x1e   : > { %2947 = vmatpush.bf16.msra.mxu0 %v8688_v56  ;;  %v12413_v15 = vld [vmem:[%s20106_s1 + $0x194] sm:$0xf0]  ;;  %p220_p3 = scmp.lt.s32.totalorder %s8456_s13, 7  ;;  %v12363_v18 = vld [vmem:[%s20106_s1 + $0x4] sm:$0xf0]  ;;  %v8800_v22 = vor.u32 %v12397_v13, %v8799_v11 }
  0x1f   : > { %2966 = vmatpush.bf16.msra.mxu1 %v8752_v57  ;;  %v8727_v19 = vld [vmem:[%s20106_s1 + $0x80] sm:$0xf]  ;;  %v12379_v20 = vld [vmem:[%s20106_s1 + $0x84] sm:$0xf0]  ;;  %v8864_v25 = vor.u32 %v12413_v15, %v8863_v14  ;;  %v8975_v28 = vld [vmem:[%s20106_s1 + $0x270] sm:$0xf]  ;;  %v8664_v31 = vor.u32 %v12363_v18, %v8663_v16 }
  0x20   : > { %2985 = vmatpush.bf16.msra.mxu2 %v8816_v58  ;;  %v8791_v23 = vld [vmem:[%s20106_s1 + $0x100] sm:$0xf]  ;;  %v12395_v24 = vld [vmem:[%s20106_s1 + $0x104] sm:$0xf0]  ;;  %s20160_s13 = smov (!%p220_p3, %s8456_s13), 7  ;;  %v8728_v35 = vor.u32 %v12379_v20, %v8727_v19 }
  0x21   : > { %3004 = vmatpush.bf16.msra.mxu3 %v8880_v62  ;;  %v8855_v26 = vld [vmem:[%s20106_s1 + $0x180] sm:$0xf]  ;;  %v12411_v27 = vld [vmem:[%s20106_s1 + $0x184] sm:$0xf0]  ;;  %s13290_s10 = smul.u32 100, %s20160_s13  ;;  %v8792_v36 = vor.u32 %v12395_v24, %v8791_v23  ;;  %s12311_s6 = sshll.u32 %s20160_s13, 7 }
  0x22   : > { %2948 = vmatpush.bf16.msra.mxu0 %v8680_v4  ;;  %v12441_v29 = vld [vmem:[%s20106_s1 + $0x274] sm:$0xf0]  ;;  %v9039_v30 = vld [vmem:[%s20106_s1 + $0x2f0] sm:$0xf]  ;;  %v8967_v39 = vld [vmem:[%s20106_s1 + $0x260] sm:$0xf]  ;;  %v8856_v41 = vor.u32 %v12411_v27, %v8855_v26  ;;  %s18069_s27 = scalar_lea.vmem %s20110_s5, %s12311_s6 }
  0x23   : > { %2967 = vmatpush.bf16.msra.mxu1 %v8744_v7  ;;  %v12457_v32 = vld [vmem:[%s20106_s1 + $0x2f4] sm:$0xf0]  ;;  %v9103_v33 = vld [vmem:[%s20106_s1 + $0x370] sm:$0xf]  ;;  %s13565_s25 = scalar_lea.vmem %s20105_s0, %s13290_s10  ;;  %v12439_v40 = vld [vmem:[%s20106_s1 + $0x264] sm:$0xf0]  ;;  %v8976_v45 = vor.u32 %v12441_v29, %v8975_v28 }
  0x24   : > { %2986 = vmatpush.bf16.msra.mxu2 %v8808_v8  ;;  %v12473_v34 = vld [vmem:[%s20106_s1 + $0x374] sm:$0xf0]  ;;  %v9167_v37 = vld [vmem:[%s20106_s1 + $0x3f0] sm:$0xf]  ;;  %v8463_v42 = vld [vmem:[%s13565_s25] sm:$0xf]  ;;  %v9040_v51 = vor.u32 %v12457_v32, %v9039_v30  ;;  %v8968_v60 = vor.u32 %v12439_v40, %v8967_v39 }
  0x25   : > { %3005 = vmatpush.bf16.msra.mxu3 %v8872_v12  ;;  %v12489_v38 = vld [vmem:[%s20106_s1 + $0x3f4] sm:$0xf0]  ;;  %v12324_v43 = vld [vmem:[%s13565_s25 + $0x60] sm:$0xf0]  ;;  %v9031_v46 = vld [vmem:[%s20106_s1 + $0x2e0] sm:$0xf]  ;;  %v9104_v57 = vor.u32 %v12473_v34, %v9103_v33 }
  0x26   : > { %2949 = vmatpush.bf16.msra.mxu0 %v8672_v17  ;;  %v12312_v44 = vld [vmem:[%s13565_s25 + $0x4] sm:$0xf]  ;;  %v13585_v47 = vor.u32 %v12324_v43, %v8463_v42  ;;  %v8465_v48 = vld [vmem:[%s13565_s25 + $0x64] sm:$0xf0]  ;;  %v12325_v50 = vld [vmem:[%s13565_s25 + $0x68] sm:$0xf0]  ;;  %v9168_v59 = vor.u32 %v12489_v38, %v9167_v37 }
  0x27   : > { %2968 = vmatpush.bf16.msra.mxu1 %v8736_v21  ;;  %v8471_v49 = vld [vmem:[%s13565_s25 + $0x8] sm:$0xf]  ;;  %v13590_v52 = vor.u32 %v12312_v44, %v8465_v48  ;;  %v12313_v54 = vld [vmem:[%s13565_s25 + $0xc] sm:$0xf]  ;;  %v8473_v55 = vld [vmem:[%s13565_s25 + $0x6c] sm:$0xf0] }
  0x28   : > { %2987 = vmatpush.bf16.msra.mxu2 %v8800_v22  ;;  %v13592_v53 = vor.u32 %v12325_v50, %v8471_v49  ;;  %v12455_v56 = vld [vmem:[%s20106_s1 + $0x2e4] sm:$0xf0]  ;;  %v13599_v58 = vor.u32 %v12313_v54, %v8473_v55  ;;  %v9095_v61 = vld [vmem:[%s20106_s1 + $0x360] sm:$0xf]  ;;  %v8959_v2 = vld [vmem:[%s20106_s1 + $0x250] sm:$0xf] }
  0x29   : > { %3006 = vmatpush.bf16.msra.mxu3 %v8864_v25  ;;  %v12471_v62 = vld [vmem:[%s20106_s1 + $0x364] sm:$0xf0]  ;;  %v9159_v63 = vld [vmem:[%s20106_s1 + $0x3e0] sm:$0xf]  ;;  %v9032_v0 = vor.u32 %v12455_v56, %v9031_v46  ;;  %v12437_v3 = vld [vmem:[%s20106_s1 + $0x254] sm:$0xf0] }
  0x2a   : > { %2950 = vmatpush.bf16.msra.mxu0 %v8664_v31  ;;  %v12487_v1 = vld [vmem:[%s20106_s1 + $0x3e4] sm:$0xf0]  ;;  %v9023_v4 = vld [vmem:[%s20106_s1 + $0x2d0] sm:$0xf]  ;;  %v12453_v5 = vld [vmem:[%s20106_s1 + $0x2d4] sm:$0xf0]  ;;  %v9096_v6 = vor.u32 %v12471_v62, %v9095_v61  ;;  %v8960_v8 = vor.u32 %v12437_v3, %v8959_v2 }
  0x2b   : > { %2969 = vmatpush.bf16.msra.mxu1 %v8728_v35  ;;  %v9160_v7 = vor.u32 %v12487_v1, %v9159_v63  ;;  %v9087_v9 = vld [vmem:[%s20106_s1 + $0x350] sm:$0xf]  ;;  %v12469_v10 = vld [vmem:[%s20106_s1 + $0x354] sm:$0xf0]  ;;  %v9024_v12 = vor.u32 %v12453_v5, %v9023_v4  ;;  %v8951_v14 = vld [vmem:[%s20106_s1 + $0x240] sm:$0xf] }
  0x2c   : > { %2988 = vmatpush.bf16.msra.mxu2 %v8792_v36  ;;  %v9151_v11 = vld [vmem:[%s20106_s1 + $0x3d0] sm:$0xf]  ;;  %v12485_v13 = vld [vmem:[%s20106_s1 + $0x3d4] sm:$0xf0]  ;;  %v12435_v15 = vld [vmem:[%s20106_s1 + $0x244] sm:$0xf0]  ;;  %v9088_v18 = vor.u32 %v12469_v10, %v9087_v9 }
  0x2d   : > { %3007 = vmatpush.bf16.msra.mxu3 %v8856_v41  ;;  %2951 = vmatmul.bf16.vlgmr.msra.gmra.mxu0 %v13585_v47  ;;  %v9015_v16 = vld [vmem:[%s20106_s1 + $0x2c0] sm:$0xf]  ;;  %v12451_v17 = vld [vmem:[%s20106_s1 + $0x2c4] sm:$0xf0]  ;;  %v9152_v22 = vor.u32 %v12485_v13, %v9151_v11  ;;  %v8952_v23 = vor.u32 %v12435_v15, %v8951_v14  ;;  %v12349_v26 = vld [vmem:[%s13565_s25 + $0x128] sm:$0xf0] }
  0x2e   : > { %3019 = vmatpush.bf16.msrb.mxu0 %v8976_v45  ;;  %2970 = vmatmul.bf16.vlgmr.msra.gmra.mxu1 %v13590_v52  ;;  %v9079_v19 = vld [vmem:[%s20106_s1 + $0x340] sm:$0xf]  ;;  %v12467_v20 = vld [vmem:[%s20106_s1 + $0x344] sm:$0xf0]  ;;  %v9016_v27 = vor.u32 %v12451_v17, %v9015_v16  ;;  %v12337_v28 = vld [vmem:[%s13565_s25 + $0xcc] sm:$0xf] }
  0x2f   : > { %3038 = vmatpush.bf16.msrb.mxu1 %v9040_v51  ;;  %2989 = vmatmul.bf16.vlgmr.msra.gmra.mxu2 %v13592_v53  ;;  %v9143_v21 = vld [vmem:[%s20106_s1 + $0x3c0] sm:$0xf]  ;;  %v12483_v24 = vld [vmem:[%s20106_s1 + $0x3c4] sm:$0xf0]  ;;  %v8565_v29 = vld [vmem:[%s13565_s25 + $0x12c] sm:$0xf0]  ;;  %v9080_v35 = vor.u32 %v12467_v20, %v9079_v19 }
  0x30   : > { %3057 = vmatpush.bf16.msrb.mxu2 %v9104_v57  ;;  %3008 = vmatmul.bf16.vlgmr.msra.gmra.mxu3 %v13599_v58  ;;  %v8563_v25 = vld [vmem:[%s13565_s25 + $0xc8] sm:$0xf]  ;;  %v8943_v30 = vld [vmem:[%s20106_s1 + $0x230] sm:$0xf]  ;;  %v12433_v31 = vld [vmem:[%s20106_s1 + $0x234] sm:$0xf0]  ;;  %v9144_v39 = vor.u32 %v12483_v24, %v9143_v21  ;;  %v13705_v50 = vor.u32 %v12337_v28, %v8565_v29 }
  0x31   : > { %3076 = vmatpush.bf16.msrb.mxu3 %v9168_v59  ;;  %v8571_v32 = vld [vmem:[%s13565_s25 + $0xd0] sm:$0xf]  ;;  %v12449_v34 = vld [vmem:[%s20106_s1 + $0x2b4] sm:$0xf0]  ;;  %v12350_v36 = vld [vmem:[%s13565_s25 + $0x130] sm:$0xf0]  ;;  %v8944_v40 = vor.u32 %v12433_v31, %v8943_v30  ;;  %v13694_v44 = vor.u32 %v12349_v26, %v8563_v25 }
  0x32   : > { %3020 = vmatpush.bf16.msrb.mxu0 %v8968_v60  ;;  %v9007_v33 = vld [vmem:[%s20106_s1 + $0x2b0] sm:$0xf]  ;;  %v12465_v38 = vld [vmem:[%s20106_s1 + $0x334] sm:$0xf0]  ;;  %v12338_v41 = vld [vmem:[%s13565_s25 + $0xd4] sm:$0xf]  ;;  %v13707_v51 = vor.u32 %v12350_v36, %v8571_v32 }
  0x33   : > { %3039 = vmatpush.bf16.msrb.mxu1 %v9032_v0  ;;  %v9071_v37 = vld [vmem:[%s20106_s1 + $0x330] sm:$0xf]  ;;  %v8573_v42 = vld [vmem:[%s13565_s25 + $0x134] sm:$0xf0]  ;;  %v9008_v45 = vor.u32 %v12449_v34, %v9007_v33  ;;  %v8935_v48 = vld [vmem:[%s20106_s1 + $0x220] sm:$0xf] }
  0x34   : > { %3058 = vmatpush.bf16.msrb.mxu2 %v9096_v6  ;;  %v9135_v43 = vld [vmem:[%s20106_s1 + $0x3b0] sm:$0xf]  ;;  %v12481_v46 = vld [vmem:[%s20106_s1 + $0x3b4] sm:$0xf0]  ;;  %v12431_v49 = vld [vmem:[%s20106_s1 + $0x224] sm:$0xf0]  ;;  %v9072_v56 = vor.u32 %v12465_v38, %v9071_v37  ;;  %v13715_v57 = vor.u32 %v12338_v41, %v8573_v42 }
  0x35   : > { %3077 = vmatpush.bf16.msrb.mxu3 %v9160_v7  ;;  %v8999_v54 = vld [vmem:[%s20106_s1 + $0x2a0] sm:$0xf]  ;;  %v12447_v55 = vld [vmem:[%s20106_s1 + $0x2a4] sm:$0xf0]  ;;  %v9136_v59 = vor.u32 %v12481_v46, %v9135_v43  ;;  %v8936_v60 = vor.u32 %v12431_v49, %v8935_v48  ;;  %v8927_v2 = vld [vmem:[%s20106_s1 + $0x210] sm:$0xf] }
  0x36   : > { %3021 = vmatpush.bf16.msrb.mxu0 %v8960_v8  ;;  %v9063_v61 = vld [vmem:[%s20106_s1 + $0x320] sm:$0xf]  ;;  %v12463_v62 = vld [vmem:[%s20106_s1 + $0x324] sm:$0xf0]  ;;  %v9000_v0 = vor.u32 %v12447_v55, %v8999_v54  ;;  %v12429_v3 = vld [vmem:[%s20106_s1 + $0x214] sm:$0xf0] }
  0x37   : > { %3040 = vmatpush.bf16.msrb.mxu1 %v9024_v12  ;;  %v9127_v63 = vld [vmem:[%s20106_s1 + $0x3a0] sm:$0xf]  ;;  %v12479_v1 = vld [vmem:[%s20106_s1 + $0x3a4] sm:$0xf0]  ;;  %v8991_v4 = vld [vmem:[%s20106_s1 + $0x290] sm:$0xf]  ;;  %v9064_v6 = vor.u32 %v12463_v62, %v9063_v61  ;;  %v8928_v10 = vor.u32 %v12429_v3, %v8927_v2 }
  0x38   : > { %3059 = vmatpush.bf16.msrb.mxu2 %v9088_v18  ;;  %v12445_v5 = vld [vmem:[%s20106_s1 + $0x294] sm:$0xf0]  ;;  %v9055_v7 = vld [vmem:[%s20106_s1 + $0x310] sm:$0xf]  ;;  %v9128_v9 = vor.u32 %v12479_v1, %v9127_v63  ;;  %v8919_v13 = vld [vmem:[%s20106_s1 + $0x200] sm:$0xf] }
  0x39   : > { %3078 = vmatpush.bf16.msrb.mxu3 %v9152_v22  ;;  %v12461_v8 = vld [vmem:[%s20106_s1 + $0x314] sm:$0xf0]  ;;  %v9119_v11 = vld [vmem:[%s20106_s1 + $0x390] sm:$0xf]  ;;  %v8992_v14 = vor.u32 %v12445_v5, %v8991_v4  ;;  %v12427_v15 = vld [vmem:[%s20106_s1 + $0x204] sm:$0xf0] }
  0x3a   : > { %3022 = vmatpush.bf16.msrb.mxu0 %v8952_v23  ;;  %v12477_v12 = vld [vmem:[%s20106_s1 + $0x394] sm:$0xf0]  ;;  %v8983_v16 = vld [vmem:[%s20106_s1 + $0x280] sm:$0xf]  ;;  %v12443_v17 = vld [vmem:[%s20106_s1 + $0x284] sm:$0xf0]  ;;  %v9056_v22 = vor.u32 %v12461_v8, %v9055_v7 }
  0x3b   : > { %3041 = vmatpush.bf16.msrb.mxu1 %v9016_v27  ;;  %v9047_v18 = vld [vmem:[%s20106_s1 + $0x300] sm:$0xf]  ;;  %v12459_v19 = vld [vmem:[%s20106_s1 + $0x304] sm:$0xf0]  ;;  %v9231_v20 = vld [vmem:[%s20106_s1 + $0x470] sm:$0xf]  ;;  %v9120_v26 = vor.u32 %v12477_v12, %v9119_v11  ;;  %v8920_v27 = vor.u32 %v12427_v15, %v8919_v13  ;;  %v8984_v31 = vor.u32 %v12443_v17, %v8983_v16 }
  0x3c   : > { %3060 = vmatpush.bf16.msrb.mxu2 %v9080_v35  ;;  %v12505_v21 = vld [vmem:[%s20106_s1 + $0x474] sm:$0xf0]  ;;  %v9111_v23 = vld [vmem:[%s20106_s1 + $0x380] sm:$0xf]  ;;  %v9295_v24 = vld [vmem:[%s20106_s1 + $0x4f0] sm:$0xf]  ;;  %v9048_v41 = vor.u32 %v12459_v19, %v9047_v18 }
  0x3d   : > { %3079 = vmatpush.bf16.msrb.mxu3 %v9144_v39  ;;  %2956 = vmatmul.bf16.gmra.mxu0 %v13694_v44  ;;  %v12521_v25 = vld [vmem:[%s20106_s1 + $0x4f4] sm:$0xf0]  ;;  %v12475_v28 = vld [vmem:[%s20106_s1 + $0x384] sm:$0xf0]  ;;  %v8479_v29 = vld [vmem:[%s13565_s25 + $0x10] sm:$0xf]  ;;  %v9232_v34 = vor.u32 %v12505_v21, %v9231_v20 }
  0x3e   : > { %3023 = vmatpush.bf16.msrb.mxu0 %v8944_v40  ;;  %2975 = vmatmul.bf16.gmra.mxu1 %v13705_v50  ;;  %v12326_v30 = vld [vmem:[%s13565_s25 + $0x70] sm:$0xf0]  ;;  %v8481_v33 = vld [vmem:[%s13565_s25 + $0x74] sm:$0xf0]  ;;  %v9359_v35 = vld [vmem:[%s20106_s1 + $0x570] sm:$0xf]  ;;  %v9296_v38 = vor.u32 %v12521_v25, %v9295_v24  ;;  %v9112_v46 = vor.u32 %v12475_v28, %v9111_v23 }
  0x3f   : > { %3042 = vmatpush.bf16.msrb.mxu1 %v9008_v45  ;;  %2994 = vmatmul.bf16.gmra.mxu2 %v13707_v51  ;;  %v12314_v32 = vld [vmem:[%s13565_s25 + $0x14] sm:$0xf]  ;;  %v12537_v36 = vld [vmem:[%s20106_s1 + $0x574] sm:$0xf0]  ;;  %v9423_v39 = vld [vmem:[%s20106_s1 + $0x5f0] sm:$0xf] }
  0x40   : > { %3061 = vmatpush.bf16.msrb.mxu2 %v9072_v56  ;;  %3013 = vmatmul.bf16.gmra.mxu3 %v13715_v57  ;;  %v8487_v37 = vld [vmem:[%s13565_s25 + $0x18] sm:$0xf]  ;;  %v12327_v42 = vld [vmem:[%s13565_s25 + $0x78] sm:$0xf0]  ;;  %v8489_v45 = vld [vmem:[%s13565_s25 + $0x7c] sm:$0xf0]  ;;  %v9360_v48 = vor.u32 %v12537_v36, %v9359_v35  ;;  %v13822_v56 = vor.u32 %v12326_v30, %v8479_v29  ;;  %v13833_v63 = vor.u32 %v12314_v32, %v8481_v33 }
  0x41   : > { %3080 = vmatpush.bf16.msrb.mxu3 %v9136_v59  ;;  %v12553_v40 = vld [vmem:[%s20106_s1 + $0x5f4] sm:$0xf0]  ;;  %v12315_v43 = vld [vmem:[%s13565_s25 + $0x1c] sm:$0xf]  ;;  %v9223_v49 = vld [vmem:[%s20106_s1 + $0x460] sm:$0xf] }
  0x42   : > { %3024 = vmatpush.bf16.msrb.mxu0 %v8936_v60  ;;  %v12503_v54 = vld [vmem:[%s20106_s1 + $0x464] sm:$0xf0]  ;;  %v9287_v55 = vld [vmem:[%s20106_s1 + $0x4e0] sm:$0xf]  ;;  %v9424_v59 = vor.u32 %v12553_v40, %v9423_v39  ;;  %v13843_v3 = vor.u32 %v12315_v43, %v8489_v45  ;;  %v9215_v7 = vld [vmem:[%s20106_s1 + $0x450] sm:$0xf] }
  0x43   : > { %3043 = vmatpush.bf16.msrb.mxu1 %v9000_v0  ;;  %v12519_v60 = vld [vmem:[%s20106_s1 + $0x4e4] sm:$0xf0]  ;;  %v9351_v61 = vld [vmem:[%s20106_s1 + $0x560] sm:$0xf]  ;;  %v13835_v0 = vor.u32 %v12327_v42, %v8487_v37  ;;  %v9224_v4 = vor.u32 %v12503_v54, %v9223_v49  ;;  %v12501_v8 = vld [vmem:[%s20106_s1 + $0x454] sm:$0xf0] }
  0x44   : > { %3062 = vmatpush.bf16.msrb.mxu2 %v9064_v6  ;;  %v12535_v62 = vld [vmem:[%s20106_s1 + $0x564] sm:$0xf0]  ;;  %v9415_v1 = vld [vmem:[%s20106_s1 + $0x5e0] sm:$0xf]  ;;  %v9288_v5 = vor.u32 %v12519_v60, %v9287_v55  ;;  %v12517_v11 = vld [vmem:[%s20106_s1 + $0x4d4] sm:$0xf0]  ;;  %v9216_v16 = vor.u32 %v12501_v8, %v9215_v7 }
  0x45   : > { %3081 = vmatpush.bf16.msrb.mxu3 %v9128_v9  ;;  %v12551_v2 = vld [vmem:[%s20106_s1 + $0x5e4] sm:$0xf0]  ;;  %v9352_v6 = vor.u32 %v12535_v62, %v9351_v61  ;;  %v9279_v9 = vld [vmem:[%s20106_s1 + $0x4d0] sm:$0xf]  ;;  %v12533_v13 = vld [vmem:[%s20106_s1 + $0x554] sm:$0xf0] }
  0x46   : > { %3025 = vmatpush.bf16.msrb.mxu0 %v8928_v10  ;;  %v9416_v10 = vor.u32 %v12551_v2, %v9415_v1  ;;  %v9343_v12 = vld [vmem:[%s20106_s1 + $0x550] sm:$0xf]  ;;  %v12549_v15 = vld [vmem:[%s20106_s1 + $0x5d4] sm:$0xf0]  ;;  %v9280_v17 = vor.u32 %v12517_v11, %v9279_v9  ;;  %v9207_v19 = vld [vmem:[%s20106_s1 + $0x440] sm:$0xf] }
  0x47   : > { %3044 = vmatpush.bf16.msrb.mxu1 %v8992_v14  ;;  %v9407_v14 = vld [vmem:[%s20106_s1 + $0x5d0] sm:$0xf]  ;;  %v9344_v18 = vor.u32 %v12533_v13, %v9343_v12  ;;  %v12499_v20 = vld [vmem:[%s20106_s1 + $0x444] sm:$0xf0]  ;;  %v9271_v21 = vld [vmem:[%s20106_s1 + $0x4c0] sm:$0xf] }
  0x48   : > { %3063 = vmatpush.bf16.msrb.mxu2 %v9056_v22  ;;  %v9408_v22 = vor.u32 %v12549_v15, %v9407_v14  ;;  %v12515_v23 = vld [vmem:[%s20106_s1 + $0x4c4] sm:$0xf0]  ;;  %v9335_v24 = vld [vmem:[%s20106_s1 + $0x540] sm:$0xf]  ;;  %v9208_v28 = vor.u32 %v12499_v20, %v9207_v19  ;;  %v12351_v32 = vld [vmem:[%s13565_s25 + $0x138] sm:$0xf0] }
  0x49   : > { %3082 = vmatpush.bf16.msrb.mxu3 %v9120_v26  ;;  %v12531_v25 = vld [vmem:[%s20106_s1 + $0x544] sm:$0xf0]  ;;  %v9399_v26 = vld [vmem:[%s20106_s1 + $0x5c0] sm:$0xf]  ;;  %v9272_v29 = vor.u32 %v12515_v23, %v9271_v21  ;;  %v9199_v33 = vld [vmem:[%s20106_s1 + $0x430] sm:$0xf] }
  0x4a   : > { %3026 = vmatpush.bf16.msrb.mxu0 %v8920_v27  ;;  %v12547_v27 = vld [vmem:[%s20106_s1 + $0x5c4] sm:$0xf0]  ;;  %v9336_v30 = vor.u32 %v12531_v25, %v9335_v24  ;;  %v9263_v35 = vld [vmem:[%s20106_s1 + $0x4b0] sm:$0xf]  ;;  %v12339_v37 = vld [vmem:[%s13565_s25 + $0xdc] sm:$0xf] }
  0x4b   : > { %3045 = vmatpush.bf16.msrb.mxu1 %v8984_v31  ;;  %v8579_v31 = vld [vmem:[%s13565_s25 + $0xd8] sm:$0xf]  ;;  %v9400_v36 = vor.u32 %v12547_v27, %v9399_v26  ;;  %v9327_v40 = vld [vmem:[%s20106_s1 + $0x530] sm:$0xf]  ;;  %v8587_v42 = vld [vmem:[%s13565_s25 + $0xe0] sm:$0xf] }
  0x4c   : > { %3064 = vmatpush.bf16.msrb.mxu2 %v9048_v41  ;;  %v12513_v39 = vld [vmem:[%s20106_s1 + $0x4b4] sm:$0xf0]  ;;  %v9391_v43 = vld [vmem:[%s20106_s1 + $0x5b0] sm:$0xf]  ;;  %v12340_v49 = vld [vmem:[%s13565_s25 + $0xe4] sm:$0xf]  ;;  %v13938_v1 = vor.u32 %v12351_v32, %v8579_v31 }
  0x4d   : > { %3083 = vmatpush.bf16.msrb.mxu3 %v9112_v46  ;;  %3027 = vmatmul.bf16.vlgmr.msrb.gmra.mxu0 %v13822_v56  ;;  %v12529_v41 = vld [vmem:[%s20106_s1 + $0x534] sm:$0xf0]  ;;  %v12352_v46 = vld [vmem:[%s13565_s25 + $0x140] sm:$0xf0]  ;;  %v8589_v54 = vld [vmem:[%s13565_s25 + $0x144] sm:$0xf0]  ;;  %v9264_v55 = vor.u32 %v12513_v39, %v9263_v35 }
  0x4e   : > { %3095 = vmatpush.bf16.msra.mxu0 %v9232_v34  ;;  %3046 = vmatmul.bf16.vlgmr.msrb.gmra.mxu1 %v13833_v63  ;;  %v12497_v34 = vld [vmem:[%s20106_s1 + $0x434] sm:$0xf0]  ;;  %v9191_v60 = vld [vmem:[%s20106_s1 + $0x420] sm:$0xf]  ;;  %v12495_v61 = vld [vmem:[%s20106_s1 + $0x424] sm:$0xf0]  ;;  %v13951_v8 = vor.u32 %v12352_v46, %v8587_v42  ;;  %v13959_v11 = vor.u32 %v12340_v49, %v8589_v54 }
  0x4f   : > { %3114 = vmatpush.bf16.msra.mxu1 %v9296_v38  ;;  %3065 = vmatmul.bf16.vlgmr.msrb.gmra.mxu2 %v13835_v0  ;;  %v8581_v38 = vld [vmem:[%s13565_s25 + $0x13c] sm:$0xf0]  ;;  %v12545_v45 = vld [vmem:[%s20106_s1 + $0x5b4] sm:$0xf0]  ;;  %v9192_v12 = vor.u32 %v12495_v61, %v9191_v60  ;;  %v9183_v15 = vld [vmem:[%s20106_s1 + $0x410] sm:$0xf] }
  0x50   : > { %3133 = vmatpush.bf16.msra.mxu2 %v9360_v48  ;;  %3084 = vmatmul.bf16.vlgmr.msrb.gmra.mxu3 %v13843_v3  ;;  %v9200_v48 = vor.u32 %v12497_v34, %v9199_v33  ;;  %v9255_v62 = vld [vmem:[%s20106_s1 + $0x4a0] sm:$0xf]  ;;  %v9392_v2 = vor.u32 %v12545_v45, %v9391_v43  ;;  %v13949_v7 = vor.u32 %v12339_v37, %v8581_v38  ;;  %v12509_v19 = vld [vmem:[%s20106_s1 + $0x494] sm:$0xf0]  ;;  %v9311_v20 = vld [vmem:[%s20106_s1 + $0x510] sm:$0xf] }
  0x51   : > { %3152 = vmatpush.bf16.msra.mxu3 %v9424_v59  ;;  %v9328_v59 = vor.u32 %v12529_v41, %v9327_v40  ;;  %v9383_v9 = vld [vmem:[%s20106_s1 + $0x5a0] sm:$0xf]  ;;  %v12525_v21 = vld [vmem:[%s20106_s1 + $0x514] sm:$0xf0]  ;;  %v12491_v26 = vld [vmem:[%s20106_s1 + $0x404] sm:$0xf0] }
  0x52   : > { %3096 = vmatpush.bf16.msra.mxu0 %v9224_v4  ;;  %v12511_v4 = vld [vmem:[%s20106_s1 + $0x4a4] sm:$0xf0]  ;;  %v12541_v23 = vld [vmem:[%s20106_s1 + $0x594] sm:$0xf0]  ;;  %v9175_v25 = vld [vmem:[%s20106_s1 + $0x400] sm:$0xf] }
  0x53   : > { %3115 = vmatpush.bf16.msra.mxu1 %v9288_v5  ;;  %v9319_v5 = vld [vmem:[%s20106_s1 + $0x520] sm:$0xf]  ;;  %v9256_v13 = vor.u32 %v12511_v4, %v9255_v62  ;;  %v12523_v33 = vld [vmem:[%s20106_s1 + $0x504] sm:$0xf0]  ;;  %v12569_v37 = vld [vmem:[%s20106_s1 + $0x674] sm:$0xf0]  ;;  %v9176_v39 = vor.u32 %v12491_v26, %v9175_v25 }
  0x54   : > { %3134 = vmatpush.bf16.msra.mxu2 %v9352_v6  ;;  %v12527_v6 = vld [vmem:[%s20106_s1 + $0x524] sm:$0xf0]  ;;  %v9303_v31 = vld [vmem:[%s20106_s1 + $0x500] sm:$0xf]  ;;  %v9551_v38 = vld [vmem:[%s20106_s1 + $0x6f0] sm:$0xf] }
  0x55   : > { %3153 = vmatpush.bf16.msra.mxu3 %v9416_v10  ;;  %v12543_v10 = vld [vmem:[%s20106_s1 + $0x5a4] sm:$0xf0]  ;;  %v9320_v14 = vor.u32 %v12527_v6, %v9319_v5  ;;  %v9367_v34 = vld [vmem:[%s20106_s1 + $0x580] sm:$0xf]  ;;  %v12585_v40 = vld [vmem:[%s20106_s1 + $0x6f4] sm:$0xf0]  ;;  %v9304_v45 = vor.u32 %v12523_v33, %v9303_v31 }
  0x56   : > { %3097 = vmatpush.bf16.msra.mxu0 %v9216_v16  ;;  %v12493_v16 = vld [vmem:[%s20106_s1 + $0x414] sm:$0xf0]  ;;  %v12539_v35 = vld [vmem:[%s20106_s1 + $0x584] sm:$0xf0]  ;;  %v9615_v41 = vld [vmem:[%s20106_s1 + $0x770] sm:$0xf] }
  0x57   : > { %3116 = vmatpush.bf16.msra.mxu1 %v9280_v17  ;;  %v9247_v17 = vld [vmem:[%s20106_s1 + $0x490] sm:$0xf]  ;;  %v9184_v24 = vor.u32 %v12493_v16, %v9183_v15  ;;  %v12601_v42 = vld [vmem:[%s20106_s1 + $0x774] sm:$0xf0]  ;;  %v9368_v49 = vor.u32 %v12539_v35, %v9367_v34  ;;  %v8495_v54 = vld [vmem:[%s13565_s25 + $0x20] sm:$0xf] }
  0x58   : > { %3135 = vmatpush.bf16.msra.mxu2 %v9344_v18  ;;  %v9384_v18 = vor.u32 %v12543_v10, %v9383_v9  ;;  %v9248_v27 = vor.u32 %v12509_v19, %v9247_v17  ;;  %v9679_v46 = vld [vmem:[%s20106_s1 + $0x7f0] sm:$0xf]  ;;  %v12316_v60 = vld [vmem:[%s13565_s25 + $0x24] sm:$0xf]  ;;  %v8497_v61 = vld [vmem:[%s13565_s25 + $0x84] sm:$0xf0]  ;;  %v9616_v4 = vor.u32 %v12601_v42, %v9615_v41 }
  0x59   : > { %3154 = vmatpush.bf16.msra.mxu3 %v9408_v22  ;;  %v9375_v22 = vld [vmem:[%s20106_s1 + $0x590] sm:$0xf]  ;;  %v8503_v62 = vld [vmem:[%s13565_s25 + $0x28] sm:$0xf]  ;;  %v12329_v5 = vld [vmem:[%s13565_s25 + $0x88] sm:$0xf0]  ;;  %v14065_v19 = vor.u32 %v12316_v60, %v8497_v61 }
  0x5a   : > { %3098 = vmatpush.bf16.msra.mxu0 %v9208_v28  ;;  %v9312_v28 = vor.u32 %v12525_v21, %v9311_v20  ;;  %v9376_v32 = vor.u32 %v12541_v23, %v9375_v22  ;;  %v12317_v6 = vld [vmem:[%s13565_s25 + $0x2c] sm:$0xf]  ;;  %v8505_v9 = vld [vmem:[%s13565_s25 + $0x8c] sm:$0xf0]  ;;  %v12583_v16 = vld [vmem:[%s20106_s1 + $0x6e4] sm:$0xf0]  ;;  %v14067_v20 = vor.u32 %v12329_v5, %v8503_v62 }
  0x5b   : > { %3117 = vmatpush.bf16.msra.mxu1 %v9272_v29  ;;  %v9239_v29 = vld [vmem:[%s20106_s1 + $0x480] sm:$0xf]  ;;  %v12615_v22 = vld [vmem:[%s20106_s1 + $0x7e4] sm:$0xf0]  ;;  %v14075_v23 = vor.u32 %v12317_v6, %v8505_v9  ;;  %v12581_v31 = vld [vmem:[%s20106_s1 + $0x6d4] sm:$0xf0] }
  0x5c   : > { %3136 = vmatpush.bf16.msra.mxu2 %v9336_v30  ;;  %v12507_v30 = vld [vmem:[%s20106_s1 + $0x484] sm:$0xf0]  ;;  %v9607_v17 = vld [vmem:[%s20106_s1 + $0x760] sm:$0xf]  ;;  %v12597_v33 = vld [vmem:[%s20106_s1 + $0x754] sm:$0xf0] }
  0x5d   : > { %3155 = vmatpush.bf16.msra.mxu3 %v9400_v36  ;;  %3032 = vmatmul.bf16.gmra.mxu0 %v13938_v1  ;;  %v9487_v36 = vld [vmem:[%s20106_s1 + $0x670] sm:$0xf]  ;;  %v9240_v43 = vor.u32 %v12507_v30, %v9239_v29  ;;  %v9671_v21 = vld [vmem:[%s20106_s1 + $0x7e0] sm:$0xf]  ;;  %v12613_v35 = vld [vmem:[%s20106_s1 + $0x7d4] sm:$0xf0] }
  0x5e   : > { %3099 = vmatpush.bf16.msra.mxu0 %v9200_v48  ;;  %3051 = vmatmul.bf16.gmra.mxu1 %v13949_v7  ;;  %v12617_v48 = vld [vmem:[%s20106_s1 + $0x7f4] sm:$0xf0]  ;;  %v9535_v29 = vld [vmem:[%s20106_s1 + $0x6d0] sm:$0xf]  ;;  %v9672_v30 = vor.u32 %v12615_v22, %v9671_v21  ;;  %v9527_v41 = vld [vmem:[%s20106_s1 + $0x6c0] sm:$0xf] }
  0x5f   : > { %3118 = vmatpush.bf16.msra.mxu1 %v9264_v55  ;;  %3070 = vmatmul.bf16.gmra.mxu2 %v13951_v8  ;;  %v12328_v55 = vld [vmem:[%s13565_s25 + $0x80] sm:$0xf0]  ;;  %v9680_v10 = vor.u32 %v12617_v48, %v9679_v46  ;;  %v9663_v34 = vld [vmem:[%s20106_s1 + $0x7d0] sm:$0xf]  ;;  %v12595_v46 = vld [vmem:[%s20106_s1 + $0x744] sm:$0xf0] }
  0x60   : > { %3137 = vmatpush.bf16.msra.mxu2 %v9328_v59  ;;  %3089 = vmatmul.bf16.gmra.mxu3 %v13959_v11  ;;  %v9488_v59 = vor.u32 %v12569_v37, %v9487_v36  ;;  %v14054_v15 = vor.u32 %v12328_v55, %v8495_v54  ;;  %v9536_v37 = vor.u32 %v12581_v31, %v9535_v29  ;;  %v9655_v48 = vld [vmem:[%s20106_s1 + $0x7c0] sm:$0xf]  ;;  %v8595_v60 = vld [vmem:[%s13565_s25 + $0xe8] sm:$0xf]  ;;  %v12353_v61 = vld [vmem:[%s13565_s25 + $0x148] sm:$0xf0] }
  0x61   : > { %3156 = vmatpush.bf16.msra.mxu3 %v9392_v2  ;;  %v9552_v2 = vor.u32 %v12585_v40, %v9551_v38  ;;  %v12563_v40 = vld [vmem:[%s20106_s1 + $0x644] sm:$0xf0]  ;;  %v9664_v42 = vor.u32 %v12613_v35, %v9663_v34  ;;  %v9455_v62 = vld [vmem:[%s20106_s1 + $0x630] sm:$0xf]  ;;  %v12341_v6 = vld [vmem:[%s13565_s25 + $0xec] sm:$0xf] }
  0x62   : > { %3100 = vmatpush.bf16.msra.mxu0 %v9192_v12  ;;  %v9479_v12 = vld [vmem:[%s20106_s1 + $0x660] sm:$0xf]  ;;  %v8597_v9 = vld [vmem:[%s13565_s25 + $0x14c] sm:$0xf0]  ;;  %v12342_v22 = vld [vmem:[%s13565_s25 + $0xf4] sm:$0xf] }
  0x63   : > { %3119 = vmatpush.bf16.msra.mxu1 %v9256_v13  ;;  %v12567_v13 = vld [vmem:[%s20106_s1 + $0x664] sm:$0xf0]  ;;  %v9511_v29 = vld [vmem:[%s20106_s1 + $0x6a0] sm:$0xf]  ;;  %v14181_v35 = vor.u32 %v12341_v6, %v8597_v9 }
  0x64   : > { %3138 = vmatpush.bf16.msra.mxu2 %v9320_v14  ;;  %v9543_v14 = vld [vmem:[%s20106_s1 + $0x6e0] sm:$0xf]  ;;  %v12591_v34 = vld [vmem:[%s20106_s1 + $0x724] sm:$0xf0] }
  0x65   : > { %3157 = vmatpush.bf16.msra.mxu3 %v9384_v18  ;;  %v12599_v18 = vld [vmem:[%s20106_s1 + $0x764] sm:$0xf0]  ;;  %v9544_v25 = vor.u32 %v12583_v16, %v9543_v14  ;;  %v8603_v14 = vld [vmem:[%s13565_s25 + $0xf0] sm:$0xf]  ;;  %v9495_v6 = vld [vmem:[%s20106_s1 + $0x680] sm:$0xf] }
  0x66   : > { %3101 = vmatpush.bf16.msra.mxu0 %v9184_v24  ;;  %v9480_v24 = vor.u32 %v12567_v13, %v9479_v12  ;;  %v9608_v26 = vor.u32 %v12599_v18, %v9607_v17  ;;  %v9583_v12 = vld [vmem:[%s20106_s1 + $0x730] sm:$0xf]  ;;  %v12593_v13 = vld [vmem:[%s20106_s1 + $0x734] sm:$0xf0]  ;;  %v12354_v18 = vld [vmem:[%s13565_s25 + $0x150] sm:$0xf0] }
  0x67   : > { %3120 = vmatpush.bf16.msra.mxu1 %v9248_v27  ;;  %v9471_v27 = vld [vmem:[%s20106_s1 + $0x650] sm:$0xf]  ;;  %v12609_v17 = vld [vmem:[%s20106_s1 + $0x7b4] sm:$0xf0]  ;;  %v12571_v9 = vld [vmem:[%s20106_s1 + $0x684] sm:$0xf0] }
  0x68   : > { %3139 = vmatpush.bf16.msra.mxu2 %v9312_v28  ;;  %v12565_v28 = vld [vmem:[%s20106_s1 + $0x654] sm:$0xf0]  ;;  %v9647_v16 = vld [vmem:[%s20106_s1 + $0x7b0] sm:$0xf] }
  0x69   : > { %3158 = vmatpush.bf16.msra.mxu3 %v9376_v32  ;;  %v9599_v32 = vld [vmem:[%s20106_s1 + $0x750] sm:$0xf]  ;;  %v9472_v36 = vor.u32 %v12565_v28, %v9471_v27  ;;  %v9447_v27 = vld [vmem:[%s20106_s1 + $0x620] sm:$0xf]  ;;  %v12559_v28 = vld [vmem:[%s20106_s1 + $0x624] sm:$0xf0]  ;;  %v9648_v31 = vor.u32 %v12609_v17, %v9647_v16 }
  0x6a   : > { %3102 = vmatpush.bf16.msra.mxu0 %v9176_v39  ;;  %v9600_v38 = vor.u32 %v12597_v33, %v9599_v32  ;;  %v9463_v39 = vld [vmem:[%s20106_s1 + $0x640] sm:$0xf]  ;;  %v12575_v32 = vld [vmem:[%s20106_s1 + $0x6a4] sm:$0xf0]  ;;  %v9743_v17 = vld [vmem:[%s20106_s1 + $0x870] sm:$0xf] }
  0x6b   : > { %3121 = vmatpush.bf16.msra.mxu1 %v9240_v43  ;;  %v12579_v43 = vld [vmem:[%s20106_s1 + $0x6c4] sm:$0xf0]  ;;  %v9464_v54 = vor.u32 %v12563_v40, %v9463_v39  ;;  %v9575_v33 = vld [vmem:[%s20106_s1 + $0x720] sm:$0xf]  ;;  %v9448_v40 = vor.u32 %v12559_v28, %v9447_v27  ;;  %v9496_v27 = vor.u32 %v12571_v9, %v9495_v6 }
  0x6c   : > { %3140 = vmatpush.bf16.msra.mxu2 %v9304_v45  ;;  %v9591_v45 = vld [vmem:[%s20106_s1 + $0x740] sm:$0xf]  ;;  %v9528_v55 = vor.u32 %v12579_v43, %v9527_v41  ;;  %v9512_v41 = vor.u32 %v12575_v32, %v9511_v29  ;;  %v9439_v43 = vld [vmem:[%s20106_s1 + $0x610] sm:$0xf]  ;;  %v12603_v16 = vld [vmem:[%s20106_s1 + $0x784] sm:$0xf0] }
  0x6d   : > { %3159 = vmatpush.bf16.msra.mxu3 %v9368_v49  ;;  %3103 = vmatmul.bf16.vlgmr.msra.gmra.mxu0 %v14054_v15  ;;  %v12611_v49 = vld [vmem:[%s20106_s1 + $0x7c4] sm:$0xf0]  ;;  %v9935_v29 = vld [vmem:[%s20106_s1 + $0x9f0] sm:$0xf]  ;;  %v9927_v6 = vld [vmem:[%s20106_s1 + $0x9e0] sm:$0xf] }
  0x6e   : > { %3171 = vmatpush.bf16.msrb.mxu0 %v9488_v59  ;;  %3122 = vmatmul.bf16.vlgmr.msra.gmra.mxu1 %v14065_v19  ;;  %v9592_v59 = vor.u32 %v12595_v46, %v9591_v45  ;;  %v9656_v5 = vor.u32 %v12611_v49, %v9655_v48  ;;  %v12557_v45 = vld [vmem:[%s20106_s1 + $0x614] sm:$0xf0]  ;;  %v9503_v46 = vld [vmem:[%s20106_s1 + $0x690] sm:$0xf]  ;;  %v12679_v9 = vld [vmem:[%s20106_s1 + $0x9e4] sm:$0xf0] }
  0x6f   : > { %3190 = vmatpush.bf16.msrb.mxu1 %v9552_v2  ;;  %3141 = vmatmul.bf16.vlgmr.msra.gmra.mxu2 %v14067_v20  ;;  %v12561_v2 = vld [vmem:[%s20106_s1 + $0x634] sm:$0xf0] }
  0x70   : > { %3209 = vmatpush.bf16.msrb.mxu2 %v9616_v4  ;;  %3160 = vmatmul.bf16.vlgmr.msra.gmra.mxu3 %v14075_v23  ;;  %v9519_v4 = vld [vmem:[%s20106_s1 + $0x6b0] sm:$0xf]  ;;  %v9456_v21 = vor.u32 %v12561_v2, %v9455_v62  ;;  %v12573_v49 = vld [vmem:[%s20106_s1 + $0x694] sm:$0xf0]  ;;  %v9431_v62 = vld [vmem:[%s20106_s1 + $0x600] sm:$0xf] }
  0x71   : > { %3228 = vmatpush.bf16.msrb.mxu3 %v9680_v10  ;;  %v12577_v10 = vld [vmem:[%s20106_s1 + $0x6b4] sm:$0xf0]  ;;  %v12555_v2 = vld [vmem:[%s20106_s1 + $0x604] sm:$0xf0] }
  0x72   : > { %3172 = vmatpush.bf16.msrb.mxu0 %v9480_v24  ;;  %v8605_v24 = vld [vmem:[%s13565_s25 + $0x154] sm:$0xf0] }
  0x73   : > { %3191 = vmatpush.bf16.msrb.mxu1 %v9544_v25  ;;  %v9520_v25 = vor.u32 %v12577_v10, %v9519_v4  ;;  %v14191_v39 = vor.u32 %v12342_v22, %v8605_v24  ;;  %v9504_v4 = vor.u32 %v12573_v49, %v9503_v46  ;;  %v9559_v10 = vld [vmem:[%s20106_s1 + $0x700] sm:$0xf]  ;;  %v9432_v22 = vor.u32 %v12555_v2, %v9431_v62  ;;  %v12649_v24 = vld [vmem:[%s20106_s1 + $0x8f4] sm:$0xf0]  ;;  %v12319_v46 = vld [vmem:[%s13565_s25 + $0x3c] sm:$0xf] }
  0x74   : > { %3210 = vmatpush.bf16.msrb.mxu2 %v9608_v26  ;;  %v9584_v26 = vor.u32 %v12593_v13, %v9583_v12  ;;  %v12587_v13 = vld [vmem:[%s20106_s1 + $0x704] sm:$0xf0]  ;;  %v9863_v62 = vld [vmem:[%s20106_s1 + $0x960] sm:$0xf] }
  0x75   : > { %3229 = vmatpush.bf16.msrb.mxu3 %v9672_v30  ;;  %v14170_v30 = vor.u32 %v12353_v61, %v8595_v60  ;;  %v12605_v60 = vld [vmem:[%s20106_s1 + $0x794] sm:$0xf0]  ;;  %v9440_v61 = vor.u32 %v12557_v45, %v9439_v43  ;;  %v9560_v28 = vor.u32 %v12587_v13, %v9559_v10  ;;  %v12331_v45 = vld [vmem:[%s13565_s25 + $0x98] sm:$0xf0]  ;;  %v12663_v2 = vld [vmem:[%s20106_s1 + $0x964] sm:$0xf0] }
  0x76   : > { %3173 = vmatpush.bf16.msrb.mxu0 %v9472_v36  ;;  %v14183_v36 = vor.u32 %v12354_v18, %v8603_v14  ;;  %v9623_v14 = vld [vmem:[%s20106_s1 + $0x780] sm:$0xf]  ;;  %v12633_v18 = vld [vmem:[%s20106_s1 + $0x874] sm:$0xf0] }
  0x77   : > { %3192 = vmatpush.bf16.msrb.mxu1 %v9536_v37  ;;  %v9639_v37 = vld [vmem:[%s20106_s1 + $0x7a0] sm:$0xf]  ;;  %v9624_v32 = vor.u32 %v12603_v16, %v9623_v14  ;;  %v9864_v14 = vor.u32 %v12663_v2, %v9863_v62  ;;  %v9727_v16 = vld [vmem:[%s20106_s1 + $0x850] sm:$0xf]  ;;  %v12343_v2 = vld [vmem:[%s13565_s25 + $0xfc] sm:$0xf] }
  0x78   : > { %3211 = vmatpush.bf16.msrb.mxu2 %v9600_v38  ;;  %v12607_v38 = vld [vmem:[%s20106_s1 + $0x7a4] sm:$0xf0] }
  0x79   : > { %3230 = vmatpush.bf16.msrb.mxu3 %v9664_v42  ;;  %v9576_v42 = vor.u32 %v12591_v34, %v9575_v33  ;;  %v9640_v48 = vor.u32 %v12607_v38, %v9639_v37  ;;  %v8511_v33 = vld [vmem:[%s13565_s25 + $0x30] sm:$0xf]  ;;  %v12330_v34 = vld [vmem:[%s13565_s25 + $0x90] sm:$0xf0]  ;;  %v9744_v37 = vor.u32 %v12633_v18, %v9743_v17  ;;  %v12629_v17 = vld [vmem:[%s20106_s1 + $0x854] sm:$0xf0] }
  0x7a   : > { %3174 = vmatpush.bf16.msrb.mxu0 %v9464_v54  ;;  %v9567_v54 = vld [vmem:[%s20106_s1 + $0x710] sm:$0xf]  ;;  %v12318_v38 = vld [vmem:[%s13565_s25 + $0x34] sm:$0xf] }
  0x7b   : > { %3193 = vmatpush.bf16.msrb.mxu1 %v9528_v55  ;;  %v12589_v55 = vld [vmem:[%s20106_s1 + $0x714] sm:$0xf0]  ;;  %v9791_v18 = vld [vmem:[%s20106_s1 + $0x8d0] sm:$0xf] }
  0x7c   : > { %3212 = vmatpush.bf16.msrb.mxu2 %v9592_v59  ;;  %v9631_v59 = vld [vmem:[%s20106_s1 + $0x790] sm:$0xf] }
  0x7d   : > { %3231 = vmatpush.bf16.msrb.mxu3 %v9656_v5  ;;  %3108 = vmatmul.bf16.gmra.mxu0 %v14170_v30  ;;  %v9568_v5 = vor.u32 %v12589_v55, %v9567_v54  ;;  %v9632_v12 = vor.u32 %v12605_v60, %v9631_v59  ;;  %v9735_v54 = vld [vmem:[%s20106_s1 + $0x860] sm:$0xf]  ;;  %v12631_v55 = vld [vmem:[%s20106_s1 + $0x864] sm:$0xf0]  ;;  %v14286_v60 = vor.u32 %v12330_v34, %v8511_v33 }
  0x7e   : > { %3175 = vmatpush.bf16.msrb.mxu0 %v9456_v21  ;;  %3127 = vmatmul.bf16.gmra.mxu1 %v14181_v35  ;;  %v9807_v21 = vld [vmem:[%s20106_s1 + $0x8f0] sm:$0xf]  ;;  %v9799_v59 = vld [vmem:[%s20106_s1 + $0x8e0] sm:$0xf]  ;;  %v12627_v33 = vld [vmem:[%s20106_s1 + $0x844] sm:$0xf0] }
  0x7f   : > { %3194 = vmatpush.bf16.msrb.mxu1 %v9520_v25  ;;  %3146 = vmatmul.bf16.gmra.mxu2 %v14183_v36  ;;  %v9871_v25 = vld [vmem:[%s20106_s1 + $0x970] sm:$0xf]  ;;  %v9783_v34 = vld [vmem:[%s20106_s1 + $0x8c0] sm:$0xf] }
  0x80   : > { %3213 = vmatpush.bf16.msrb.mxu2 %v9584_v26  ;;  %3165 = vmatmul.bf16.gmra.mxu3 %v14191_v39  ;;  %v12665_v26 = vld [vmem:[%s20106_s1 + $0x974] sm:$0xf0] }
  0x81   : > { %3232 = vmatpush.bf16.msrb.mxu3 %v9648_v31  ;;  %v12681_v31 = vld [vmem:[%s20106_s1 + $0x9f4] sm:$0xf0]  ;;  %v9872_v43 = vor.u32 %v12665_v26, %v9871_v25  ;;  %v9919_v26 = vld [vmem:[%s20106_s1 + $0x9d0] sm:$0xf] }
  0x82   : > { %3176 = vmatpush.bf16.msrb.mxu0 %v9448_v40  ;;  %v8513_v40 = vld [vmem:[%s13565_s25 + $0x94] sm:$0xf0]  ;;  %v9936_v49 = vor.u32 %v12681_v31, %v9935_v29 }
  0x83   : > { %3195 = vmatpush.bf16.msrb.mxu1 %v9512_v41  ;;  %v8519_v41 = vld [vmem:[%s13565_s25 + $0x38] sm:$0xf] }
  0x84   : > { %3214 = vmatpush.bf16.msrb.mxu2 %v9576_v42  ;;  %v9808_v42 = vor.u32 %v12649_v24, %v9807_v21  ;;  %v9928_v21 = vor.u32 %v12679_v9, %v9927_v6  ;;  %v9855_v24 = vld [vmem:[%s20106_s1 + $0x950] sm:$0xf]  ;;  %v12661_v25 = vld [vmem:[%s20106_s1 + $0x954] sm:$0xf0]  ;;  %v8613_v6 = vld [vmem:[%s13565_s25 + $0x15c] sm:$0xf0] }
  0x85   : > { %3233 = vmatpush.bf16.msrb.mxu3 %v9640_v48  ;;  %v8521_v48 = vld [vmem:[%s13565_s25 + $0x9c] sm:$0xf0]  ;;  %v9856_v31 = vor.u32 %v12661_v25, %v9855_v24  ;;  %v12641_v9 = vld [vmem:[%s20106_s1 + $0x8b4] sm:$0xf0]  ;;  %v8621_v24 = vld [vmem:[%s13565_s25 + $0x164] sm:$0xf0] }
  0x86   : > { %3177 = vmatpush.bf16.msrb.mxu0 %v9440_v61  ;;  %v12647_v61 = vld [vmem:[%s20106_s1 + $0x8e4] sm:$0xf0]  ;;  %v14307_v10 = vor.u32 %v12319_v46, %v8521_v48 }
  0x87   : > { %3196 = vmatpush.bf16.msrb.mxu1 %v9504_v4  ;;  %v14297_v4 = vor.u32 %v12318_v38, %v8513_v40  ;;  %v9800_v13 = vor.u32 %v12647_v61, %v9799_v59  ;;  %v12643_v38 = vld [vmem:[%s20106_s1 + $0x8c4] sm:$0xf0]  ;;  %v9847_v40 = vld [vmem:[%s20106_s1 + $0x940] sm:$0xf]  ;;  %v12625_v59 = vld [vmem:[%s20106_s1 + $0x834] sm:$0xf0] }
  0x88   : > { %3215 = vmatpush.bf16.msrb.mxu2 %v9568_v5  ;;  %v14299_v5 = vor.u32 %v12331_v45, %v8519_v41  ;;  %v12659_v41 = vld [vmem:[%s20106_s1 + $0x944] sm:$0xf0]  ;;  %v9784_v46 = vor.u32 %v12643_v38, %v9783_v34  ;;  %v9775_v61 = vld [vmem:[%s20106_s1 + $0x8b0] sm:$0xf]  ;;  %v9831_v34 = vld [vmem:[%s20106_s1 + $0x920] sm:$0xf]  ;;  %v14413_v38 = vor.u32 %v12343_v2, %v8613_v6 }
  0x89   : > { %3234 = vmatpush.bf16.msrb.mxu3 %v9632_v12  ;;  %v9736_v12 = vor.u32 %v12631_v55, %v9735_v54  ;;  %v9848_v48 = vor.u32 %v12659_v41, %v9847_v40  ;;  %v12355_v54 = vld [vmem:[%s13565_s25 + $0x158] sm:$0xf0]  ;;  %v9711_v55 = vld [vmem:[%s20106_s1 + $0x830] sm:$0xf]  ;;  %v9776_v25 = vor.u32 %v12641_v9, %v9775_v61  ;;  %v9895_v41 = vld [vmem:[%s20106_s1 + $0x9a0] sm:$0xf] }
  0x8a   : > { %3178 = vmatpush.bf16.msrb.mxu0 %v9432_v22  ;;  %v12645_v22 = vld [vmem:[%s20106_s1 + $0x8d4] sm:$0xf0]  ;;  %v9887_v6 = vld [vmem:[%s20106_s1 + $0x990] sm:$0xf] }
  0x8b   : > { %3197 = vmatpush.bf16.msrb.mxu1 %v9496_v27  ;;  %v12677_v27 = vld [vmem:[%s20106_s1 + $0x9d4] sm:$0xf0]  ;;  %v9792_v29 = vor.u32 %v12645_v22, %v9791_v18  ;;  %v12356_v18 = vld [vmem:[%s13565_s25 + $0x160] sm:$0xf0] }
  0x8c   : > { %3216 = vmatpush.bf16.msrb.mxu2 %v9560_v28  ;;  %v9728_v28 = vor.u32 %v12629_v17, %v9727_v16  ;;  %v9903_v16 = vld [vmem:[%s20106_s1 + $0x9b0] sm:$0xf]  ;;  %v12673_v17 = vld [vmem:[%s20106_s1 + $0x9b4] sm:$0xf0]  ;;  %v12344_v22 = vld [vmem:[%s13565_s25 + $0x104] sm:$0xf] }
  0x8d   : > { %3235 = vmatpush.bf16.msrb.mxu3 %v9624_v32  ;;  %3179 = vmatmul.bf16.vlgmr.msrb.gmra.mxu0 %v14286_v60  ;;  %v9719_v32 = vld [vmem:[%s20106_s1 + $0x840] sm:$0xf]  ;;  %v12637_v61 = vld [vmem:[%s20106_s1 + $0x894] sm:$0xf0] }
  0x8e   : > { %3247 = vmatpush.bf16.msra.mxu0 %v9744_v37  ;;  %3198 = vmatmul.bf16.vlgmr.msrb.gmra.mxu1 %v14297_v4  ;;  %v9920_v37 = vor.u32 %v12677_v27, %v9919_v26  ;;  %v9720_v45 = vor.u32 %v12627_v33, %v9719_v32  ;;  %v9703_v27 = vld [vmem:[%s20106_s1 + $0x820] sm:$0xf]  ;;  %v9904_v32 = vor.u32 %v12673_v17, %v9903_v16  ;;  %v12639_v33 = vld [vmem:[%s20106_s1 + $0x8a4] sm:$0xf0]  ;;  %v12653_v2 = vld [vmem:[%s20106_s1 + $0x914] sm:$0xf0] }
  0x8f   : > { %3266 = vmatpush.bf16.msra.mxu1 %v9808_v42  ;;  %3217 = vmatmul.bf16.vlgmr.msrb.gmra.mxu2 %v14299_v5  ;;  %v9911_v42 = vld [vmem:[%s20106_s1 + $0x9c0] sm:$0xf]  ;;  %v12669_v9 = vld [vmem:[%s20106_s1 + $0x994] sm:$0xf0] }
  0x90   : > { %3285 = vmatpush.bf16.msra.mxu2 %v9872_v43  ;;  %3236 = vmatmul.bf16.vlgmr.msrb.gmra.mxu3 %v14307_v10  ;;  %v12675_v43 = vld [vmem:[%s20106_s1 + $0x9c4] sm:$0xf0] }
  0x91   : > { %3304 = vmatpush.bf16.msra.mxu3 %v9936_v49  ;;  %v8611_v49 = vld [vmem:[%s13565_s25 + $0xf8] sm:$0xf]  ;;  %v9912_v62 = vor.u32 %v12675_v43, %v9911_v42  ;;  %v12671_v42 = vld [vmem:[%s20106_s1 + $0x9a4] sm:$0xf0]  ;;  %v14423_v43 = vor.u32 %v12344_v22, %v8621_v24  ;;  %v9815_v24 = vld [vmem:[%s20106_s1 + $0x900] sm:$0xf] }
  0x92   : > { %3248 = vmatpush.bf16.msra.mxu0 %v9736_v12  ;;  %v9839_v12 = vld [vmem:[%s20106_s1 + $0x930] sm:$0xf]  ;;  %v12635_v22 = vld [vmem:[%s20106_s1 + $0x884] sm:$0xf0] }
  0x93   : > { %3267 = vmatpush.bf16.msra.mxu1 %v9800_v13  ;;  %v12657_v13 = vld [vmem:[%s20106_s1 + $0x934] sm:$0xf0]  ;;  %20127 = vst [vmem:[#allocation2_spill] sm:$0xff] %v14423_v43 }
  0x94   : > { %3286 = vmatpush.bf16.msra.mxu2 %v9864_v14  ;;  %v8619_v14 = vld [vmem:[%s13565_s25 + $0x100] sm:$0xf]  ;;  %v9840_v26 = vor.u32 %v12657_v13, %v9839_v12 }
  0x95   : > { %3305 = vmatpush.bf16.msra.mxu3 %v9928_v21  ;;  %v9712_v21 = vor.u32 %v12625_v59, %v9711_v55  ;;  %v14415_v40 = vor.u32 %v12356_v18, %v8619_v14  ;;  %v9759_v55 = vld [vmem:[%s20106_s1 + $0x890] sm:$0xf]  ;;  %v9896_v59 = vor.u32 %v12671_v42, %v9895_v41  ;;  %v9687_v13 = vld [vmem:[%s20106_s1 + $0x800] sm:$0xf]  ;;  %v12619_v14 = vld [vmem:[%s20106_s1 + $0x804] sm:$0xf0] }
  0x96   : > { %3249 = vmatpush.bf16.msra.mxu0 %v9728_v28  ;;  %v12623_v28 = vld [vmem:[%s20106_s1 + $0x824] sm:$0xf0]  ;;  %v9760_v16 = vor.u32 %v12637_v61, %v9759_v55  ;;  %v685_v18 = vld [vmem:[%s20107_s2] sm:$0x3]  ;;  %v10127_v41 = vld [vmem:[%s20106_s1 + $0xb70] sm:$0xf] }
  0x97   : > { %3268 = vmatpush.bf16.msra.mxu1 %v9792_v29  ;;  %v9767_v29 = vld [vmem:[%s20106_s1 + $0x8a0] sm:$0xf]  ;;  %v12729_v42 = vld [vmem:[%s20106_s1 + $0xb74] sm:$0xf0]  ;;  %v12332_v61 = vld [vmem:[%s13565_s25 + $0xa0] sm:$0xf0] }
  0x98   : > { %3287 = vmatpush.bf16.msra.mxu2 %v9856_v31  ;;  %v14402_v31 = vor.u32 %v12355_v54, %v8611_v49  ;;  %v9695_v49 = vld [vmem:[%s20106_s1 + $0x810] sm:$0xf]  ;;  %v12621_v54 = vld [vmem:[%s20106_s1 + $0x814] sm:$0xf0] }
  0x99   : > { %3306 = vmatpush.bf16.msra.mxu3 %v9920_v37  ;;  %v12655_v37 = vld [vmem:[%s20106_s1 + $0x924] sm:$0xf0]  ;;  %v9696_v12 = vor.u32 %v12621_v54, %v9695_v49  ;;  %v12745_v49 = vld [vmem:[%s20106_s1 + $0xbf4] sm:$0xf0]  ;;  %v14504_v54 = vperm.slane %v685_v18, 0 }
  0x9a   : > { %3250 = vmatpush.bf16.msra.mxu0 %v9720_v45  ;;  %v9704_v45 = vor.u32 %v12623_v28, %v9703_v27  ;;  %v9879_v27 = vld [vmem:[%s20106_s1 + $0x980] sm:$0xf]  ;;  %v12667_v28 = vld [vmem:[%s20106_s1 + $0x984] sm:$0xf0] }
  0x9b   : > { %3269 = vmatpush.bf16.msra.mxu1 %v9784_v46  ;;  %v9768_v46 = vor.u32 %v12639_v33, %v9767_v29  ;;  %v9999_v29 = vld [vmem:[%s20106_s1 + $0xa70] sm:$0xf]  ;;  %v9880_v55 = vor.u32 %v12667_v28, %v9879_v27  ;;  %v9991_v18 = vld [vmem:[%s20106_s1 + $0xa60] sm:$0xf]  ;;  %v12727_v28 = vld [vmem:[%s20106_s1 + $0xb64] sm:$0xf0] }
  0x9c   : > { %3288 = vmatpush.bf16.msra.mxu2 %v9848_v48  ;;  %v9832_v48 = vor.u32 %v12655_v37, %v9831_v34  ;;  %v10063_v33 = vld [vmem:[%s20106_s1 + $0xaf0] sm:$0xf]  ;;  %v9688_v34 = vor.u32 %v12619_v14, %v9687_v13  ;;  %v12713_v37 = vld [vmem:[%s20106_s1 + $0xaf4] sm:$0xf0]  ;;  %v10128_v13 = vor.u32 %v12729_v42, %v10127_v41  ;;  %v12333_v14 = vld [vmem:[%s13565_s25 + $0xa8] sm:$0xf0] }
  0x9d   : > { %3307 = vmatpush.bf16.msra.mxu3 %v9912_v62  ;;  %3184 = vmatmul.bf16.gmra.mxu0 %v14402_v31  ;;  %v9823_v62 = vld [vmem:[%s20106_s1 + $0x910] sm:$0xf]  ;;  %v10119_v27 = vld [vmem:[%s20106_s1 + $0xb60] sm:$0xf] }
  0x9e   : > { %3251 = vmatpush.bf16.msra.mxu0 %v9712_v21  ;;  %3203 = vmatmul.bf16.gmra.mxu1 %v14413_v38  ;;  %v9824_v17 = vor.u32 %v12653_v2, %v9823_v62  ;;  %v9751_v21 = vld [vmem:[%s20106_s1 + $0x880] sm:$0xf]  ;;  %v12320_v2 = vld [vmem:[%s13565_s25 + $0x44] sm:$0xf] }
  0x9f   : > { %3270 = vmatpush.bf16.msra.mxu1 %v9776_v25  ;;  %3222 = vmatmul.bf16.gmra.mxu2 %v14415_v40  ;;  %v9888_v25 = vor.u32 %v12669_v9, %v9887_v6  ;;  %v8529_v6 = vld [vmem:[%s13565_s25 + $0xa4] sm:$0xf0] }
  0xa0   : > { %3289 = vmatpush.bf16.msra.mxu2 %v9840_v26  ;;  %3241 = vmatmul.bf16.gmra.mxu3 %v14423_v43  ;;  %v12651_v26 = vld [vmem:[%s20106_s1 + $0x904] sm:$0xf0] }
  0xa1   : > { %3308 = vmatpush.bf16.msra.mxu3 %v9904_v32  ;;  %v12697_v32 = vld [vmem:[%s20106_s1 + $0xa74] sm:$0xf0]  ;;  %v8535_v9 = vld [vmem:[%s13565_s25 + $0x48] sm:$0xf] }
  0xa2   : > { %3252 = vmatpush.bf16.msra.mxu0 %v9704_v45  ;;  %v9752_v45 = vor.u32 %v12635_v22, %v9751_v21  ;;  %v10000_v62 = vor.u32 %v12697_v32, %v9999_v29  ;;  %v12695_v22 = vld [vmem:[%s20106_s1 + $0xa64] sm:$0xf0]  ;;  %v14534_v32 = vor.u32 %v12320_v2, %v8529_v6  ;;  %v12709_v6 = vld [vmem:[%s20106_s1 + $0xad4] sm:$0xf0] }
  0xa3   : > { %3271 = vmatpush.bf16.msra.mxu1 %v9768_v46  ;;  %v9816_v46 = vor.u32 %v12651_v26, %v9815_v24  ;;  %v10055_v24 = vld [vmem:[%s20106_s1 + $0xae0] sm:$0xf]  ;;  %v12711_v26 = vld [vmem:[%s20106_s1 + $0xae4] sm:$0xf0] }
  0xa4   : > { %3290 = vmatpush.bf16.msra.mxu2 %v9832_v48  ;;  %v10191_v48 = vld [vmem:[%s20106_s1 + $0xbf0] sm:$0xf]  ;;  %20129 = vst [vmem:[#allocation4_spill] sm:$0xff] %v14534_v32 }
  0xa5   : > { %3309 = vmatpush.bf16.msra.mxu3 %v9896_v59  ;;  %v8527_v59 = vld [vmem:[%s13565_s25 + $0x40] sm:$0xf]  ;;  %v10192_v21 = vor.u32 %v12745_v49, %v10191_v48  ;;  %v10056_v48 = vor.u32 %v12711_v26, %v10055_v24  ;;  %v10120_v49 = vor.u32 %v12727_v28, %v10119_v27  ;;  %v12707_v28 = vld [vmem:[%s20106_s1 + $0xac4] sm:$0xf0] }
  0xa6   : > { %3253 = vmatpush.bf16.msra.mxu0 %v9696_v12  ;;  %v10064_v12 = vor.u32 %v12713_v37, %v10063_v33  ;;  %v14536_v33 = vor.u32 %v12333_v14, %v8535_v9  ;;  %v12743_v37 = vld [vmem:[%s20106_s1 + $0xbe4] sm:$0xf0]  ;;  %v10111_v9 = vld [vmem:[%s20106_s1 + $0xb50] sm:$0xf]  ;;  %v12741_v14 = vld [vmem:[%s20106_s1 + $0xbd4] sm:$0xf0] }
  0xa7   : > { %3272 = vmatpush.bf16.msra.mxu1 %v9760_v16  ;;  %v12321_v16 = vld [vmem:[%s13565_s25 + $0x4c] sm:$0xf]  ;;  %v10039_v24 = vld [vmem:[%s20106_s1 + $0xac0] sm:$0xf] }
  0xa8   : > { %3291 = vmatpush.bf16.msra.mxu2 %v9824_v17  ;;  %v8537_v17 = vld [vmem:[%s13565_s25 + $0xac] sm:$0xf0]  ;;  %20130 = vst [vmem:[#allocation5_spill] sm:$0xff] %v14536_v33 }
  0xa9   : > { %3310 = vmatpush.bf16.msra.mxu3 %v9888_v25  ;;  %v14523_v25 = vor.u32 %v12332_v61, %v8527_v59  ;;  %v12693_v59 = vld [vmem:[%s20106_s1 + $0xa54] sm:$0xf0]  ;;  %v10047_v61 = vld [vmem:[%s20106_s1 + $0xad0] sm:$0xf] }
  0xaa   : > { %3254 = vmatpush.bf16.msra.mxu0 %v9688_v34  ;;  %v2952_v29 = vpop.f32.mrf.mxu0  ;;  %v10183_v34 = vld [vmem:[%s20106_s1 + $0xbe0] sm:$0xf] }
  0xab   : > { %3273 = vmatpush.bf16.msra.mxu1 %v9752_v45  ;;  %20128 = vst [vmem:[#allocation3_spill] sm:$0xff] %v14523_v25  ;;  %v2953_v41 = vadd.f32 %v2952_v29, %v14504_v54  ;;  %v2971_v42 = vpop.f32.mrf.mxu1  ;;  %v14545_v45 = vor.u32 %v12321_v16, %v8537_v17  ;;  %v10184_v2 = vor.u32 %v12743_v37, %v10183_v34  ;;  %v10103_v29 = vld [vmem:[%s20106_s1 + $0xb40] sm:$0xf]  ;;  %v12723_v34 = vld [vmem:[%s20106_s1 + $0xb44] sm:$0xf0] }
  0xac   : > { %3292 = vmatpush.bf16.msra.mxu2 %v9816_v46  ;;  %v9992_v46 = vor.u32 %v12695_v22, %v9991_v18  ;;  %v10048_v17 = vor.u32 %v12709_v6, %v10047_v61  ;;  %v9975_v18 = vld [vmem:[%s20106_s1 + $0xa40] sm:$0xf]  ;;  %v12691_v22 = vld [vmem:[%s20106_s1 + $0xa44] sm:$0xf0] }
  0xad   : > { %3311 = vmatpush.bf16.msra.mxu3 %v9880_v55  ;;  %20131 = vst [vmem:[#allocation6_spill] sm:$0xff] %v14545_v45  ;;  %v9983_v55 = vld [vmem:[%s20106_s1 + $0xa50] sm:$0xf]  ;;  %3255 = vmatmul.bf16.vlgmr.msra.gmra.mxu0 %v14523_v25  ;;  %v8627_v6 = vld [vmem:[%s13565_s25 + $0x108] sm:$0xf] }
  0xae   : > { %3323 = vmatpush.bf16.msrb.mxu0 %v10000_v62  ;;  %v2972_v62 = vadd.f32 %v2971_v42, %v2953_v41  ;;  %3274 = vmatmul.bf16.vlgmr.msra.gmra.mxu1 %v14534_v32  ;;  %v9984_v16 = vor.u32 %v12693_v59, %v9983_v55  ;;  %v9976_v59 = vor.u32 %v12691_v22, %v9975_v18  ;;  %v8629_v18 = vld [vmem:[%s13565_s25 + $0x16c] sm:$0xf0]  ;;  %v12705_v22 = vld [vmem:[%s20106_s1 + $0xab4] sm:$0xf0]  ;;  %v8553_v32 = vld [vmem:[%s13565_s25 + $0xbc] sm:$0xf0] }
  0xaf   : > { %3342 = vmatpush.bf16.msrb.mxu1 %v10064_v12  ;;  %v12725_v12 = vld [vmem:[%s20106_s1 + $0xb54] sm:$0xf0]  ;;  %3293 = vmatmul.bf16.vlgmr.msra.gmra.mxu2 %v14536_v33 }
  0xb0   : > { %3361 = vmatpush.bf16.msrb.mxu2 %v10128_v13  ;;  %v10175_v13 = vld [vmem:[%s20106_s1 + $0xbd0] sm:$0xf]  ;;  %3312 = vmatmul.bf16.vlgmr.msra.gmra.mxu3 %v14545_v45 }
  0xb1   : > { %3380 = vmatpush.bf16.msrb.mxu3 %v10192_v21  ;;  %v10112_v21 = vor.u32 %v12725_v12, %v10111_v9  ;;  %v10176_v27 = vor.u32 %v12741_v14, %v10175_v13  ;;  %v12357_v9 = vld [vmem:[%s13565_s25 + $0x168] sm:$0xf0]  ;;  %v9967_v12 = vld [vmem:[%s20106_s1 + $0xa30] sm:$0xf]  ;;  %v12689_v13 = vld [vmem:[%s20106_s1 + $0xa34] sm:$0xf0] }
  0xb2   : > { %3324 = vmatpush.bf16.msrb.mxu0 %v9992_v46  ;;  %v2990_v26 = vpop.f32.mrf.mxu2  ;;  %v2954_v41 = vpop.f32.mrf.mxu0  ;;  %v10167_v46 = vld [vmem:[%s20106_s1 + $0xbc0] sm:$0xf]  ;;  %v10031_v14 = vld [vmem:[%s20106_s1 + $0xab0] sm:$0xf] }
  0xb3   : > { %3343 = vmatpush.bf16.msrb.mxu1 %v10056_v48  ;;  %v2991_v37 = vadd.f32 %v2990_v26, %v2972_v62  ;;  %v3009_v42 = vpop.f32.mrf.mxu3  ;;  %v12739_v48 = vld [vmem:[%s20106_s1 + $0xbc4] sm:$0xf0]  ;;  %v2973_v55 = vpop.f32.mrf.mxu1  ;;  %v10040_v62 = vor.u32 %v12707_v28, %v10039_v24  ;;  %v10095_v24 = vld [vmem:[%s20106_s1 + $0xb30] sm:$0xf]  ;;  %v12721_v26 = vld [vmem:[%s20106_s1 + $0xb34] sm:$0xf0] }
  0xb4   : > { %3362 = vmatpush.bf16.msrb.mxu2 %v10120_v49  ;;  %v2955_v49 = vadd.f32 %v2954_v41, %v14504_v54  ;;  %v8635_v28 = vld [vmem:[%s13565_s25 + $0x110] sm:$0xf]  ;;  %v12346_v41 = vld [vmem:[%s13565_s25 + $0x114] sm:$0xf] }
  0xb5   : > { %3381 = vmatpush.bf16.msrb.mxu3 %v10184_v2  ;;  %v14600_v61 = vadd.f32 %v3009_v42, %v2991_v37  ;;  %v10104_v2 = vor.u32 %v12723_v34, %v10103_v29  ;;  %v12737_v29 = vld [vmem:[%s20106_s1 + $0xbb4] sm:$0xf0]  ;;  %v12358_v34 = vld [vmem:[%s13565_s25 + $0x170] sm:$0xf0]  ;;  %v9968_v37 = vor.u32 %v12689_v13, %v9967_v12  ;;  %v14643_v12 = vor.u32 %v12357_v9, %v8627_v6  ;;  %v10087_v13 = vld [vmem:[%s20106_s1 + $0xb20] sm:$0xf] }
  0xb6   : > { %3325 = vmatpush.bf16.msrb.mxu0 %v9984_v16  ;;  %v2974_v16 = vadd.f32 %v2973_v55, %v2955_v49  ;;  %v8637_v42 = vld [vmem:[%s13565_s25 + $0x174] sm:$0xf0]  ;;  %v9959_v49 = vld [vmem:[%s20106_s1 + $0xa20] sm:$0xf]  ;;  %v12687_v55 = vld [vmem:[%s20106_s1 + $0xa24] sm:$0xf0]  ;;  %v14656_v6 = vor.u32 %v12358_v34, %v8635_v28 }
  0xb7   : > { %3344 = vmatpush.bf16.msrb.mxu1 %v10048_v17  ;;  %v10168_v17 = vor.u32 %v12739_v48, %v10167_v46  ;;  %v10032_v46 = vor.u32 %v12705_v22, %v10031_v14  ;;  %v10096_v48 = vor.u32 %v12721_v26, %v10095_v24  ;;  %20132 = vst [vmem:[#allocation7_spill] sm:$0xff] %v14643_v12  ;;  %v12719_v14 = vld [vmem:[%s20106_s1 + $0xb24] sm:$0xf0]  ;;  %v10151_v9 = vld [vmem:[%s20106_s1 + $0xba0] sm:$0xf] }
  0xb8   : > { %3363 = vmatpush.bf16.msrb.mxu2 %v10112_v21  ;;  %v12345_v21 = vld [vmem:[%s13565_s25 + $0x10c] sm:$0xf]  ;;  %20134 = vst [vmem:[#allocation9_spill] sm:$0xff] %v14656_v6  ;;  %v14665_v33 = vor.u32 %v12346_v41, %v8637_v42  ;;  %v9951_v28 = vld [vmem:[%s20106_s1 + $0xa10] sm:$0xf] }
  0xb9   : > { %3382 = vmatpush.bf16.msrb.mxu3 %v10176_v27  ;;  %v10159_v27 = vld [vmem:[%s20106_s1 + $0xbb0] sm:$0xf]  ;;  %v14654_v43 = vor.u32 %v12345_v21, %v8629_v18  ;;  %v10088_v18 = vor.u32 %v12719_v14, %v10087_v13  ;;  %v12685_v34 = vld [vmem:[%s20106_s1 + $0xa14] sm:$0xf0]  ;;  %v12683_v13 = vld [vmem:[%s20106_s1 + $0xa04] sm:$0xf0] }
  0xba   : > { %3326 = vmatpush.bf16.msrb.mxu0 %v9976_v59  ;;  %v10023_v59 = vld [vmem:[%s20106_s1 + $0xaa0] sm:$0xf]  ;;  %v2992_v45 = vpop.f32.mrf.mxu2  ;;  %v2957_v24 = vpop.f32.mrf.mxu0  ;;  %20135 = vst [vmem:[#allocation10_spill] sm:$0xff] %v14665_v33 }
  0xbb   : > { %3345 = vmatpush.bf16.msrb.mxu1 %v10040_v62  ;;  %v10160_v62 = vor.u32 %v12737_v29, %v10159_v27  ;;  %v2993_v22 = vadd.f32 %v2992_v45, %v2974_v16  ;;  %v3011_v26 = vpop.f32.mrf.mxu3  ;;  %20133 = vst [vmem:[#allocation8_spill] sm:$0xff] %v14654_v43  ;;  %v2958_v27 = vadd.f32 %v2957_v24, %v14504_v54  ;;  %v2976_v29 = vpop.f32.mrf.mxu1  ;;  %v10007_v24 = vld [vmem:[%s20106_s1 + $0xa80] sm:$0xf] }
  0xbc   : > { %3364 = vmatpush.bf16.msrb.mxu2 %v10104_v2  ;;  %v12703_v2 = vld [vmem:[%s20106_s1 + $0xaa4] sm:$0xf0]  ;;  %v9960_v45 = vor.u32 %v12687_v55, %v9959_v49  ;;  %v12717_v49 = vld [vmem:[%s20106_s1 + $0xb14] sm:$0xf0]  ;;  %v10143_v55 = vld [vmem:[%s20106_s1 + $0xb90] sm:$0xf] }
  0xbd   : > { %3383 = vmatpush.bf16.msrb.mxu3 %v10168_v17  ;;  %v12735_v17 = vld [vmem:[%s20106_s1 + $0xba4] sm:$0xf0]  ;;  %v14667_v16 = vadd.f32 %v3011_v26, %v2993_v22  ;;  %v10024_v21 = vor.u32 %v12703_v2, %v10023_v59  ;;  %v2977_v41 = vadd.f32 %v2976_v29, %v2958_v27  ;;  %3260 = vmatmul.bf16.gmra.mxu0 %v14643_v12  ;;  %v12733_v59 = vld [vmem:[%s20106_s1 + $0xb94] sm:$0xf0]  ;;  %v9943_v2 = vld [vmem:[%s20106_s1 + $0xa00] sm:$0xf] }
  0xbe   : > { %3327 = vmatpush.bf16.msrb.mxu0 %v9968_v37  ;;  %v10015_v37 = vld [vmem:[%s20106_s1 + $0xa90] sm:$0xf]  ;;  %v10152_v42 = vor.u32 %v12735_v17, %v10151_v9  ;;  %3279 = vmatmul.bf16.gmra.mxu1 %v14654_v43  ;;  %v12699_v26 = vld [vmem:[%s20106_s1 + $0xa84] sm:$0xf0]  ;;  %v10071_v9 = vld [vmem:[%s20106_s1 + $0xb00] sm:$0xf]  ;;  %v10144_v27 = vor.u32 %v12733_v59, %v10143_v55 }
  0xbf   : > { %3346 = vmatpush.bf16.msrb.mxu1 %v10032_v46  ;;  %v12701_v46 = vld [vmem:[%s20106_s1 + $0xa94] sm:$0xf0]  ;;  %3298 = vmatmul.bf16.gmra.mxu2 %v14656_v6  ;;  %v12715_v29 = vld [vmem:[%s20106_s1 + $0xb04] sm:$0xf0]  ;;  %v8721_v55 = vld [vmem:[%s20106_s1 + $0x78] sm:$0xf0] }
  0xc0   : > { %3365 = vmatpush.bf16.msrb.mxu2 %v10096_v48  ;;  %v10079_v48 = vld [vmem:[%s20106_s1 + $0xb10] sm:$0xf]  ;;  %3317 = vmatmul.bf16.gmra.mxu3 %v14665_v33  ;;  %v10016_v14 = vor.u32 %v12701_v46, %v10015_v37  ;;  %v12376_v46 = vld [vmem:[%s20106_s1 + $0x74] sm:$0xf]  ;;  %v12335_v43 = vld [vmem:[%s13565_s25 + $0xb8] sm:$0xf0] }
  0xc1   : > { %3384 = vmatpush.bf16.msrb.mxu3 %v10160_v62  ;;  %v9952_v62 = vor.u32 %v12685_v34, %v9951_v28  ;;  %v10080_v22 = vor.u32 %v12717_v49, %v10079_v48  ;;  %v10255_v37 = vld [vmem:[%s20106_s1 + $0xc70] sm:$0xf]  ;;  %v12392_v59 = vld [vmem:[%s20106_s1 + $0xf4] sm:$0xf]  ;;  %v12323_v12 = vld [vmem:[%s13565_s25 + $0x5c] sm:$0xf] }
  0xc2   : > { %3328 = vmatpush.bf16.msrb.mxu0 %v9960_v45  ;;  %v2995_v17 = vpop.f32.mrf.mxu2  ;;  %v10135_v45 = vld [vmem:[%s20106_s1 + $0xb80] sm:$0xf]  ;;  %v2959_v28 = vpop.f32.mrf.mxu0 }
  0xc3   : > { %3347 = vmatpush.bf16.msrb.mxu1 %v10024_v21  ;;  %v12731_v21 = vld [vmem:[%s20106_s1 + $0xb84] sm:$0xf0]  ;;  %v3014_v34 = vpop.f32.mrf.mxu3  ;;  %v2960_v48 = vadd.f32 %v2959_v28, %v14504_v54  ;;  %v2978_v49 = vpop.f32.mrf.mxu1  ;;  %v8849_v28 = vld [vmem:[%s20106_s1 + $0x178] sm:$0xf0] }
  0xc4   : > { %3366 = vmatpush.bf16.msrb.mxu2 %v10088_v18  ;;  %v2996_v18 = vadd.f32 %v2995_v17, %v2977_v41  ;;  %v9944_v41 = vor.u32 %v12683_v13, %v9943_v2  ;;  %v8785_v17 = vld [vmem:[%s20106_s1 + $0xf8] sm:$0xf0]  ;;  %v10072_v2 = vor.u32 %v12715_v29, %v10071_v9  ;;  %v12408_v13 = vld [vmem:[%s20106_s1 + $0x174] sm:$0xf]  ;;  %v10136_v6 = vor.u32 %v12731_v21, %v10135_v45  ;;  %v12759_v45 = vld [vmem:[%s20106_s1 + $0xc64] sm:$0xf0] }
  0xc5   : > { %3385 = vmatpush.bf16.msrb.mxu3 %v10152_v42  ;;  %v12761_v42 = vld [vmem:[%s20106_s1 + $0xc74] sm:$0xf0]  ;;  %v2979_v33 = vadd.f32 %v2978_v49, %v2960_v48  ;;  %v8724_v9 = vor.u32 %v12376_v46, %v8721_v55  ;;  %v8788_v29 = vor.u32 %v12392_v59, %v8785_v17  ;;  %v8852_v25 = vor.u32 %v12408_v13, %v8849_v28  ;;  %v12374_v21 = vld [vmem:[%s20106_s1 + $0x64] sm:$0xf]  ;;  %v8713_v46 = vld [vmem:[%s20106_s1 + $0x68] sm:$0xf0] }
  0xc6   : > { %3329 = vmatpush.bf16.msrb.mxu0 %v9952_v62  ;;  %v14740_v54 = vadd.f32 %v3014_v34, %v2996_v18  ;;  %v10008_v62 = vor.u32 %v12699_v26, %v10007_v24  ;;  %v8543_v18 = vld [vmem:[%s13565_s25 + $0x50] sm:$0xf]  ;;  %v12334_v34 = vld [vmem:[%s13565_s25 + $0xb0] sm:$0xf0]  ;;  %v8545_v24 = vld [vmem:[%s13565_s25 + $0xb4] sm:$0xf0] }
  0xc7   : > { %3348 = vmatpush.bf16.msrb.mxu1 %v10016_v14  ;;  %v10256_v14 = vor.u32 %v12761_v42, %v10255_v37  ;;  %v8551_v26 = vld [vmem:[%s13565_s25 + $0x58] sm:$0xf]  ;;  %v14765_v42 = vor.u32 %v12334_v34, %v8543_v18  ;;  %v12390_v48 = vld [vmem:[%s20106_s1 + $0xe4] sm:$0xf]  ;;  %v8777_v49 = vld [vmem:[%s20106_s1 + $0xe8] sm:$0xf0] }
  0xc8   : > { %3367 = vmatpush.bf16.msrb.mxu2 %v10080_v22  ;;  %v12322_v22 = vld [vmem:[%s13565_s25 + $0x54] sm:$0xf] }
  0xc9   : > { %3386 = vmatpush.bf16.msrb.mxu3 %v10144_v27  ;;  %v10247_v27 = vld [vmem:[%s20106_s1 + $0xc60] sm:$0xf]  ;;  %v14776_v17 = vor.u32 %v12322_v22, %v8545_v24  ;;  %v10239_v22 = vld [vmem:[%s20106_s1 + $0xc50] sm:$0xf]  ;;  %v12757_v24 = vld [vmem:[%s20106_s1 + $0xc54] sm:$0xf0] }
  0xca   : > { %3330 = vmatpush.bf16.msrb.mxu0 %v9944_v41  ;;  %v2997_v37 = vpop.f32.mrf.mxu2  ;;  %v3028_v59 = vpop.f32.mrf.mxu0  ;;  %v10248_v18 = vor.u32 %v12759_v45, %v10247_v27  ;;  %v8833_v27 = vld [vmem:[%s20106_s1 + $0x158] sm:$0xf0]  ;;  %v10240_v45 = vor.u32 %v12757_v24, %v10239_v22 }
  0xcb   : > { %3349 = vmatpush.bf16.msrb.mxu1 %v10008_v62  ;;  %v2998_v41 = vadd.f32 %v2997_v37, %v2979_v33  ;;  %v3016_v55 = vpop.f32.mrf.mxu3  ;;  %20136 = vst [vmem:[#allocation11_spill] sm:$0xff] %v14776_v17  ;;  %v12406_v62 = vld [vmem:[%s20106_s1 + $0x164] sm:$0xf]  ;;  %v3029_v13 = vadd.f32 %v3028_v59, %v14600_v61  ;;  %v3047_v28 = vpop.f32.mrf.mxu1  ;;  %v14787_v33 = vor.u32 %v12323_v12, %v8553_v32  ;;  %v12372_v61 = vld [vmem:[%s20106_s1 + $0x54] sm:$0xf] }
  0xcc   : > { %3368 = vmatpush.bf16.msrb.mxu2 %v10072_v2  ;;  %v8841_v2 = vld [vmem:[%s20106_s1 + $0x168] sm:$0xf0]  ;;  %v8705_v12 = vld [vmem:[%s20106_s1 + $0x58] sm:$0xf0] }
  0xcd   : > { %3387 = vmatpush.bf16.msrb.mxu3 %v10136_v6  ;;  %v14778_v6 = vor.u32 %v12335_v43, %v8551_v26  ;;  %20138 = vst [vmem:[#allocation13_spill] sm:$0xff] %v14787_v33  ;;  %v14789_v34 = vadd.f32 %v3016_v55, %v2998_v41  ;;  %v8716_v43 = vor.u32 %v12374_v21, %v8713_v46  ;;  %v12388_v26 = vld [vmem:[%s20106_s1 + $0xd4] sm:$0xf]  ;;  %v10231_v46 = vld [vmem:[%s20106_s1 + $0xc40] sm:$0xf] }
  0xce   : > { %3399 = vmatpush.bf16.msra.mxu0 %v10256_v14  ;;  %v8780_v14 = vor.u32 %v12390_v48, %v8777_v49  ;;  %v3048_v32 = vadd.f32 %v3047_v28, %v3029_v13  ;;  %3350 = vmatmul.bf16.vlgmr.msrb.gmra.mxu1 %v14776_v17  ;;  %v8708_v21 = vor.u32 %v12372_v61, %v8705_v12  ;;  %v12755_v48 = vld [vmem:[%s20106_s1 + $0xc44] sm:$0xf0]  ;;  %v12370_v49 = vld [vmem:[%s20106_s1 + $0x44] sm:$0xf]  ;;  %v8697_v59 = vld [vmem:[%s20106_s1 + $0x48] sm:$0xf0] }
  0xcf   : > { %20137 = vst [vmem:[#allocation12_spill] sm:$0xff] %v14778_v6  ;;  %3418 = vmatpush.bf16.msra.mxu1 %v8724_v9  ;;  %3331 = vmatmul.bf16.vlgmr.msrb.gmra.mxu0 %v14765_v42  ;;  %v8769_v9 = vld [vmem:[%s20106_s1 + $0xd8] sm:$0xf0]  ;;  %v10232_v61 = vor.u32 %v12755_v48, %v10231_v46  ;;  %v8645_v46 = vld [vmem:[%s13565_s25 + $0x17c] sm:$0xf0] }
  0xd0   : > { %3437 = vmatpush.bf16.msra.mxu2 %v8788_v29  ;;  %v12404_v29 = vld [vmem:[%s20106_s1 + $0x154] sm:$0xf]  ;;  %3388 = vmatmul.bf16.vlgmr.msrb.gmra.mxu3 %v14787_v33  ;;  %v8772_v37 = vor.u32 %v12388_v26, %v8769_v9  ;;  %v8643_v26 = vld [vmem:[%s13565_s25 + $0x118] sm:$0xf]  ;;  %v12359_v9 = vld [vmem:[%s13565_s25 + $0x178] sm:$0xf0] }
  0xd1   : > { %3456 = vmatpush.bf16.msra.mxu3 %v8852_v25  ;;  %v8844_v25 = vor.u32 %v12406_v62, %v8841_v2  ;;  %3369 = vmatmul.bf16.vlgmr.msrb.gmra.mxu2 %v14778_v6  ;;  %v8836_v55 = vor.u32 %v12404_v29, %v8833_v27  ;;  %v12386_v62 = vld [vmem:[%s20106_s1 + $0xc4] sm:$0xf]  ;;  %v8761_v2 = vld [vmem:[%s20106_s1 + $0xc8] sm:$0xf0]  ;;  %v10223_v29 = vld [vmem:[%s20106_s1 + $0xc30] sm:$0xf] }
  0xd2   : > { %3400 = vmatpush.bf16.msra.mxu0 %v10248_v18  ;;  %v3066_v41 = vpop.f32.mrf.mxu2  ;;  %v3030_v28 = vpop.f32.mrf.mxu0  ;;  %v8764_v12 = vor.u32 %v12386_v62, %v8761_v2  ;;  %v12368_v27 = vld [vmem:[%s20106_s1 + $0x34] sm:$0xf]  ;;  %v8689_v48 = vld [vmem:[%s20106_s1 + $0x38] sm:$0xf0]  ;;  %v12360_v2 = vld [vmem:[%s13565_s25 + $0x180] sm:$0xf0] }
  0xd3   : > { %3419 = vmatpush.bf16.msra.mxu1 %v8716_v43  ;;  %v3067_v13 = vadd.f32 %v3066_v41, %v3048_v32  ;;  %v3085_v18 = vpop.f32.mrf.mxu3  ;;  %v12402_v43 = vld [vmem:[%s20106_s1 + $0x144] sm:$0xf]  ;;  %v3031_v22 = vadd.f32 %v3030_v28, %v14667_v16  ;;  %v3049_v24 = vpop.f32.mrf.mxu1  ;;  %v8700_v32 = vor.u32 %v12370_v49, %v8697_v59  ;;  %v12753_v16 = vld [vmem:[%s20106_s1 + $0xc34] sm:$0xf0]  ;;  %v12384_v49 = vld [vmem:[%s20106_s1 + $0xb4] sm:$0xf] }
  0xd4   : > { %3438 = vmatpush.bf16.msra.mxu2 %v8780_v14  ;;  %v8825_v14 = vld [vmem:[%s20106_s1 + $0x148] sm:$0xf0]  ;;  %v8753_v41 = vld [vmem:[%s20106_s1 + $0xb8] sm:$0xf0]  ;;  %v8651_v59 = vld [vmem:[%s13565_s25 + $0x120] sm:$0xf] }
  0xd5   : > { %3457 = vmatpush.bf16.msra.mxu3 %v8844_v25  ;;  %v14844_v25 = vadd.f32 %v3085_v18, %v3067_v13  ;;  %v8817_v62 = vld [vmem:[%s20106_s1 + $0x138] sm:$0xf0]  ;;  %v10224_v13 = vor.u32 %v12753_v16, %v10223_v29  ;;  %v12348_v28 = vld [vmem:[%s13565_s25 + $0x124] sm:$0xf]  ;;  %v8653_v18 = vld [vmem:[%s13565_s25 + $0x184] sm:$0xf0]  ;;  %v14887_v29 = vor.u32 %v12359_v9, %v8643_v26  ;;  %v14900_v26 = vor.u32 %v12360_v2, %v8651_v59 }
  0xd6   : > { %3401 = vmatpush.bf16.msra.mxu0 %v10240_v45  ;;  %v3050_v45 = vadd.f32 %v3049_v24, %v3031_v22  ;;  %v10215_v22 = vld [vmem:[%s20106_s1 + $0xc20] sm:$0xf]  ;;  %v12751_v24 = vld [vmem:[%s20106_s1 + $0xc24] sm:$0xf0]  ;;  %v12382_v16 = vld [vmem:[%s20106_s1 + $0xa4] sm:$0xf]  ;;  %v14909_v17 = vor.u32 %v12348_v28, %v8653_v18 }
  0xd7   : > { %3420 = vmatpush.bf16.msra.mxu1 %v8708_v21  ;;  %v8828_v21 = vor.u32 %v12402_v43, %v8825_v14  ;;  %v8692_v43 = vor.u32 %v12368_v27, %v8689_v48  ;;  %v8756_v14 = vor.u32 %v12384_v49, %v8753_v41  ;;  %20139 = vst [vmem:[#allocation14_spill] sm:$0xff] %v14887_v29  ;;  %v8745_v27 = vld [vmem:[%s20106_s1 + $0xa8] sm:$0xf0]  ;;  %v12398_v9 = vld [vmem:[%s20106_s1 + $0x124] sm:$0xf] }
  0xd8   : > { %3439 = vmatpush.bf16.msra.mxu2 %v8772_v37  ;;  %v12347_v37 = vld [vmem:[%s13565_s25 + $0x11c] sm:$0xf]  ;;  %20141 = vst [vmem:[#allocation16_spill] sm:$0xff] %v14900_v26  ;;  %v10207_v59 = vld [vmem:[%s20106_s1 + $0xc10] sm:$0xf] }
  0xd9   : > { %3458 = vmatpush.bf16.msra.mxu3 %v8836_v55  ;;  %v12400_v55 = vld [vmem:[%s20106_s1 + $0x134] sm:$0xf]  ;;  %v14898_v6 = vor.u32 %v12347_v37, %v8645_v46  ;;  %20142 = vst [vmem:[#allocation17_spill] sm:$0xff] %v14909_v17  ;;  %v8748_v46 = vor.u32 %v12382_v16, %v8745_v27  ;;  %v12749_v2 = vld [vmem:[%s20106_s1 + $0xc14] sm:$0xf0] }
  0xda   : > { %3402 = vmatpush.bf16.msra.mxu0 %v10232_v61  ;;  %v12366_v61 = vld [vmem:[%s20106_s1 + $0x24] sm:$0xf]  ;;  %v3068_v33 = vpop.f32.mrf.mxu2  ;;  %v3033_v49 = vpop.f32.mrf.mxu0  ;;  %v8673_v18 = vld [vmem:[%s20106_s1 + $0x18] sm:$0xf0] }
  0xdb   : > { %3421 = vmatpush.bf16.msra.mxu1 %v8700_v32  ;;  %v8820_v32 = vor.u32 %v12400_v55, %v8817_v62  ;;  %v3069_v48 = vadd.f32 %v3068_v33, %v3050_v45  ;;  %v3087_v41 = vpop.f32.mrf.mxu3  ;;  %20140 = vst [vmem:[#allocation15_spill] sm:$0xff] %v14898_v6  ;;  %v3034_v55 = vadd.f32 %v3033_v49, %v14740_v54  ;;  %v3052_v62 = vpop.f32.mrf.mxu1  ;;  %v12364_v54 = vld [vmem:[%s20106_s1 + $0x14] sm:$0xf]  ;;  %v8665_v49 = vld [vmem:[%s20106_s1 + $0x8] sm:$0xf0] }
  0xdc   : > { %3440 = vmatpush.bf16.msra.mxu2 %v8764_v12  ;;  %v8681_v12 = vld [vmem:[%s20106_s1 + $0x28] sm:$0xf0]  ;;  %v10216_v33 = vor.u32 %v12751_v24, %v10215_v22  ;;  %v12396_v22 = vld [vmem:[%s20106_s1 + $0x114] sm:$0xf]  ;;  %v8801_v24 = vld [vmem:[%s20106_s1 + $0x118] sm:$0xf0]  ;;  %v8676_v16 = vor.u32 %v12364_v54, %v8673_v18 }
  0xdd   : > { %3459 = vmatpush.bf16.msra.mxu3 %v8828_v21  ;;  %v8809_v21 = vld [vmem:[%s20106_s1 + $0x128] sm:$0xf0]  ;;  %v14911_v45 = vadd.f32 %v3087_v41, %v3069_v48  ;;  %v8684_v37 = vor.u32 %v12366_v61, %v8681_v12  ;;  %v10208_v61 = vor.u32 %v12749_v2, %v10207_v59  ;;  %v12747_v12 = vld [vmem:[%s20106_s1 + $0xc04] sm:$0xf0]  ;;  %v12362_v48 = vld [vmem:[%s20106_s1 + $0x4] sm:$0xf] }
  0xde   : > { %3403 = vmatpush.bf16.msra.mxu0 %v10224_v13  ;;  %v3053_v13 = vadd.f32 %v3052_v62, %v3034_v55  ;;  %v8812_v28 = vor.u32 %v12398_v9, %v8809_v21  ;;  %3355 = vmatmul.bf16.gmra.mxu1 %v14898_v6  ;;  %v12378_v41 = vld [vmem:[%s20106_s1 + $0x84] sm:$0xf]  ;;  %v8804_v21 = vor.u32 %v12396_v22, %v8801_v24  ;;  %v8729_v55 = vld [vmem:[%s20106_s1 + $0x88] sm:$0xf0]  ;;  %v12424_v2 = vld [vmem:[%s20106_s1 + $0x1f4] sm:$0xf] }
  0xdf   : > { %3422 = vmatpush.bf16.msra.mxu1 %v8692_v43  ;;  %3336 = vmatmul.bf16.gmra.mxu0 %v14887_v29  ;;  %v12380_v43 = vld [vmem:[%s20106_s1 + $0x94] sm:$0xf]  ;;  %v12394_v62 = vld [vmem:[%s20106_s1 + $0x104] sm:$0xf]  ;;  %v8913_v54 = vld [vmem:[%s20106_s1 + $0x1f8] sm:$0xf0] }
  0xe0   : > { %3441 = vmatpush.bf16.msra.mxu2 %v8756_v14  ;;  %v8737_v14 = vld [vmem:[%s20106_s1 + $0x98] sm:$0xf0]  ;;  %3393 = vmatmul.bf16.gmra.mxu3 %v14909_v17  ;;  %v12456_v22 = vld [vmem:[%s20106_s1 + $0x2f4] sm:$0xf]  ;;  %v8559_v6 = vld [vmem:[%s13565_s25 + $0x60] sm:$0xf] }
  0xe1   : > { %3460 = vmatpush.bf16.msra.mxu3 %v8820_v32  ;;  %3374 = vmatmul.bf16.gmra.mxu2 %v14900_v26  ;;  %v10199_v32 = vld [vmem:[%s20106_s1 + $0xc00] sm:$0xf]  ;;  %v8740_v27 = vor.u32 %v12380_v43, %v8737_v14  ;;  %v8977_v14 = vld [vmem:[%s20106_s1 + $0x278] sm:$0xf0]  ;;  %v8916_v26 = vor.u32 %v12424_v2, %v8913_v54  ;;  %v12336_v29 = vld [vmem:[%s13565_s25 + $0xc0] sm:$0xf0] }
  0xe2   : > { %3404 = vmatpush.bf16.msra.mxu0 %v10216_v33  ;;  %v3071_v9 = vpop.f32.mrf.mxu2  ;;  %v8793_v33 = vld [vmem:[%s20106_s1 + $0x108] sm:$0xf0]  ;;  %v9041_v24 = vld [vmem:[%s20106_s1 + $0x2f8] sm:$0xf0] }
  0xe3   : > { %3423 = vmatpush.bf16.msra.mxu1 %v8684_v37  ;;  %v3072_v37 = vadd.f32 %v3071_v9, %v3053_v13  ;;  %v3090_v59 = vpop.f32.mrf.mxu3  ;;  %v3054_v43 = vpop.f32.mrf.mxu1  ;;  %v10200_v13 = vor.u32 %v12747_v12, %v10199_v32  ;;  %v12472_v32 = vld [vmem:[%s20106_s1 + $0x374] sm:$0xf]  ;;  %v9105_v12 = vld [vmem:[%s20106_s1 + $0x378] sm:$0xf0]  ;;  %v8796_v17 = vor.u32 %v12394_v62, %v8793_v33  ;;  %v12454_v62 = vld [vmem:[%s20106_s1 + $0x2e4] sm:$0xf] }
  0xe4   : > { %3442 = vmatpush.bf16.msra.mxu2 %v8748_v46  ;;  %v3035_v46 = vpop.f32.mrf.mxu0  ;;  %v9033_v33 = vld [vmem:[%s20106_s1 + $0x2e8] sm:$0xf0] }
  0xe5   : > { %3461 = vmatpush.bf16.msra.mxu3 %v8812_v28  ;;  %v12440_v28 = vld [vmem:[%s20106_s1 + $0x274] sm:$0xf]  ;;  %v3036_v18 = vadd.f32 %v3035_v46, %v14789_v34  ;;  %v14984_v9 = vadd.f32 %v3090_v59, %v3072_v37  ;;  %v8668_v34 = vor.u32 %v12362_v48, %v8665_v49  ;;  %v9044_v59 = vor.u32 %v12456_v22, %v9041_v24  ;;  %v8905_v48 = vld [vmem:[%s20106_s1 + $0x1e8] sm:$0xf0]  ;;  %v12438_v49 = vld [vmem:[%s20106_s1 + $0x264] sm:$0xf] }
  0xe6   : > { %3405 = vmatpush.bf16.msra.mxu0 %v10208_v61  ;;  %v8732_v61 = vor.u32 %v12378_v41, %v8729_v55  ;;  %v8980_v37 = vor.u32 %v12440_v28, %v8977_v14  ;;  %v8969_v55 = vld [vmem:[%s20106_s1 + $0x268] sm:$0xf0]  ;;  %v9036_v14 = vor.u32 %v12454_v62, %v9033_v33  ;;  %v12420_v22 = vld [vmem:[%s20106_s1 + $0x1d4] sm:$0xf]  ;;  %v8897_v24 = vld [vmem:[%s20106_s1 + $0x1d8] sm:$0xf0] }
  0xe7   : > { %3424 = vmatpush.bf16.msra.mxu1 %v8676_v16  ;;  %v3055_v46 = vadd.f32 %v3054_v43, %v3036_v18  ;;  %v9108_v16 = vor.u32 %v12472_v32, %v9105_v12  ;;  %v8961_v32 = vld [vmem:[%s20106_s1 + $0x258] sm:$0xf0]  ;;  %v12452_v12 = vld [vmem:[%s20106_s1 + $0x2d4] sm:$0xf]  ;;  %v12450_v62 = vld [vmem:[%s20106_s1 + $0x2c4] sm:$0xf] }
  0xe8   : > { %3443 = vmatpush.bf16.msra.mxu2 %v8740_v27  ;;  %v12422_v27 = vld [vmem:[%s20106_s1 + $0x1e4] sm:$0xf]  ;;  %v9017_v33 = vld [vmem:[%s20106_s1 + $0x2c8] sm:$0xf0] }
  0xe9   : > { %3462 = vmatpush.bf16.msra.mxu3 %v8804_v21  ;;  %v15003_v21 = vor.u32 %v12336_v29, %v8559_v6  ;;  %v9097_v6 = vld [vmem:[%s20106_s1 + $0x368] sm:$0xf0]  ;;  %v8908_v18 = vor.u32 %v12422_v27, %v8905_v48 }
  0xea   : > { %3406 = vmatpush.bf16.msra.mxu0 %v10200_v13  ;;  %v3073_v41 = vpop.f32.mrf.mxu2  ;;  %v8972_v13 = vor.u32 %v12438_v49, %v8969_v55  ;;  %v12434_v49 = vld [vmem:[%s20106_s1 + $0x244] sm:$0xf]  ;;  %v8953_v55 = vld [vmem:[%s20106_s1 + $0x248] sm:$0xf0] }
  0xeb   : > { %3425 = vmatpush.bf16.msra.mxu1 %v8668_v34  ;;  %v3074_v2 = vadd.f32 %v3073_v41, %v3055_v46  ;;  %v3092_v54 = vpop.f32.mrf.mxu3  ;;  %v12436_v34 = vld [vmem:[%s20106_s1 + $0x254] sm:$0xf]  ;;  %v9025_v46 = vld [vmem:[%s20106_s1 + $0x2d8] sm:$0xf0] }
  0xec   : > { %3444 = vmatpush.bf16.msra.mxu2 %v8732_v61  ;;  %v3104_v28 = vpop.f32.mrf.mxu0  ;;  %v8964_v27 = vor.u32 %v12436_v34, %v8961_v32  ;;  %v9028_v48 = vor.u32 %v12452_v12, %v9025_v46  ;;  %v12416_v34 = vld [vmem:[%s20106_s1 + $0x1b4] sm:$0xf]  ;;  %v8945_v12 = vld [vmem:[%s20106_s1 + $0x238] sm:$0xf0] }
  0xed   : > { %3463 = vmatpush.bf16.msra.mxu3 %v8796_v17  ;;  %v12470_v17 = vld [vmem:[%s20106_s1 + $0x364] sm:$0xf]  ;;  %v3105_v29 = vadd.f32 %v3104_v28, %v14844_v25  ;;  %v15021_v43 = vadd.f32 %v3092_v54, %v3074_v2  ;;  %v12448_v46 = vld [vmem:[%s20106_s1 + $0x2b4] sm:$0xf] }
  0xee   : > { %3475 = vmatpush.bf16.msrb.mxu0 %v8916_v26  ;;  %v3123_v26 = vpop.f32.mrf.mxu1  ;;  %v9100_v61 = vor.u32 %v12470_v17, %v9097_v6  ;;  %3426 = vmatmul.bf16.vlgmr.msra.gmra.mxu1 %v13585_v47  ;;  %v12418_v47 = vld [vmem:[%s20106_s1 + $0x1c4] sm:$0xf]  ;;  %v9081_v6 = vld [vmem:[%s20106_s1 + $0x348] sm:$0xf0] }
  0xef   : > { %3494 = vmatpush.bf16.msrb.mxu1 %v8980_v37  ;;  %v3124_v25 = vadd.f32 %v3123_v26, %v3105_v29  ;;  %3407 = vmatmul.bf16.vlgmr.msra.gmra.mxu0 %v15003_v21  ;;  %v12468_v37 = vld [vmem:[%s20106_s1 + $0x354] sm:$0xf]  ;;  %v12466_v17 = vld [vmem:[%s20106_s1 + $0x344] sm:$0xf] }
  0xf0   : > { %3513 = vmatpush.bf16.msrb.mxu2 %v9044_v59  ;;  %v9089_v59 = vld [vmem:[%s20106_s1 + $0x358] sm:$0xf0]  ;;  %3464 = vmatmul.bf16.vlgmr.msra.gmra.mxu3 %v13592_v53  ;;  %v9084_v32 = vor.u32 %v12466_v17, %v9081_v6 }
  0xf1   : > { %3532 = vmatpush.bf16.msrb.mxu3 %v9108_v16  ;;  %3445 = vmatmul.bf16.vlgmr.msra.gmra.mxu2 %v13590_v52  ;;  %v8900_v16 = vor.u32 %v12420_v22, %v8897_v24  ;;  %v8889_v52 = vld [vmem:[%s20106_s1 + $0x1c8] sm:$0xf0]  ;;  %v9092_v53 = vor.u32 %v12468_v37, %v9089_v59  ;;  %v9020_v22 = vor.u32 %v12450_v62, %v9017_v33  ;;  %v8659_v24 = vld [vmem:[%s13565_s25 + $0x128] sm:$0xf]  ;;  %v9009_v37 = vld [vmem:[%s20106_s1 + $0x2b8] sm:$0xf0] }
  0xf2   : > { %3476 = vmatpush.bf16.msrb.mxu0 %v8908_v18  ;;  %v3142_v41 = vpop.f32.mrf.mxu2  ;;  %v8892_v18 = vor.u32 %v12418_v47, %v8889_v52  ;;  %v12361_v59 = vld [vmem:[%s13565_s25 + $0x188] sm:$0xf0]  ;;  %v9012_v52 = vor.u32 %v12448_v46, %v9009_v37  ;;  %v8929_v37 = vld [vmem:[%s20106_s1 + $0x218] sm:$0xf0] }
  0xf3   : > { %3495 = vmatpush.bf16.msrb.mxu1 %v8972_v13  ;;  %v3143_v2 = vadd.f32 %v3142_v41, %v3124_v25  ;;  %v3161_v28 = vpop.f32.mrf.mxu3  ;;  %v8881_v25 = vld [vmem:[%s20106_s1 + $0x1b8] sm:$0xf0]  ;;  %v8873_v41 = vld [vmem:[%s20106_s1 + $0x1a8] sm:$0xf0]  ;;  %v15113_v62 = vor.u32 %v12361_v59, %v8659_v24  ;;  %v12444_v59 = vld [vmem:[%s20106_s1 + $0x294] sm:$0xf] }
  0xf4   : > { %3514 = vmatpush.bf16.msrb.mxu2 %v9036_v14  ;;  %v3106_v54 = vpop.f32.mrf.mxu0  ;;  %v8956_v14 = vor.u32 %v12434_v49, %v8953_v55  ;;  %v12414_v49 = vld [vmem:[%s20106_s1 + $0x1a4] sm:$0xf] }
  0xf5   : > { %3533 = vmatpush.bf16.msrb.mxu3 %v9100_v61  ;;  %v3107_v29 = vadd.f32 %v3106_v54, %v14911_v45  ;;  %v15076_v13 = vadd.f32 %v3161_v28, %v3143_v2  ;;  %v12432_v45 = vld [vmem:[%s20106_s1 + $0x234] sm:$0xf]  ;;  %v8937_v2 = vld [vmem:[%s20106_s1 + $0x228] sm:$0xf0]  ;;  %v12446_v54 = vld [vmem:[%s20106_s1 + $0x2a4] sm:$0xf]  ;;  %v8876_v24 = vor.u32 %v12414_v49, %v8873_v41 }
  0xf6   : > { %v3125_v26 = vpop.f32.mrf.mxu1  ;;  %3477 = vmatpush.bf16.msrb.mxu0 %v8900_v16  ;;  %v12464_v16 = vld [vmem:[%s20106_s1 + $0x334] sm:$0xf]  ;;  %v8948_v47 = vor.u32 %v12432_v45, %v8945_v12  ;;  %v9001_v28 = vld [vmem:[%s20106_s1 + $0x2a8] sm:$0xf0]  ;;  %v12426_v41 = vld [vmem:[%s20106_s1 + $0x204] sm:$0xf] }
  0xf7   : > { %3496 = vmatpush.bf16.msrb.mxu1 %v8964_v27  ;;  %v3126_v61 = vadd.f32 %v3125_v26, %v3107_v29  ;;  %v9073_v27 = vld [vmem:[%s20106_s1 + $0x338] sm:$0xf0]  ;;  %v12462_v26 = vld [vmem:[%s20106_s1 + $0x324] sm:$0xf]  ;;  %v9004_v45 = vor.u32 %v12446_v54, %v9001_v28  ;;  %v9049_v28 = vld [vmem:[%s20106_s1 + $0x308] sm:$0xf0] }
  0xf8   : > { %3515 = vmatpush.bf16.msrb.mxu2 %v9028_v48  ;;  %v8884_v48 = vor.u32 %v12416_v34, %v8881_v25  ;;  %v9076_v33 = vor.u32 %v12464_v16, %v9073_v27  ;;  %v8993_v16 = vld [vmem:[%s20106_s1 + $0x298] sm:$0xf0]  ;;  %v12460_v27 = vld [vmem:[%s20106_s1 + $0x314] sm:$0xf]  ;;  %v12458_v54 = vld [vmem:[%s20106_s1 + $0x304] sm:$0xf] }
  0xf9   : > { %3534 = vmatpush.bf16.msrb.mxu3 %v9092_v53  ;;  %v12430_v53 = vld [vmem:[%s20106_s1 + $0x224] sm:$0xf]  ;;  %v8996_v49 = vor.u32 %v12444_v59, %v8993_v16  ;;  %v9052_v16 = vor.u32 %v12458_v54, %v9049_v28 }
  0xfa   : > { %3478 = vmatpush.bf16.msrb.mxu0 %v8892_v18  ;;  %v3144_v55 = vpop.f32.mrf.mxu2  ;;  %v9065_v18 = vld [vmem:[%s20106_s1 + $0x328] sm:$0xf0]  ;;  %v8940_v25 = vor.u32 %v12430_v53, %v8937_v2  ;;  %v12442_v53 = vld [vmem:[%s20106_s1 + $0x284] sm:$0xf] }
  0xfb   : > { %3497 = vmatpush.bf16.msrb.mxu1 %v8956_v14  ;;  %v3145_v17 = vadd.f32 %v3144_v55, %v3126_v61  ;;  %v3163_v29 = vpop.f32.mrf.mxu3  ;;  %v12412_v61 = vld [vmem:[%s20106_s1 + $0x194] sm:$0xf]  ;;  %v9068_v46 = vor.u32 %v12462_v26, %v9065_v18  ;;  %v8985_v2 = vld [vmem:[%s20106_s1 + $0x288] sm:$0xf0]  ;;  %v9169_v18 = vld [vmem:[%s20106_s1 + $0x3f8] sm:$0xf0] }
  0xfc   : > { %3516 = vmatpush.bf16.msrb.mxu2 %v9020_v22  ;;  %v3109_v6 = vpop.f32.mrf.mxu0  ;;  %v12488_v26 = vld [vmem:[%s20106_s1 + $0x3f4] sm:$0xf]  ;;  %v12534_v28 = vld [vmem:[%s20106_s1 + $0x564] sm:$0xf] }
  0xfd   : > { %3535 = vmatpush.bf16.msrb.mxu3 %v9084_v32  ;;  %v3110_v14 = vadd.f32 %v3109_v6, %v14984_v9  ;;  %v15131_v34 = vadd.f32 %v3163_v29, %v3145_v17  ;;  %v8865_v32 = vld [vmem:[%s20106_s1 + $0x198] sm:$0xf0]  ;;  %v12428_v9 = vld [vmem:[%s20106_s1 + $0x214] sm:$0xf] }
  0xfe   : > { %v3128_v22 = vpop.f32.mrf.mxu1  ;;  %3479 = vmatpush.bf16.msrb.mxu0 %v8884_v48  ;;  %3431 = vmatmul.bf16.gmra.mxu1 %v13694_v44  ;;  %v9057_v48 = vld [vmem:[%s20106_s1 + $0x318] sm:$0xf0]  ;;  %v8857_v44 = vld [vmem:[%s20106_s1 + $0x188] sm:$0xf0] }
  0xff   : > { %3498 = vmatpush.bf16.msrb.mxu1 %v8948_v47  ;;  %v3129_v12 = vadd.f32 %v3128_v22, %v3110_v14  ;;  %3412 = vmatmul.bf16.gmra.mxu0 %v15113_v62  ;;  %v8868_v47 = vor.u32 %v12412_v61, %v8865_v32  ;;  %v12504_v14 = vld [vmem:[%s20106_s1 + $0x474] sm:$0xf]  ;;  %v9297_v32 = vld [vmem:[%s20106_s1 + $0x4f8] sm:$0xf0] }
 0x100   : > { %3517 = vmatpush.bf16.msrb.mxu2 %v9012_v52  ;;  %3469 = vmatmul.bf16.gmra.mxu3 %v13707_v51  ;;  %v12410_v52 = vld [vmem:[%s20106_s1 + $0x184] sm:$0xf]  ;;  %v8921_v51 = vld [vmem:[%s20106_s1 + $0x208] sm:$0xf0]  ;;  %v12520_v61 = vld [vmem:[%s20106_s1 + $0x4f4] sm:$0xf] }
 0x101   : > { %3536 = vmatpush.bf16.msrb.mxu3 %v9076_v33  ;;  %3450 = vmatmul.bf16.gmra.mxu2 %v13705_v50  ;;  %v8932_v50 = vor.u32 %v12428_v9, %v8929_v37  ;;  %v9060_v33 = vor.u32 %v12460_v27, %v9057_v48  ;;  %v9361_v37 = vld [vmem:[%s20106_s1 + $0x578] sm:$0xf0]  ;;  %v9172_v27 = vor.u32 %v12488_v26, %v9169_v18 }
 0x102   : > { %3480 = vmatpush.bf16.msrb.mxu0 %v8876_v24  ;;  %v3147_v55 = vpop.f32.mrf.mxu2 }
 0x103   : > { %3499 = vmatpush.bf16.msrb.mxu1 %v8940_v25  ;;  %v3148_v17 = vadd.f32 %v3147_v55, %v3129_v12  ;;  %v3166_v29 = vpop.f32.mrf.mxu3  ;;  %v8860_v25 = vor.u32 %v12410_v52, %v8857_v44  ;;  %v8988_v12 = vor.u32 %v12442_v53, %v8985_v2  ;;  %v12486_v44 = vld [vmem:[%s20106_s1 + $0x3e4] sm:$0xf]  ;;  %v9289_v55 = vld [vmem:[%s20106_s1 + $0x4e8] sm:$0xf0] }
 0x104   : > { %3518 = vmatpush.bf16.msrb.mxu2 %v9004_v45  ;;  %v3111_v6 = vpop.f32.mrf.mxu0  ;;  %v9233_v45 = vld [vmem:[%s20106_s1 + $0x478] sm:$0xf0]  ;;  %v12518_v53 = vld [vmem:[%s20106_s1 + $0x4e4] sm:$0xf] }
 0x105   : > { %3537 = vmatpush.bf16.msrb.mxu3 %v9068_v46  ;;  %v3112_v22 = vadd.f32 %v3111_v6, %v15021_v43  ;;  %v15204_v9 = vadd.f32 %v3166_v29, %v3148_v17  ;;  %v8924_v43 = vor.u32 %v12426_v41, %v8921_v51  ;;  %v12536_v46 = vld [vmem:[%s20106_s1 + $0x574] sm:$0xf]  ;;  %v9236_v48 = vor.u32 %v12504_v14, %v9233_v45  ;;  %v9225_v51 = vld [vmem:[%s20106_s1 + $0x468] sm:$0xf0] }
 0x106   : > { %v3130_v24 = vpop.f32.mrf.mxu1  ;;  %3481 = vmatpush.bf16.msrb.mxu0 %v8868_v47  ;;  %v9300_v47 = vor.u32 %v12520_v61, %v9297_v32  ;;  %v9364_v52 = vor.u32 %v12536_v46, %v9361_v37  ;;  %v9353_v17 = vld [vmem:[%s20106_s1 + $0x568] sm:$0xf0]  ;;  %v12500_v45 = vld [vmem:[%s20106_s1 + $0x454] sm:$0xf]  ;;  %v9217_v32 = vld [vmem:[%s20106_s1 + $0x458] sm:$0xf0] }
 0x107   : > { %3500 = vmatpush.bf16.msrb.mxu1 %v8932_v50  ;;  %v3131_v59 = vadd.f32 %v3130_v24, %v3112_v22  ;;  %v9161_v50 = vld [vmem:[%s20106_s1 + $0x3e8] sm:$0xf0]  ;;  %v9292_v22 = vor.u32 %v12518_v53, %v9289_v55  ;;  %v12484_v24 = vld [vmem:[%s20106_s1 + $0x3d4] sm:$0xf]  ;;  %v9356_v61 = vor.u32 %v12534_v28, %v9353_v17  ;;  %v9345_v46 = vld [vmem:[%s20106_s1 + $0x558] sm:$0xf0] }
 0x108   : > { %3519 = vmatpush.bf16.msrb.mxu2 %v8996_v49  ;;  %v12502_v49 = vld [vmem:[%s20106_s1 + $0x464] sm:$0xf]  ;;  %v9164_v26 = vor.u32 %v12486_v44, %v9161_v50  ;;  %v9273_v44 = vld [vmem:[%s20106_s1 + $0x4c8] sm:$0xf0] }
 0x109   : > { %3538 = vmatpush.bf16.msrb.mxu3 %v9060_v33  ;;  %v9228_v14 = vor.u32 %v12502_v49, %v9225_v51  ;;  %v12530_v51 = vld [vmem:[%s20106_s1 + $0x544] sm:$0xf]  ;;  %v9337_v53 = vld [vmem:[%s20106_s1 + $0x548] sm:$0xf0] }
 0x10a   : > { %3482 = vmatpush.bf16.msrb.mxu0 %v8860_v25  ;;  %v3149_v41 = vpop.f32.mrf.mxu2  ;;  %v9153_v25 = vld [vmem:[%s20106_s1 + $0x3d8] sm:$0xf0] }
 0x10b   : > { %3501 = vmatpush.bf16.msrb.mxu1 %v8924_v43  ;;  %v3150_v33 = vadd.f32 %v3149_v41, %v3131_v59  ;;  %v3168_v2 = vpop.f32.mrf.mxu3  ;;  %v12516_v43 = vld [vmem:[%s20106_s1 + $0x4d4] sm:$0xf]  ;;  %v9156_v37 = vor.u32 %v12484_v24, %v9153_v25  ;;  %v9220_v59 = vor.u32 %v12500_v45, %v9217_v32  ;;  %v9265_v25 = vld [vmem:[%s20106_s1 + $0x4b8] sm:$0xf0] }
 0x10c   : > { %3520 = vmatpush.bf16.msrb.mxu2 %v8988_v12  ;;  %v3180_v54 = vpop.f32.mrf.mxu0  ;;  %v9281_v12 = vld [vmem:[%s20106_s1 + $0x4d8] sm:$0xf0]  ;;  %v12512_v24 = vld [vmem:[%s20106_s1 + $0x4b4] sm:$0xf] }
 0x10d   : > { %3539 = vmatpush.bf16.msrb.mxu3 %v9052_v16  ;;  %v3181_v6 = vadd.f32 %v3180_v54, %v15076_v13  ;;  %v15237_v18 = vadd.f32 %v3168_v2, %v3150_v33  ;;  %v9284_v16 = vor.u32 %v12516_v43, %v9281_v12  ;;  %v12528_v45 = vld [vmem:[%s20106_s1 + $0x534] sm:$0xf]  ;;  %v9268_v43 = vor.u32 %v12512_v24, %v9265_v25  ;;  %v12478_v12 = vld [vmem:[%s20106_s1 + $0x3a4] sm:$0xf] }
 0x10e   : > { %3551 = vmatpush.bf16.msra.mxu0 %v9172_v27  ;;  %v3199_v29 = vpop.f32.mrf.mxu1  ;;  %3502 = vmatmul.bf16.vlgmr.msrb.gmra.mxu1 %v13822_v56  ;;  %v12482_v56 = vld [vmem:[%s20106_s1 + $0x3c4] sm:$0xf] }
 0x10f   : > { %3570 = vmatpush.bf16.msra.mxu1 %v9236_v48  ;;  %v3200_v13 = vadd.f32 %v3199_v29, %v3181_v6  ;;  %3483 = vmatmul.bf16.vlgmr.msrb.gmra.mxu0 %v13599_v58  ;;  %v12532_v58 = vld [vmem:[%s20106_s1 + $0x554] sm:$0xf]  ;;  %v12498_v27 = vld [vmem:[%s20106_s1 + $0x444] sm:$0xf]  ;;  %v9137_v29 = vld [vmem:[%s20106_s1 + $0x3b8] sm:$0xf0] }
 0x110   : > { %3589 = vmatpush.bf16.msra.mxu2 %v9300_v47  ;;  %3540 = vmatmul.bf16.vlgmr.msrb.gmra.mxu3 %v13835_v0  ;;  %v9348_v0 = vor.u32 %v12532_v58, %v9345_v46  ;;  %v9209_v47 = vld [vmem:[%s20106_s1 + $0x448] sm:$0xf0]  ;;  %v12480_v6 = vld [vmem:[%s20106_s1 + $0x3b4] sm:$0xf]  ;;  %v12494_v46 = vld [vmem:[%s20106_s1 + $0x424] sm:$0xf] }
 0x111   : > { %3608 = vmatpush.bf16.msra.mxu3 %v9364_v52  ;;  %3521 = vmatmul.bf16.vlgmr.msrb.gmra.mxu2 %v13833_v63  ;;  %v9145_v63 = vld [vmem:[%s20106_s1 + $0x3c8] sm:$0xf0]  ;;  %v12514_v52 = vld [vmem:[%s20106_s1 + $0x4c4] sm:$0xf]  ;;  %v9212_v28 = vor.u32 %v12498_v27, %v9209_v47 }
 0x112   : > { %3552 = vmatpush.bf16.msra.mxu0 %v9164_v26  ;;  %v3218_v48 = vpop.f32.mrf.mxu2  ;;  %v9148_v2 = vor.u32 %v12482_v56, %v9145_v63  ;;  %v9276_v17 = vor.u32 %v12514_v52, %v9273_v44  ;;  %v9129_v58 = vld [vmem:[%s20106_s1 + $0x3a8] sm:$0xf0]  ;;  %v12510_v56 = vld [vmem:[%s20106_s1 + $0x4a4] sm:$0xf] }
 0x113   : > { %3571 = vmatpush.bf16.msra.mxu1 %v9228_v14  ;;  %v3219_v50 = vadd.f32 %v3218_v48, %v3200_v13  ;;  %v3237_v41 = vpop.f32.mrf.mxu3  ;;  %v9340_v14 = vor.u32 %v12530_v51, %v9337_v53  ;;  %v9329_v13 = vld [vmem:[%s20106_s1 + $0x538] sm:$0xf0]  ;;  %v9257_v63 = vld [vmem:[%s20106_s1 + $0x4a8] sm:$0xf0]  ;;  %v12526_v47 = vld [vmem:[%s20106_s1 + $0x524] sm:$0xf] }
 0x114   : > { %3590 = vmatpush.bf16.msra.mxu2 %v9292_v22  ;;  %v3182_v49 = vpop.f32.mrf.mxu0  ;;  %v9201_v22 = vld [vmem:[%s20106_s1 + $0x438] sm:$0xf0]  ;;  %v9321_v52 = vld [vmem:[%s20106_s1 + $0x528] sm:$0xf0]  ;;  %v9260_v53 = vor.u32 %v12510_v56, %v9257_v63  ;;  %v12490_v24 = vld [vmem:[%s20106_s1 + $0x404] sm:$0xf] }
 0x115   : > { %3609 = vmatpush.bf16.msra.mxu3 %v9356_v61  ;;  %v3183_v55 = vadd.f32 %v3182_v49, %v15131_v34  ;;  %v15292_v54 = vadd.f32 %v3237_v41, %v3219_v50  ;;  %v12496_v34 = vld [vmem:[%s20106_s1 + $0x434] sm:$0xf]  ;;  %v9140_v61 = vor.u32 %v12480_v6, %v9137_v29  ;;  %v9132_v49 = vor.u32 %v12478_v12, %v9129_v58  ;;  %v9249_v29 = vld [vmem:[%s20106_s1 + $0x498] sm:$0xf0]  ;;  %v12506_v25 = vld [vmem:[%s20106_s1 + $0x484] sm:$0xf] }
 0x116   : > { %v3201_v33 = vpop.f32.mrf.mxu1  ;;  %3553 = vmatpush.bf16.msra.mxu0 %v9156_v37  ;;  %v9204_v32 = vor.u32 %v12496_v34, %v9201_v22  ;;  %v12508_v6 = vld [vmem:[%s20106_s1 + $0x494] sm:$0xf]  ;;  %v9313_v34 = vld [vmem:[%s20106_s1 + $0x518] sm:$0xf0] }
 0x117   : > { %3572 = vmatpush.bf16.msra.mxu1 %v9220_v59  ;;  %v3202_v26 = vadd.f32 %v3201_v33, %v3183_v55  ;;  %v9332_v59 = vor.u32 %v12528_v45, %v9329_v13  ;;  %v12476_v55 = vld [vmem:[%s20106_s1 + $0x394] sm:$0xf]  ;;  %v9121_v33 = vld [vmem:[%s20106_s1 + $0x398] sm:$0xf0]  ;;  %v9252_v22 = vor.u32 %v12508_v6, %v9249_v29  ;;  %v12566_v6 = vld [vmem:[%s20106_s1 + $0x664] sm:$0xf] }
 0x118   : > { %3591 = vmatpush.bf16.msra.mxu2 %v9284_v16  ;;  %v9193_v16 = vld [vmem:[%s20106_s1 + $0x428] sm:$0xf0] }
 0x119   : > { %3610 = vmatpush.bf16.msra.mxu3 %v9348_v0  ;;  %v9196_v51 = vor.u32 %v12494_v46, %v9193_v16  ;;  %v12568_v16 = vld [vmem:[%s20106_s1 + $0x674] sm:$0xf] }
 0x11a   : > { %3554 = vmatpush.bf16.msra.mxu0 %v9148_v2  ;;  %v3220_v37 = vpop.f32.mrf.mxu2 }
 0x11b   : > { %3573 = vmatpush.bf16.msra.mxu1 %v9212_v28  ;;  %v3221_v27 = vadd.f32 %v3220_v37, %v3202_v26  ;;  %v3239_v0 = vpop.f32.mrf.mxu3  ;;  %v9324_v28 = vor.u32 %v12526_v47, %v9321_v52  ;;  %v9124_v26 = vor.u32 %v12476_v55, %v9121_v33  ;;  %v12552_v37 = vld [vmem:[%s20106_s1 + $0x5f4] sm:$0xf]  ;;  %v9553_v47 = vld [vmem:[%s20106_s1 + $0x6f8] sm:$0xf0] }
 0x11c   : > { %3592 = vmatpush.bf16.msra.mxu2 %v9276_v17  ;;  %v3185_v48 = vpop.f32.mrf.mxu0  ;;  %v9185_v17 = vld [vmem:[%s20106_s1 + $0x418] sm:$0xf0] }
 0x11d   : > { %3611 = vmatpush.bf16.msra.mxu3 %v9340_v14  ;;  %v3186_v44 = vadd.f32 %v3185_v48, %v15204_v9  ;;  %v15343_v41 = vadd.f32 %v3239_v0, %v3221_v27  ;;  %v12492_v9 = vld [vmem:[%s20106_s1 + $0x414] sm:$0xf]  ;;  %v12474_v14 = vld [vmem:[%s20106_s1 + $0x384] sm:$0xf]  ;;  %v9489_v48 = vld [vmem:[%s20106_s1 + $0x678] sm:$0xf0] }
 0x11e   : > { %v3204_v50 = vpop.f32.mrf.mxu1  ;;  %3555 = vmatpush.bf16.msra.mxu0 %v9140_v61  ;;  %3507 = vmatmul.bf16.gmra.mxu1 %v13938_v1  ;;  %v9113_v1 = vld [vmem:[%s20106_s1 + $0x388] sm:$0xf0]  ;;  %v12584_v0 = vld [vmem:[%s20106_s1 + $0x6f4] sm:$0xf]  ;;  %v9492_v33 = vor.u32 %v12568_v16, %v9489_v48  ;;  %v9537_v16 = vld [vmem:[%s20106_s1 + $0x6d8] sm:$0xf0] }
 0x11f   : > { %3574 = vmatpush.bf16.msra.mxu1 %v9204_v32  ;;  %v3205_v2 = vadd.f32 %v3204_v50, %v3186_v44  ;;  %3488 = vmatmul.bf16.gmra.mxu0 %v13715_v57  ;;  %v12524_v57 = vld [vmem:[%s20106_s1 + $0x514] sm:$0xf]  ;;  %v9241_v61 = vld [vmem:[%s20106_s1 + $0x488] sm:$0xf0]  ;;  %v12522_v32 = vld [vmem:[%s20106_s1 + $0x504] sm:$0xf]  ;;  %v9116_v27 = vor.u32 %v12474_v14, %v9113_v1 }
 0x120   : > { %3593 = vmatpush.bf16.msra.mxu2 %v9268_v43  ;;  %3545 = vmatmul.bf16.gmra.mxu3 %v13951_v8  ;;  %v9177_v8 = vld [vmem:[%s20106_s1 + $0x408] sm:$0xf0]  ;;  %v9316_v13 = vor.u32 %v12524_v57, %v9313_v34  ;;  %v9244_v44 = vor.u32 %v12506_v25, %v9241_v61  ;;  %v12600_v50 = vld [vmem:[%s20106_s1 + $0x774] sm:$0xf]  ;;  %v12582_v34 = vld [vmem:[%s20106_s1 + $0x6e4] sm:$0xf] }
 0x121   : > { %3612 = vmatpush.bf16.msra.mxu3 %v9332_v59  ;;  %3526 = vmatmul.bf16.gmra.mxu2 %v13949_v7  ;;  %v9188_v7 = vor.u32 %v12492_v9, %v9185_v17  ;;  %v9305_v43 = vld [vmem:[%s20106_s1 + $0x508] sm:$0xf0]  ;;  %v9425_v59 = vld [vmem:[%s20106_s1 + $0x5f8] sm:$0xf0]  ;;  %v9556_v9 = vor.u32 %v12584_v0, %v9553_v47  ;;  %v12562_v0 = vld [vmem:[%s20106_s1 + $0x644] sm:$0xf] }
 0x122   : > { %3556 = vmatpush.bf16.msra.mxu0 %v9132_v49  ;;  %v3223_v45 = vpop.f32.mrf.mxu2  ;;  %v9617_v49 = vld [vmem:[%s20106_s1 + $0x778] sm:$0xf0]  ;;  %v9428_v55 = vor.u32 %v12552_v37, %v9425_v59  ;;  %v9417_v17 = vld [vmem:[%s20106_s1 + $0x5e8] sm:$0xf0]  ;;  %v12580_v59 = vld [vmem:[%s20106_s1 + $0x6d4] sm:$0xf] }
 0x123   : > { %3575 = vmatpush.bf16.msra.mxu1 %v9196_v51  ;;  %v3224_v12 = vadd.f32 %v3223_v45, %v3205_v2  ;;  %v3242_v46 = vpop.f32.mrf.mxu3  ;;  %v9620_v2 = vor.u32 %v12600_v50, %v9617_v49  ;;  %v9481_v57 = vld [vmem:[%s20106_s1 + $0x668] sm:$0xf0]  ;;  %v9473_v37 = vld [vmem:[%s20106_s1 + $0x658] sm:$0xf0]  ;;  %v9540_v48 = vor.u32 %v12580_v59, %v9537_v16 }
 0x124   : > { %3594 = vmatpush.bf16.msra.mxu2 %v9260_v53  ;;  %v3187_v58 = vpop.f32.mrf.mxu0  ;;  %v9308_v53 = vor.u32 %v12522_v32, %v9305_v43  ;;  %v9484_v61 = vor.u32 %v12566_v6, %v9481_v57  ;;  %v12548_v43 = vld [vmem:[%s20106_s1 + $0x5d4] sm:$0xf]  ;;  %v9529_v50 = vld [vmem:[%s20106_s1 + $0x6c8] sm:$0xf0] }
 0x125   : > { %3613 = vmatpush.bf16.msra.mxu3 %v9324_v28  ;;  %v3188_v56 = vadd.f32 %v3187_v58, %v15237_v18  ;;  %v15416_v52 = vadd.f32 %v3242_v46, %v3224_v12  ;;  %v9180_v18 = vor.u32 %v12490_v24, %v9177_v8  ;;  %v12550_v28 = vld [vmem:[%s20106_s1 + $0x5e4] sm:$0xf]  ;;  %v9609_v24 = vld [vmem:[%s20106_s1 + $0x768] sm:$0xf0]  ;;  %v9409_v12 = vld [vmem:[%s20106_s1 + $0x5d8] sm:$0xf0] }
 0x126   : > { %v3206_v63 = vpop.f32.mrf.mxu1  ;;  %3557 = vmatpush.bf16.msra.mxu0 %v9124_v26  ;;  %v9545_v26 = vld [vmem:[%s20106_s1 + $0x6e8] sm:$0xf0]  ;;  %v9420_v45 = vor.u32 %v12550_v28, %v9417_v17  ;;  %v12564_v58 = vld [vmem:[%s20106_s1 + $0x654] sm:$0xf] }
 0x127   : > { %3576 = vmatpush.bf16.msra.mxu1 %v9188_v7  ;;  %v3207_v51 = vadd.f32 %v3206_v63, %v3188_v56  ;;  %v9548_v32 = vor.u32 %v12582_v34, %v9545_v26  ;;  %v9601_v56 = vld [vmem:[%s20106_s1 + $0x758] sm:$0xf0]  ;;  %v9412_v63 = vor.u32 %v12548_v43, %v9409_v12  ;;  %v12544_v57 = vld [vmem:[%s20106_s1 + $0x5b4] sm:$0xf]  ;;  %v9385_v43 = vld [vmem:[%s20106_s1 + $0x5a8] sm:$0xf0] }
 0x128   : > { %3595 = vmatpush.bf16.msra.mxu2 %v9252_v22  ;;  %v12598_v22 = vld [vmem:[%s20106_s1 + $0x764] sm:$0xf]  ;;  %v9393_v34 = vld [vmem:[%s20106_s1 + $0x5b8] sm:$0xf0]  ;;  %v9513_v59 = vld [vmem:[%s20106_s1 + $0x6a8] sm:$0xf0] }
 0x129   : > { %3614 = vmatpush.bf16.msra.mxu3 %v9316_v13  ;;  %v9612_v46 = vor.u32 %v12598_v22, %v9609_v24  ;;  %v9521_v22 = vld [vmem:[%s20106_s1 + $0x6b8] sm:$0xf0]  ;;  %v12592_v24 = vld [vmem:[%s20106_s1 + $0x734] sm:$0xf]  ;;  %v12558_v12 = vld [vmem:[%s20106_s1 + $0x624] sm:$0xf] }
 0x12a   : > { %3558 = vmatpush.bf16.msra.mxu0 %v9116_v27  ;;  %v3225_v29 = vpop.f32.mrf.mxu2  ;;  %v9476_v27 = vor.u32 %v12564_v58, %v9473_v37  ;;  %v12574_v37 = vld [vmem:[%s20106_s1 + $0x6a4] sm:$0xf] }
 0x12b   : > { %3577 = vmatpush.bf16.msra.mxu1 %v9180_v18  ;;  %v3226_v14 = vadd.f32 %v3225_v29, %v3207_v51  ;;  %v3244_v1 = vpop.f32.mrf.mxu3  ;;  %v9465_v18 = vld [vmem:[%s20106_s1 + $0x648] sm:$0xf0] }
 0x12c   : > { %3596 = vmatpush.bf16.msra.mxu2 %v9244_v44  ;;  %v3256_v7 = vpop.f32.mrf.mxu0  ;;  %v12578_v44 = vld [vmem:[%s20106_s1 + $0x6c4] sm:$0xf]  ;;  %v9468_v6 = vor.u32 %v12562_v0, %v9465_v18  ;;  %v12540_v18 = vld [vmem:[%s20106_s1 + $0x594] sm:$0xf] }
 0x12d   : > { %3615 = vmatpush.bf16.msra.mxu3 %v9308_v53  ;;  %v3257_v8 = vadd.f32 %v3256_v7, %v15292_v54  ;;  %v15449_v13 = vadd.f32 %v3244_v1, %v3226_v14  ;;  %v9532_v29 = vor.u32 %v12578_v44, %v9529_v50  ;;  %v9457_v1 = vld [vmem:[%s20106_s1 + $0x638] sm:$0xf0]  ;;  %v12576_v7 = vld [vmem:[%s20106_s1 + $0x6b4] sm:$0xf] }
 0x12e   : > { %3627 = vmatpush.bf16.msrb.mxu0 %v9428_v55  ;;  %v3275_v25 = vpop.f32.mrf.mxu1  ;;  %3578 = vmatmul.bf16.vlgmr.msra.gmra.mxu1 %v14054_v15  ;;  %v12546_v15 = vld [vmem:[%s20106_s1 + $0x5c4] sm:$0xf]  ;;  %v9377_v44 = vld [vmem:[%s20106_s1 + $0x598] sm:$0xf0] }
 0x12f   : > { %3646 = vmatpush.bf16.msrb.mxu1 %v9492_v33  ;;  %v3276_v54 = vadd.f32 %v3275_v25, %v3257_v8  ;;  %3559 = vmatmul.bf16.vlgmr.msra.gmra.mxu0 %v13843_v3  ;;  %v12596_v3 = vld [vmem:[%s20106_s1 + $0x754] sm:$0xf]  ;;  %v12594_v55 = vld [vmem:[%s20106_s1 + $0x744] sm:$0xf]  ;;  %v9593_v33 = vld [vmem:[%s20106_s1 + $0x748] sm:$0xf0]  ;;  %v9396_v25 = vor.u32 %v12544_v57, %v9393_v34 }
 0x130   : > { %3665 = vmatpush.bf16.msrb.mxu2 %v9556_v9  ;;  %3616 = vmatmul.bf16.vlgmr.msra.gmra.mxu3 %v14067_v20  ;;  %v9604_v20 = vor.u32 %v12596_v3, %v9601_v56  ;;  %v9596_v14 = vor.u32 %v12594_v55, %v9593_v33  ;;  %v9585_v8 = vld [vmem:[%s20106_s1 + $0x738] sm:$0xf0] }
 0x131   : > { %3684 = vmatpush.bf16.msrb.mxu3 %v9620_v2  ;;  %3597 = vmatmul.bf16.vlgmr.msra.gmra.mxu2 %v14065_v19  ;;  %v9401_v19 = vld [vmem:[%s20106_s1 + $0x5c8] sm:$0xf0]  ;;  %v9505_v55 = vld [vmem:[%s20106_s1 + $0x698] sm:$0xf0] }
 0x132   : > { %3628 = vmatpush.bf16.msrb.mxu0 %v9420_v45  ;;  %v3294_v47 = vpop.f32.mrf.mxu2  ;;  %v9404_v28 = vor.u32 %v12546_v15, %v9401_v19  ;;  %v9569_v33 = vld [vmem:[%s20106_s1 + $0x718] sm:$0xf0] }
 0x133   : > { %3647 = vmatpush.bf16.msrb.mxu1 %v9484_v61  ;;  %v3295_v49 = vadd.f32 %v3294_v47, %v3276_v54  ;;  %v3313_v53 = vpop.f32.mrf.mxu3  ;;  %v9524_v61 = vor.u32 %v12576_v7, %v9521_v22  ;;  %v9588_v54 = vor.u32 %v12592_v24, %v9585_v8  ;;  %v12616_v24 = vld [vmem:[%s20106_s1 + $0x7f4] sm:$0xf]  ;;  %v9681_v8 = vld [vmem:[%s20106_s1 + $0x7f8] sm:$0xf0] }
 0x134   : > { %3666 = vmatpush.bf16.msrb.mxu2 %v9548_v32  ;;  %v3258_v51 = vpop.f32.mrf.mxu0  ;;  %v12542_v32 = vld [vmem:[%s20106_s1 + $0x5a4] sm:$0xf] }
 0x135   : > { %3685 = vmatpush.bf16.msrb.mxu3 %v9612_v46  ;;  %v3259_v9 = vadd.f32 %v3258_v51, %v15343_v41  ;;  %v15504_v17 = vadd.f32 %v3313_v53, %v3295_v49  ;;  %v12560_v41 = vld [vmem:[%s20106_s1 + $0x634] sm:$0xf]  ;;  %v9449_v46 = vld [vmem:[%s20106_s1 + $0x628] sm:$0xf0]  ;;  %v9388_v19 = vor.u32 %v12542_v32, %v9385_v43  ;;  %v9441_v51 = vld [vmem:[%s20106_s1 + $0x618] sm:$0xf0] }
 0x136   : > { %v3277_v2 = vpop.f32.mrf.mxu1  ;;  %3629 = vmatpush.bf16.msrb.mxu0 %v9412_v63  ;;  %v9460_v45 = vor.u32 %v12560_v41, %v9457_v1  ;;  %v12590_v63 = vld [vmem:[%s20106_s1 + $0x724] sm:$0xf]  ;;  %v9452_v47 = vor.u32 %v12558_v12, %v9449_v46  ;;  %v12572_v53 = vld [vmem:[%s20106_s1 + $0x694] sm:$0xf]  ;;  %v9497_v41 = vld [vmem:[%s20106_s1 + $0x688] sm:$0xf0] }
 0x137   : > { %3648 = vmatpush.bf16.msrb.mxu1 %v9476_v27  ;;  %v3278_v26 = vadd.f32 %v3277_v2, %v3259_v9  ;;  %v9577_v27 = vld [vmem:[%s20106_s1 + $0x728] sm:$0xf0]  ;;  %v9380_v9 = vor.u32 %v12540_v18, %v9377_v44  ;;  %v12538_v2 = vld [vmem:[%s20106_s1 + $0x584] sm:$0xf]  ;;  %v9745_v43 = vld [vmem:[%s20106_s1 + $0x878] sm:$0xf0] }
 0x138   : > { %3667 = vmatpush.bf16.msrb.mxu2 %v9540_v48  ;;  %v9580_v49 = vor.u32 %v12590_v63, %v9577_v27  ;;  %v12648_v12 = vld [vmem:[%s20106_s1 + $0x8f4] sm:$0xf]  ;;  %v9737_v18 = vld [vmem:[%s20106_s1 + $0x868] sm:$0xf0]  ;;  %v12646_v44 = vld [vmem:[%s20106_s1 + $0x8e4] sm:$0xf] }
 0x139   : > { %3686 = vmatpush.bf16.msrb.mxu3 %v9604_v20  ;;  %v9516_v20 = vor.u32 %v12574_v37, %v9513_v59  ;;  %v12664_v37 = vld [vmem:[%s20106_s1 + $0x974] sm:$0xf]  ;;  %v9873_v59 = vld [vmem:[%s20106_s1 + $0x978] sm:$0xf0] }
 0x13a   : > { %3630 = vmatpush.bf16.msrb.mxu0 %v9404_v28  ;;  %v3296_v58 = vpop.f32.mrf.mxu2  ;;  %v9508_v28 = vor.u32 %v12572_v53, %v9505_v55  ;;  %v12662_v53 = vld [vmem:[%s20106_s1 + $0x964] sm:$0xf]  ;;  %v9865_v55 = vld [vmem:[%s20106_s1 + $0x968] sm:$0xf0] }
 0x13b   : > { %3649 = vmatpush.bf16.msrb.mxu1 %v9468_v6  ;;  %v3297_v16 = vadd.f32 %v3296_v58, %v3278_v26  ;;  %v3315_v56 = vpop.f32.mrf.mxu3  ;;  %v12554_v6 = vld [vmem:[%s20106_s1 + $0x604] sm:$0xf]  ;;  %v9809_v58 = vld [vmem:[%s20106_s1 + $0x8f8] sm:$0xf0] }
 0x13c   : > { %3668 = vmatpush.bf16.msrb.mxu2 %v9532_v29  ;;  %v3261_v3 = vpop.f32.mrf.mxu0  ;;  %v12570_v29 = vld [vmem:[%s20106_s1 + $0x684] sm:$0xf]  ;;  %v9812_v27 = vor.u32 %v12648_v12, %v9809_v58  ;;  %v9849_v12 = vld [vmem:[%s20106_s1 + $0x948] sm:$0xf0] }
 0x13d   : > { %3687 = vmatpush.bf16.msrb.mxu3 %v9596_v14  ;;  %v3262_v48 = vadd.f32 %v3261_v3, %v15416_v52  ;;  %v15555_v0 = vadd.f32 %v3315_v56, %v3297_v16  ;;  %v12556_v52 = vld [vmem:[%s20106_s1 + $0x614] sm:$0xf]  ;;  %v12586_v26 = vld [vmem:[%s20106_s1 + $0x704] sm:$0xf]  ;;  %v9561_v14 = vld [vmem:[%s20106_s1 + $0x708] sm:$0xf0]  ;;  %v9500_v46 = vor.u32 %v12570_v29, %v9497_v41  ;;  %v9684_v56 = vor.u32 %v12616_v24, %v9681_v8 }
 0x13e   : > { %v3280_v15 = vpop.f32.mrf.mxu1  ;;  %3631 = vmatpush.bf16.msrb.mxu0 %v9396_v25  ;;  %3583 = vmatmul.bf16.gmra.mxu1 %v14170_v30  ;;  %v9369_v30 = vld [vmem:[%s20106_s1 + $0x588] sm:$0xf0]  ;;  %v12632_v25 = vld [vmem:[%s20106_s1 + $0x874] sm:$0xf]  ;;  %v9564_v3 = vor.u32 %v12586_v26, %v9561_v14  ;;  %v9868_v29 = vor.u32 %v12662_v53, %v9865_v55  ;;  %v9793_v41 = vld [vmem:[%s20106_s1 + $0x8d8] sm:$0xf0] }
 0x13f   : > { %3650 = vmatpush.bf16.msrb.mxu1 %v9460_v45  ;;  %v3281_v50 = vadd.f32 %v3280_v15, %v3262_v48  ;;  %3564 = vmatmul.bf16.gmra.mxu0 %v13959_v11  ;;  %v12588_v11 = vld [vmem:[%s20106_s1 + $0x714] sm:$0xf]  ;;  %v9372_v32 = vor.u32 %v12538_v2, %v9369_v30  ;;  %v9748_v63 = vor.u32 %v12632_v25, %v9745_v43  ;;  %v12614_v15 = vld [vmem:[%s20106_s1 + $0x7e4] sm:$0xf]  ;;  %v9857_v26 = vld [vmem:[%s20106_s1 + $0x958] sm:$0xf0] }
 0x140   : > { %3669 = vmatpush.bf16.msrb.mxu2 %v9524_v61  ;;  %3621 = vmatmul.bf16.gmra.mxu3 %v14183_v36  ;;  %v9433_v36 = vld [vmem:[%s20106_s1 + $0x608] sm:$0xf0]  ;;  %v9572_v34 = vor.u32 %v12588_v11, %v9569_v33  ;;  %v9876_v48 = vor.u32 %v12664_v37, %v9873_v59  ;;  %v12642_v25 = vld [vmem:[%s20106_s1 + $0x8c4] sm:$0xf] }
 0x141   : > { %3688 = vmatpush.bf16.msrb.mxu3 %v9588_v54  ;;  %3602 = vmatmul.bf16.gmra.mxu2 %v14181_v35  ;;  %v9444_v35 = vor.u32 %v12556_v52, %v9441_v51  ;;  %v9801_v52 = vld [vmem:[%s20106_s1 + $0x8e8] sm:$0xf0]  ;;  %v12658_v43 = vld [vmem:[%s20106_s1 + $0x944] sm:$0xf] }
 0x142   : > { %3632 = vmatpush.bf16.msrb.mxu0 %v9388_v19  ;;  %v3299_v57 = vpop.f32.mrf.mxu2  ;;  %v9673_v19 = vld [vmem:[%s20106_s1 + $0x7e8] sm:$0xf0] }
 0x143   : > { %3651 = vmatpush.bf16.msrb.mxu1 %v9452_v47  ;;  %v3300_v1 = vadd.f32 %v3299_v57, %v3281_v50  ;;  %v3318_v22 = vpop.f32.mrf.mxu3  ;;  %v12630_v47 = vld [vmem:[%s20106_s1 + $0x864] sm:$0xf]  ;;  %v9729_v57 = vld [vmem:[%s20106_s1 + $0x858] sm:$0xf0]  ;;  %v9721_v8 = vld [vmem:[%s20106_s1 + $0x848] sm:$0xf0] }
 0x144   : > { %3670 = vmatpush.bf16.msrb.mxu2 %v9516_v20  ;;  %v3263_v7 = vpop.f32.mrf.mxu0  ;;  %v9740_v30 = vor.u32 %v12630_v47, %v9737_v18  ;;  %v9841_v47 = vld [vmem:[%s20106_s1 + $0x938] sm:$0xf0]  ;;  %v9705_v55 = vld [vmem:[%s20106_s1 + $0x828] sm:$0xf0] }
 0x145   : > { %3689 = vmatpush.bf16.msrb.mxu3 %v9580_v49  ;;  %v3264_v45 = vadd.f32 %v3263_v7, %v15449_v13  ;;  %v15628_v54 = vadd.f32 %v3318_v22, %v3300_v1  ;;  %v9436_v13 = vor.u32 %v12554_v6, %v9433_v36  ;;  %v9665_v6 = vld [vmem:[%s20106_s1 + $0x7d8] sm:$0xf0]  ;;  %v12628_v36 = vld [vmem:[%s20106_s1 + $0x854] sm:$0xf]  ;;  %v12626_v22 = vld [vmem:[%s20106_s1 + $0x844] sm:$0xf] }
 0x146   : > { %v3282_v61 = vpop.f32.mrf.mxu1  ;;  %3633 = vmatpush.bf16.msrb.mxu0 %v9380_v9  ;;  %v9676_v9 = vor.u32 %v12614_v15, %v9673_v19  ;;  %v9732_v1 = vor.u32 %v12628_v36, %v9729_v57  ;;  %v9724_v37 = vor.u32 %v12626_v22, %v9721_v8  ;;  %v9777_v15 = vld [vmem:[%s20106_s1 + $0x8b8] sm:$0xf0]  ;;  %v12656_v19 = vld [vmem:[%s20106_s1 + $0x934] sm:$0xf] }
 0x147   : > { %3652 = vmatpush.bf16.msrb.mxu1 %v9444_v35  ;;  %v3283_v16 = vadd.f32 %v3282_v61, %v3264_v45  ;;  %v9804_v35 = vor.u32 %v12646_v44, %v9801_v52  ;;  %v9785_v45 = vld [vmem:[%s20106_s1 + $0x8c8] sm:$0xf0]  ;;  %v12606_v52 = vld [vmem:[%s20106_s1 + $0x7a4] sm:$0xf]  ;;  %v9844_v53 = vor.u32 %v12656_v19, %v9841_v47  ;;  %v10065_v19 = vld [vmem:[%s20106_s1 + $0xaf8] sm:$0xf0] }
 0x148   : > { %3671 = vmatpush.bf16.msrb.mxu2 %v9508_v28  ;;  %v12612_v28 = vld [vmem:[%s20106_s1 + $0x7d4] sm:$0xf]  ;;  %v9788_v59 = vor.u32 %v12642_v25, %v9785_v45  ;;  %v12618_v25 = vld [vmem:[%s20106_s1 + $0x804] sm:$0xf] }
 0x149   : > { %3690 = vmatpush.bf16.msrb.mxu3 %v9572_v34  ;;  %v12644_v34 = vld [vmem:[%s20106_s1 + $0x8d4] sm:$0xf]  ;;  %v9668_v14 = vor.u32 %v12612_v28, %v9665_v6  ;;  %v9833_v28 = vld [vmem:[%s20106_s1 + $0x928] sm:$0xf0]  ;;  %v12634_v45 = vld [vmem:[%s20106_s1 + $0x884] sm:$0xf] }
 0x14a   : > { %3634 = vmatpush.bf16.msrb.mxu0 %v9372_v32  ;;  %v3301_v20 = vpop.f32.mrf.mxu2  ;;  %v9796_v7 = vor.u32 %v12644_v34, %v9793_v41  ;;  %v12604_v41 = vld [vmem:[%s20106_s1 + $0x794] sm:$0xf] }
 0x14b   : > { %3653 = vmatpush.bf16.msrb.mxu1 %v9436_v13  ;;  %v3302_v50 = vadd.f32 %v3301_v20, %v3283_v16  ;;  %v3320_v49 = vpop.f32.mrf.mxu3  ;;  %v12608_v16 = vld [vmem:[%s20106_s1 + $0x7b4] sm:$0xf] }
 0x14c   : > { %3672 = vmatpush.bf16.msrb.mxu2 %v9500_v46  ;;  %v3332_v51 = vpop.f32.mrf.mxu0 }
 0x14d   : > { %3691 = vmatpush.bf16.msrb.mxu3 %v9564_v3  ;;  %v3333_v11 = vadd.f32 %v3332_v51, %v15504_v17  ;;  %v15661_v2 = vadd.f32 %v3320_v49, %v3302_v50  ;;  %v9649_v3 = vld [vmem:[%s20106_s1 + $0x7b8] sm:$0xf0]  ;;  %v9641_v50 = vld [vmem:[%s20106_s1 + $0x7a8] sm:$0xf0]  ;;  %v12622_v49 = vld [vmem:[%s20106_s1 + $0x824] sm:$0xf] }
 0x14e   : > { %3703 = vmatpush.bf16.msra.mxu0 %v9684_v56  ;;  %v3351_v33 = vpop.f32.mrf.mxu1  ;;  %3654 = vmatmul.bf16.vlgmr.msrb.gmra.mxu1 %v14286_v60  ;;  %v12610_v60 = vld [vmem:[%s20106_s1 + $0x7c4] sm:$0xf]  ;;  %v12624_v56 = vld [vmem:[%s20106_s1 + $0x834] sm:$0xf]  ;;  %v9652_v20 = vor.u32 %v12608_v16, %v9649_v3  ;;  %v9708_v57 = vor.u32 %v12622_v49, %v9705_v55  ;;  %v9937_v16 = vld [vmem:[%s20106_s1 + $0x9f8] sm:$0xf0] }
 0x14f   : > { %3722 = vmatpush.bf16.msra.mxu1 %v9748_v63  ;;  %v15672_v17 = vadd.f32 %v3351_v33, %v3333_v11  ;;  %3635 = vmatmul.bf16.vlgmr.msrb.gmra.mxu0 %v14075_v23  ;;  %v12660_v23 = vld [vmem:[%s20106_s1 + $0x954] sm:$0xf]  ;;  %v9852_v63 = vor.u32 %v12658_v43, %v9849_v12  ;;  %v12638_v11 = vld [vmem:[%s20106_s1 + $0x8a4] sm:$0xf]  ;;  %v9769_v33 = vld [vmem:[%s20106_s1 + $0x8a8] sm:$0xf0] }
 0x150   : > { %3741 = vmatpush.bf16.msra.mxu2 %v9812_v27  ;;  %3692 = vmatmul.bf16.vlgmr.msrb.gmra.mxu3 %v14299_v5  ;;  %v9860_v5 = vor.u32 %v12660_v23, %v9857_v26  ;;  %v9713_v27 = vld [vmem:[%s20106_s1 + $0x838] sm:$0xf0]  ;;  %v9772_v34 = vor.u32 %v12638_v11, %v9769_v33  ;;  %v12620_v26 = vld [vmem:[%s20106_s1 + $0x814] sm:$0xf]  ;;  %v9753_v12 = vld [vmem:[%s20106_s1 + $0x888] sm:$0xf0] }
 0x151   : > { %3760 = vmatpush.bf16.msra.mxu3 %v9876_v48  ;;  %3673 = vmatmul.bf16.vlgmr.msrb.gmra.mxu2 %v14297_v4  ;;  %v9657_v4 = vld [vmem:[%s20106_s1 + $0x7c8] sm:$0xf0]  ;;  %v12640_v48 = vld [vmem:[%s20106_s1 + $0x8b4] sm:$0xf]  ;;  %v9716_v18 = vor.u32 %v12624_v56, %v9713_v27  ;;  %v9633_v23 = vld [vmem:[%s20106_s1 + $0x798] sm:$0xf0] }
 0x152   : > { %3704 = vmatpush.bf16.msra.mxu0 %v9676_v9  ;;  %v9660_v46 = vor.u32 %v12610_v60, %v9657_v4  ;;  %v9780_v44 = vor.u32 %v12640_v48, %v9777_v15  ;;  %v9761_v60 = vld [vmem:[%s20106_s1 + $0x898] sm:$0xf0]  ;;  %v9636_v22 = vor.u32 %v12604_v41, %v9633_v23  ;;  %v12696_v3 = vld [vmem:[%s20106_s1 + $0xa74] sm:$0xf]  ;;  %v12678_v11 = vld [vmem:[%s20106_s1 + $0x9e4] sm:$0xf] }
 0x153   : > { %3723 = vmatpush.bf16.msra.mxu1 %v9740_v30  ;;  %v15713_v32 = vpop.f32.mrf.mxu3  ;;  %v9825_v4 = vld [vmem:[%s20106_s1 + $0x918] sm:$0xf0]  ;;  %v12712_v15 = vld [vmem:[%s20106_s1 + $0xaf4] sm:$0xf]  ;;  %v9929_v33 = vld [vmem:[%s20106_s1 + $0x9e8] sm:$0xf0] }
 0x154   : > { %3742 = vmatpush.bf16.msra.mxu2 %v9804_v35  ;;  %v15702_v24 = vpop.f32.mrf.mxu2  ;;  %v3334_v61 = vpop.f32.mrf.mxu0  ;;  %v12654_v35 = vld [vmem:[%s20106_s1 + $0x924] sm:$0xf]  ;;  %v10001_v48 = vld [vmem:[%s20106_s1 + $0xa78] sm:$0xf0]  ;;  %v10121_v41 = vld [vmem:[%s20106_s1 + $0xb68] sm:$0xf0] }
 0x155   : > { %3761 = vmatpush.bf16.msra.mxu3 %v9868_v29  ;;  %v3335_v58 = vadd.f32 %v3334_v61, %v15555_v0  ;;  %v9644_v29 = vor.u32 %v12606_v52, %v9641_v50  ;;  %v10004_v49 = vor.u32 %v12696_v3, %v10001_v48  ;;  %v3371_v23 = vadd.f32 %v15702_v24, %v15672_v17  ;;  %v12692_v17 = vld [vmem:[%s20106_s1 + $0xa54] sm:$0xf]  ;;  %v12706_v48 = vld [vmem:[%s20106_s1 + $0xac4] sm:$0xf] }
 0x156   : > { %v3353_v13 = vpop.f32.mrf.mxu1  ;;  %3705 = vmatpush.bf16.msra.mxu0 %v9668_v14  ;;  %v9836_v14 = vor.u32 %v12654_v35, %v9833_v28  ;;  %v9993_v28 = vld [vmem:[%s20106_s1 + $0xa68] sm:$0xf0] }
 0x157   : > { %3724 = vmatpush.bf16.msra.mxu1 %v9732_v1  ;;  %v15731_v0 = vadd.f32 %v3353_v13, %v3335_v58  ;;  %v9697_v1 = vld [vmem:[%s20106_s1 + $0x818] sm:$0xf0]  ;;  %v12650_v58 = vld [vmem:[%s20106_s1 + $0x904] sm:$0xf]  ;;  %v9817_v13 = vld [vmem:[%s20106_s1 + $0x908] sm:$0xf0] }
 0x158   : > { %3743 = vmatpush.bf16.msra.mxu2 %v9796_v7  ;;  %v12636_v7 = vld [vmem:[%s20106_s1 + $0x894] sm:$0xf]  ;;  %v9820_v52 = vor.u32 %v12650_v58, %v9817_v13 }
 0x159   : > { %3762 = vmatpush.bf16.msra.mxu3 %v9860_v5  ;;  %v12602_v5 = vld [vmem:[%s20106_s1 + $0x784] sm:$0xf]  ;;  %v9764_v8 = vor.u32 %v12636_v7, %v9761_v60  ;;  %v9932_v7 = vor.u32 %v12678_v11, %v9929_v33  ;;  %v9905_v33 = vld [vmem:[%s20106_s1 + $0x9b8] sm:$0xf0] }
 0x15a   : > { %3706 = vmatpush.bf16.msra.mxu0 %v9660_v46 }
 0x15b   : > { %3725 = vmatpush.bf16.msra.mxu1 %v9724_v37  ;;  %v15768_v30 = vpop.f32.mrf.mxu3 }
 0x15c   : > { %3744 = vmatpush.bf16.msra.mxu2 %v9788_v59  ;;  %v15757_v51 = vpop.f32.mrf.mxu2  ;;  %v3337_v9 = vpop.f32.mrf.mxu0  ;;  %v12680_v59 = vld [vmem:[%s20106_s1 + $0x9f4] sm:$0xf] }
 0x15d   : > { %3763 = vmatpush.bf16.msra.mxu3 %v9852_v63  ;;  %v3338_v6 = vadd.f32 %v3337_v9, %v15628_v54  ;;  %v9940_v50 = vor.u32 %v12680_v59, %v9937_v16  ;;  %v12694_v9 = vld [vmem:[%s20106_s1 + $0xa64] sm:$0xf]  ;;  %v3373_v24 = vadd.f32 %v15757_v51, %v15731_v0  ;;  %v10113_v0 = vld [vmem:[%s20106_s1 + $0xb58] sm:$0xf0]  ;;  %v3390_v51 = vadd.f32 %v15713_v32, %v3371_v23  ;;  %v9913_v59 = vld [vmem:[%s20106_s1 + $0x9c8] sm:$0xf0] }
 0x15e   : > { %v3356_v36 = vpop.f32.mrf.mxu1  ;;  %3707 = vmatpush.bf16.msra.mxu0 %v9652_v20  ;;  %3659 = vmatmul.bf16.gmra.mxu1 %v14402_v31  ;;  %v9625_v31 = vld [vmem:[%s20106_s1 + $0x788] sm:$0xf0]  ;;  %v9756_v20 = vor.u32 %v12634_v45, %v9753_v12  ;;  %v9996_v60 = vor.u32 %v12694_v9, %v9993_v28  ;;  %v20145_v45 = vld [vmem:[#allocation5_spill] sm:$0xff]  ;;  %v12690_v32 = vld [vmem:[%s20106_s1 + $0xa44] sm:$0xf] }
 0x15f   : > { %3726 = vmatpush.bf16.msra.mxu1 %v9716_v18  ;;  %v15786_v54 = vadd.f32 %v3356_v36, %v3338_v6  ;;  %3640 = vmatmul.bf16.gmra.mxu0 %v14191_v39  ;;  %v12652_v39 = vld [vmem:[%s20106_s1 + $0x914] sm:$0xf]  ;;  %v9628_v27 = vor.u32 %v12602_v5, %v9625_v31  ;;  %v10129_v18 = vld [vmem:[%s20106_s1 + $0xb78] sm:$0xf0]  ;;  %v12710_v6 = vld [vmem:[%s20106_s1 + $0xae4] sm:$0xf]  ;;  %v3392_v16 = vadd.f32 %v15768_v30, %v3373_v24 }
 0x160   : > { %3745 = vmatpush.bf16.msra.mxu2 %v9780_v44  ;;  %3697 = vmatmul.bf16.gmra.mxu3 %v14415_v40  ;;  %v9689_v40 = vld [vmem:[%s20106_s1 + $0x808] sm:$0xf0]  ;;  %v9828_v43 = vor.u32 %v12652_v39, %v9825_v4  ;;  %v12676_v4 = vld [vmem:[%s20106_s1 + $0x9d4] sm:$0xf]  ;;  %v9985_v31 = vld [vmem:[%s20106_s1 + $0xa58] sm:$0xf0] }
 0x161   : > { %3764 = vmatpush.bf16.msra.mxu3 %v9844_v53  ;;  %3678 = vmatmul.bf16.gmra.mxu2 %v14413_v38  ;;  %v9700_v38 = vor.u32 %v12620_v26, %v9697_v1  ;;  %v9692_v47 = vor.u32 %v12618_v25, %v9689_v40  ;;  %v10068_v53 = vor.u32 %v12712_v15, %v10065_v19  ;;  %v10057_v36 = vld [vmem:[%s20106_s1 + $0xae8] sm:$0xf0]  ;;  %v13299_v26 = vld [vmem:[%s20107_s2] sm:$0x3]  ;;  %v20144_v40 = vld [vmem:[#allocation4_spill] sm:$0xff] }
 0x162   : > { %3708 = vmatpush.bf16.msra.mxu0 %v9644_v29  ;;  %v10060_v39 = vor.u32 %v12710_v6, %v10057_v36  ;;  %v20143_v25 = vld [vmem:[#allocation3_spill] sm:$0xff]  ;;  %v9988_v58 = vor.u32 %v12692_v17, %v9985_v31  ;;  %v12722_v30 = vld [vmem:[%s20106_s1 + $0xb44] sm:$0xf]  ;;  %v12688_v9 = vld [vmem:[%s20106_s1 + $0xa34] sm:$0xf] }
 0x163   : > { %3727 = vmatpush.bf16.msra.mxu1 %v9708_v57  ;;  %v15833_v37 = vpop.f32.mrf.mxu3  ;;  %v10041_v15 = vld [vmem:[%s20106_s1 + $0xac8] sm:$0xf0]  ;;  %v9969_v28 = vld [vmem:[%s20106_s1 + $0xa38] sm:$0xf0]  ;;  %v12720_v23 = vld [vmem:[%s20106_s1 + $0xb34] sm:$0xf] }
 0x164   : > { %3746 = vmatpush.bf16.msra.mxu2 %v9772_v34  ;;  %v15822_v61 = vpop.f32.mrf.mxu2  ;;  %v3339_v46 = vpop.f32.mrf.mxu0  ;;  %v12726_v34 = vld [vmem:[%s20106_s1 + $0xb64] sm:$0xf]  ;;  %v10044_v11 = vor.u32 %v12706_v48, %v10041_v15  ;;  %v9897_v17 = vld [vmem:[%s20106_s1 + $0x9a8] sm:$0xf0]  ;;  %v20148_v15 = vld [vmem:[#allocation8_spill] sm:$0xff] }
 0x165   : > { %3765 = vmatpush.bf16.msra.mxu3 %v9836_v14  ;;  %v3340_v56 = vadd.f32 %v3339_v46, %v15661_v2  ;;  %v12728_v2 = vld [vmem:[%s20106_s1 + $0xb74] sm:$0xf]  ;;  %v15895_v14 = vperm.slane %v13299_v26, 1  ;;  %v10124_v5 = vor.u32 %v12726_v34, %v10121_v41  ;;  %v12674_v46 = vld [vmem:[%s20106_s1 + $0x9c4] sm:$0xf]  ;;  %v20147_v48 = vld [vmem:[#allocation7_spill] sm:$0xff] }
 0x166   : > { %v3358_v63 = vpop.f32.mrf.mxu1  ;;  %3709 = vmatpush.bf16.msra.mxu0 %v9636_v22  ;;  %v10132_v55 = vor.u32 %v12728_v2, %v10129_v18  ;;  %v9921_v22 = vld [vmem:[%s20106_s1 + $0x9d8] sm:$0xf0]  ;;  %v10105_v2 = vld [vmem:[%s20106_s1 + $0xb48] sm:$0xf0]  ;;  %v12704_v34 = vld [vmem:[%s20106_s1 + $0xab4] sm:$0xf] }
 0x167   : > { %3728 = vmatpush.bf16.msra.mxu1 %v9700_v38  ;;  %v15860_v44 = vadd.f32 %v3358_v63, %v3340_v56  ;;  %v12708_v38 = vld [vmem:[%s20106_s1 + $0xad4] sm:$0xf]  ;;  %v10033_v41 = vld [vmem:[%s20106_s1 + $0xab8] sm:$0xf0]  ;;  %v12686_v24 = vld [vmem:[%s20106_s1 + $0xa24] sm:$0xf] }
 0x168   : > { %3747 = vmatpush.bf16.msra.mxu2 %v9764_v8  ;;  %v10049_v8 = vld [vmem:[%s20106_s1 + $0xad8] sm:$0xf0] }
 0x169   : > { %3766 = vmatpush.bf16.msra.mxu3 %v9828_v43  ;;  %v9924_v43 = vor.u32 %v12676_v4, %v9921_v22  ;;  %v10052_v13 = vor.u32 %v12708_v38, %v10049_v8  ;;  %v10097_v26 = vld [vmem:[%s20106_s1 + $0xb38] sm:$0xf0]  ;;  %v10036_v4 = vor.u32 %v12704_v34, %v10033_v41  ;;  %v12670_v22 = vld [vmem:[%s20106_s1 + $0x9a4] sm:$0xf]  ;;  %v9961_v38 = vld [vmem:[%s20106_s1 + $0xa28] sm:$0xf0] }
 0x16a   : > { %3710 = vmatpush.bf16.msra.mxu0 %v9628_v27  ;;  %v9977_v27 = vld [vmem:[%s20106_s1 + $0xa48] sm:$0xf0]  ;;  %v10100_v31 = vor.u32 %v12720_v23, %v10097_v26  ;;  %v12702_v8 = vld [vmem:[%s20106_s1 + $0xaa4] sm:$0xf]  ;;  %v10193_v26 = vld [vmem:[%s20106_s1 + $0xbf8] sm:$0xf0] }
 0x16b   : > { %3729 = vmatpush.bf16.msra.mxu1 %v9692_v47  ;;  %v15882_v29 = vpop.f32.mrf.mxu3 }
 0x16c   : > { %3748 = vmatpush.bf16.msra.mxu2 %v9756_v20  ;;  %v15871_v35 = vpop.f32.mrf.mxu2  ;;  %v3408_v57 = vpop.f32.mrf.mxu0 }
 0x16d   : > { %3767 = vmatpush.bf16.msra.mxu3 %v9820_v52  ;;  %v3409_v3 = vadd.f32 %v3408_v57, %v3390_v51  ;;  %v10108_v57 = vor.u32 %v12722_v30, %v10105_v2  ;;  %v12718_v51 = vld [vmem:[%s20106_s1 + $0xb24] sm:$0xf]  ;;  %v9881_v2 = vld [vmem:[%s20106_s1 + $0x988] sm:$0xf0] }
 0x16e   : > { %3779 = vmatpush.bf16.msrb.mxu0 %v9940_v50  ;;  %v3427_v1 = vpop.f32.mrf.mxu1  ;;  %3730 = vmatmul.bf16.vlgmr.msra.gmra.mxu1 %v20143_v25  ;;  %v9916_v50 = vor.u32 %v12674_v46, %v9913_v59  ;;  %v10025_v25 = vld [vmem:[%s20106_s1 + $0xaa8] sm:$0xf0]  ;;  %v12668_v59 = vld [vmem:[%s20106_s1 + $0x994] sm:$0xf]  ;;  %v12666_v30 = vld [vmem:[%s20106_s1 + $0x984] sm:$0xf] }
 0x16f   : > { %3798 = vmatpush.bf16.msrb.mxu1 %v10004_v49  ;;  %3711 = vmatmul.bf16.vlgmr.msra.gmra.mxu0 %v14307_v10  ;;  %v12724_v10 = vld [vmem:[%s20106_s1 + $0xb54] sm:$0xf]  ;;  %v3428_v12 = vadd.f32 %v3427_v1, %v15895_v14  ;;  %v3893_v6 = vmax.f32 %v3409_v3, 0.0  ;;  %v10028_v46 = vor.u32 %v12702_v8, %v10025_v25 }
 0x170   : > { %3817 = vmatpush.bf16.msrb.mxu2 %v10068_v53  ;;  %3768 = vmatmul.bf16.vlgmr.msra.gmra.mxu3 %v20145_v45  ;;  %v10116_v63 = vor.u32 %v12724_v10, %v10113_v0  ;;  %v12672_v49 = vld [vmem:[%s20106_s1 + $0x9b4] sm:$0xf]  ;;  %v10089_v45 = vld [vmem:[%s20106_s1 + $0xb28] sm:$0xf0] }
 0x171   : > { %3836 = vmatpush.bf16.msrb.mxu3 %v10132_v55  ;;  %3749 = vmatmul.bf16.vlgmr.msra.gmra.mxu2 %v20144_v40  ;;  %v9980_v55 = vor.u32 %v12690_v32, %v9977_v27  ;;  %v9889_v32 = vld [vmem:[%s20106_s1 + $0x998] sm:$0xf0]  ;;  %v10092_v3 = vor.u32 %v12718_v51, %v10089_v45 }
 0x172   : > { %3780 = vmatpush.bf16.msrb.mxu0 %v9932_v7  ;;  %v9908_v7 = vor.u32 %v12672_v49, %v9905_v33  ;;  %v10017_v27 = vld [vmem:[%s20106_s1 + $0xa98] sm:$0xf0]  ;;  %v9945_v49 = vld [vmem:[%s20106_s1 + $0xa08] sm:$0xf0] }
 0x173   : > { %3799 = vmatpush.bf16.msrb.mxu1 %v9996_v60  ;;  %v3465_v20 = vpop.f32.mrf.mxu3 }
 0x174   : > { %3818 = vmatpush.bf16.msrb.mxu2 %v10060_v39  ;;  %v3446_v56 = vpop.f32.mrf.mxu2  ;;  %v3410_v47 = vpop.f32.mrf.mxu0  ;;  %v9972_v39 = vor.u32 %v12688_v9, %v9969_v28 }
 0x175   : > { %3837 = vmatpush.bf16.msrb.mxu3 %v10124_v5  ;;  %v3447_v19 = vadd.f32 %v3446_v56, %v3428_v12  ;;  %v3411_v18 = vadd.f32 %v3410_v47, %v3392_v16  ;;  %v12684_v16 = vld [vmem:[%s20106_s1 + $0xa14] sm:$0xf]  ;;  %v9953_v56 = vld [vmem:[%s20106_s1 + $0xa18] sm:$0xf0] }
 0x176   : > { %v3429_v52 = vpop.f32.mrf.mxu1  ;;  %3781 = vmatpush.bf16.msrb.mxu0 %v9924_v43  ;;  %v3376_v43 = vadd.f32 %v15822_v61, %v15786_v54  ;;  %v3378_v54 = vadd.f32 %v15871_v35, %v15860_v44  ;;  %v20146_v61 = vld [vmem:[#allocation2_spill] sm:$0xff]  ;;  %v12716_v44 = vld [vmem:[%s20106_s1 + $0xb14] sm:$0xf]  ;;  %v10081_v35 = vld [vmem:[%s20106_s1 + $0xb18] sm:$0xf0] }
 0x177   : > { %v15957_v53 = vadd.f32 %v3465_v20, %v3447_v19  ;;  %3800 = vmatpush.bf16.msrb.mxu1 %v9988_v58  ;;  %v3895_v36 = vmax.f32 %v3411_v18, 0.0  ;;  %v3430_v60 = vadd.f32 %v3429_v52, %v15895_v14  ;;  %v9900_v58 = vor.u32 %v12670_v22, %v9897_v17  ;;  %v20149_v47 = vld [vmem:[#allocation9_spill] sm:$0xff]  ;;  %v10487_v17 = vld [vmem:[%s20108_s3 + $0x700] sm:$0xf] }
 0x178   : > { %3819 = vmatpush.bf16.msrb.mxu2 %v10052_v13  ;;  %v9964_v13 = vor.u32 %v12686_v24, %v9961_v38  ;;  %v3395_v19 = vadd.f32 %v15833_v37, %v3376_v43  ;;  %v9892_v20 = vor.u32 %v12668_v59, %v9889_v32  ;;  %v9956_v52 = vor.u32 %v12684_v16, %v9953_v56  ;;  %v12682_v37 = vld [vmem:[%s20106_s1 + $0xa04] sm:$0xf]  ;;  %v10257_v22 = vld [vmem:[%s20106_s1 + $0xc78] sm:$0xf0]  ;;  %v12822_v24 = vld [vmem:[%s20108_s3 + $0x77c] sm:$0xf0] }
 0x179   : > { %3838 = vmatpush.bf16.msrb.mxu3 %v10116_v63  ;;  %v15980_v1 = vpack.c.bf16 %v3895_v36, %v3893_v6  ;;  %v12700_v63 = vld [vmem:[%s20106_s1 + $0xa94] sm:$0xf]  ;;  %v10084_v28 = vor.u32 %v12716_v44, %v10081_v35  ;;  %v10009_v6 = vld [vmem:[%s20106_s1 + $0xa88] sm:$0xf0]  ;;  %v12714_v36 = vld [vmem:[%s20106_s1 + $0xb04] sm:$0xf]  ;;  %v10488_v43 = vor.u32 %v12822_v24, %v10487_v17 }
 0x17a   : > { %3782 = vmatpush.bf16.msrb.mxu0 %v9916_v50  ;;  %v10020_v50 = vor.u32 %v12700_v63, %v10017_v27  ;;  %v12758_v59 = vld [vmem:[%s20106_s1 + $0xc64] sm:$0xf]  ;;  %v10455_v16 = vld [vmem:[%s20108_s3 + $0x600] sm:$0xf]  ;;  %v12740_v35 = vld [vmem:[%s20106_s1 + $0xbd4] sm:$0xf] }
 0x17b   : > { %3801 = vmatpush.bf16.msrb.mxu1 %v9980_v55  ;;  %v16003_v0 = vpop.f32.mrf.mxu3  ;;  %v12698_v55 = vld [vmem:[%s20106_s1 + $0xa84] sm:$0xf]  ;;  %v10225_v17 = vld [vmem:[%s20106_s1 + $0xc38] sm:$0xf0]  ;;  %v10359_v24 = vld [vmem:[%s20108_s3 + $0x300] sm:$0xf] }
 0x17c   : > { %3820 = vmatpush.bf16.msrb.mxu2 %v10044_v11  ;;  %v3448_v5 = vpop.f32.mrf.mxu2  ;;  %v3413_v10 = vpop.f32.mrf.mxu0  ;;  %v3397_v11 = vadd.f32 %v15882_v29, %v3378_v54  ;;  %v12744_v29 = vld [vmem:[%s20106_s1 + $0xbf4] sm:$0xf]  ;;  %v10012_v38 = vor.u32 %v12698_v55, %v10009_v6  ;;  %v12814_v54 = vld [vmem:[%s20108_s3 + $0x67c] sm:$0xf0]  ;;  %v10233_v6 = vld [vmem:[%s20106_s1 + $0xc48] sm:$0xf0] }
 0x17d   : > { %3839 = vmatpush.bf16.msrb.mxu3 %v10108_v57  ;;  %v16001_v40 = vadd.f32 %v3448_v5, %v3430_v60  ;;  %v3414_v33 = vadd.f32 %v3413_v10, %v3395_v19  ;;  %v10073_v57 = vld [vmem:[%s20106_s1 + $0xb08] sm:$0xf0]  ;;  %v10196_v51 = vor.u32 %v12744_v29, %v10193_v26  ;;  %v10456_v44 = vor.u32 %v12814_v54, %v10455_v16  ;;  %v10177_v19 = vld [vmem:[%s20106_s1 + $0xbd8] sm:$0xf0] }
 0x17e   : > { %v3432_v12 = vpop.f32.mrf.mxu1  ;;  %3783 = vmatpush.bf16.msrb.mxu0 %v9908_v7  ;;  %3735 = vmatmul.bf16.gmra.mxu1 %v20147_v48  ;;  %v12760_v7 = vld [vmem:[%s20106_s1 + $0xc74] sm:$0xf]  ;;  %v10076_v10 = vor.u32 %v12714_v36, %v10073_v57  ;;  %v10391_v36 = vld [vmem:[%s20108_s3 + $0x400] sm:$0xf] }
 0x17f   : > { %3802 = vmatpush.bf16.msrb.mxu1 %v9972_v39  ;;  %3716 = vmatmul.bf16.gmra.mxu0 %v20146_v61  ;;  %v3433_v18 = vadd.f32 %v3432_v12, %v15895_v14  ;;  %v3897_v8 = vmax.f32 %v3414_v33, 0.0  ;;  %v10260_v45 = vor.u32 %v12760_v7, %v10257_v22  ;;  %v10169_v33 = vld [vmem:[%s20106_s1 + $0xbc8] sm:$0xf0]  ;;  %v12798_v57 = vld [vmem:[%s20108_s3 + $0x47c] sm:$0xf0] }
 0x180   : > { %3821 = vmatpush.bf16.msrb.mxu2 %v10036_v4  ;;  %3773 = vmatmul.bf16.gmra.mxu3 %v20149_v47  ;;  %v9884_v4 = vor.u32 %v12666_v30, %v9881_v2  ;;  %v12756_v47 = vld [vmem:[%s20106_s1 + $0xc54] sm:$0xf]  ;;  %v20150_v30 = vld [vmem:[#allocation6_spill] sm:$0xff] }
 0x181   : > { %3840 = vmatpush.bf16.msrb.mxu3 %v10100_v31  ;;  %3754 = vmatmul.bf16.gmra.mxu2 %v20148_v15  ;;  %v9948_v31 = vor.u32 %v12682_v37, %v9945_v49  ;;  %v10423_v2 = vld [vmem:[%s20108_s3 + $0x500] sm:$0xf]  ;;  %v10180_v37 = vor.u32 %v12740_v35, %v10177_v19  ;;  %v12752_v22 = vld [vmem:[%s20106_s1 + $0xc34] sm:$0xf] }
 0x182   : > { %3784 = vmatpush.bf16.msrb.mxu0 %v9900_v58  ;;  %v12748_v35 = vld [vmem:[%s20106_s1 + $0xc14] sm:$0xf]  ;;  %v20153_v19 = vld [vmem:[#allocation10_spill] sm:$0xff] }
 0x183   : > { %3803 = vmatpush.bf16.msrb.mxu1 %v9964_v13  ;;  %v3470_v23 = vpop.f32.mrf.mxu3  ;;  %v12742_v13 = vld [vmem:[%s20106_s1 + $0xbe4] sm:$0xf] }
 0x184   : > { %3822 = vmatpush.bf16.msrb.mxu2 %v10028_v46  ;;  %v3451_v9 = vpop.f32.mrf.mxu2  ;;  %v3415_v41 = vpop.f32.mrf.mxu0  ;;  %v10185_v46 = vld [vmem:[%s20106_s1 + $0xbe8] sm:$0xf0] }
 0x185   : > { %3841 = vmatpush.bf16.msrb.mxu3 %v10092_v3  ;;  %v3452_v34 = vadd.f32 %v3451_v9, %v3433_v18  ;;  %v3416_v60 = vadd.f32 %v3415_v41, %v3397_v11  ;;  %v10188_v48 = vor.u32 %v12742_v13, %v10185_v46  ;;  %v12806_v18 = vld [vmem:[%s20108_s3 + $0x57c] sm:$0xf0]  ;;  %v12738_v11 = vld [vmem:[%s20106_s1 + $0xbc4] sm:$0xf]  ;;  %v3468_v9 = vadd.f32 %v16003_v0, %v16001_v40  ;;  %v10217_v13 = vld [vmem:[%s20106_s1 + $0xc28] sm:$0xf0] }
 0x186   : > { %v3434_v39 = vpop.f32.mrf.mxu1  ;;  %3785 = vmatpush.bf16.msrb.mxu0 %v9892_v20  ;;  %v10424_v55 = vor.u32 %v12806_v18, %v10423_v2  ;;  %v10172_v40 = vor.u32 %v12738_v11, %v10169_v33  ;;  %v10327_v46 = vld [vmem:[%s20108_s3 + $0x200] sm:$0xf]  ;;  %v20155_v2 = vld [vmem:[#allocation15_spill] sm:$0xff]  ;;  %v20156_v18 = vld [vmem:[#allocation16_spill] sm:$0xff] }
 0x187   : > { %v16088_v5 = vadd.f32 %v3470_v23, %v3452_v34  ;;  %3804 = vmatpush.bf16.msrb.mxu1 %v9956_v52  ;;  %v3899_v25 = vmax.f32 %v3416_v60, 0.0  ;;  %v3435_v58 = vadd.f32 %v3434_v39, %v15895_v14  ;;  %v10249_v14 = vld [vmem:[%s20106_s1 + $0xc68] sm:$0xf0]  ;;  %v10392_v60 = vor.u32 %v12798_v57, %v10391_v36  ;;  %v12736_v39 = vld [vmem:[%s20106_s1 + $0xbb4] sm:$0xf] }
 0x188   : > { %3823 = vmatpush.bf16.msrb.mxu2 %v10020_v50  ;;  %v10252_v15 = vor.u32 %v12758_v59, %v10249_v14  ;;  %v20151_v52 = vld [vmem:[#allocation11_spill] sm:$0xff]  ;;  %v20152_v50 = vld [vmem:[#allocation12_spill] sm:$0xff]  ;;  %v12782_v59 = vld [vmem:[%s20108_s3 + $0x27c] sm:$0xf0] }
 0x189   : > { %3842 = vmatpush.bf16.msrb.mxu3 %v10084_v28  ;;  %v16090_v12 = vpack.c.bf16 %v3899_v25, %v3897_v8  ;;  %v10228_v25 = vor.u32 %v12752_v22, %v10225_v17  ;;  %v12746_v11 = vld [vmem:[%s20106_s1 + $0xc04] sm:$0xf]  ;;  %v10201_v33 = vld [vmem:[%s20106_s1 + $0xc08] sm:$0xf0]  ;;  %v10463_v17 = vld [vmem:[%s20108_s3 + $0x608] sm:$0xf] }
 0x18a   : > { %3786 = vmatpush.bf16.msrb.mxu0 %v9884_v4  ;;  %v10161_v4 = vld [vmem:[%s20106_s1 + $0xbb8] sm:$0xf0]  ;;  %v12818_v36 = vld [vmem:[%s20108_s3 + $0x704] sm:$0xf] }
 0x18b   : > { %3805 = vmatpush.bf16.msrb.mxu1 %v9948_v31  ;;  %v16113_v3 = vpop.f32.mrf.mxu3  ;;  %v12790_v31 = vld [vmem:[%s20108_s3 + $0x37c] sm:$0xf0] }
 0x18c   : > { %3824 = vmatpush.bf16.msrb.mxu2 %v10012_v38  ;;  %v3453_v32 = vpop.f32.mrf.mxu2  ;;  %v3484_v56 = vpop.f32.mrf.mxu0  ;;  %v10164_v38 = vor.u32 %v12736_v39, %v10161_v4 }
 0x18d   : > { %3843 = vmatpush.bf16.msrb.mxu3 %v10076_v10  ;;  %v16111_v61 = vadd.f32 %v3453_v32, %v3435_v58  ;;  %v3485_v63 = vadd.f32 %v3484_v56, %v15957_v53  ;;  %v10241_v53 = vld [vmem:[%s20106_s1 + $0xc58] sm:$0xf0]  ;;  %v10360_v10 = vor.u32 %v12790_v31, %v10359_v24  ;;  %v12815_v24 = vld [vmem:[%s20108_s3 + $0x684] sm:$0xf0] }
 0x18e   : > { %3855 = vmatpush.bf16.msra.mxu0 %v10196_v51  ;;  %v3503_v27 = vpop.f32.mrf.mxu1  ;;  %3806 = vmatmul.bf16.vlgmr.msrb.gmra.mxu1 %v14765_v42  ;;  %v10244_v49 = vor.u32 %v12756_v47, %v10241_v53  ;;  %v12754_v42 = vld [vmem:[%s20106_s1 + $0xc44] sm:$0xf]  ;;  %v10209_v47 = vld [vmem:[%s20106_s1 + $0xc18] sm:$0xf0] }
 0x18f   : > { %3874 = vmatpush.bf16.msra.mxu1 %v10260_v45  ;;  %v3504_v20 = vadd.f32 %v3503_v27, %v3485_v63  ;;  %3787 = vmatmul.bf16.vlgmr.msrb.gmra.mxu0 %v20150_v30  ;;  %v10236_v7 = vor.u32 %v12754_v42, %v10233_v6  ;;  %v12734_v51 = vld [vmem:[%s20106_s1 + $0xba4] sm:$0xf]  ;;  %v10153_v45 = vld [vmem:[%s20106_s1 + $0xba8] sm:$0xf0]  ;;  %v12774_v30 = vld [vmem:[%s20108_s3 + $0x17c] sm:$0xf0]  ;;  %v3473_v42 = vadd.f32 %v16113_v3, %v16111_v61 }
 0x190   : > { %4691 = vmatpush.bf16.msra.mxu2 %v10488_v43  ;;  %3844 = vmatmul.bf16.vlgmr.msrb.gmra.mxu3 %v20152_v50  ;;  %v12750_v43 = vld [vmem:[%s20106_s1 + $0xc24] sm:$0xf]  ;;  %v10156_v63 = vor.u32 %v12734_v51, %v10153_v45  ;;  %v12766_v6 = vld [vmem:[%s20108_s3 + $0x7c] sm:$0xf0]  ;;  %v10495_v3 = vld [vmem:[%s20108_s3 + $0x708] sm:$0xf] }
 0x191   : > { %3825 = vmatmul.bf16.vlgmr.msrb.gmra.mxu2 %v20151_v52  ;;  %v10220_v27 = vor.u32 %v12750_v43, %v10217_v13  ;;  %v20154_v53 = vld [vmem:[#allocation14_spill] sm:$0xff]  ;;  %v12807_v13 = vld [vmem:[%s20108_s3 + $0x584] sm:$0xf0] }
 0x192   : > { %3856 = vmatpush.bf16.msra.mxu0 %v10188_v48  ;;  %v10328_v48 = vor.u32 %v12782_v59, %v10327_v46  ;;  %v12730_v50 = vld [vmem:[%s20106_s1 + $0xb84] sm:$0xf] }
 0x193   : > { %3875 = vmatpush.bf16.msra.mxu1 %v10252_v15  ;;  %v3541_v23 = vpop.f32.mrf.mxu3  ;;  %v12732_v15 = vld [vmem:[%s20106_s1 + $0xb94] sm:$0xf]  ;;  %v10489_v61 = vld [vmem:[%s20108_s3 + $0x780] sm:$0xf0] }
 0x194   : > { %4692 = vmatpush.bf16.msra.mxu2 %v10456_v44  ;;  %v3522_v28 = vpop.f32.mrf.mxu2  ;;  %v3486_v41 = vpop.f32.mrf.mxu0  ;;  %v10145_v44 = vld [vmem:[%s20106_s1 + $0xb98] sm:$0xf0]  ;;  %v10492_v4 = vor.u32 %v12818_v36, %v10489_v61 }
 0x195   : > { %v3523_v34 = vadd.f32 %v3522_v28, %v3504_v20  ;;  %v3487_v29 = vadd.f32 %v3486_v41, %v3468_v9  ;;  %v10295_v20 = vld [vmem:[%s20108_s3 + $0x100] sm:$0xf]  ;;  %v10148_v52 = vor.u32 %v12732_v15, %v10145_v44  ;;  %v12799_v15 = vld [vmem:[%s20108_s3 + $0x484] sm:$0xf0] }
 0x196   : > { %v3505_v26 = vpop.f32.mrf.mxu1  ;;  %3857 = vmatpush.bf16.msra.mxu0 %v10180_v37  ;;  %v10212_v37 = vor.u32 %v12748_v35, %v10209_v47  ;;  %v10263_v28 = vld [vmem:[%s20108_s3] sm:$0xf]  ;;  %v12794_v35 = vld [vmem:[%s20108_s3 + $0x404] sm:$0xf] }
 0x197   : > { %v16158_v0 = vadd.f32 %v3541_v23, %v3523_v34  ;;  %3876 = vmatpush.bf16.msra.mxu1 %v10244_v49  ;;  %v3506_v8 = vadd.f32 %v3505_v26, %v3487_v29  ;;  %v10296_v49 = vor.u32 %v12774_v30, %v10295_v20  ;;  %v12823_v23 = vld [vmem:[%s20108_s3 + $0x784] sm:$0xf0]  ;;  %v10264_v39 = vor.u32 %v12766_v6, %v10263_v28  ;;  %v12778_v28 = vld [vmem:[%s20108_s3 + $0x204] sm:$0xf] }
 0x198   : > { %4693 = vmatpush.bf16.msra.mxu2 %v10424_v55  ;;  %v10137_v55 = vld [vmem:[%s20106_s1 + $0xb88] sm:$0xf0]  ;;  %v10496_v22 = vor.u32 %v12823_v23, %v10495_v3  ;;  %v10329_v6 = vld [vmem:[%s20108_s3 + $0x280] sm:$0xf0]  ;;  %v10303_v3 = vld [vmem:[%s20108_s3 + $0x108] sm:$0xf] }
 0x199   : > { %v12775_v23 = vld [vmem:[%s20108_s3 + $0x184] sm:$0xf0] }
 0x19a   : > { %3858 = vmatpush.bf16.msra.mxu0 %v10172_v40  ;;  %v10140_v40 = vor.u32 %v12730_v50, %v10137_v55 }
 0x19b   : > { %3877 = vmatpush.bf16.msra.mxu1 %v10236_v7  ;;  %v16198_v16 = vpop.f32.mrf.mxu3 }
 0x19c   : > { %4694 = vmatpush.bf16.msra.mxu2 %v10392_v60  ;;  %v3524_v58 = vpop.f32.mrf.mxu2  ;;  %v3489_v14 = vpop.f32.mrf.mxu0  ;;  %v10204_v60 = vor.u32 %v12746_v11, %v10201_v33  ;;  %v10335_v11 = vld [vmem:[%s20108_s3 + $0x208] sm:$0xf] }
 0x19d   : > { %v16196_v32 = vadd.f32 %v3524_v58, %v3506_v8  ;;  %v3490_v54 = vadd.f32 %v3489_v14, %v16088_v5  ;;  %v10457_v8 = vld [vmem:[%s20108_s3 + $0x680] sm:$0xf0]  ;;  %v10431_v58 = vld [vmem:[%s20108_s3 + $0x508] sm:$0xf] }
 0x19e   : > { %v3508_v56 = vpop.f32.mrf.mxu1  ;;  %3859 = vmatpush.bf16.msra.mxu0 %v10164_v38  ;;  %3811 = vmatmul.bf16.gmra.mxu1 %v20154_v53  ;;  %v12810_v38 = vld [vmem:[%s20108_s3 + $0x604] sm:$0xf]  ;;  %v12783_v33 = vld [vmem:[%s20108_s3 + $0x284] sm:$0xf0] }
 0x19f   : > { %3878 = vmatpush.bf16.msra.mxu1 %v10228_v25  ;;  %v3509_v5 = vadd.f32 %v3508_v56, %v3490_v54  ;;  %3792 = vmatmul.bf16.gmra.mxu0 %v20153_v19  ;;  %v10460_v14 = vor.u32 %v12810_v38, %v10457_v8  ;;  %v12802_v54 = vld [vmem:[%s20108_s3 + $0x504] sm:$0xf]  ;;  %v10503_v38 = vld [vmem:[%s20108_s3 + $0x710] sm:$0xf] }
 0x1a0   : > { %4695 = vmatpush.bf16.msra.mxu2 %v10360_v10  ;;  %3849 = vmatmul.bf16.gmra.mxu3 %v20156_v18  ;;  %v10464_v10 = vor.u32 %v12815_v24, %v10463_v17  ;;  %v10425_v56 = vld [vmem:[%s20108_s3 + $0x580] sm:$0xf0]  ;;  %v12791_v18 = vld [vmem:[%s20108_s3 + $0x384] sm:$0xf0]  ;;  %v10304_v17 = vor.u32 %v12775_v23, %v10303_v3  ;;  %v12787_v23 = vld [vmem:[%s20108_s3 + $0x30c] sm:$0xf] }
 0x1a1   : > { %3830 = vmatmul.bf16.gmra.mxu2 %v20155_v2  ;;  %v10428_v44 = vor.u32 %v12802_v54, %v10425_v56  ;;  %v10367_v2 = vld [vmem:[%s20108_s3 + $0x308] sm:$0xf]  ;;  %v12762_v8 = vld [vmem:[%s20108_s3 + $0x4] sm:$0xf] }
 0x1a2   : > { %3860 = vmatpush.bf16.msra.mxu0 %v10156_v63  ;;  %v10368_v55 = vor.u32 %v12791_v18, %v10367_v2  ;;  %v12767_v24 = vld [vmem:[%s20108_s3 + $0x84] sm:$0xf0]  ;;  %v10433_v2 = vld [vmem:[%s20108_s3 + $0x588] sm:$0xf0] }
 0x1a3   : > { %3879 = vmatpush.bf16.msra.mxu1 %v10220_v27  ;;  %v3546_v41 = vpop.f32.mrf.mxu3  ;;  %v20157_v27 = vld [vmem:[#allocation13_spill] sm:$0xff] }
 0x1a4   : > { %4696 = vmatpush.bf16.msra.mxu2 %v10328_v48  ;;  %v3527_v9 = vpop.f32.mrf.mxu2  ;;  %v3491_v34 = vpop.f32.mrf.mxu0  ;;  %v10432_v48 = vor.u32 %v12807_v13, %v10431_v58  ;;  %v12819_v13 = vld [vmem:[%s20108_s3 + $0x70c] sm:$0xf] }
 0x1a5   : > { %v3528_v57 = vadd.f32 %v3527_v9, %v3509_v5  ;;  %v3492_v29 = vadd.f32 %v3491_v34, %v3473_v42  ;;  %v3544_v5 = vadd.f32 %v16198_v16, %v16196_v32  ;;  %v12786_v32 = vld [vmem:[%s20108_s3 + $0x304] sm:$0xf] }
 0x1a6   : > { %v3510_v26 = vpop.f32.mrf.mxu1  ;;  %3861 = vmatpush.bf16.msra.mxu0 %v10148_v52  ;;  %v10361_v16 = vld [vmem:[%s20108_s3 + $0x380] sm:$0xf0] }
 0x1a7   : > { %v16255_v7 = vadd.f32 %v3546_v41, %v3528_v57  ;;  %3880 = vmatpush.bf16.msra.mxu1 %v10212_v37  ;;  %v3511_v31 = vadd.f32 %v3510_v26, %v3492_v29  ;;  %v10364_v42 = vor.u32 %v12786_v32, %v10361_v16  ;;  %v10336_v57 = vor.u32 %v12783_v33, %v10335_v11  ;;  %v10407_v11 = vld [vmem:[%s20108_s3 + $0x410] sm:$0xf] }
 0x1a8   : > { %4697 = vmatpush.bf16.msra.mxu2 %v10296_v49  ;;  %v12800_v33 = vld [vmem:[%s20108_s3 + $0x48c] sm:$0xf0] }
 0x1aa   : > { %3862 = vmatpush.bf16.msra.mxu0 %v10140_v40  ;;  %v10332_v40 = vor.u32 %v12778_v28, %v10329_v6  ;;  %v10408_v28 = vor.u32 %v12800_v33, %v10407_v11  ;;  %v12809_v11 = vld [vmem:[%s20108_s3 + $0x594] sm:$0xf0]  ;;  %v12804_v33 = vld [vmem:[%s20108_s3 + $0x514] sm:$0xf] }
 0x1ab   : > { %3881 = vmatpush.bf16.msra.mxu1 %v10204_v60  ;;  %v16271_v45 = vpop.f32.mrf.mxu3  ;;  %v12770_v60 = vld [vmem:[%s20108_s3 + $0x104] sm:$0xf] }
 0x1ac   : > { %4698 = vmatpush.bf16.msra.mxu2 %v10264_v39  ;;  %v3529_v25 = vpop.f32.mrf.mxu2  ;;  %v3560_v43 = vpop.f32.mrf.mxu0  ;;  %v10297_v39 = vld [vmem:[%s20108_s3 + $0x180] sm:$0xf0] }
 0x1ad   : > { %v16269_v51 = vadd.f32 %v3529_v25, %v3511_v31  ;;  %v3561_v46 = vadd.f32 %v3560_v43, %v16158_v0  ;;  %v10399_v0 = vld [vmem:[%s20108_s3 + $0x408] sm:$0xf]  ;;  %v10300_v31 = vor.u32 %v12770_v60, %v10297_v39  ;;  %v10265_v25 = vld [vmem:[%s20108_s3 + $0x80] sm:$0xf0] }
 0x1ae   : > { %4729 = vmatpush.bf16.msrb.mxu0 %v10492_v4  ;;  %v3579_v59 = vpop.f32.mrf.mxu1  ;;  %3882 = vmatmul.bf16.vlgmr.msra.gmra.mxu1 %v15003_v21  ;;  %v10393_v21 = vld [vmem:[%s20108_s3 + $0x480] sm:$0xf0]  ;;  %v10400_v47 = vor.u32 %v12799_v15, %v10399_v0 }
 0x1af   : > { %v3580_v63 = vadd.f32 %v3579_v59, %v3561_v46  ;;  %3863 = vmatmul.bf16.vlgmr.msra.gmra.mxu0 %v20157_v27  ;;  %v10396_v37 = vor.u32 %v12794_v35, %v10393_v21  ;;  %v10497_v46 = vld [vmem:[%s20108_s3 + $0x788] sm:$0xf0] }
 0x1b0   : > { %4767 = vmatpush.bf16.msrb.mxu2 %v10496_v22  ;;  %v20158_v22 = vld [vmem:[#allocation17_spill] sm:$0xff]  ;;  %v10500_v15 = vor.u32 %v12819_v13, %v10497_v46  ;;  %v10465_v35 = vld [vmem:[%s20108_s3 + $0x688] sm:$0xf0] }
 0x1b1   : > { %4699 = vmatmul.bf16.vlgmr.msra.gmra.mxu2 %v15980_v1 }
 0x1b2   : > { %4730 = vmatpush.bf16.msrb.mxu0 %v10460_v14 }
 0x1b3   : > { %v3617_v53 = vpop.f32.mrf.mxu3 }
 0x1b4   : > { %4768 = vmatpush.bf16.msrb.mxu2 %v10464_v10  ;;  %v3598_v19 = vpop.f32.mrf.mxu2  ;;  %v3562_v30 = vpop.f32.mrf.mxu0  ;;  %v3549_v10 = vadd.f32 %v16271_v45, %v16269_v51  ;;  %v10471_v51 = vld [vmem:[%s20108_s3 + $0x610] sm:$0xf] }
 0x1b5   : > { %v3599_v20 = vadd.f32 %v3598_v19, %v3580_v63  ;;  %v3563_v52 = vadd.f32 %v3562_v30, %v3544_v5  ;;  %v12816_v45 = vld [vmem:[%s20108_s3 + $0x68c] sm:$0xf0] }
 0x1b6   : > { %v3581_v50 = vpop.f32.mrf.mxu1  ;;  %4731 = vmatpush.bf16.msrb.mxu0 %v10428_v44  ;;  %v12811_v44 = vld [vmem:[%s20108_s3 + $0x60c] sm:$0xf]  ;;  %v10472_v21 = vor.u32 %v12816_v45, %v10471_v51  ;;  %v10511_v51 = vld [vmem:[%s20108_s3 + $0x718] sm:$0xf] }
 0x1b7   : > { %v16309_v49 = vadd.f32 %v3617_v53, %v3599_v20  ;;  %v3582_v9 = vadd.f32 %v3581_v50, %v3563_v52  ;;  %v10468_v19 = vor.u32 %v12811_v44, %v10465_v35  ;;  %v12808_v20 = vld [vmem:[%s20108_s3 + $0x58c] sm:$0xf0]  ;;  %v12803_v53 = vld [vmem:[%s20108_s3 + $0x50c] sm:$0xf]  ;;  %v12825_v45 = vld [vmem:[%s20108_s3 + $0x794] sm:$0xf0] }
 0x1b8   : > { %4769 = vmatpush.bf16.msrb.mxu2 %v10432_v48  ;;  %v10268_v48 = vor.u32 %v12762_v8, %v10265_v25  ;;  %v12771_v25 = vld [vmem:[%s20108_s3 + $0x10c] sm:$0xf] }
 0x1ba   : > { %4732 = vmatpush.bf16.msrb.mxu0 %v10396_v37 }
 0x1bb   : > { %v16331_v61 = vpop.f32.mrf.mxu3 }
 0x1bc   : > { %4770 = vmatpush.bf16.msrb.mxu2 %v10400_v47  ;;  %v3600_v36 = vpop.f32.mrf.mxu2  ;;  %v3565_v41 = vpop.f32.mrf.mxu0  ;;  %v10439_v47 = vld [vmem:[%s20108_s3 + $0x510] sm:$0xf] }
 0x1bd   : > { %v16329_v34 = vadd.f32 %v3600_v36, %v3582_v9  ;;  %v3566_v29 = vadd.f32 %v3565_v41, %v16255_v7  ;;  %v10271_v7 = vld [vmem:[%s20108_s3 + $0x8] sm:$0xf]  ;;  %v10440_v16 = vor.u32 %v12808_v20, %v10439_v47  ;;  %v10401_v9 = vld [vmem:[%s20108_s3 + $0x488] sm:$0xf0]  ;;  %v10375_v36 = vld [vmem:[%s20108_s3 + $0x310] sm:$0xf] }
 0x1be   : > { %v3584_v26 = vpop.f32.mrf.mxu1  ;;  %4733 = vmatpush.bf16.msrb.mxu0 %v10364_v42  ;;  %3887 = vmatmul.bf16.gmra.mxu1 %v15113_v62  ;;  %v12824_v62 = vld [vmem:[%s20108_s3 + $0x78c] sm:$0xf0]  ;;  %v10272_v58 = vor.u32 %v12767_v24, %v10271_v7  ;;  %v10337_v7 = vld [vmem:[%s20108_s3 + $0x288] sm:$0xf0]  ;;  %v10479_v20 = vld [vmem:[%s20108_s3 + $0x618] sm:$0xf] }
 0x1bf   : > { %v3585_v4 = vadd.f32 %v3584_v26, %v3566_v29  ;;  %3868 = vmatmul.bf16.gmra.mxu0 %v20158_v22  ;;  %v10504_v56 = vor.u32 %v12824_v62, %v10503_v38  ;;  %v3620_v41 = vadd.f32 %v16331_v61, %v16329_v34  ;;  %v10369_v29 = vld [vmem:[%s20108_s3 + $0x388] sm:$0xf0]  ;;  %v10343_v61 = vld [vmem:[%s20108_s3 + $0x210] sm:$0xf] }
 0x1c0   : > { %4771 = vmatpush.bf16.msrb.mxu2 %v10368_v55  ;;  %v10436_v55 = vor.u32 %v12803_v53, %v10433_v2  ;;  %v10372_v34 = vor.u32 %v12787_v23, %v10369_v29  ;;  %v12784_v22 = vld [vmem:[%s20108_s3 + $0x28c] sm:$0xf0]  ;;  %v12812_v2 = vld [vmem:[%s20108_s3 + $0x614] sm:$0xf] }
 0x1c1   : > { %4704 = vmatmul.bf16.gmra.mxu2 %v16090_v12  ;;  %v10344_v24 = vor.u32 %v12784_v22, %v10343_v61  ;;  %v10311_v38 = vld [vmem:[%s20108_s3 + $0x110] sm:$0xf]  ;;  %v12796_v29 = vld [vmem:[%s20108_s3 + $0x414] sm:$0xf]  ;;  %v12793_v61 = vld [vmem:[%s20108_s3 + $0x394] sm:$0xf0] }
 0x1c2   : > { %4734 = vmatpush.bf16.msrb.mxu0 %v10332_v40  ;;  %v12776_v62 = vld [vmem:[%s20108_s3 + $0x18c] sm:$0xf0] }
 0x1c3   : > { %v3622_v54 = vpop.f32.mrf.mxu3 }
 0x1c4   : > { %4772 = vmatpush.bf16.msrb.mxu2 %v10336_v57  ;;  %v3603_v43 = vpop.f32.mrf.mxu2  ;;  %v3567_v14 = vpop.f32.mrf.mxu0  ;;  %v12792_v57 = vld [vmem:[%s20108_s3 + $0x38c] sm:$0xf0] }
 0x1c5   : > { %v3604_v59 = vadd.f32 %v3603_v43, %v3585_v4  ;;  %v3568_v63 = vadd.f32 %v3567_v14, %v3549_v10  ;;  %v10376_v4 = vor.u32 %v12792_v57, %v10375_v36  ;;  %v10305_v10 = vld [vmem:[%s20108_s3 + $0x188] sm:$0xf0]  ;;  %v12801_v36 = vld [vmem:[%s20108_s3 + $0x494] sm:$0xf0] }
 0x1c6   : > { %v3586_v27 = vpop.f32.mrf.mxu1  ;;  %4735 = vmatpush.bf16.msrb.mxu0 %v10300_v31  ;;  %v10308_v14 = vor.u32 %v12771_v25, %v10305_v10  ;;  %v12785_v25 = vld [vmem:[%s20108_s3 + $0x294] sm:$0xf0] }
 0x1c7   : > { %v16381_v0 = vadd.f32 %v3622_v54, %v3604_v59  ;;  %v3587_v5 = vadd.f32 %v3586_v27, %v3568_v63  ;;  %v10312_v59 = vor.u32 %v12776_v62, %v10311_v38  ;;  %v12763_v54 = vld [vmem:[%s20108_s3 + $0xc] sm:$0xf]  ;;  %v12768_v63 = vld [vmem:[%s20108_s3 + $0x8c] sm:$0xf0]  ;;  %v10351_v62 = vld [vmem:[%s20108_s3 + $0x218] sm:$0xf] }
 0x1c8   : > { %4773 = vmatpush.bf16.msrb.mxu2 %v10304_v17  ;;  %v12779_v17 = vld [vmem:[%s20108_s3 + $0x20c] sm:$0xf] }
 0x1c9   : > { %v10340_v31 = vor.u32 %v12779_v17, %v10337_v7  ;;  %v12788_v7 = vld [vmem:[%s20108_s3 + $0x314] sm:$0xf] }
 0x1ca   : > { %4736 = vmatpush.bf16.msrb.mxu0 %v10268_v48  ;;  %v10273_v48 = vld [vmem:[%s20108_s3 + $0x88] sm:$0xf0] }
 0x1cb   : > { %v16403_v52 = vpop.f32.mrf.mxu3  ;;  %v10276_v35 = vor.u32 %v12763_v54, %v10273_v48  ;;  %v10319_v54 = vld [vmem:[%s20108_s3 + $0x118] sm:$0xf]  ;;  %v12772_v48 = vld [vmem:[%s20108_s3 + $0x114] sm:$0xf] }
 0x1cc   : > { %4774 = vmatpush.bf16.msrb.mxu2 %v10272_v58  ;;  %v3605_v30 = vpop.f32.mrf.mxu2  ;;  %v3636_v50 = vpop.f32.mrf.mxu0 }
 0x1cd   : > { %v16401_v18 = vadd.f32 %v3605_v30, %v3587_v5  ;;  %v3637_v37 = vadd.f32 %v3636_v50, %v16309_v49  ;;  %v12795_v49 = vld [vmem:[%s20108_s3 + $0x40c] sm:$0xf]  ;;  %v12817_v30 = vld [vmem:[%s20108_s3 + $0x694] sm:$0xf0] }
 0x1ce   : > { %4805 = vmatpush.bf16.msra.mxu0 %v10500_v15  ;;  %v3655_v32 = vpop.f32.mrf.mxu1  ;;  %v10404_v6 = vor.u32 %v12795_v49, %v10401_v9  ;;  %v10505_v15 = vld [vmem:[%s20108_s3 + $0x790] sm:$0xf0] }
 0x1cf   : > { %v16412_v42 = vadd.f32 %v3655_v32, %v3637_v37  ;;  %4737 = vmatmul.bf16.vlgmr.msrb.gmra.mxu0 %v15980_v1  ;;  %v3625_v5 = vadd.f32 %v16403_v52, %v16401_v18  ;;  %v10473_v18 = vld [vmem:[%s20108_s3 + $0x690] sm:$0xf0]  ;;  %v10480_v32 = vor.u32 %v12817_v30, %v10479_v20  ;;  %v10743_v30 = vld [vmem:[%s20108_s3 + $0xf00] sm:$0xf] }
 0x1d0   : > { %4843 = vmatpush.bf16.msra.mxu2 %v10504_v56  ;;  %v10279_v56 = vld [vmem:[%s20108_s3 + $0x10] sm:$0xf]  ;;  %v10441_v49 = vld [vmem:[%s20108_s3 + $0x590] sm:$0xf0] }
 0x1d1   : > { %4775 = vmatmul.bf16.vlgmr.msrb.gmra.mxu2 %v15980_v1  ;;  %v10280_v44 = vor.u32 %v12768_v63, %v10279_v56  ;;  %v12777_v56 = vld [vmem:[%s20108_s3 + $0x194] sm:$0xf0] }
 0x1d2   : > { %4806 = vmatpush.bf16.msra.mxu0 %v10468_v19 }
 0x1d3   : > { %v16438_v40 = vpop.f32.mrf.mxu3 }
 0x1d4   : > { %4844 = vmatpush.bf16.msra.mxu2 %v10472_v21  ;;  %v16430_v3 = vpop.f32.mrf.mxu2  ;;  %v3638_v26 = vpop.f32.mrf.mxu0  ;;  %v10512_v21 = vor.u32 %v12825_v45, %v10511_v51  ;;  %v10313_v51 = vld [vmem:[%s20108_s3 + $0x190] sm:$0xf0] }
 0x1d5   : > { %v16440_v60 = vadd.f32 %v3638_v26, %v3620_v41  ;;  %v10444_v41 = vor.u32 %v12804_v33, %v10441_v49  ;;  %v10409_v26 = vld [vmem:[%s20108_s3 + $0x490] sm:$0xf0]  ;;  %v10316_v20 = vor.u32 %v12772_v48, %v10313_v51  ;;  %v12821_v49 = vld [vmem:[%s20108_s3 + $0x71c] sm:$0xf]  ;;  %v12870_v48 = vld [vmem:[%s20108_s3 + $0xd7c] sm:$0xf0] }
 0x1d6   : > { %4807 = vmatpush.bf16.msra.mxu0 %v10436_v55  ;;  %v16442_v39 = vpop.f32.mrf.mxu1  ;;  %v10447_v55 = vld [vmem:[%s20108_s3 + $0x518] sm:$0xf]  ;;  %v10412_v17 = vor.u32 %v12796_v29, %v10409_v26  ;;  %v12942_v29 = vld [vmem:[%s20108_s3 + $0x69c] sm:$0xf0]  ;;  %v12866_v51 = vld [vmem:[%s20108_s3 + $0xd04] sm:$0xf] }
 0x1d7   : > { %v10448_v9 = vor.u32 %v12809_v11, %v10447_v55  ;;  %v10745_v11 = vld [vmem:[%s20108_s3 + $0xf80] sm:$0xf0] }
 0x1d8   : > { %4845 = vmatpush.bf16.msra.mxu2 %v10440_v16  ;;  %v10476_v16 = vor.u32 %v12812_v2, %v10473_v18  ;;  %v12882_v2 = vld [vmem:[%s20108_s3 + $0xf04] sm:$0xf] }
 0x1da   : > { %4808 = vmatpush.bf16.msra.mxu0 %v10404_v6  ;;  %v10415_v6 = vld [vmem:[%s20108_s3 + $0x418] sm:$0xf] }
 0x1db   : > { %v16470_v58 = vpop.f32.mrf.mxu3 }
 0x1dc   : > { %4846 = vmatpush.bf16.msra.mxu2 %v10408_v28  ;;  %v16462_v8 = vpop.f32.mrf.mxu2  ;;  %v3641_v43 = vpop.f32.mrf.mxu0 }
 0x1dd   : > { %v3642_v13 = vadd.f32 %v3641_v43, %v16381_v0  ;;  %v12820_v0 = vld [vmem:[%s20108_s3 + $0x714] sm:$0xf] }
 0x1de   : > { %4809 = vmatpush.bf16.msra.mxu0 %v10372_v34  ;;  %v3660_v46 = vpop.f32.mrf.mxu1  ;;  %v10508_v47 = vor.u32 %v12820_v0, %v10505_v15  ;;  %v10383_v34 = vld [vmem:[%s20108_s3 + $0x318] sm:$0xf]  ;;  %v10320_v0 = vor.u32 %v12777_v56, %v10319_v54 }
 0x1df   : > { %v16482_v27 = vadd.f32 %v3660_v46, %v3642_v13  ;;  %4742 = vmatmul.bf16.gmra.mxu0 %v16090_v12  ;;  %v12780_v46 = vld [vmem:[%s20108_s3 + $0x214] sm:$0xf]  ;;  %v10287_v15 = vld [vmem:[%s20108_s3 + $0x18] sm:$0xf] }
 0x1e0   : > { %4847 = vmatpush.bf16.msra.mxu2 %v10376_v4  ;;  %v10416_v4 = vor.u32 %v12801_v36, %v10415_v6  ;;  %v10748_v6 = vor.u32 %v12882_v2, %v10745_v11  ;;  %v10903_v2 = vld [vmem:[%s20108_s3 + $0x420] sm:$0xf] }
 0x1e1   : > { %4780 = vmatmul.bf16.gmra.mxu2 %v16090_v12 }
 0x1e2   : > { %4810 = vmatpush.bf16.msra.mxu0 %v10340_v31  ;;  %v10384_v31 = vor.u32 %v12793_v61, %v10383_v34  ;;  %v12878_v34 = vld [vmem:[%s20108_s3 + $0xe7c] sm:$0xf0]  ;;  %v12874_v61 = vld [vmem:[%s20108_s3 + $0xe04] sm:$0xf]  ;;  %4748 = vmatpush.bf16.msrb.mxu1 %v10748_v6 }
 0x1e3   : > { %v16521_v37 = vpop.f32.mrf.mxu3 }
 0x1e4   : > { %4848 = vmatpush.bf16.msra.mxu2 %v10344_v24  ;;  %v16503_v19 = vpop.f32.mrf.mxu2  ;;  %v3643_v53 = vpop.f32.mrf.mxu0  ;;  %v10377_v24 = vld [vmem:[%s20108_s3 + $0x390] sm:$0xf0] }
 0x1e5   : > { %v16517_v52 = vadd.f32 %v3643_v53, %v3625_v5  ;;  %v10380_v43 = vor.u32 %v12788_v7, %v10377_v24  ;;  %v12950_v5 = vld [vmem:[%s20108_s3 + $0x79c] sm:$0xf0]  ;;  %v10713_v24 = vld [vmem:[%s20108_s3 + $0xe80] sm:$0xf0] }
 0x1e6   : > { %4811 = vmatpush.bf16.msra.mxu0 %v10308_v14  ;;  %v16519_v50 = vpop.f32.mrf.mxu1  ;;  %v10352_v14 = vor.u32 %v12785_v25, %v10351_v62  ;;  %v12886_v53 = vld [vmem:[%s20108_s3 + $0xf7c] sm:$0xf0]  ;;  %v10481_v62 = vld [vmem:[%s20108_s3 + $0x698] sm:$0xf0]  ;;  %v10716_v25 = vor.u32 %v12874_v61, %v10713_v24  ;;  %v12850_v24 = vld [vmem:[%s20108_s3 + $0xb04] sm:$0xf] }
 0x1e7   : > { %v10744_v55 = vor.u32 %v12886_v53, %v10743_v30 }
 0x1e8   : > { %4849 = vmatpush.bf16.msra.mxu2 %v10312_v59  ;;  %v10345_v59 = vld [vmem:[%s20108_s3 + $0x290] sm:$0xf0]  ;;  %4749 = vmatpush.bf16.msrb.mxu1 %v10716_v25 }
 0x1e9   : > { %v10348_v63 = vor.u32 %v12780_v46, %v10345_v59  ;;  %4710 = vmatpush.bf16.msra.mxu3 %v10744_v55  ;;  %v10935_v59 = vld [vmem:[%s20108_s3 + $0x520] sm:$0xf] }
 0x1ea   : > { %4812 = vmatpush.bf16.msra.mxu0 %v10276_v35  ;;  %v12769_v35 = vld [vmem:[%s20108_s3 + $0x94] sm:$0xf0]  ;;  %v12926_v55 = vld [vmem:[%s20108_s3 + $0x49c] sm:$0xf0] }
 0x1eb   : > { %v16560_v22 = vpop.f32.mrf.mxu3  ;;  %v10288_v33 = vor.u32 %v12769_v35, %v10287_v15 }
 0x1ec   : > { %4850 = vmatpush.bf16.msra.mxu2 %v10280_v44  ;;  %v16535_v28 = vpop.f32.mrf.mxu2  ;;  %v16543_v57 = vpop.f32.mrf.mxu0 }
 0x1ee   : > { %4881 = vmatpush.bf16.msrb.mxu0 %v10508_v47  ;;  %v16545_v23 = vpop.f32.mrf.mxu1 }
 0x1ef   : > { %4813 = vmatmul.bf16.vlgmr.msra.gmra.mxu0 %v15980_v1 }
 0x1f0   : > { %4919 = vmatpush.bf16.msrb.mxu2 %v10512_v21  ;;  %v10999_v21 = vld [vmem:[%s20108_s3 + $0x720] sm:$0xf] }
 0x1f1   : > { %4851 = vmatmul.bf16.vlgmr.msra.gmra.mxu2 %v15980_v1  ;;  %v11000_v36 = vor.u32 %v12950_v5, %v10999_v21  ;;  %v10681_v21 = vld [vmem:[%s20108_s3 + $0xd80] sm:$0xf0]  ;;  %v12805_v5 = vld [vmem:[%s20108_s3 + $0x51c] sm:$0xf] }
 0x1f2   : > { %4882 = vmatpush.bf16.msrb.mxu0 %v10476_v16  ;;  %v10281_v16 = vld [vmem:[%s20108_s3 + $0x90] sm:$0xf0]  ;;  %v10684_v30 = vor.u32 %v12866_v51, %v10681_v21  ;;  %v10583_v21 = vld [vmem:[%s20108_s3 + $0xa00] sm:$0xf] }
 0x1f3   : > { %v16599_v45 = vpop.f32.mrf.mxu3 }
 0x1f4   : > { %4920 = vmatpush.bf16.msrb.mxu2 %v10480_v32  ;;  %v16569_v38 = vpop.f32.mrf.mxu2  ;;  %v16577_v10 = vpop.f32.mrf.mxu0  ;;  %v12764_v32 = vld [vmem:[%s20108_s3 + $0x14] sm:$0xf]  ;;  %4750 = vmatpush.bf16.msrb.mxu1 %v10684_v30 }
 0x1f5   : > { %v10284_v26 = vor.u32 %v12764_v32, %v10281_v16  ;;  %v10647_v32 = vld [vmem:[%s20108_s3 + $0xc00] sm:$0xf] }
 0x1f6   : > { %4883 = vmatpush.bf16.msrb.mxu0 %v10444_v41  ;;  %v16579_v13 = vpop.f32.mrf.mxu1  ;;  %v10967_v41 = vld [vmem:[%s20108_s3 + $0x620] sm:$0xf] }
 0x1f7   : > { %v10968_v46 = vor.u32 %v12942_v29, %v10967_v41  ;;  %v12862_v16 = vld [vmem:[%s20108_s3 + $0xc7c] sm:$0xf0]  ;;  %v10417_v41 = vld [vmem:[%s20108_s3 + $0x498] sm:$0xf0] }
 0x1f8   : > { %4921 = vmatpush.bf16.msrb.mxu2 %v10448_v9  ;;  %v10513_v9 = vld [vmem:[%s20108_s3 + $0x798] sm:$0xf0]  ;;  %v10648_v11 = vor.u32 %v12862_v16, %v10647_v32  ;;  %v3675_v32 = vadd.f32 %v16430_v3, %v16412_v42  ;;  %v12902_v42 = vld [vmem:[%s20108_s3 + $0x19c] sm:$0xf0]  ;;  %v3658_v3 = vadd.f32 %v16442_v39, %v16440_v60  ;;  %v10553_v39 = vld [vmem:[%s20108_s3 + $0x980] sm:$0xf0] }
 0x1f9   : > { %v12781_v16 = vld [vmem:[%s20108_s3 + $0x21c] sm:$0xf] }
 0x1fa   : > { %4884 = vmatpush.bf16.msrb.mxu0 %v10412_v17  ;;  %v10516_v17 = vor.u32 %v12821_v49, %v10513_v9  ;;  %v10649_v49 = vld [vmem:[%s20108_s3 + $0xc80] sm:$0xf0] }
 0x1fb   : > { %v16677_v54 = vpop.f32.mrf.mxu3 }
 0x1fc   : > { %4922 = vmatpush.bf16.msrb.mxu2 %v10416_v4  ;;  %v16604_v44 = vpop.f32.mrf.mxu2  ;;  %v16615_v47 = vpop.f32.mrf.mxu0  ;;  %v10711_v4 = vld [vmem:[%s20108_s3 + $0xe00] sm:$0xf] }
 0x1fd   : > { %v10712_v7 = vor.u32 %v12878_v34, %v10711_v4  ;;  %v10871_v4 = vld [vmem:[%s20108_s3 + $0x320] sm:$0xf] }
 0x1fe   : > { %4885 = vmatpush.bf16.msrb.mxu0 %v10380_v43  ;;  %v16626_v18 = vpop.f32.mrf.mxu1  ;;  %v12918_v34 = vld [vmem:[%s20108_s3 + $0x39c] sm:$0xf0] }
 0x1ff   : > { %4818 = vmatmul.bf16.gmra.mxu0 %v16090_v12  ;;  %4711 = vmatpush.bf16.msra.mxu3 %v10712_v7  ;;  %v12854_v7 = vld [vmem:[%s20108_s3 + $0xb7c] sm:$0xf0]  ;;  %v10872_v51 = vor.u32 %v12918_v34, %v10871_v4 }
 0x200   : > { %4923 = vmatpush.bf16.msrb.mxu2 %v10384_v31  ;;  %v12813_v31 = vld [vmem:[%s20108_s3 + $0x61c] sm:$0xf] }
 0x201   : > { %4856 = vmatmul.bf16.gmra.mxu2 %v16090_v12  ;;  %v10484_v15 = vor.u32 %v12813_v31, %v10481_v62 }
 0x202   : > { %4886 = vmatpush.bf16.msrb.mxu0 %v10348_v63  ;;  %v10679_v63 = vld [vmem:[%s20108_s3 + $0xd00] sm:$0xf] }
 0x203   : > { %v10680_v35 = vor.u32 %v12870_v48, %v10679_v63  ;;  %v10385_v63 = vld [vmem:[%s20108_s3 + $0x398] sm:$0xf0] }
 0x204   : > { %4924 = vmatpush.bf16.msrb.mxu2 %v10352_v14  ;;  %v16669_v43 = vpop.f32.mrf.mxu2  ;;  %v12934_v14 = vld [vmem:[%s20108_s3 + $0x59c] sm:$0xf0]  ;;  %v16679_v56 = vpop.f32.mrf.mxu0 }
 0x205   : > { %v10936_v53 = vor.u32 %v12934_v14, %v10935_v59  ;;  %4712 = vmatpush.bf16.msra.mxu3 %v10680_v35  ;;  %v16749_v59 = vpop.f32.mrf.mxu3  ;;  %v12789_v14 = vld [vmem:[%s20108_s3 + $0x31c] sm:$0xf]  ;;  %v12910_v35 = vld [vmem:[%s20108_s3 + $0x29c] sm:$0xf0] }
 0x206   : > { %4887 = vmatpush.bf16.msrb.mxu0 %v10316_v20  ;;  %v10449_v20 = vld [vmem:[%s20108_s3 + $0x598] sm:$0xf0]  ;;  %v10388_v30 = vor.u32 %v12789_v14, %v10385_v63  ;;  %v10775_v14 = vld [vmem:[%s20108_s3 + $0x20] sm:$0xf] }
 0x207   : > { %v10452_v9 = vor.u32 %v12805_v5, %v10449_v20  ;;  %v12846_v5 = vld [vmem:[%s20108_s3 + $0xa7c] sm:$0xf0]  ;;  %v12842_v20 = vld [vmem:[%s20108_s3 + $0xa04] sm:$0xf] }
 0x208   : > { %4925 = vmatpush.bf16.msrb.mxu2 %v10320_v0  ;;  %v16690_v0 = vpop.f32.mrf.mxu1 }
 0x209   : > { %4713 = vmatpush.bf16.msra.mxu3 %v10648_v11 }
 0x20a   : > { %4888 = vmatpush.bf16.msrb.mxu0 %v10284_v26  ;;  %v10904_v26 = vor.u32 %v12926_v55, %v10903_v2  ;;  %v10585_v2 = vld [vmem:[%s20108_s3 + $0xa80] sm:$0xf0]  ;;  %v10353_v55 = vld [vmem:[%s20108_s3 + $0x298] sm:$0xf0] }
 0x20b   : > { %v10588_v11 = vor.u32 %v12842_v20, %v10585_v2  ;;  %v10356_v34 = vor.u32 %v12781_v16, %v10353_v55  ;;  %v12951_v2 = vld [vmem:[%s20108_s3 + $0x7a4] sm:$0xf0] }
 0x20c   : > { %4926 = vmatpush.bf16.msrb.mxu2 %v10288_v33  ;;  %v12858_v33 = vld [vmem:[%s20108_s3 + $0xc04] sm:$0xf]  ;;  %v16725_v29 = vpop.f32.mrf.mxu2  ;;  %v16733_v61 = vpop.f32.mrf.mxu0 }
 0x20d   : > { %v10652_v6 = vor.u32 %v12858_v33, %v10649_v49  ;;  %v16826_v63 = vpop.f32.mrf.mxu3 }
 0x20e   : > { %4957 = vmatpush.bf16.msra.mxu0 %v10516_v17  ;;  %v10615_v17 = vld [vmem:[%s20108_s3 + $0xb00] sm:$0xf] }
 0x20f   : > { %4751 = vmatpush.bf16.msrb.mxu1 %v10652_v6  ;;  %v10616_v25 = vor.u32 %v12854_v7, %v10615_v17  ;;  %4889 = vmatmul.bf16.vlgmr.msrb.gmra.mxu0 %v15980_v1  ;;  %v3694_v17 = vadd.f32 %v16438_v40, %v3675_v32  ;;  %v3677_v7 = vadd.f32 %v16462_v8, %v3658_v3  ;;  %v12894_v40 = vld [vmem:[%s20108_s3 + $0x9c] sm:$0xf0]  ;;  %v10751_v3 = vld [vmem:[%s20108_s3 + $0xf08] sm:$0xf] }
 0x210   : > { %5813 = vmatpush.bf16.msra.mxu2 %v11000_v36  ;;  %v12797_v36 = vld [vmem:[%s20108_s3 + $0x41c] sm:$0xf]  ;;  %v16744_v31 = vpop.f32.mrf.mxu1  ;;  %v10776_v55 = vor.u32 %v12894_v40, %v10775_v14  ;;  %v10719_v14 = vld [vmem:[%s20108_s3 + $0xe08] sm:$0xf]  ;;  %v12875_v40 = vld [vmem:[%s20108_s3 + $0xe0c] sm:$0xf] }
 0x211   : > { %v10420_v62 = vor.u32 %v12797_v36, %v10417_v41  ;;  %4927 = vmatmul.bf16.vlgmr.msrb.gmra.mxu2 %v15980_v1  ;;  %4714 = vmatpush.bf16.msra.mxu3 %v10616_v25  ;;  %v10551_v36 = vld [vmem:[%s20108_s3 + $0x900] sm:$0xf]  ;;  %v3713_v8 = vadd.f32 %v16543_v57, %v3694_v17  ;;  %v12765_v57 = vld [vmem:[%s20108_s3 + $0x1c] sm:$0xf]  ;;  %v3696_v20 = vadd.f32 %v16470_v58, %v3677_v7  ;;  %v12946_v58 = vld [vmem:[%s20108_s3 + $0x724] sm:$0xf] }
 0x212   : > { %4958 = vmatpush.bf16.msra.mxu0 %v10484_v15  ;;  %v10839_v15 = vld [vmem:[%s20108_s3 + $0x220] sm:$0xf]  ;;  %v10975_v17 = vld [vmem:[%s20108_s3 + $0x628] sm:$0xf] }
 0x213   : > { %v10840_v49 = vor.u32 %v12910_v35, %v10839_v15  ;;  %v12838_v41 = vld [vmem:[%s20108_s3 + $0x97c] sm:$0xf0]  ;;  %v12826_v15 = vld [vmem:[%s20108_s3 + $0x804] sm:$0xf]  ;;  %v12943_v7 = vld [vmem:[%s20108_s3 + $0x6a4] sm:$0xf0] }
 0x214   : > { %5814 = vmatpush.bf16.msra.mxu2 %v10968_v46  ;;  %v10617_v46 = vld [vmem:[%s20108_s3 + $0xb80] sm:$0xf0]  ;;  %v16785_v33 = vpop.f32.mrf.mxu2  ;;  %v16795_v6 = vpop.f32.mrf.mxu0  ;;  %v10552_v60 = vor.u32 %v12838_v41, %v10551_v36  ;;  %v12887_v36 = vld [vmem:[%s20108_s3 + $0xf84] sm:$0xf0]  ;;  %v12883_v41 = vld [vmem:[%s20108_s3 + $0xf0c] sm:$0xf] }
 0x215   : > { %v10620_v48 = vor.u32 %v12850_v24, %v10617_v46  ;;  %v12773_v24 = vld [vmem:[%s20108_s3 + $0x11c] sm:$0xf] }
 0x216   : > { %4959 = vmatpush.bf16.msra.mxu0 %v10452_v9  ;;  %v10807_v9 = vld [vmem:[%s20108_s3 + $0x120] sm:$0xf] }
 0x217   : > { %4752 = vmatpush.bf16.msrb.mxu1 %v10620_v48  ;;  %v10808_v46 = vor.u32 %v12902_v42, %v10807_v9  ;;  %v10519_v48 = vld [vmem:[%s20108_s3 + $0x800] sm:$0xf]  ;;  %v3715_v9 = vadd.f32 %v16577_v10, %v3696_v20 }
 0x218   : > { %5815 = vmatpush.bf16.msra.mxu2 %v10936_v53  ;;  %v10584_v53 = vor.u32 %v12846_v5, %v10583_v21  ;;  %v16806_v4 = vpop.f32.mrf.mxu1  ;;  %v10521_v5 = vld [vmem:[%s20108_s3 + $0x880] sm:$0xf0] }
 0x219   : > { %v10524_v32 = vor.u32 %v12826_v15, %v10521_v5  ;;  %v10721_v15 = vld [vmem:[%s20108_s3 + $0xe88] sm:$0xf0]  ;;  %v10943_v5 = vld [vmem:[%s20108_s3 + $0x528] sm:$0xf] }
 0x21a   : > { %4960 = vmatpush.bf16.msra.mxu0 %v10420_v62  ;;  %4715 = vmatpush.bf16.msra.mxu3 %v10584_v53  ;;  %v10321_v62 = vld [vmem:[%s20108_s3 + $0x198] sm:$0xf0]  ;;  %v11007_v53 = vld [vmem:[%s20108_s3 + $0x728] sm:$0xf]  ;;  %v10724_v20 = vor.u32 %v12875_v40, %v10721_v15 }
 0x21b   : > { %4753 = vmatpush.bf16.msrb.mxu1 %v10588_v11  ;;  %v10324_v35 = vor.u32 %v12773_v24, %v10321_v62  ;;  %v11001_v11 = vld [vmem:[%s20108_s3 + $0x7a0] sm:$0xf0]  ;;  %v11008_v10 = vor.u32 %v12951_v2, %v11007_v53 }
 0x21c   : > { %5816 = vmatpush.bf16.msra.mxu2 %v10904_v26  ;;  %v12834_v26 = vld [vmem:[%s20108_s3 + $0x904] sm:$0xf]  ;;  %v16853_v16 = vpop.f32.mrf.mxu2  ;;  %v16863_v42 = vpop.f32.mrf.mxu0 }
 0x21d   : > { %v10556_v25 = vor.u32 %v12834_v26, %v10553_v39  ;;  %v11004_v39 = vor.u32 %v12946_v58, %v11001_v11  ;;  %v3663_v58 = vadd.f32 %v16519_v50, %v16517_v52  ;;  %v12927_v52 = vld [vmem:[%s20108_s3 + $0x4a4] sm:$0xf0] }
 0x21e   : > { %4961 = vmatpush.bf16.msra.mxu0 %v10388_v30  ;;  %4716 = vmatpush.bf16.msra.mxu3 %v10552_v60  ;;  %v10289_v30 = vld [vmem:[%s20108_s3 + $0x98] sm:$0xf0]  ;;  %v10753_v60 = vld [vmem:[%s20108_s3 + $0xf88] sm:$0xf0] }
 0x21f   : > { %4754 = vmatpush.bf16.msrb.mxu1 %v10556_v25  ;;  %v10756_v24 = vor.u32 %v12883_v41, %v10753_v60  ;;  %4894 = vmatmul.bf16.gmra.mxu0 %v16090_v12  ;;  %v12938_v25 = vld [vmem:[%s20108_s3 + $0x624] sm:$0xf] }
 0x220   : > { %5817 = vmatpush.bf16.msra.mxu2 %v10872_v51  ;;  %v12830_v51 = vld [vmem:[%s20108_s3 + $0x87c] sm:$0xf0]  ;;  %v16874_v26 = vpop.f32.mrf.mxu1  ;;  %v10905_v60 = vld [vmem:[%s20108_s3 + $0x4a0] sm:$0xf0] }
 0x221   : > { %v10520_v21 = vor.u32 %v12830_v51, %v10519_v48  ;;  %4932 = vmatmul.bf16.gmra.mxu2 %v16090_v12  ;;  %v10976_v48 = vor.u32 %v12943_v7, %v10975_v17  ;;  %v10655_v17 = vld [vmem:[%s20108_s3 + $0xc08] sm:$0xf] }
 0x222   : > { %4962 = vmatpush.bf16.msra.mxu0 %v10356_v34  ;;  %v10752_v34 = vor.u32 %v12887_v36, %v10751_v3  ;;  %v10689_v36 = vld [vmem:[%s20108_s3 + $0xd88] sm:$0xf0] }
 0x223   : > { %4717 = vmatpush.bf16.msra.mxu3 %v10520_v21  ;;  %4755 = vmatpush.bf16.msrb.mxu1 %v10524_v32 }
 0x224   : > { %5818 = vmatpush.bf16.msra.mxu2 %v10840_v49  ;;  %v3732_v49 = vadd.f32 %v16545_v23, %v3713_v8  ;;  %v10292_v23 = vor.u32 %v12765_v57, %v10289_v30  ;;  %v3734_v8 = vadd.f32 %v16579_v13, %v3715_v9  ;;  %v16909_v57 = vpop.f32.mrf.mxu3  ;;  %v12935_v13 = vld [vmem:[%s20108_s3 + $0x5a4] sm:$0xf0]  ;;  %v16919_v2 = vpop.f32.mrf.mxu2 }
 0x225   : > { %v16927_v32 = vpop.f32.mrf.mxu0  ;;  %v10944_v9 = vor.u32 %v12935_v13, %v10943_v5 }
 0x226   : > { %4963 = vmatpush.bf16.msra.mxu0 %v10324_v35  ;;  %v3751_v62 = vadd.f32 %v16569_v38, %v3732_v49  ;;  %v12879_v38 = vld [vmem:[%s20108_s3 + $0xe84] sm:$0xf0]  ;;  %v3680_v35 = vadd.f32 %v16503_v19, %v16482_v27  ;;  %v3753_v53 = vadd.f32 %v16604_v44, %v3734_v8  ;;  %v12930_v27 = vld [vmem:[%s20108_s3 + $0x524] sm:$0xf]  ;;  %v12867_v44 = vld [vmem:[%s20108_s3 + $0xd0c] sm:$0xf] }
 0x227   : > { %4786 = vmatpush.bf16.msrb.mxu3 %v10752_v34  ;;  %v10720_v51 = vor.u32 %v12879_v38, %v10719_v14  ;;  %4824 = vmatpush.bf16.msra.mxu1 %v10756_v24  ;;  %v10937_v19 = vld [vmem:[%s20108_s3 + $0x5a0] sm:$0xf0]  ;;  %v10692_v50 = vor.u32 %v12867_v44, %v10689_v36  ;;  %v10879_v14 = vld [vmem:[%s20108_s3 + $0x328] sm:$0xf] }
 0x228   : > { %5819 = vmatpush.bf16.msra.mxu2 %v10808_v46  ;;  %v10969_v46 = vld [vmem:[%s20108_s3 + $0x6a0] sm:$0xf0]  ;;  %v3770_v30 = vadd.f32 %v16599_v45, %v3751_v62  ;;  %v12871_v45 = vld [vmem:[%s20108_s3 + $0xd84] sm:$0xf0]  ;;  %v16941_v49 = vpop.f32.mrf.mxu1  ;;  %v3699_v41 = vadd.f32 %v16521_v37, %v3680_v35  ;;  %v3772_v34 = vadd.f32 %v16677_v54, %v3753_v53  ;;  %v12859_v54 = vld [vmem:[%s20108_s3 + $0xc0c] sm:$0xf] }
 0x229   : > { %v10972_v21 = vor.u32 %v12938_v25, %v10969_v46  ;;  %v12922_v37 = vld [vmem:[%s20108_s3 + $0x424] sm:$0xf]  ;;  %v10657_v25 = vld [vmem:[%s20108_s3 + $0xc88] sm:$0xf0]  ;;  %v12919_v38 = vld [vmem:[%s20108_s3 + $0x3a4] sm:$0xf0] }
 0x22a   : > { %4964 = vmatpush.bf16.msra.mxu0 %v10292_v23  ;;  %v3789_v11 = vadd.f32 %v16733_v61, %v3770_v30  ;;  %v10940_v23 = vor.u32 %v12930_v27, %v10937_v19  ;;  %v3682_v61 = vadd.f32 %v16535_v28, %v3663_v58  ;;  %v12863_v28 = vld [vmem:[%s20108_s3 + $0xc84] sm:$0xf0]  ;;  %v3791_v24 = vadd.f32 %v16795_v6, %v3772_v34  ;;  %v10625_v27 = vld [vmem:[%s20108_s3 + $0xb88] sm:$0xf0] }
 0x22b   : > { %4787 = vmatpush.bf16.msrb.mxu3 %v10720_v51  ;;  %4825 = vmatpush.bf16.msra.mxu1 %v10724_v20  ;;  %v10908_v46 = vor.u32 %v12922_v37, %v10905_v60  ;;  %v10873_v51 = vld [vmem:[%s20108_s3 + $0x3a0] sm:$0xf0]  ;;  %v10880_v30 = vor.u32 %v12919_v38, %v10879_v14  ;;  %v10561_v14 = vld [vmem:[%s20108_s3 + $0x988] sm:$0xf0] }
 0x22c   : > { %5820 = vmatpush.bf16.msra.mxu2 %v10776_v55  ;;  %v10687_v55 = vld [vmem:[%s20108_s3 + $0xd08] sm:$0xf]  ;;  %v3808_v7 = vadd.f32 %v16744_v31, %v3789_v11  ;;  %v10660_v31 = vor.u32 %v12859_v54, %v10657_v25  ;;  %v3701_v6 = vadd.f32 %v16560_v22, %v3682_v61  ;;  %v16984_v8 = vpop.f32.mrf.mxu2  ;;  %v3847_v35 = vpop.f32.mrf.mxu3  ;;  %v3810_v13 = vadd.f32 %v16806_v4, %v3791_v24  ;;  %v10841_v11 = vld [vmem:[%s20108_s3 + $0x2a0] sm:$0xf0]  ;;  %v12835_v24 = vld [vmem:[%s20108_s3 + $0x90c] sm:$0xf] }
 0x22d   : > { %v10688_v3 = vor.u32 %v12871_v45, %v10687_v55  ;;  %v10623_v22 = vld [vmem:[%s20108_s3 + $0xb08] sm:$0xf] }
 0x22e   : > { %5851 = vmatpush.bf16.msrb.mxu0 %v11004_v39  ;;  %v3718_v39 = vadd.f32 %v16615_v47, %v3699_v41  ;;  %v10656_v47 = vor.u32 %v12863_v28, %v10655_v17  ;;  %v3827_v40 = vadd.f32 %v16785_v33, %v3808_v7  ;;  %v12855_v33 = vld [vmem:[%s20108_s3 + $0xb84] sm:$0xf0]  ;;  %v3720_v5 = vadd.f32 %v16679_v56, %v3701_v6  ;;  %v10809_v17 = vld [vmem:[%s20108_s3 + $0x1a0] sm:$0xf0] }
 0x22f   : > { %4788 = vmatpush.bf16.msrb.mxu3 %v10688_v3  ;;  %4826 = vmatpush.bf16.msra.mxu1 %v10692_v50  ;;  %v10624_v53 = vor.u32 %v12855_v33, %v10623_v22  ;;  %v10847_v56 = vld [vmem:[%s20108_s3 + $0x228] sm:$0xf]  ;;  %v3829_v58 = vadd.f32 %v16853_v16, %v3810_v13  ;;  %v12890_v6 = vld [vmem:[%s20108_s3 + $0x24] sm:$0xf] }
 0x230   : > { %5889 = vmatpush.bf16.msrb.mxu2 %v11008_v10  ;;  %v10911_v10 = vld [vmem:[%s20108_s3 + $0x428] sm:$0xf]  ;;  %v3737_v15 = vadd.f32 %v16626_v18, %v3718_v39  ;;  %v3883_v20 = vpop.f32.mrf.mxu1  ;;  %v12851_v18 = vld [vmem:[%s20108_s3 + $0xb0c] sm:$0xf]  ;;  %v3846_v44 = vadd.f32 %v16909_v57, %v3827_v40  ;;  %4965 = vmatmul.bf16.vlgmr.msra.gmra.mxu0 %v15980_v1  ;;  %v3739_v57 = vadd.f32 %v16690_v0, %v3720_v5  ;;  %v10777_v40 = vld [vmem:[%s20108_s3 + $0xa0] sm:$0xf0] }
 0x231   : > { %v10912_v62 = vor.u32 %v12927_v52, %v10911_v10  ;;  %v12911_v4 = vld [vmem:[%s20108_s3 + $0x2a4] sm:$0xf0]  ;;  %v10628_v45 = vor.u32 %v12851_v18, %v10625_v27  ;;  %5821 = vmatmul.bf16.vlgmr.msra.gmra.mxu2 %v15980_v1  ;;  %v10593_v10 = vld [vmem:[%s20108_s3 + $0xa88] sm:$0xf0]  ;;  %v3848_v60 = vadd.f32 %v3847_v35, %v3829_v58  ;;  %v11015_v5 = vld [vmem:[%s20108_s3 + $0x730] sm:$0xf] }
 0x232   : > { %5852 = vmatpush.bf16.msrb.mxu0 %v10972_v21  ;;  %v3864_v21 = vpop.f32.mrf.mxu0  ;;  %v3756_v19 = vadd.f32 %v16669_v43, %v3737_v15  ;;  %v12906_v43 = vld [vmem:[%s20108_s3 + $0x224] sm:$0xf]  ;;  %v12847_v16 = vld [vmem:[%s20108_s3 + $0xa84] sm:$0xf0]  ;;  %v10848_v36 = vor.u32 %v12911_v4, %v10847_v56  ;;  %v3758_v37 = vadd.f32 %v16725_v29, %v3739_v57  ;;  %v12947_v27 = vld [vmem:[%s20108_s3 + $0x72c] sm:$0xf] }
 0x233   : > { %4789 = vmatpush.bf16.msrb.mxu3 %v10656_v47  ;;  %4827 = vmatpush.bf16.msra.mxu1 %v10660_v31  ;;  %v3865_v3 = vadd.f32 %v3864_v21, %v3846_v44  ;;  %v10844_v50 = vor.u32 %v12906_v43, %v10841_v11  ;;  %v10815_v0 = vld [vmem:[%s20108_s3 + $0x128] sm:$0xf]  ;;  %v10983_v43 = vld [vmem:[%s20108_s3 + $0x630] sm:$0xf] }
 0x234   : > { %5890 = vmatpush.bf16.msrb.mxu2 %v10976_v48  ;;  %v12914_v48 = vld [vmem:[%s20108_s3 + $0x324] sm:$0xf]  ;;  %v3775_v52 = vadd.f32 %v16749_v59, %v3756_v19  ;;  %v12903_v61 = vld [vmem:[%s20108_s3 + $0x1a4] sm:$0xf0]  ;;  %v17045_v39 = vpop.f32.mrf.mxu2  ;;  %v3850_v38 = vpop.f32.mrf.mxu3  ;;  %v3777_v15 = vadd.f32 %v16826_v63, %v3758_v37  ;;  %v12952_v63 = vld [vmem:[%s20108_s3 + $0x7ac] sm:$0xf0] }
 0x235   : > { %v10876_v55 = vor.u32 %v12914_v48, %v10873_v51  ;;  %v12898_v59 = vld [vmem:[%s20108_s3 + $0x124] sm:$0xf]  ;;  %v10559_v7 = vld [vmem:[%s20108_s3 + $0x908] sm:$0xf]  ;;  %v10564_v48 = vor.u32 %v12835_v24, %v10561_v14  ;;  %v11009_v19 = vld [vmem:[%s20108_s3 + $0x7a8] sm:$0xf0]  ;;  %v11016_v58 = vor.u32 %v12952_v63, %v11015_v5 }
 0x236   : > { %5853 = vmatpush.bf16.msrb.mxu0 %v10940_v23  ;;  %v12843_v23 = vld [vmem:[%s20108_s3 + $0xa0c] sm:$0xf]  ;;  %v3794_v28 = vadd.f32 %v16863_v42, %v3775_v52  ;;  %v12839_v29 = vld [vmem:[%s20108_s3 + $0x984] sm:$0xf0]  ;;  %v10812_v31 = vor.u32 %v12898_v59, %v10809_v17  ;;  %v12944_v11 = vld [vmem:[%s20108_s3 + $0x6ac] sm:$0xf0] }
 0x237   : > { %4790 = vmatpush.bf16.msrb.mxu3 %v10624_v53  ;;  %4828 = vmatpush.bf16.msra.mxu1 %v10628_v45  ;;  %v10596_v34 = vor.u32 %v12843_v23, %v10593_v10  ;;  %v10560_v42 = vor.u32 %v12839_v29, %v10559_v7  ;;  %v10527_v51 = vld [vmem:[%s20108_s3 + $0x808] sm:$0xf]  ;;  %v12888_v57 = vld [vmem:[%s20108_s3 + $0xf8c] sm:$0xf0]  ;;  %v12939_v23 = vld [vmem:[%s20108_s3 + $0x62c] sm:$0xf]  ;;  %v10984_v37 = vor.u32 %v12944_v11, %v10983_v43 }
 0x238   : > { %5891 = vmatpush.bf16.msrb.mxu2 %v10944_v9  ;;  %v10591_v9 = vld [vmem:[%s20108_s3 + $0xa08] sm:$0xf]  ;;  %v3885_v25 = vpop.f32.mrf.mxu1  ;;  %v10977_v10 = vld [vmem:[%s20108_s3 + $0x6a8] sm:$0xf0]  ;;  %v12936_v59 = vld [vmem:[%s20108_s3 + $0x5ac] sm:$0xf0] }
 0x239   : > { %v10592_v41 = vor.u32 %v12847_v16, %v10591_v9  ;;  %v10783_v21 = vld [vmem:[%s20108_s3 + $0x28] sm:$0xf]  ;;  %v11012_v16 = vor.u32 %v12947_v27, %v11009_v19  ;;  %v12876_v7 = vld [vmem:[%s20108_s3 + $0xe14] sm:$0xf]  ;;  %v12931_v24 = vld [vmem:[%s20108_s3 + $0x52c] sm:$0xf] }
 0x23a   : > { %5854 = vmatpush.bf16.msrb.mxu0 %v10908_v46  ;;  %v3866_v54 = vpop.f32.mrf.mxu0  ;;  %v10816_v46 = vor.u32 %v12903_v61, %v10815_v0  ;;  %v12895_v22 = vld [vmem:[%s20108_s3 + $0xa4] sm:$0xf0]  ;;  %v10761_v0 = vld [vmem:[%s20108_s3 + $0xf90] sm:$0xf0]  ;;  %v10913_v5 = vld [vmem:[%s20108_s3 + $0x4a8] sm:$0xf0] }
 0x23b   : > { %4791 = vmatpush.bf16.msrb.mxu3 %v10592_v41  ;;  %v3867_v47 = vadd.f32 %v3866_v54, %v3848_v60  ;;  %4829 = vmatpush.bf16.msra.mxu1 %v10596_v34  ;;  %v12831_v33 = vld [vmem:[%s20108_s3 + $0x884] sm:$0xf0]  ;;  %v10784_v56 = vor.u32 %v12895_v22, %v10783_v21  ;;  %v10951_v60 = vld [vmem:[%s20108_s3 + $0x530] sm:$0xf]  ;;  %v12915_v11 = vld [vmem:[%s20108_s3 + $0x32c] sm:$0xf] }
 0x23c   : > { %5892 = vmatpush.bf16.msrb.mxu2 %v10912_v62  ;;  %v3884_v62 = vadd.f32 %v3883_v20, %v3865_v3  ;;  %v10528_v13 = vor.u32 %v12831_v33, %v10527_v51  ;;  %v3813_v20 = vadd.f32 %v16874_v26, %v3794_v28  ;;  %v12827_v26 = vld [vmem:[%s20108_s3 + $0x80c] sm:$0xf]  ;;  %v17108_v44 = vpop.f32.mrf.mxu2  ;;  %v12884_v3 = vld [vmem:[%s20108_s3 + $0xf14] sm:$0xf]  ;;  %v3852_v17 = vpop.f32.mrf.mxu3  ;;  %v10980_v28 = vor.u32 %v12939_v23, %v10977_v10  ;;  %v12880_v54 = vld [vmem:[%s20108_s3 + $0xe8c] sm:$0xf0] }
 0x23d   : > { %v3886_v35 = vadd.f32 %v3885_v25, %v3867_v47  ;;  %v10729_v25 = vld [vmem:[%s20108_s3 + $0xe90] sm:$0xf0]  ;;  %v10695_v51 = vld [vmem:[%s20108_s3 + $0xd10] sm:$0xf]  ;;  %v12923_v33 = vld [vmem:[%s20108_s3 + $0x42c] sm:$0xf] }
 0x23e   : > { %5855 = vmatpush.bf16.msrb.mxu0 %v10876_v55  ;;  %v3894_v53 = vmax.f32 %v3884_v62, 0.0  ;;  %v10780_v55 = vor.u32 %v12890_v6, %v10777_v40  ;;  %v3832_v4 = vadd.f32 %v16919_v2, %v3813_v20  ;;  %v10759_v2 = vld [vmem:[%s20108_s3 + $0xf10] sm:$0xf]  ;;  %v10945_v62 = vld [vmem:[%s20108_s3 + $0x5a8] sm:$0xf0] }
 0x23f   : > { %4792 = vmatpush.bf16.msrb.mxu3 %v10560_v42  ;;  %v3896_v18 = vmax.f32 %v3886_v35, 0.0  ;;  %4830 = vmatpush.bf16.msra.mxu1 %v10564_v48  ;;  %v12928_v6 = vld [vmem:[%s20108_s3 + $0x4ac] sm:$0xf0]  ;;  %v10948_v48 = vor.u32 %v12931_v24, %v10945_v62  ;;  %v12868_v35 = vld [vmem:[%s20108_s3 + $0xd14] sm:$0xf] }
 0x240   : > { %5893 = vmatpush.bf16.msrb.mxu2 %v10880_v30  ;;  %v3796_v30 = vadd.f32 %v16927_v32, %v3777_v15  ;;  %v10529_v32 = vld [vmem:[%s20108_s3 + $0x888] sm:$0xf0]  ;;  %v3888_v41 = vpop.f32.mrf.mxu1  ;;  %v3851_v61 = vadd.f32 %v3850_v38, %v3832_v4  ;;  %4970 = vmatmul.bf16.gmra.mxu0 %v16090_v12  ;;  %v10952_v38 = vor.u32 %v12936_v59, %v10951_v60  ;;  %v12872_v15 = vld [vmem:[%s20108_s3 + $0xd8c] sm:$0xf0]  ;;  %v10665_v4 = vld [vmem:[%s20108_s3 + $0xc90] sm:$0xf0] }
 0x241   : > { %v17106_v45 = vpack.c.bf16 %v3896_v18, %v3894_v53  ;;  %v10532_v52 = vor.u32 %v12827_v26, %v10529_v32  ;;  %5826 = vmatmul.bf16.gmra.mxu2 %v16090_v12  ;;  %v10696_v63 = vor.u32 %v12872_v15, %v10695_v51  ;;  %v10887_v27 = vld [vmem:[%s20108_s3 + $0x330] sm:$0xf]  ;;  %v12860_v32 = vld [vmem:[%s20108_s3 + $0xc14] sm:$0xf]  ;;  %v10817_v62 = vld [vmem:[%s20108_s3 + $0x1a8] sm:$0xf0] }
 0x242   : > { %5856 = vmatpush.bf16.msrb.mxu0 %v10844_v50  ;;  %v3869_v9 = vpop.f32.mrf.mxu0  ;;  %v10760_v50 = vor.u32 %v12888_v57, %v10759_v2  ;;  %v10663_v19 = vld [vmem:[%s20108_s3 + $0xc10] sm:$0xf]  ;;  %v10668_v2 = vor.u32 %v12860_v32, %v10665_v4  ;;  %v12828_v32 = vld [vmem:[%s20108_s3 + $0x814] sm:$0xf] }
 0x243   : > { %4793 = vmatpush.bf16.msrb.mxu3 %v10528_v13  ;;  %4756 = vmatmul.bf16.vlgmr.msrb.gmra.mxu1 %v17106_v45  ;;  %v3870_v29 = vadd.f32 %v3869_v9, %v3851_v61  ;;  %v10697_v13 = vld [vmem:[%s20108_s3 + $0xd90] sm:$0xf0]  ;;  %v12920_v26 = vld [vmem:[%s20108_s3 + $0x3ac] sm:$0xf0]  ;;  %v10881_v9 = vld [vmem:[%s20108_s3 + $0x3a8] sm:$0xf0] }
 0x244   : > { %5894 = vmatpush.bf16.msrb.mxu2 %v10848_v36  ;;  %v3815_v36 = vadd.f32 %v16941_v49, %v3796_v30  ;;  %4718 = vmatmul.bf16.vlgmr.msra.gmra.mxu3 %v17106_v45  ;;  %v10764_v49 = vor.u32 %v12884_v3, %v10761_v0  ;;  %v17164_v14 = vpop.f32.mrf.mxu2  ;;  %v10700_v30 = vor.u32 %v12868_v35, %v10697_v13  ;;  %v10855_v23 = vld [vmem:[%s20108_s3 + $0x230] sm:$0xf]  ;;  %v10849_v61 = vld [vmem:[%s20108_s3 + $0x2a8] sm:$0xf0]  ;;  %v10569_v13 = vld [vmem:[%s20108_s3 + $0x990] sm:$0xf0] }
 0x245   : > { %4831 = vmatpush.bf16.msra.mxu1 %v10532_v52  ;;  %v3889_v21 = vadd.f32 %v3888_v41, %v3870_v29  ;;  %v12907_v41 = vld [vmem:[%s20108_s3 + $0x22c] sm:$0xf]  ;;  %v10884_v52 = vor.u32 %v12915_v11, %v10881_v9  ;;  %v10631_v0 = vld [vmem:[%s20108_s3 + $0xb10] sm:$0xf]  ;;  %v10537_v4 = vld [vmem:[%s20108_s3 + $0x890] sm:$0xf0] }
 0x246   : > { %5857 = vmatpush.bf16.msrb.mxu0 %v10812_v31  ;;  %v3834_v34 = vadd.f32 %v16984_v8, %v3815_v36  ;;  %v10727_v8 = vld [vmem:[%s20108_s3 + $0xe10] sm:$0xf]  ;;  %v10888_v36 = vor.u32 %v12920_v26, %v10887_v27  ;;  %v11017_v27 = vld [vmem:[%s20108_s3 + $0x7b0] sm:$0xf0]  ;;  %v12945_v11 = vld [vmem:[%s20108_s3 + $0x6b4] sm:$0xf0] }
 0x247   : > { %4862 = vmatpush.bf16.msra.mxu3 %v10760_v50  ;;  %v10728_v47 = vor.u32 %v12880_v54, %v10727_v8  ;;  %v10919_v31 = vld [vmem:[%s20108_s3 + $0x430] sm:$0xf]  ;;  %v10852_v54 = vor.u32 %v12907_v41, %v10849_v61  ;;  %v10540_v41 = vor.u32 %v12828_v32, %v10537_v4  ;;  %v10673_v32 = vld [vmem:[%s20108_s3 + $0xc98] sm:$0xf0] }
 0x248   : > { %5895 = vmatpush.bf16.msrb.mxu2 %v10816_v46  ;;  %v10732_v46 = vor.u32 %v12876_v7, %v10729_v25  ;;  %v3853_v42 = vadd.f32 %v3852_v17, %v3834_v34  ;;  %v3890_v20 = vpop.f32.mrf.mxu1  ;;  %v10920_v18 = vor.u32 %v12928_v6, %v10919_v31  ;;  %v12912_v50 = vld [vmem:[%s20108_s3 + $0x2ac] sm:$0xf0]  ;;  %v12852_v34 = vld [vmem:[%s20108_s3 + $0xb14] sm:$0xf]  ;;  %v12891_v6 = vld [vmem:[%s20108_s3 + $0x2c] sm:$0xf] }
 0x249   : > { %4900 = vmatpush.bf16.msrb.mxu1 %v10764_v49  ;;  %v12856_v49 = vld [vmem:[%s20108_s3 + $0xb8c] sm:$0xf0]  ;;  %v10856_v17 = vor.u32 %v12912_v50, %v10855_v23  ;;  %v10601_v25 = vld [vmem:[%s20108_s3 + $0xa90] sm:$0xf0]  ;;  %v12889_v50 = vld [vmem:[%s20108_s3 + $0xf94] sm:$0xf0] }
 0x24a   : > { %5858 = vmatpush.bf16.msrb.mxu0 %v10780_v55  ;;  %v3871_v40 = vpop.f32.mrf.mxu0  ;;  %v12864_v55 = vld [vmem:[%s20108_s3 + $0xc8c] sm:$0xf0]  ;;  %v10632_v60 = vor.u32 %v12856_v49, %v10631_v0  ;;  %v12885_v0 = vld [vmem:[%s20108_s3 + $0xf1c] sm:$0xf] }
 0x24b   : > { %v3872_v22 = vadd.f32 %v3871_v40, %v3853_v42  ;;  %4863 = vmatpush.bf16.msra.mxu3 %v10728_v47  ;;  %v10823_v8 = vld [vmem:[%s20108_s3 + $0x130] sm:$0xf]  ;;  %v12844_v47 = vld [vmem:[%s20108_s3 + $0xa14] sm:$0xf]  ;;  %v10785_v40 = vld [vmem:[%s20108_s3 + $0xa8] sm:$0xf0] }
 0x24c   : > { %5896 = vmatpush.bf16.msrb.mxu2 %v10784_v56  ;;  %v10916_v56 = vor.u32 %v12923_v33, %v10913_v5  ;;  %v17216_v3 = vpop.f32.mrf.mxu2  ;;  %v12904_v7 = vld [vmem:[%s20108_s3 + $0x1ac] sm:$0xf0]  ;;  %v10604_v42 = vor.u32 %v12844_v47, %v10601_v25  ;;  %v12836_v33 = vld [vmem:[%s20108_s3 + $0x914] sm:$0xf]  ;;  %v11023_v5 = vld [vmem:[%s20108_s3 + $0x738] sm:$0xf] }
 0x24d   : > { %4901 = vmatpush.bf16.msrb.mxu1 %v10732_v46  ;;  %v3891_v53 = vadd.f32 %v3890_v20, %v3872_v22  ;;  %v10599_v29 = vld [vmem:[%s20108_s3 + $0xa10] sm:$0xf]  ;;  %v10824_v31 = vor.u32 %v12904_v7, %v10823_v8  ;;  %v12948_v20 = vld [vmem:[%s20108_s3 + $0x734] sm:$0xf]  ;;  %v12881_v7 = vld [vmem:[%s20108_s3 + $0xe94] sm:$0xf0] }
 0x24e   : > { %5927 = vmatpush.bf16.msra.mxu0 %v11012_v16  ;;  %v10664_v16 = vor.u32 %v12864_v55, %v10663_v19  ;;  %v12848_v24 = vld [vmem:[%s20108_s3 + $0xa8c] sm:$0xf0]  ;;  %v10953_v8 = vld [vmem:[%s20108_s3 + $0x5b0] sm:$0xf0]  ;;  %v10737_v47 = vld [vmem:[%s20108_s3 + $0xe98] sm:$0xf0] }
 0x24f   : > { %v3900_v43 = vmax.f32 %v3891_v53, 0.0  ;;  %4864 = vmatpush.bf16.msra.mxu3 %v10696_v63  ;;  %v10600_v46 = vor.u32 %v12848_v24, %v10599_v29  ;;  %v12896_v51 = vld [vmem:[%s20108_s3 + $0xac] sm:$0xf0]  ;;  %v12953_v63 = vld [vmem:[%s20108_s3 + $0x7b4] sm:$0xf0]  ;;  %v10572_v53 = vor.u32 %v12836_v33, %v10569_v13 }
 0x250   : > { %5965 = vmatpush.bf16.msra.mxu2 %v11016_v58  ;;  %v3898_v58 = vmax.f32 %v3889_v21, 0.0  ;;  %5859 = vmatmul.bf16.vlgmr.msrb.gmra.mxu0 %v15980_v1  ;;  %v10567_v21 = vld [vmem:[%s20108_s3 + $0x910] sm:$0xf]  ;;  %v11024_v26 = vor.u32 %v12953_v63, %v11023_v5  ;;  %v12877_v29 = vld [vmem:[%s20108_s3 + $0xe1c] sm:$0xf] }
 0x251   : > { %4902 = vmatpush.bf16.msrb.mxu1 %v10700_v30  ;;  %5897 = vmatmul.bf16.vlgmr.msrb.gmra.mxu2 %v15980_v1  ;;  %v12840_v22 = vld [vmem:[%s20108_s3 + $0x98c] sm:$0xf0]  ;;  %v10705_v63 = vld [vmem:[%s20108_s3 + $0xd98] sm:$0xf0] }
 0x252   : > { %5928 = vmatpush.bf16.msra.mxu0 %v10980_v28  ;;  %v17214_v57 = vpack.c.bf16 %v3900_v43, %v3898_v58  ;;  %v17224_v10 = vpop.f32.mrf.mxu0  ;;  %v12899_v28 = vld [vmem:[%s20108_s3 + $0x12c] sm:$0xf]  ;;  %v10568_v30 = vor.u32 %v12840_v22, %v10567_v21  ;;  %v10535_v19 = vld [vmem:[%s20108_s3 + $0x810] sm:$0xf]  ;;  %v11020_v58 = vor.u32 %v12948_v20, %v11017_v27  ;;  %v10991_v43 = vld [vmem:[%s20108_s3 + $0x638] sm:$0xf] }
 0x253   : > { %4865 = vmatpush.bf16.msra.mxu3 %v10664_v16  ;;  %v10820_v35 = vor.u32 %v12899_v28, %v10817_v62  ;;  %v12832_v55 = vld [vmem:[%s20108_s3 + $0x88c] sm:$0xf0]  ;;  %v10992_v49 = vor.u32 %v12945_v11, %v10991_v43  ;;  %v12932_v28 = vld [vmem:[%s20108_s3 + $0x534] sm:$0xf]  ;;  %v12873_v21 = vld [vmem:[%s20108_s3 + $0xd94] sm:$0xf0] }
 0x254   : > { %5966 = vmatpush.bf16.msra.mxu2 %v10984_v37  ;;  %4723 = vmatmul.bf16.gmra.mxu3 %v17214_v57  ;;  %v10633_v37 = vld [vmem:[%s20108_s3 + $0xb90] sm:$0xf0]  ;;  %v10536_v9 = vor.u32 %v12832_v55, %v10535_v19  ;;  %v10956_v25 = vor.u32 %v12932_v28, %v10953_v8  ;;  %v12869_v22 = vld [vmem:[%s20108_s3 + $0xd1c] sm:$0xf]  ;;  %v10895_v27 = vld [vmem:[%s20108_s3 + $0x338] sm:$0xf] }
 0x255   : > { %4761 = vmatmul.bf16.gmra.mxu1 %v17214_v57  ;;  %v10636_v59 = vor.u32 %v12852_v34, %v10633_v37  ;;  %v10769_v34 = vld [vmem:[%s20108_s3 + $0xf98] sm:$0xf0]  ;;  %v12916_v20 = vld [vmem:[%s20108_s3 + $0x334] sm:$0xf]  ;;  %v12921_v19 = vld [vmem:[%s20108_s3 + $0x3b4] sm:$0xf0] }
 0x256   : > { %5929 = vmatpush.bf16.msra.mxu0 %v10948_v48  ;;  %4903 = vmatpush.bf16.msrb.mxu1 %v10668_v2  ;;  %v10791_v48 = vld [vmem:[%s20108_s3 + $0x30] sm:$0xf]  ;;  %v12940_v2 = vld [vmem:[%s20108_s3 + $0x634] sm:$0xf]  ;;  %v12865_v55 = vld [vmem:[%s20108_s3 + $0xc94] sm:$0xf0] }
 0x257   : > { %4866 = vmatpush.bf16.msra.mxu3 %v10632_v60  ;;  %v10959_v60 = vld [vmem:[%s20108_s3 + $0x538] sm:$0xf]  ;;  %v12908_v43 = vld [vmem:[%s20108_s3 + $0x234] sm:$0xf] }
 0x258   : > { %5967 = vmatpush.bf16.msra.mxu2 %v10952_v38  ;;  %v17272_v38 = vpop.f32.mrf.mxu2  ;;  %v10831_v28 = vld [vmem:[%s20108_s3 + $0x138] sm:$0xf] }
 0x259   : > { %v12905_v8 = vld [vmem:[%s20108_s3 + $0x1b4] sm:$0xf0] }
 0x25a   : > { %5930 = vmatpush.bf16.msra.mxu0 %v10916_v56  ;;  %4904 = vmatpush.bf16.msrb.mxu1 %v10636_v59  ;;  %v17286_v15 = vpop.f32.mrf.mxu0  ;;  %v10788_v56 = vor.u32 %v12891_v6, %v10785_v40  ;;  %v12937_v59 = vld [vmem:[%s20108_s3 + $0x5b4] sm:$0xf0]  ;;  %v12924_v40 = vld [vmem:[%s20108_s3 + $0x434] sm:$0xf] }
 0x25b   : > { %4867 = vmatpush.bf16.msra.mxu3 %v10600_v46  ;;  %v10960_v24 = vor.u32 %v12937_v59, %v10959_v60  ;;  %v10927_v46 = vld [vmem:[%s20108_s3 + $0x438] sm:$0xf]  ;;  %v12900_v59 = vld [vmem:[%s20108_s3 + $0x134] sm:$0xf] }
 0x25c   : > { %5968 = vmatpush.bf16.msra.mxu2 %v10920_v18  ;;  %v10792_v18 = vor.u32 %v12896_v51, %v10791_v48  ;;  %v10921_v48 = vld [vmem:[%s20108_s3 + $0x4b0] sm:$0xf0] }
 0x25d   : > { %v10924_v13 = vor.u32 %v12924_v40, %v10921_v48  ;;  %v10799_v40 = vld [vmem:[%s20108_s3 + $0x38] sm:$0xf] }
 0x25e   : > { %5931 = vmatpush.bf16.msra.mxu0 %v10884_v52  ;;  %4905 = vmatpush.bf16.msrb.mxu1 %v10604_v42  ;;  %v10767_v52 = vld [vmem:[%s20108_s3 + $0xf18] sm:$0xf] }
 0x25f   : > { %4868 = vmatpush.bf16.msra.mxu3 %v10568_v30  ;;  %v10768_v61 = vor.u32 %v12889_v50, %v10767_v52  ;;  %v12929_v42 = vld [vmem:[%s20108_s3 + $0x4b4] sm:$0xf0]  ;;  %v10889_v30 = vld [vmem:[%s20108_s3 + $0x3b0] sm:$0xf0] }
 0x260   : > { %5969 = vmatpush.bf16.msra.mxu2 %v10888_v36  ;;  %v17330_v16 = vpop.f32.mrf.mxu2  ;;  %v10985_v36 = vld [vmem:[%s20108_s3 + $0x6b0] sm:$0xf0]  ;;  %5864 = vmatmul.bf16.gmra.mxu0 %v16090_v12  ;;  %v10928_v33 = vor.u32 %v12929_v42, %v10927_v46  ;;  %v10892_v4 = vor.u32 %v12916_v20, %v10889_v30  ;;  %v10639_v50 = vld [vmem:[%s20108_s3 + $0xb18] sm:$0xf]  ;;  %v10832_v42 = vor.u32 %v12905_v8, %v10831_v28  ;;  %v13014_v28 = vld [vmem:[%s20108_s3 + $0xf9c] sm:$0xf0] }
 0x261   : > { %v10988_v37 = vor.u32 %v12940_v2, %v10985_v36  ;;  %5902 = vmatmul.bf16.gmra.mxu2 %v16090_v12  ;;  %v10863_v2 = vld [vmem:[%s20108_s3 + $0x238] sm:$0xf]  ;;  %v13010_v8 = vld [vmem:[%s20108_s3 + $0xf24] sm:$0xf] }
 0x262   : > { %5932 = vmatpush.bf16.msra.mxu0 %v10852_v54  ;;  %4906 = vmatpush.bf16.msrb.mxu1 %v10572_v53  ;;  %v17338_v23 = vpop.f32.mrf.mxu0  ;;  %v10735_v54 = vld [vmem:[%s20108_s3 + $0xe18] sm:$0xf]  ;;  %v10708_v53 = vor.u32 %v12869_v22, %v10705_v63  ;;  %v11025_v22 = vld [vmem:[%s20108_s3 + $0x7b8] sm:$0xf0] }
 0x263   : > { %4869 = vmatpush.bf16.msra.mxu3 %v10536_v9  ;;  %v10736_v62 = vor.u32 %v12881_v7, %v10735_v54  ;;  %v10857_v9 = vld [vmem:[%s20108_s3 + $0x2b0] sm:$0xf0]  ;;  %v12913_v36 = vld [vmem:[%s20108_s3 + $0x2b4] sm:$0xf0] }
 0x264   : > { %5970 = vmatpush.bf16.msra.mxu2 %v10856_v17  ;;  %4794 = vmatmul.bf16.vlgmr.msrb.gmra.mxu3 %v17106_v45  ;;  %v10772_v17 = vor.u32 %v12885_v0, %v10769_v34  ;;  %v12857_v0 = vld [vmem:[%s20108_s3 + $0xb94] sm:$0xf0]  ;;  %v10641_v34 = vld [vmem:[%s20108_s3 + $0xb98] sm:$0xf0]  ;;  %v10864_v60 = vor.u32 %v12913_v36, %v10863_v2 }
 0x265   : > { %4832 = vmatmul.bf16.vlgmr.msra.gmra.mxu1 %v17106_v45  ;;  %v10607_v7 = vld [vmem:[%s20108_s3 + $0xa18] sm:$0xf]  ;;  %v12941_v36 = vld [vmem:[%s20108_s3 + $0x63c] sm:$0xf] }
 0x266   : > { %5933 = vmatpush.bf16.msra.mxu0 %v10820_v35  ;;  %4907 = vmatpush.bf16.msrb.mxu1 %v10540_v41  ;;  %v10703_v35 = vld [vmem:[%s20108_s3 + $0xd18] sm:$0xf] }
 0x267   : > { %4938 = vmatpush.bf16.msrb.mxu3 %v10768_v61  ;;  %v10704_v5 = vor.u32 %v12873_v21, %v10703_v35  ;;  %v12853_v61 = vld [vmem:[%s20108_s3 + $0xb1c] sm:$0xf]  ;;  %v12897_v48 = vld [vmem:[%s20108_s3 + $0xb4] sm:$0xf0] }
 0x268   : > { %5971 = vmatpush.bf16.msra.mxu2 %v10824_v31  ;;  %v10740_v31 = vor.u32 %v12877_v29, %v10737_v47  ;;  %v17386_v6 = vpop.f32.mrf.mxu2  ;;  %v10644_v54 = vor.u32 %v12853_v61, %v10641_v34  ;;  %v12849_v29 = vld [vmem:[%s20108_s3 + $0xa94] sm:$0xf0]  ;;  %v12845_v47 = vld [vmem:[%s20108_s3 + $0xa1c] sm:$0xf]  ;;  %v11447_v34 = vld [vmem:[%s20108_s3 + $0x540] sm:$0xf] }
 0x269   : > { %v12949_v21 = vld [vmem:[%s20108_s3 + $0x73c] sm:$0xf]  ;;  %v10575_v20 = vld [vmem:[%s20108_s3 + $0x918] sm:$0xf] }
 0x26a   : > { %5934 = vmatpush.bf16.msra.mxu0 %v10788_v56  ;;  %4976 = vmatpush.bf16.msra.mxu1 %v10772_v17  ;;  %v17394_v51 = vpop.f32.mrf.mxu0  ;;  %v10825_v17 = vld [vmem:[%s20108_s3 + $0x1b0] sm:$0xf0]  ;;  %v12841_v30 = vld [vmem:[%s20108_s3 + $0x994] sm:$0xf0] }
 0x26b   : > { %4939 = vmatpush.bf16.msrb.mxu3 %v10736_v62  ;;  %v10608_v62 = vor.u32 %v12849_v29, %v10607_v7  ;;  %v10828_v46 = vor.u32 %v12900_v59, %v10825_v17  ;;  %v11255_v17 = vld [vmem:[%s20108_s3 + $0xf20] sm:$0xf]  ;;  %v10961_v7 = vld [vmem:[%s20108_s3 + $0x5b8] sm:$0xf0] }
 0x26c   : > { %5972 = vmatpush.bf16.msra.mxu2 %v10792_v18  ;;  %v10671_v18 = vld [vmem:[%s20108_s3 + $0xc18] sm:$0xf] }
 0x26d   : > { %v10672_v56 = vor.u32 %v12865_v55, %v10671_v18  ;;  %v12837_v18 = vld [vmem:[%s20108_s3 + $0x91c] sm:$0xf]  ;;  %v10800_v55 = vor.u32 %v12897_v48, %v10799_v40  ;;  %v11223_v40 = vld [vmem:[%s20108_s3 + $0xe20] sm:$0xf] }
 0x26e   : > { %6003 = vmatpush.bf16.msrb.mxu0 %v11020_v58  ;;  %4977 = vmatpush.bf16.msra.mxu1 %v10740_v31  ;;  %v10896_v58 = vor.u32 %v12921_v19, %v10895_v27  ;;  %v10793_v31 = vld [vmem:[%s20108_s3 + $0xb0] sm:$0xf0]  ;;  %v10577_v27 = vld [vmem:[%s20108_s3 + $0x998] sm:$0xf0]  ;;  %v13006_v48 = vld [vmem:[%s20108_s3 + $0xe9c] sm:$0xf0] }
 0x26f   : > { %4940 = vmatpush.bf16.msrb.mxu3 %v10704_v5 }
 0x270   : > { %6041 = vmatpush.bf16.msrb.mxu2 %v11024_v26  ;;  %v12861_v26 = vld [vmem:[%s20108_s3 + $0xc1c] sm:$0xf]  ;;  %v17435_v11 = vpop.f32.mrf.mxu2  ;;  %5935 = vmatmul.bf16.vlgmr.msra.gmra.mxu0 %v15980_v1 }
 0x271   : > { %v10676_v41 = vor.u32 %v12861_v26, %v10673_v32  ;;  %5973 = vmatmul.bf16.vlgmr.msra.gmra.mxu2 %v15980_v1  ;;  %v11028_v26 = vor.u32 %v12949_v21, %v11025_v22  ;;  %v13002_v21 = vld [vmem:[%s20108_s3 + $0xe24] sm:$0xf]  ;;  %v12925_v22 = vld [vmem:[%s20108_s3 + $0x43c] sm:$0xf] }
 0x272   : > { %6004 = vmatpush.bf16.msrb.mxu0 %v10988_v37  ;;  %4978 = vmatpush.bf16.msra.mxu1 %v10708_v53  ;;  %v17446_v52 = vpop.f32.mrf.mxu0  ;;  %v10860_v37 = vor.u32 %v12908_v43, %v10857_v9  ;;  %v10576_v53 = vor.u32 %v12841_v30, %v10575_v20  ;;  %v13070_v43 = vld [vmem:[%s20108_s3 + $0x6bc] sm:$0xf0]  ;;  %v10580_v9 = vor.u32 %v12837_v18, %v10577_v27 }
 0x273   : > { %4941 = vmatpush.bf16.msrb.mxu3 %v10672_v56  ;;  %v10543_v56 = vld [vmem:[%s20108_s3 + $0x818] sm:$0xf]  ;;  %v11383_v18 = vld [vmem:[%s20108_s3 + $0x340] sm:$0xf] }
 0x274   : > { %6042 = vmatpush.bf16.msrb.mxu2 %v10992_v49  ;;  %4799 = vmatmul.bf16.gmra.mxu3 %v17214_v57  ;;  %v10640_v49 = vor.u32 %v12857_v0, %v10639_v50  ;;  %v12829_v50 = vld [vmem:[%s20108_s3 + $0x81c] sm:$0xf]  ;;  %v13046_v27 = vld [vmem:[%s20108_s3 + $0x3bc] sm:$0xf0] }
 0x275   : > { %4837 = vmatmul.bf16.gmra.mxu1 %v17214_v57  ;;  %v10545_v0 = vld [vmem:[%s20108_s3 + $0x898] sm:$0xf0] }
 0x276   : > { %6005 = vmatpush.bf16.msrb.mxu0 %v10956_v25  ;;  %4979 = vmatpush.bf16.msra.mxu1 %v10676_v41  ;;  %v10609_v25 = vld [vmem:[%s20108_s3 + $0xa98] sm:$0xf0]  ;;  %v10548_v29 = vor.u32 %v12829_v50, %v10545_v0  ;;  %v11159_v50 = vld [vmem:[%s20108_s3 + $0xc20] sm:$0xf] }
 0x277   : > { %4942 = vmatpush.bf16.msrb.mxu3 %v10640_v49  ;;  %v10612_v5 = vor.u32 %v12845_v47, %v10609_v25  ;;  %v10993_v41 = vld [vmem:[%s20108_s3 + $0x6b8] sm:$0xf0]  ;;  %v12990_v0 = vld [vmem:[%s20108_s3 + $0xc9c] sm:$0xf0] }
 0x278   : > { %6043 = vmatpush.bf16.msrb.mxu2 %v10960_v24  ;;  %v12892_v24 = vld [vmem:[%s20108_s3 + $0x34] sm:$0xf]  ;;  %v17500_v35 = vpop.f32.mrf.mxu2  ;;  %v10996_v59 = vor.u32 %v12941_v36, %v10993_v41  ;;  %v11384_v36 = vor.u32 %v13046_v27, %v11383_v18  ;;  %v11351_v41 = vld [vmem:[%s20108_s3 + $0x240] sm:$0xf] }
 0x279   : > { %v10796_v19 = vor.u32 %v12892_v24, %v10793_v31  ;;  %v11256_v24 = vor.u32 %v13014_v28, %v11255_v17  ;;  %v12909_v17 = vld [vmem:[%s20108_s3 + $0x23c] sm:$0xf]  ;;  %v13022_v18 = vld [vmem:[%s20108_s3 + $0xbc] sm:$0xf0] }
 0x27a   : > { %6006 = vmatpush.bf16.msrb.mxu0 %v10924_v13  ;;  %4980 = vmatpush.bf16.msra.mxu1 %v10644_v54  ;;  %v17511_v63 = vpop.f32.mrf.mxu0  ;;  %v13078_v13 = vld [vmem:[%s20108_s3 + $0x7bc] sm:$0xf0]  ;;  %v12933_v54 = vld [vmem:[%s20108_s3 + $0x53c] sm:$0xf] }
 0x27b   : > { %4943 = vmatpush.bf16.msrb.mxu3 %v10608_v62  ;;  %v11257_v62 = vld [vmem:[%s20108_s3 + $0xfa0] sm:$0xf0]  ;;  %v10964_v31 = vor.u32 %v12933_v54, %v10961_v7  ;;  %v10865_v28 = vld [vmem:[%s20108_s3 + $0x2b8] sm:$0xf0] }
 0x27c   : > { %6044 = vmatpush.bf16.msrb.mxu2 %v10928_v33  ;;  %v11511_v33 = vld [vmem:[%s20108_s3 + $0x740] sm:$0xf]  ;;  %v11260_v47 = vor.u32 %v13010_v8, %v11257_v62  ;;  %v11160_v8 = vor.u32 %v12990_v0, %v11159_v50 }
 0x27d   : > { %v11512_v32 = vor.u32 %v13078_v13, %v11511_v33  ;;  %v10929_v33 = vld [vmem:[%s20108_s3 + $0x4b8] sm:$0xf0]  ;;  %v11225_v13 = vld [vmem:[%s20108_s3 + $0xea0] sm:$0xf0]  ;;  %v11319_v62 = vld [vmem:[%s20108_s3 + $0x140] sm:$0xf] }
 0x27e   : > { %6007 = vmatpush.bf16.msrb.mxu0 %v10892_v4  ;;  %4981 = vmatpush.bf16.msra.mxu1 %v10612_v5  ;;  %v12833_v4 = vld [vmem:[%s20108_s3 + $0x894] sm:$0xf0]  ;;  %v11224_v5 = vor.u32 %v13006_v48, %v11223_v40  ;;  %v11228_v20 = vor.u32 %v13002_v21, %v11225_v13  ;;  %v10833_v40 = vld [vmem:[%s20108_s3 + $0x1b8] sm:$0xf0]  ;;  %v12978_v48 = vld [vmem:[%s20108_s3 + $0xb24] sm:$0xf] }
 0x27f   : > { %4944 = vmatpush.bf16.msrb.mxu3 %v10576_v53  ;;  %v10544_v2 = vor.u32 %v12833_v4, %v10543_v56  ;;  %v11191_v56 = vld [vmem:[%s20108_s3 + $0xd20] sm:$0xf]  ;;  %v12917_v4 = vld [vmem:[%s20108_s3 + $0x33c] sm:$0xf]  ;;  %v11129_v21 = vld [vmem:[%s20108_s3 + $0xba0] sm:$0xf0] }
 0x280   : > { %6045 = vmatpush.bf16.msrb.mxu2 %v10896_v58  ;;  %v11479_v58 = vld [vmem:[%s20108_s3 + $0x640] sm:$0xf]  ;;  %v17552_v49 = vpop.f32.mrf.mxu2  ;;  %5940 = vmatmul.bf16.gmra.mxu0 %v16090_v12  ;;  %v12893_v13 = vld [vmem:[%s20108_s3 + $0x3c] sm:$0xf] }
 0x281   : > { %v11480_v61 = vor.u32 %v13070_v43, %v11479_v58  ;;  %5978 = vmatmul.bf16.gmra.mxu2 %v16090_v12  ;;  %v10897_v58 = vld [vmem:[%s20108_s3 + $0x3b8] sm:$0xf0] }
 0x282   : > { %6008 = vmatpush.bf16.msrb.mxu0 %v10860_v37  ;;  %v13062_v37 = vld [vmem:[%s20108_s3 + $0x5bc] sm:$0xf0]  ;;  %4982 = vmatpush.bf16.msra.mxu1 %v10580_v9  ;;  %v11193_v9 = vld [vmem:[%s20108_s3 + $0xda0] sm:$0xf0] }
 0x283   : > { %4945 = vmatpush.bf16.msrb.mxu3 %v10544_v2  ;;  %v11448_v25 = vor.u32 %v13062_v37, %v11447_v34  ;;  %v13038_v34 = vld [vmem:[%s20108_s3 + $0x2bc] sm:$0xf0]  ;;  %v12986_v37 = vld [vmem:[%s20108_s3 + $0xc24] sm:$0xf] }
 0x284   : > { %6046 = vmatpush.bf16.msrb.mxu2 %v10864_v60  ;;  %v17560_v60 = vpop.f32.mrf.mxu0  ;;  %4870 = vmatmul.bf16.vlgmr.msra.gmra.mxu3 %v17106_v45 }
 0x285   : > { %4908 = vmatmul.bf16.vlgmr.msrb.gmra.mxu1 %v17106_v45 }
 0x286   : > { %6009 = vmatpush.bf16.msrb.mxu0 %v10828_v46  ;;  %v11415_v46 = vld [vmem:[%s20108_s3 + $0x440] sm:$0xf]  ;;  %4983 = vmatpush.bf16.msra.mxu1 %v10548_v29  ;;  %v11352_v29 = vor.u32 %v13038_v34, %v11351_v41 }
 0x287   : > { %5832 = vmatpush.bf16.msra.mxu3 %v11256_v24  ;;  %v12901_v24 = vld [vmem:[%s20108_s3 + $0x13c] sm:$0xf]  ;;  %v11063_v34 = vld [vmem:[%s20108_s3 + $0x920] sm:$0xf] }
 0x288   : > { %6047 = vmatpush.bf16.msrb.mxu2 %v10832_v42  ;;  %v13054_v42 = vld [vmem:[%s20108_s3 + $0x4bc] sm:$0xf0]  ;;  %v17608_v30 = vpop.f32.mrf.mxu2  ;;  %v10836_v27 = vor.u32 %v12901_v24, %v10833_v40 }
 0x289   : > { %v11416_v53 = vor.u32 %v13054_v42, %v11415_v46  ;;  %v11127_v46 = vld [vmem:[%s20108_s3 + $0xb20] sm:$0xf] }
 0x28a   : > { %6010 = vmatpush.bf16.msrb.mxu0 %v10796_v19  ;;  %5870 = vmatpush.bf16.msrb.mxu1 %v11260_v47  ;;  %v10868_v47 = vor.u32 %v12909_v17, %v10865_v28  ;;  %v12982_v42 = vld [vmem:[%s20108_s3 + $0xb9c] sm:$0xf0]  ;;  %v11487_v28 = vld [vmem:[%s20108_s3 + $0x648] sm:$0xf] }
 0x28b   : > { %5833 = vmatpush.bf16.msra.mxu3 %v11224_v5 }
 0x28c   : > { %6048 = vmatpush.bf16.msrb.mxu2 %v10800_v55  ;;  %v17616_v19 = vpop.f32.mrf.mxu0  ;;  %v10932_v55 = vor.u32 %v12925_v22, %v10929_v33  ;;  %v11128_v22 = vor.u32 %v12982_v42, %v11127_v46  ;;  %v11132_v33 = vor.u32 %v12978_v48, %v11129_v21  ;;  %v11031_v46 = vld [vmem:[%s20108_s3 + $0x820] sm:$0xf]  ;;  %v12954_v48 = vld [vmem:[%s20108_s3 + $0x824] sm:$0xf] }
 0x28d   : > { %v12958_v42 = vld [vmem:[%s20108_s3 + $0x89c] sm:$0xf0]  ;;  %v11033_v21 = vld [vmem:[%s20108_s3 + $0x8a0] sm:$0xf0] }
 0x28e   : > { %6079 = vmatpush.bf16.msra.mxu0 %v11028_v26  ;;  %v12998_v26 = vld [vmem:[%s20108_s3 + $0xd9c] sm:$0xf0]  ;;  %5871 = vmatpush.bf16.msrb.mxu1 %v11228_v20  ;;  %v10801_v20 = vld [vmem:[%s20108_s3 + $0xb8] sm:$0xf0] }
 0x28f   : > { %v11192_v43 = vor.u32 %v12998_v26, %v11191_v56  ;;  %v11095_v56 = vld [vmem:[%s20108_s3 + $0xa20] sm:$0xf]  ;;  %v10804_v0 = vor.u32 %v12893_v13, %v10801_v20  ;;  %v11032_v13 = vor.u32 %v12958_v42, %v11031_v46  ;;  %v13042_v46 = vld [vmem:[%s20108_s3 + $0x344] sm:$0xf] }
 0x290   : > { %6935 = vmatpush.bf16.msra.mxu2 %v11512_v32  ;;  %v12994_v32 = vld [vmem:[%s20108_s3 + $0xd24] sm:$0xf]  ;;  %v17660_v7 = vpop.f32.mrf.mxu2  ;;  %6011 = vmatmul.bf16.vlgmr.msrb.gmra.mxu0 %v15980_v1  ;;  %v12974_v26 = vld [vmem:[%s20108_s3 + $0xa9c] sm:$0xf0] }
 0x291   : > { %v11196_v2 = vor.u32 %v12994_v32, %v11193_v9  ;;  %5834 = vmatpush.bf16.msra.mxu3 %v11192_v43  ;;  %6049 = vmatmul.bf16.vlgmr.msrb.gmra.mxu2 %v15980_v1  ;;  %v13079_v32 = vld [vmem:[%s20108_s3 + $0x7c4] sm:$0xf0]  ;;  %v13074_v43 = vld [vmem:[%s20108_s3 + $0x744] sm:$0xf] }
 0x292   : > { %6080 = vmatpush.bf16.msra.mxu0 %v10996_v59  ;;  %v11161_v59 = vld [vmem:[%s20108_s3 + $0xca0] sm:$0xf0] }
 0x293   : > { %5872 = vmatpush.bf16.msrb.mxu1 %v11196_v2  ;;  %v11164_v54 = vor.u32 %v12986_v37, %v11161_v59  ;;  %v11513_v9 = vld [vmem:[%s20108_s3 + $0x7c0] sm:$0xf0]  ;;  %v11096_v2 = vor.u32 %v12974_v26, %v11095_v56  ;;  %v12966_v37 = vld [vmem:[%s20108_s3 + $0x99c] sm:$0xf0]  ;;  %v13015_v56 = vld [vmem:[%s20108_s3 + $0xfa4] sm:$0xf0] }
 0x294   : > { %6936 = vmatpush.bf16.msra.mxu2 %v11480_v61  ;;  %v10900_v61 = vor.u32 %v12917_v4, %v10897_v58  ;;  %4875 = vmatmul.bf16.gmra.mxu3 %v17214_v57  ;;  %v12970_v4 = vld [vmem:[%s20108_s3 + $0xa24] sm:$0xf]  ;;  %v11516_v17 = vor.u32 %v13074_v43, %v11513_v9  ;;  %v11064_v24 = vor.u32 %v12966_v37, %v11063_v34  ;;  %v13011_v26 = vld [vmem:[%s20108_s3 + $0xf2c] sm:$0xf]  ;;  %v11423_v9 = vld [vmem:[%s20108_s3 + $0x448] sm:$0xf] }
 0x295   : > { %4913 = vmatmul.bf16.gmra.mxu1 %v17214_v57  ;;  %5835 = vmatpush.bf16.msra.mxu3 %v11160_v8  ;;  %v11097_v58 = vld [vmem:[%s20108_s3 + $0xaa0] sm:$0xf0]  ;;  %v13071_v8 = vld [vmem:[%s20108_s3 + $0x6c4] sm:$0xf0]  ;;  %v13003_v37 = vld [vmem:[%s20108_s3 + $0xe2c] sm:$0xf] }
 0x296   : > { %6081 = vmatpush.bf16.msra.mxu0 %v10964_v31  ;;  %v17677_v31 = vpop.f32.mrf.mxu0  ;;  %v12962_v59 = vld [vmem:[%s20108_s3 + $0x924] sm:$0xf]  ;;  %v11488_v40 = vor.u32 %v13071_v8, %v11487_v28  ;;  %v13007_v34 = vld [vmem:[%s20108_s3 + $0xea4] sm:$0xf0]  ;;  %v11233_v8 = vld [vmem:[%s20108_s3 + $0xea8] sm:$0xf0] }
 0x297   : > { %5873 = vmatpush.bf16.msrb.mxu1 %v11164_v54  ;;  %v11065_v54 = vld [vmem:[%s20108_s3 + $0x9a0] sm:$0xf0] }
 0x298   : > { %6937 = vmatpush.bf16.msra.mxu2 %v11448_v25  ;;  %v13030_v25 = vld [vmem:[%s20108_s3 + $0x1bc] sm:$0xf0]  ;;  %v17728_v41 = vpop.f32.mrf.mxu2  ;;  %v11385_v42 = vld [vmem:[%s20108_s3 + $0x3c0] sm:$0xf0] }
 0x299   : > { %v11320_v5 = vor.u32 %v13030_v25, %v11319_v62  ;;  %5836 = vmatpush.bf16.msra.mxu3 %v11128_v22  ;;  %v11068_v62 = vor.u32 %v12962_v59, %v11065_v54  ;;  %v11481_v25 = vld [vmem:[%s20108_s3 + $0x6c0] sm:$0xf0] }
 0x29a   : > { %6082 = vmatpush.bf16.msra.mxu0 %v10932_v55  ;;  %v11519_v55 = vld [vmem:[%s20108_s3 + $0x748] sm:$0xf] }
 0x29b   : > { %5874 = vmatpush.bf16.msrb.mxu1 %v11132_v33  ;;  %v11455_v33 = vld [vmem:[%s20108_s3 + $0x548] sm:$0xf] }
 0x29c   : > { %6938 = vmatpush.bf16.msra.mxu2 %v11416_v53  ;;  %v11287_v53 = vld [vmem:[%s20108_s3 + $0x40] sm:$0xf] }
 0x29d   : > { %v11288_v50 = vor.u32 %v13022_v18, %v11287_v53  ;;  %5837 = vmatpush.bf16.msra.mxu3 %v11096_v2  ;;  %v13058_v53 = vld [vmem:[%s20108_s3 + $0x544] sm:$0xf]  ;;  %v13055_v2 = vld [vmem:[%s20108_s3 + $0x4c4] sm:$0xf0] }
 0x29e   : > { %6083 = vmatpush.bf16.msra.mxu0 %v10900_v61  ;;  %v11520_v61 = vor.u32 %v13079_v32, %v11519_v55  ;;  %v11449_v18 = vld [vmem:[%s20108_s3 + $0x5c0] sm:$0xf0]  ;;  %v11263_v55 = vld [vmem:[%s20108_s3 + $0xf28] sm:$0xf] }
 0x29f   : > { %v11452_v43 = vor.u32 %v13058_v53, %v11449_v18  ;;  %v13034_v53 = vld [vmem:[%s20108_s3 + $0x244] sm:$0xf] }
 0x2a0   : > { %6939 = vmatpush.bf16.msra.mxu2 %v11384_v36  ;;  %v11100_v36 = vor.u32 %v12970_v4, %v11097_v58  ;;  %v17774_v20 = vpop.f32.mrf.mxu2  ;;  %v11264_v4 = vor.u32 %v13015_v56, %v11263_v55  ;;  %v11265_v58 = vld [vmem:[%s20108_s3 + $0xfa8] sm:$0xf0]  ;;  %6016 = vmatmul.bf16.gmra.mxu0 %v16090_v12  ;;  %v11359_v55 = vld [vmem:[%s20108_s3 + $0x248] sm:$0xf] }
 0x2a1   : > { %5838 = vmatpush.bf16.msra.mxu3 %v11064_v24  ;;  %6054 = vmatmul.bf16.gmra.mxu2 %v16090_v12  ;;  %v13047_v24 = vld [vmem:[%s20108_s3 + $0x3c4] sm:$0xf0] }
 0x2a2   : > { %6084 = vmatpush.bf16.msra.mxu0 %v10868_v47  ;;  %5875 = vmatpush.bf16.msrb.mxu1 %v11100_v36  ;;  %v17751_v47 = vpop.f32.mrf.mxu0  ;;  %v11268_v36 = vor.u32 %v13011_v26, %v11265_v58  ;;  %v13039_v56 = vld [vmem:[%s20108_s3 + $0x2c4] sm:$0xf0] }
 0x2a3   : > { %v11167_v26 = vld [vmem:[%s20108_s3 + $0xc28] sm:$0xf] }
 0x2a4   : > { %6940 = vmatpush.bf16.msra.mxu2 %v11352_v29  ;;  %v13066_v29 = vld [vmem:[%s20108_s3 + $0x644] sm:$0xf]  ;;  %4946 = vmatmul.bf16.vlgmr.msrb.gmra.mxu3 %v17106_v45 }
 0x2a5   : > { %v11484_v22 = vor.u32 %v13066_v29, %v11481_v25  ;;  %4984 = vmatmul.bf16.vlgmr.msra.gmra.mxu1 %v17106_v45  ;;  %5839 = vmatpush.bf16.msra.mxu3 %v11032_v13  ;;  %v11391_v29 = vld [vmem:[%s20108_s3 + $0x348] sm:$0xf]  ;;  %v11388_v13 = vor.u32 %v13042_v46, %v11385_v42 }
 0x2a6   : > { %6085 = vmatpush.bf16.msra.mxu0 %v10836_v27  ;;  %5876 = vmatpush.bf16.msrb.mxu1 %v11068_v62  ;;  %v11036_v27 = vor.u32 %v12954_v48, %v11033_v21  ;;  %v11236_v62 = vor.u32 %v13003_v37, %v11233_v8  ;;  %v12999_v48 = vld [vmem:[%s20108_s3 + $0xda4] sm:$0xf0]  ;;  %v12995_v21 = vld [vmem:[%s20108_s3 + $0xd2c] sm:$0xf] }
 0x2a7   : > { %v12983_v8 = vld [vmem:[%s20108_s3 + $0xba4] sm:$0xf0] }
 0x2a8   : > { %6941 = vmatpush.bf16.msra.mxu2 %v11320_v5  ;;  %v13063_v5 = vld [vmem:[%s20108_s3 + $0x5c4] sm:$0xf0]  ;;  %v17830_v25 = vpop.f32.mrf.mxu2 }
 0x2a9   : > { %v11456_v32 = vor.u32 %v13063_v5, %v11455_v33  ;;  %5908 = vmatpush.bf16.msrb.mxu3 %v11264_v4  ;;  %v11201_v5 = vld [vmem:[%s20108_s3 + $0xda8] sm:$0xf0] }
 0x2aa   : > { %6086 = vmatpush.bf16.msra.mxu0 %v10804_v0  ;;  %5877 = vmatpush.bf16.msrb.mxu1 %v11036_v27  ;;  %v11417_v0 = vld [vmem:[%s20108_s3 + $0x4c0] sm:$0xf0]  ;;  %v17819_v59 = vpop.f32.mrf.mxu0  ;;  %v11204_v18 = vor.u32 %v12995_v21, %v11201_v5  ;;  %v12987_v4 = vld [vmem:[%s20108_s3 + $0xc2c] sm:$0xf]  ;;  %v13023_v21 = vld [vmem:[%s20108_s3 + $0xc4] sm:$0xf0] }
 0x2ab   : > { %v11353_v27 = vld [vmem:[%s20108_s3 + $0x2c0] sm:$0xf0]  ;;  %v11521_v5 = vld [vmem:[%s20108_s3 + $0x7c8] sm:$0xf0] }
 0x2ac   : > { %6942 = vmatpush.bf16.msra.mxu2 %v11288_v50  ;;  %v13050_v50 = vld [vmem:[%s20108_s3 + $0x444] sm:$0xf] }
 0x2ad   : > { %v11420_v54 = vor.u32 %v13050_v50, %v11417_v0  ;;  %v11321_v0 = vld [vmem:[%s20108_s3 + $0x1c0] sm:$0xf0] }
 0x2ae   : > { %6973 = vmatpush.bf16.msrb.mxu0 %v11516_v17  ;;  %v11424_v17 = vor.u32 %v13055_v2, %v11423_v9  ;;  %5946 = vmatpush.bf16.msra.mxu1 %v11268_v36  ;;  %v11356_v9 = vor.u32 %v13034_v53, %v11353_v27  ;;  %v11360_v2 = vor.u32 %v13039_v56, %v11359_v55  ;;  %v13026_v36 = vld [vmem:[%s20108_s3 + $0x144] sm:$0xf]  ;;  %v13080_v53 = vld [vmem:[%s20108_s3 + $0x7cc] sm:$0xf0]  ;;  %v12975_v27 = vld [vmem:[%s20108_s3 + $0xaa4] sm:$0xf0] }
 0x2af   : > { %v11324_v46 = vor.u32 %v13026_v36, %v11321_v0  ;;  %v12971_v56 = vld [vmem:[%s20108_s3 + $0xa2c] sm:$0xf]  ;;  %v11495_v36 = vld [vmem:[%s20108_s3 + $0x650] sm:$0xf] }
 0x2b0   : > { %7011 = vmatpush.bf16.msrb.mxu2 %v11520_v61  ;;  %v11231_v61 = vld [vmem:[%s20108_s3 + $0xe28] sm:$0xf]  ;;  %6087 = vmatmul.bf16.vlgmr.msra.gmra.mxu0 %v15980_v1 }
 0x2b1   : > { %v11232_v28 = vor.u32 %v13007_v34, %v11231_v61  ;;  %v11327_v61 = vld [vmem:[%s20108_s3 + $0x148] sm:$0xf]  ;;  %6943 = vmatmul.bf16.vlgmr.msra.gmra.mxu2 %v15980_v1 }
 0x2b2   : > { %6974 = vmatpush.bf16.msrb.mxu0 %v11484_v22  ;;  %v11392_v22 = vor.u32 %v13047_v24, %v11391_v29  ;;  %5947 = vmatpush.bf16.msra.mxu1 %v11236_v62  ;;  %v17877_v50 = vpop.f32.mrf.mxu0  ;;  %v13031_v34 = vld [vmem:[%s20108_s3 + $0x1c4] sm:$0xf0]  ;;  %v12979_v24 = vld [vmem:[%s20108_s3 + $0xb2c] sm:$0xf] }
 0x2b3   : > { %5909 = vmatpush.bf16.msrb.mxu3 %v11232_v28  ;;  %v11135_v28 = vld [vmem:[%s20108_s3 + $0xb28] sm:$0xf]  ;;  %v11137_v62 = vld [vmem:[%s20108_s3 + $0xba8] sm:$0xf0]  ;;  %v11328_v42 = vor.u32 %v13031_v34, %v11327_v61  ;;  %v13072_v61 = vld [vmem:[%s20108_s3 + $0x6cc] sm:$0xf0] }
 0x2b4   : > { %7012 = vmatpush.bf16.msrb.mxu2 %v11488_v40  ;;  %v11199_v40 = vld [vmem:[%s20108_s3 + $0xd28] sm:$0xf]  ;;  %4951 = vmatmul.bf16.gmra.mxu3 %v17214_v57  ;;  %v11136_v29 = vor.u32 %v12983_v8, %v11135_v28 }
 0x2b5   : > { %v11200_v33 = vor.u32 %v12999_v48, %v11199_v40  ;;  %4989 = vmatmul.bf16.gmra.mxu1 %v17214_v57  ;;  %v11289_v40 = vld [vmem:[%s20108_s3 + $0xc0] sm:$0xf0]  ;;  %v11295_v48 = vld [vmem:[%s20108_s3 + $0x48] sm:$0xf] }
 0x2b6   : > { %6975 = vmatpush.bf16.msrb.mxu0 %v11452_v43  ;;  %5948 = vmatpush.bf16.msra.mxu1 %v11204_v18  ;;  %v11169_v43 = vld [vmem:[%s20108_s3 + $0xca8] sm:$0xf0]  ;;  %v11103_v18 = vld [vmem:[%s20108_s3 + $0xa28] sm:$0xf] }
 0x2b7   : > { %5910 = vmatpush.bf16.msrb.mxu3 %v11200_v33  ;;  %v11172_v37 = vor.u32 %v12987_v4, %v11169_v43  ;;  %v13075_v33 = vld [vmem:[%s20108_s3 + $0x74c] sm:$0xf]  ;;  %v11104_v55 = vor.u32 %v12975_v27, %v11103_v18  ;;  %v11296_v4 = vor.u32 %v13023_v21, %v11295_v48  ;;  %v11071_v34 = vld [vmem:[%s20108_s3 + $0x928] sm:$0xf]  ;;  %v13064_v21 = vld [vmem:[%s20108_s3 + $0x5cc] sm:$0xf0] }
 0x2b8   : > { %7013 = vmatpush.bf16.msrb.mxu2 %v11456_v32  ;;  %v12991_v32 = vld [vmem:[%s20108_s3 + $0xca4] sm:$0xf0]  ;;  %v12955_v27 = vld [vmem:[%s20108_s3 + $0x82c] sm:$0xf] }
 0x2b9   : > { %v11168_v58 = vor.u32 %v12991_v32, %v11167_v26  ;;  %v11105_v26 = vld [vmem:[%s20108_s3 + $0xaa8] sm:$0xf0] }
 0x2ba   : > { %6976 = vmatpush.bf16.msrb.mxu0 %v11420_v54  ;;  %v13018_v54 = vld [vmem:[%s20108_s3 + $0x44] sm:$0xf]  ;;  %5949 = vmatpush.bf16.msra.mxu1 %v11172_v37  ;;  %v11108_v0 = vor.u32 %v12971_v56, %v11105_v26  ;;  %v12967_v37 = vld [vmem:[%s20108_s3 + $0x9a4] sm:$0xf0]  ;;  %v17960_v28 = vpop.f32.mrf.mxu0 }
 0x2bb   : > { %5911 = vmatpush.bf16.msrb.mxu3 %v11168_v58  ;;  %v11292_v32 = vor.u32 %v13018_v54, %v11289_v40  ;;  %v11524_v58 = vor.u32 %v13075_v33, %v11521_v5  ;;  %v11072_v8 = vor.u32 %v12967_v37, %v11071_v34  ;;  %v12963_v54 = vld [vmem:[%s20108_s3 + $0x92c] sm:$0xf]  ;;  %v11463_v40 = vld [vmem:[%s20108_s3 + $0x550] sm:$0xf]  ;;  %v12959_v33 = vld [vmem:[%s20108_s3 + $0x8a4] sm:$0xf0] }
 0x2bc   : > { %7014 = vmatpush.bf16.msrb.mxu2 %v11424_v17  ;;  %v17888_v17 = vpop.f32.mrf.mxu2  ;;  %v13059_v5 = vld [vmem:[%s20108_s3 + $0x54c] sm:$0xf] }
 0x2bd   : > { %v11425_v34 = vld [vmem:[%s20108_s3 + $0x4c8] sm:$0xf0] }
 0x2be   : > { %6977 = vmatpush.bf16.msrb.mxu0 %v11388_v13  ;;  %v11527_v13 = vld [vmem:[%s20108_s3 + $0x750] sm:$0xf] }
 0x2bf   : > { %5912 = vmatpush.bf16.msrb.mxu3 %v11136_v29  ;;  %v11528_v43 = vor.u32 %v13080_v53, %v11527_v13  ;;  %v11073_v29 = vld [vmem:[%s20108_s3 + $0x9a8] sm:$0xf0] }
 0x2c0   : > { %7015 = vmatpush.bf16.msrb.mxu2 %v11392_v22  ;;  %v11140_v22 = vor.u32 %v12979_v24, %v11137_v62  ;;  %v17973_v62 = vld [vmem:[%s20109_s4] sm:$0xff]  ;;  %v11076_v48 = vor.u32 %v12963_v54, %v11073_v29  ;;  %v11457_v13 = vld [vmem:[%s20108_s3 + $0x5c8] sm:$0xf0]  ;;  %v4757_v18 = vpop.f32.mrf.mxu1  ;;  %6092 = vmatmul.bf16.gmra.mxu0 %v16090_v12 }
 0x2c1   : > { %v18000_v56 = vperm.slane %v17973_v62, 0  ;;  %v18003_v26 = vperm.slane %v17973_v62, 1  ;;  %6948 = vmatmul.bf16.gmra.mxu2 %v16090_v12 }
 0x2c2   : > { %6978 = vmatpush.bf16.msrb.mxu0 %v11356_v9  ;;  %5950 = vmatpush.bf16.msra.mxu1 %v11140_v22  ;;  %v13067_v9 = vld [vmem:[%s20108_s3 + $0x64c] sm:$0xf]  ;;  %v11039_v22 = vld [vmem:[%s20108_s3 + $0x828] sm:$0xf] }
 0x2c3   : > { %5913 = vmatpush.bf16.msrb.mxu3 %v11104_v55  ;;  %v11040_v53 = vor.u32 %v12959_v33, %v11039_v22  ;;  %v11041_v55 = vld [vmem:[%s20108_s3 + $0x8a8] sm:$0xf0]  ;;  %v4701_v29 = vadd.f32 %v17045_v39, %v18000_v56  ;;  %v11239_v33 = vld [vmem:[%s20108_s3 + $0xe30] sm:$0xf] }
 0x2c4   : > { %7016 = vmatpush.bf16.msrb.mxu2 %v11360_v2  ;;  %v11489_v2 = vld [vmem:[%s20108_s3 + $0x6c8] sm:$0xf0]  ;;  %v17968_v24 = vpop.f32.mrf.mxu2  ;;  %5840 = vmatmul.bf16.vlgmr.msra.gmra.mxu3 %v17106_v45 }
 0x2c5   : > { %5878 = vmatmul.bf16.vlgmr.msrb.gmra.mxu1 %v17106_v45 }
 0x2c6   : > { %6979 = vmatpush.bf16.msrb.mxu0 %v11324_v46  ;;  %v11492_v46 = vor.u32 %v13067_v9, %v11489_v2  ;;  %5951 = vmatpush.bf16.msra.mxu1 %v11108_v0  ;;  %v11271_v9 = vld [vmem:[%s20108_s3 + $0xf30] sm:$0xf]  ;;  %v11044_v0 = vor.u32 %v12955_v27, %v11041_v55  ;;  %v13043_v55 = vld [vmem:[%s20108_s3 + $0x34c] sm:$0xf] }
 0x2c7   : > { %5914 = vmatpush.bf16.msrb.mxu3 %v11072_v8  ;;  %v13016_v2 = vld [vmem:[%s20108_s3 + $0xfac] sm:$0xf0]  ;;  %v11273_v8 = vld [vmem:[%s20108_s3 + $0xfb0] sm:$0xf0]  ;;  %v4719_v39 = vpop.f32.mrf.mxu3 }
 0x2c8   : > { %7017 = vmatpush.bf16.msrb.mxu2 %v11328_v42  ;;  %v11496_v42 = vor.u32 %v13072_v61, %v11495_v36  ;;  %v13012_v36 = vld [vmem:[%s20108_s3 + $0xf34] sm:$0xf]  ;;  %v13051_v61 = vld [vmem:[%s20108_s3 + $0x44c] sm:$0xf]  ;;  %v11272_v37 = vor.u32 %v13016_v2, %v11271_v9  ;;  %v4720_v27 = vadd.f32 %v4719_v39, %v4701_v29  ;;  %v4741_v39 = vadd.f32 %v17286_v15, %v18003_v26  ;;  %v12992_v15 = vld [vmem:[%s20108_s3 + $0xcac] sm:$0xf0] }
 0x2c9   : > { %v11276_v54 = vor.u32 %v13012_v36, %v11273_v8  ;;  %v11367_v36 = vld [vmem:[%s20108_s3 + $0x250] sm:$0xf]  ;;  %v12996_v8 = vld [vmem:[%s20108_s3 + $0xd34] sm:$0xf]  ;;  %v11361_v29 = vld [vmem:[%s20108_s3 + $0x2c8] sm:$0xf0] }
 0x2ca   : > { %6980 = vmatpush.bf16.msrb.mxu0 %v11292_v32  ;;  %v11464_v32 = vor.u32 %v13064_v21, %v11463_v40  ;;  %5952 = vmatpush.bf16.msra.mxu1 %v11076_v48  ;;  %v11399_v48 = vld [vmem:[%s20108_s3 + $0x350] sm:$0xf] }
 0x2cb   : > { %5915 = vmatpush.bf16.msrb.mxu3 %v11040_v53  ;;  %v13048_v21 = vld [vmem:[%s20108_s3 + $0x3cc] sm:$0xf0] }
 0x2cc   : > { %7018 = vmatpush.bf16.msrb.mxu2 %v11296_v4  ;;  %v11431_v4 = vld [vmem:[%s20108_s3 + $0x450] sm:$0xf]  ;;  %v18045_v22 = vpop.f32.mrf.mxu2  ;;  %v11400_v2 = vor.u32 %v13048_v21, %v11399_v48  ;;  %v4703_v21 = vadd.f32 %v17108_v44, %v18000_v56 }
 0x2cd   : > { %v11175_v44 = vld [vmem:[%s20108_s3 + $0xc30] sm:$0xf] }
 0x2ce   : > { %7049 = vmatpush.bf16.msra.mxu0 %v11524_v58  ;;  %v13056_v58 = vld [vmem:[%s20108_s3 + $0x4cc] sm:$0xf0]  ;;  %5953 = vmatpush.bf16.msra.mxu1 %v11044_v0 }
 0x2cf   : > { %v11432_v40 = vor.u32 %v13056_v58, %v11431_v4  ;;  %5984 = vmatpush.bf16.msra.mxu3 %v11272_v37  ;;  %v11241_v58 = vld [vmem:[%s20108_s3 + $0xeb0] sm:$0xf0]  ;;  %v13040_v0 = vld [vmem:[%s20108_s3 + $0x2cc] sm:$0xf0] }
 0x2d0   : > { %7087 = vmatpush.bf16.msra.mxu2 %v11528_v43  ;;  %v11460_v43 = vor.u32 %v13059_v5, %v11457_v13  ;;  %v13008_v5 = vld [vmem:[%s20108_s3 + $0xeac] sm:$0xf0]  ;;  %v13004_v13 = vld [vmem:[%s20108_s3 + $0xe34] sm:$0xf]  ;;  %6981 = vmatmul.bf16.vlgmr.msrb.gmra.mxu0 %v15980_v1 }
 0x2d1   : > { %v11240_v4 = vor.u32 %v13008_v5, %v11239_v33  ;;  %v13000_v37 = vld [vmem:[%s20108_s3 + $0xdac] sm:$0xf0]  ;;  %7019 = vmatmul.bf16.vlgmr.msrb.gmra.mxu2 %v15980_v1 }
 0x2d2   : > { %7050 = vmatpush.bf16.msra.mxu0 %v11492_v46  ;;  %v4739_v46 = vadd.f32 %v17224_v10, %v18003_v26  ;;  %v11428_v10 = vor.u32 %v13051_v61, %v11425_v34  ;;  %6022 = vmatpush.bf16.msrb.mxu1 %v11276_v54  ;;  %v11207_v34 = vld [vmem:[%s20108_s3 + $0xd30] sm:$0xf]  ;;  %v13035_v54 = vld [vmem:[%s20108_s3 + $0x24c] sm:$0xf] }
 0x2d3   : > { %5985 = vmatpush.bf16.msra.mxu3 %v11240_v4  ;;  %v11335_v33 = vld [vmem:[%s20108_s3 + $0x150] sm:$0xf] }
 0x2d4   : > { %7088 = vmatpush.bf16.msra.mxu2 %v11496_v42  ;;  %v18035_v42 = vpop.f32.mrf.mxu0  ;;  %v4758_v53 = vadd.f32 %v4757_v18, %v4739_v46  ;;  %v4759_v18 = vpop.f32.mrf.mxu1  ;;  %v11208_v46 = vor.u32 %v13000_v37, %v11207_v34  ;;  %v13032_v5 = vld [vmem:[%s20108_s3 + $0x1cc] sm:$0xf0]  ;;  %v13019_v37 = vld [vmem:[%s20108_s3 + $0x4c] sm:$0xf]  ;;  %5845 = vmatmul.bf16.gmra.mxu3 %v17214_v57 }
 0x2d5   : > { %v11336_v34 = vor.u32 %v13032_v5, %v11335_v33  ;;  %5883 = vmatmul.bf16.gmra.mxu1 %v17214_v57  ;;  %v13076_v5 = vld [vmem:[%s20108_s3 + $0x754] sm:$0xf] }
 0x2d6   : > { %7051 = vmatpush.bf16.msra.mxu0 %v11460_v43  ;;  %v11244_v43 = vor.u32 %v13004_v13, %v11241_v58  ;;  %v4995_v9 = vpack.c.bf16 %v4758_v53, %v4720_v27  ;;  %v4721_v13 = vpop.f32.mrf.mxu3  ;;  %v11364_v53 = vor.u32 %v13035_v54, %v11361_v29  ;;  %v12988_v27 = vld [vmem:[%s20108_s3 + $0xc34] sm:$0xf]  ;;  %v13027_v58 = vld [vmem:[%s20108_s3 + $0x14c] sm:$0xf]  ;;  %v11303_v54 = vld [vmem:[%s20108_s3 + $0x50] sm:$0xf] }
 0x2d7   : > { %v4722_v4 = vadd.f32 %v4721_v13, %v4703_v21  ;;  %5986 = vmatpush.bf16.msra.mxu3 %v11208_v46  ;;  %v13024_v46 = vld [vmem:[%s20108_s3 + $0xcc] sm:$0xf0]  ;;  %v12980_v21 = vld [vmem:[%s20108_s3 + $0xb34] sm:$0xf] }
 0x2d8   : > { %7089 = vmatpush.bf16.msra.mxu2 %v11464_v32  ;;  %v11393_v32 = vld [vmem:[%s20108_s3 + $0x3c8] sm:$0xf0]  ;;  %5011 = vst [vmem:[%s18069_s27] sm:$0xff] %v4995_v9  ;;  %6023 = vmatpush.bf16.msrb.mxu1 %v11244_v43  ;;  %v11177_v9 = vld [vmem:[%s20108_s3 + $0xcb0] sm:$0xf0] }
 0x2d9   : > { %v11396_v61 = vor.u32 %v13043_v55, %v11393_v32  ;;  %v4760_v32 = vadd.f32 %v4759_v18, %v4741_v39  ;;  %v11329_v43 = vld [vmem:[%s20108_s3 + $0x1c8] sm:$0xf0]  ;;  %v11176_v18 = vor.u32 %v12992_v15, %v11175_v44  ;;  %v11145_v39 = vld [vmem:[%s20108_s3 + $0xbb0] sm:$0xf0]  ;;  %v4706_v44 = vadd.f32 %v17164_v14, %v18000_v56  ;;  %v11111_v14 = vld [vmem:[%s20108_s3 + $0xa30] sm:$0xf] }
 0x2da   : > { %7052 = vmatpush.bf16.msra.mxu0 %v11428_v10  ;;  %v11368_v10 = vor.u32 %v13040_v0, %v11367_v36  ;;  %v11180_v0 = vor.u32 %v12988_v27, %v11177_v9  ;;  %v11332_v29 = vor.u32 %v13027_v58, %v11329_v43  ;;  %v11148_v33 = vor.u32 %v12980_v21, %v11145_v39  ;;  %v11529_v13 = vld [vmem:[%s20108_s3 + $0x7d0] sm:$0xf0]  ;;  %v13073_v21 = vld [vmem:[%s20108_s3 + $0x6d4] sm:$0xf0] }
 0x2db   : > { %5987 = vmatpush.bf16.msra.mxu3 %v11176_v18  ;;  %v4744_v15 = vadd.f32 %v17338_v23, %v18003_v26  ;;  %v11304_v27 = vor.u32 %v13024_v46, %v11303_v54  ;;  %v12976_v23 = vld [vmem:[%s20108_s3 + $0xaac] sm:$0xf0]  ;;  %v12972_v9 = vld [vmem:[%s20108_s3 + $0xa34] sm:$0xf] }
 0x2dc   : > { %7090 = vmatpush.bf16.msra.mxu2 %v11432_v40  ;;  %v11209_v40 = vld [vmem:[%s20108_s3 + $0xdb0] sm:$0xf0]  ;;  %v18115_v55 = vpop.f32.mrf.mxu0  ;;  %v4762_v36 = vpop.f32.mrf.mxu1 }
 0x2dd   : > { %v11212_v48 = vor.u32 %v12996_v8, %v11209_v40  ;;  %v11297_v8 = vld [vmem:[%s20108_s3 + $0xc8] sm:$0xf0]  ;;  %v11143_v40 = vld [vmem:[%s20108_s3 + $0xb30] sm:$0xf]  ;;  %v4763_v18 = vadd.f32 %v4762_v36, %v4744_v15  ;;  %v11497_v36 = vld [vmem:[%s20108_s3 + $0x6d0] sm:$0xf0] }
 0x2de   : > { %7053 = vmatpush.bf16.msra.mxu0 %v11396_v61  ;;  %v4999_v61 = vpack.c.bf16 %v4760_v32, %v4722_v4  ;;  %v13081_v32 = vld [vmem:[%s20108_s3 + $0x7d4] sm:$0xf0]  ;;  %v4724_v4 = vpop.f32.mrf.mxu3  ;;  %v11300_v58 = vor.u32 %v13019_v37, %v11297_v8  ;;  %v11112_v8 = vor.u32 %v12976_v23, %v11111_v14  ;;  %v11465_v14 = vld [vmem:[%s20108_s3 + $0x5d0] sm:$0xf0] }
 0x2df   : > { %6024 = vmatpush.bf16.msrb.mxu1 %v11212_v48  ;;  %v12984_v48 = vld [vmem:[%s20108_s3 + $0xbac] sm:$0xf0]  ;;  %v13065_v23 = vld [vmem:[%s20108_s3 + $0x5d4] sm:$0xf0] }
 0x2e0   : > { %7091 = vmatpush.bf16.msra.mxu2 %v11400_v2  ;;  %v18126_v2 = vpop.f32.mrf.mxu2  ;;  %5015 = vst [vmem:[%s18069_s27 + $0x80] sm:$0xff] %v4999_v61  ;;  %v11532_v61 = vor.u32 %v13076_v5, %v11529_v13  ;;  %v12968_v5 = vld [vmem:[%s20108_s3 + $0x9ac] sm:$0xf0]  ;;  %v12964_v13 = vld [vmem:[%s20108_s3 + $0x934] sm:$0xf]  ;;  %6986 = vmatmul.bf16.gmra.mxu0 %v16090_v12 }
 0x2e1   : > { %7024 = vmatmul.bf16.gmra.mxu2 %v16090_v12 }
 0x2e2   : > { %7054 = vmatpush.bf16.msra.mxu0 %v11364_v53  ;;  %v11535_v53 = vld [vmem:[%s20108_s3 + $0x758] sm:$0xf] }
 0x2e3   : > { %6025 = vmatpush.bf16.msrb.mxu1 %v11180_v0  ;;  %v11536_v43 = vor.u32 %v13081_v32, %v11535_v53  ;;  %v4725_v0 = vadd.f32 %v4724_v4, %v4706_v44  ;;  %v11081_v44 = vld [vmem:[%s20108_s3 + $0x9b0] sm:$0xf0]  ;;  %v11471_v32 = vld [vmem:[%s20108_s3 + $0x558] sm:$0xf]  ;;  %v4708_v4 = vadd.f32 %v17216_v3, %v18000_v56  ;;  %v11047_v3 = vld [vmem:[%s20108_s3 + $0x830] sm:$0xf] }
 0x2e4   : > { %7092 = vmatpush.bf16.msra.mxu2 %v11368_v10  ;;  %v11144_v10 = vor.u32 %v12984_v48, %v11143_v40  ;;  %v4764_v37 = vpop.f32.mrf.mxu1  ;;  %v18191_v46 = vpop.f32.mrf.mxu0  ;;  %v11503_v48 = vld [vmem:[%s20108_s3 + $0x658] sm:$0xf]  ;;  %v12956_v56 = vld [vmem:[%s20108_s3 + $0x834] sm:$0xf]  ;;  %5916 = vmatmul.bf16.vlgmr.msrb.gmra.mxu3 %v17106_v45 }
 0x2e5   : > { %v5003_v40 = vpack.c.bf16 %v4763_v18, %v4725_v0  ;;  %v11472_v18 = vor.u32 %v13065_v23, %v11471_v32  ;;  %5954 = vmatmul.bf16.vlgmr.msra.gmra.mxu1 %v17106_v45  ;;  %v11281_v32 = vld [vmem:[%s20108_s3 + $0xfb8] sm:$0xf0]  ;;  %v11407_v23 = vld [vmem:[%s20108_s3 + $0x358] sm:$0xf] }
 0x2e6   : > { %7055 = vmatpush.bf16.msra.mxu0 %v11332_v29  ;;  %5988 = vmatpush.bf16.msra.mxu3 %v11144_v10  ;;  %v13068_v29 = vld [vmem:[%s20108_s3 + $0x654] sm:$0xf]  ;;  %v11504_v10 = vor.u32 %v13073_v21, %v11503_v48 }
 0x2e7   : > { %6026 = vmatpush.bf16.msrb.mxu1 %v11148_v33  ;;  %v11079_v33 = vld [vmem:[%s20108_s3 + $0x930] sm:$0xf]  ;;  %5019 = vst [vmem:[%s18069_s27 + $0x100] sm:$0xff] %v5003_v40  ;;  %v11500_v53 = vor.u32 %v13068_v29, %v11497_v36  ;;  %v13052_v21 = vld [vmem:[%s20108_s3 + $0x454] sm:$0xf] }
 0x2e8   : > { %7093 = vmatpush.bf16.msra.mxu2 %v11336_v34  ;;  %v11113_v34 = vld [vmem:[%s20108_s3 + $0xab0] sm:$0xf0]  ;;  %v18199_v39 = vpop.f32.mrf.mxu2  ;;  %v11080_v15 = vor.u32 %v12968_v5, %v11079_v33  ;;  %v13057_v33 = vld [vmem:[%s20108_s3 + $0x4d4] sm:$0xf0] }
 0x2e9   : > { %v11116_v54 = vor.u32 %v12972_v9, %v11113_v34  ;;  %v4726_v9 = vpop.f32.mrf.mxu3  ;;  %v18243_v34 = vperm.slane %v17973_v62, 2  ;;  %v11279_v5 = vld [vmem:[%s20108_s3 + $0xf38] sm:$0xf] }
 0x2ea   : > { %7056 = vmatpush.bf16.msra.mxu0 %v11300_v58  ;;  %5989 = vmatpush.bf16.msra.mxu3 %v11112_v8  ;;  %v4746_v58 = vadd.f32 %v17394_v51, %v18003_v26  ;;  %v12960_v51 = vld [vmem:[%s20108_s3 + $0x8ac] sm:$0xf0]  ;;  %v4727_v0 = vadd.f32 %v4726_v9, %v4708_v4  ;;  %v18246_v8 = vperm.slane %v17973_v62, 3 }
 0x2eb   : > { %6027 = vmatpush.bf16.msrb.mxu1 %v11116_v54  ;;  %v11048_v36 = vor.u32 %v12960_v51, %v11047_v3  ;;  %v4777_v9 = vadd.f32 %v17272_v38, %v18243_v34  ;;  %v13049_v3 = vld [vmem:[%s20108_s3 + $0x3d4] sm:$0xf0] }
 0x2ec   : > { %7094 = vmatpush.bf16.msra.mxu2 %v11304_v27  ;;  %v11084_v27 = vor.u32 %v12964_v13, %v11081_v44  ;;  %v4765_v26 = vadd.f32 %v4764_v37, %v4746_v58  ;;  %v4833_v54 = vpop.f32.mrf.mxu1  ;;  %v11439_v37 = vld [vmem:[%s20108_s3 + $0x458] sm:$0xf]  ;;  %v18269_v44 = vpop.f32.mrf.mxu0  ;;  %v4815_v4 = vadd.f32 %v17446_v52, %v18246_v8  ;;  %v13044_v52 = vld [vmem:[%s20108_s3 + $0x354] sm:$0xf] }
 0x2ed   : > { %v13017_v13 = vld [vmem:[%s20108_s3 + $0xfb4] sm:$0xf0] }
 0x2ee   : > { %7125 = vmatpush.bf16.msrb.mxu0 %v11532_v61  ;;  %v11049_v61 = vld [vmem:[%s20108_s3 + $0x8b0] sm:$0xf0]  ;;  %5990 = vmatpush.bf16.msra.mxu3 %v11080_v15  ;;  %v5007_v40 = vpack.c.bf16 %v4765_v26, %v4727_v0  ;;  %v11440_v15 = vor.u32 %v13057_v33, %v11439_v37  ;;  %v4834_v51 = vadd.f32 %v4833_v54, %v4815_v4  ;;  %v11247_v38 = vld [vmem:[%s20108_s3 + $0xe38] sm:$0xf]  ;;  %v13005_v0 = vld [vmem:[%s20108_s3 + $0xe3c] sm:$0xf] }
 0x2ef   : > { %6028 = vmatpush.bf16.msrb.mxu1 %v11084_v27  ;;  %v11052_v48 = vor.u32 %v12956_v56, %v11049_v61  ;;  %v11280_v27 = vor.u32 %v13017_v13, %v11279_v5  ;;  %v13009_v26 = vld [vmem:[%s20108_s3 + $0xeb4] sm:$0xf0]  ;;  %v11408_v54 = vor.u32 %v13049_v3, %v11407_v23  ;;  %v13036_v33 = vld [vmem:[%s20108_s3 + $0x254] sm:$0xf] }
 0x2f0   : > { %7163 = vmatpush.bf16.msrb.mxu2 %v11536_v43  ;;  %v13060_v43 = vld [vmem:[%s20108_s3 + $0x554] sm:$0xf]  ;;  %5023 = vst [vmem:[%s18069_s27 + $0x180] sm:$0xff] %v5007_v40  ;;  %v18279_v58 = vpop.f32.mrf.mxu2  ;;  %v13041_v13 = vld [vmem:[%s20108_s3 + $0x2d4] sm:$0xf0]  ;;  %7057 = vmatmul.bf16.vlgmr.msra.gmra.mxu0 %v15980_v1 }
 0x2f1   : > { %v11468_v29 = vor.u32 %v13060_v43, %v11465_v14  ;;  %v4795_v56 = vpop.f32.mrf.mxu3  ;;  %v11369_v5 = vld [vmem:[%s20108_s3 + $0x2d0] sm:$0xf0]  ;;  %7095 = vmatmul.bf16.vlgmr.msra.gmra.mxu2 %v15980_v1 }
 0x2f2   : > { %7126 = vmatpush.bf16.msrb.mxu0 %v11500_v53  ;;  %v13013_v53 = vld [vmem:[%s20108_s3 + $0xf3c] sm:$0xf]  ;;  %5991 = vmatpush.bf16.msra.mxu3 %v11048_v36  ;;  %v4796_v61 = vadd.f32 %v4795_v56, %v4777_v9  ;;  %v13028_v9 = vld [vmem:[%s20108_s3 + $0x154] sm:$0xf]  ;;  %v11343_v56 = vld [vmem:[%s20108_s3 + $0x158] sm:$0xf] }
 0x2f3   : > { %v11284_v14 = vor.u32 %v13013_v53, %v11281_v32  ;;  %6029 = vmatpush.bf16.msrb.mxu1 %v11052_v48  ;;  %v11249_v36 = vld [vmem:[%s20108_s3 + $0xeb8] sm:$0xf0]  ;;  %v11215_v53 = vld [vmem:[%s20108_s3 + $0xd38] sm:$0xf] }
 0x2f4   : > { %7164 = vmatpush.bf16.msrb.mxu2 %v11504_v10  ;;  %v11433_v10 = vld [vmem:[%s20108_s3 + $0x4d0] sm:$0xf0]  ;;  %v4835_v37 = vpop.f32.mrf.mxu1  ;;  %v11252_v48 = vor.u32 %v13005_v0, %v11249_v36  ;;  %v18341_v3 = vpop.f32.mrf.mxu0  ;;  %v12993_v0 = vld [vmem:[%s20108_s3 + $0xcb4] sm:$0xf0]  ;;  %5921 = vmatmul.bf16.gmra.mxu3 %v17214_v57 }
 0x2f5   : > { %v11436_v43 = vor.u32 %v13052_v21, %v11433_v10  ;;  %v11375_v21 = vld [vmem:[%s20108_s3 + $0x258] sm:$0xf]  ;;  %v4996_v10 = vpack.c.bf16 %v4834_v51, %v4796_v61  ;;  %v11337_v51 = vld [vmem:[%s20108_s3 + $0x1d0] sm:$0xf0]  ;;  %v12989_v61 = vld [vmem:[%s20108_s3 + $0xc3c] sm:$0xf]  ;;  %5959 = vmatmul.bf16.gmra.mxu1 %v17214_v57 }
 0x2f6   : > { %7127 = vmatpush.bf16.msrb.mxu0 %v11468_v29  ;;  %6060 = vmatpush.bf16.msrb.mxu3 %v11280_v27  ;;  %v11248_v29 = vor.u32 %v13009_v26, %v11247_v38  ;;  %v12997_v27 = vld [vmem:[%s20108_s3 + $0xd3c] sm:$0xf]  ;;  %v11376_v32 = vor.u32 %v13041_v13, %v11375_v21  ;;  %v13033_v38 = vld [vmem:[%s20108_s3 + $0x1d4] sm:$0xf0]  ;;  %v11340_v21 = vor.u32 %v13028_v9, %v11337_v51 }
 0x2f7   : > { %6098 = vmatpush.bf16.msra.mxu1 %v11284_v14  ;;  %5012 = vst [vmem:[%s18069_s27 + $0x8] sm:$0xff] %v4996_v10  ;;  %v11372_v14 = vor.u32 %v13036_v33, %v11369_v5  ;;  %v11344_v10 = vor.u32 %v13033_v38, %v11343_v56  ;;  %v13020_v33 = vld [vmem:[%s20108_s3 + $0x54] sm:$0xf]  ;;  %v11537_v51 = vld [vmem:[%s20108_s3 + $0x7d8] sm:$0xf0]  ;;  %v4820_v38 = vadd.f32 %v17560_v60, %v18246_v8 }
 0x2f8   : > { %7165 = vmatpush.bf16.msrb.mxu2 %v11472_v18  ;;  %v11401_v18 = vld [vmem:[%s20108_s3 + $0x3d0] sm:$0xf0]  ;;  %v18352_v26 = vpop.f32.mrf.mxu2  ;;  %v12023_v56 = vld [vmem:[%s20108_s3 + $0x760] sm:$0xf]  ;;  %v12977_v60 = vld [vmem:[%s20108_s3 + $0xab4] sm:$0xf0] }
 0x2f9   : > { %v11404_v40 = vor.u32 %v13044_v52, %v11401_v18  ;;  %v4779_v52 = vadd.f32 %v17330_v16, %v18243_v34  ;;  %v4817_v18 = vadd.f32 %v17511_v63, %v18246_v8  ;;  %v4797_v16 = vpop.f32.mrf.mxu3  ;;  %v11183_v63 = vld [vmem:[%s20108_s3 + $0xc38] sm:$0xf] }
 0x2fa   : > { %7128 = vmatpush.bf16.msrb.mxu0 %v11436_v43  ;;  %6061 = vmatpush.bf16.msrb.mxu3 %v11248_v29  ;;  %v11217_v43 = vld [vmem:[%s20108_s3 + $0xdb8] sm:$0xf0]  ;;  %v11184_v36 = vor.u32 %v12993_v0, %v11183_v63  ;;  %v13206_v63 = vld [vmem:[%s20108_s3 + $0x7dc] sm:$0xf0] }
 0x2fb   : > { %6099 = vmatpush.bf16.msra.mxu1 %v11252_v48  ;;  %v11220_v23 = vor.u32 %v12997_v27, %v11217_v43  ;;  %v4798_v29 = vadd.f32 %v4797_v16, %v4779_v52  ;;  %v11151_v27 = vld [vmem:[%s20108_s3 + $0xb38] sm:$0xf]  ;;  %v12981_v43 = vld [vmem:[%s20108_s3 + $0xb3c] sm:$0xf] }
 0x2fc   : > { %7166 = vmatpush.bf16.msrb.mxu2 %v11440_v15  ;;  %v13001_v15 = vld [vmem:[%s20108_s3 + $0xdb4] sm:$0xf0]  ;;  %v4838_v48 = vpop.f32.mrf.mxu1 }
 0x2fd   : > { %v11216_v4 = vor.u32 %v13001_v15, %v11215_v53  ;;  %v11311_v53 = vld [vmem:[%s20108_s3 + $0x58] sm:$0xf] }
 0x2fe   : > { %7129 = vmatpush.bf16.msrb.mxu0 %v11404_v40  ;;  %v11185_v40 = vld [vmem:[%s20108_s3 + $0xcb8] sm:$0xf0]  ;;  %v13025_v15 = vld [vmem:[%s20108_s3 + $0xd4] sm:$0xf0] }
 0x2ff   : > { %6062 = vmatpush.bf16.msrb.mxu3 %v11216_v4  ;;  %6100 = vmatpush.bf16.msra.mxu1 %v11220_v23  ;;  %v11188_v13 = vor.u32 %v12989_v61, %v11185_v40  ;;  %v4782_v23 = vadd.f32 %v17386_v6, %v18243_v34  ;;  %v11312_v52 = vor.u32 %v13025_v15, %v11311_v53 }
 0x300   : > { %7167 = vmatpush.bf16.msrb.mxu2 %v11408_v54  ;;  %v4836_v54 = vadd.f32 %v4835_v37, %v4817_v18  ;;  %v11305_v37 = vld [vmem:[%s20108_s3 + $0xd0] sm:$0xf0]  ;;  %v13077_v18 = vld [vmem:[%s20108_s3 + $0x75c] sm:$0xf]  ;;  %v12024_v61 = vor.u32 %v13206_v63, %v12023_v56  ;;  %v4839_v40 = vadd.f32 %v4838_v48, %v4820_v38  ;;  %7062 = vmatmul.bf16.gmra.mxu0 %v16090_v12 }
 0x301   : > { %v11308_v9 = vor.u32 %v13020_v33, %v11305_v37  ;;  %v11540_v16 = vor.u32 %v13077_v18, %v11537_v51  ;;  %v4800_v0 = vpop.f32.mrf.mxu3  ;;  %v11121_v33 = vld [vmem:[%s20108_s3 + $0xab8] sm:$0xf0]  ;;  %v4784_v51 = vadd.f32 %v17435_v11, %v18243_v34  ;;  %v13190_v11 = vld [vmem:[%s20108_s3 + $0x5dc] sm:$0xf0]  ;;  %7100 = vmatmul.bf16.gmra.mxu2 %v16090_v12 }
 0x302   : > { %7130 = vmatpush.bf16.msrb.mxu0 %v11372_v14  ;;  %v5000_v5 = vpack.c.bf16 %v4836_v54, %v4798_v29  ;;  %v11153_v14 = vld [vmem:[%s20108_s3 + $0xbb8] sm:$0xf0]  ;;  %v11119_v54 = vld [vmem:[%s20108_s3 + $0xa38] sm:$0xf] }
 0x303   : > { %6063 = vmatpush.bf16.msrb.mxu3 %v11184_v36  ;;  %6101 = vmatpush.bf16.msra.mxu1 %v11188_v13  ;;  %v11156_v6 = vor.u32 %v12981_v43, %v11153_v14  ;;  %v12973_v29 = vld [vmem:[%s20108_s3 + $0xa3c] sm:$0xf]  ;;  %v18420_v36 = vpop.f32.mrf.mxu0  ;;  %v11087_v14 = vld [vmem:[%s20108_s3 + $0x938] sm:$0xf] }
 0x304   : > { %7168 = vmatpush.bf16.msrb.mxu2 %v11376_v32  ;;  %v12985_v32 = vld [vmem:[%s20108_s3 + $0xbb4] sm:$0xf0]  ;;  %5016 = vst [vmem:[%s18069_s27 + $0x88] sm:$0xff] %v5000_v5  ;;  %v18425_v5 = vpop.f32.mrf.mxu2  ;;  %v4840_v13 = vpop.f32.mrf.mxu1  ;;  %v13069_v37 = vld [vmem:[%s20108_s3 + $0x65c] sm:$0xf]  ;;  %v11124_v15 = vor.u32 %v12973_v29, %v11121_v33  ;;  %5992 = vmatmul.bf16.vlgmr.msra.gmra.mxu3 %v17106_v45 }
 0x305   : > { %v11152_v4 = vor.u32 %v12985_v32, %v11151_v27  ;;  %v11505_v48 = vld [vmem:[%s20108_s3 + $0x6d8] sm:$0xf0]  ;;  %v11991_v32 = vld [vmem:[%s20108_s3 + $0x660] sm:$0xf]  ;;  %6030 = vmatmul.bf16.vlgmr.msrb.gmra.mxu1 %v17106_v45 }
 0x306   : > { %7131 = vmatpush.bf16.msrb.mxu0 %v11340_v21  ;;  %v4801_v21 = vadd.f32 %v4800_v0, %v4782_v23  ;;  %v11508_v27 = vor.u32 %v13069_v37, %v11505_v48  ;;  %v12969_v23 = vld [vmem:[%s20108_s3 + $0x9b4] sm:$0xf0]  ;;  %v11089_v18 = vld [vmem:[%s20108_s3 + $0x9b8] sm:$0xf0] }
 0x307   : > { %6064 = vmatpush.bf16.msrb.mxu3 %v11152_v4  ;;  %6102 = vmatpush.bf16.msra.mxu1 %v11156_v6  ;;  %v13198_v4 = vld [vmem:[%s20108_s3 + $0x6dc] sm:$0xf0]  ;;  %v13061_v56 = vld [vmem:[%s20108_s3 + $0x55c] sm:$0xf] }
 0x308   : > { %7169 = vmatpush.bf16.msrb.mxu2 %v11344_v10  ;;  %v11120_v10 = vor.u32 %v12977_v60, %v11119_v54  ;;  %v5004_v53 = vpack.c.bf16 %v4839_v40, %v4801_v21  ;;  %v11992_v43 = vor.u32 %v13198_v4, %v11991_v32  ;;  %v11473_v38 = vld [vmem:[%s20108_s3 + $0x5d8] sm:$0xf0]  ;;  %v11959_v6 = vld [vmem:[%s20108_s3 + $0x560] sm:$0xf]  ;;  %v11055_v54 = vld [vmem:[%s20108_s3 + $0x838] sm:$0xf] }
 0x309   : > { %v11476_v0 = vor.u32 %v13061_v56, %v11473_v38  ;;  %v4802_v34 = vpop.f32.mrf.mxu3  ;;  %v18478_v60 = vperm.slane %v17973_v62, 5  ;;  %v13053_v37 = vld [vmem:[%s20108_s3 + $0x45c] sm:$0xf]  ;;  %v13182_v4 = vld [vmem:[%s20108_s3 + $0x4dc] sm:$0xf0] }
 0x30a   : > { %7132 = vmatpush.bf16.msrb.mxu0 %v11308_v9  ;;  %v12965_v9 = vld [vmem:[%s20108_s3 + $0x93c] sm:$0xf]  ;;  %5020 = vst [vmem:[%s18069_s27 + $0x108] sm:$0xff] %v5004_v53  ;;  %v4803_v40 = vadd.f32 %v4802_v34, %v4784_v51  ;;  %v18493_v53 = vperm.slane %v17973_v62, 4  ;;  %v11767_v62 = vld [vmem:[%s20108_s3 + $0xf40] sm:$0xf] }
 0x30b   : > { %6065 = vmatpush.bf16.msrb.mxu3 %v11120_v10  ;;  %6103 = vmatpush.bf16.msra.mxu1 %v11124_v15  ;;  %v11092_v63 = vor.u32 %v12965_v9, %v11089_v18  ;;  %v11057_v10 = vld [vmem:[%s20108_s3 + $0x8b8] sm:$0xf0]  ;;  %v18495_v15 = vpop.f32.mrf.mxu0  ;;  %v13138_v9 = vld [vmem:[%s20108_s3 + $0xf44] sm:$0xf]  ;;  %v4891_v56 = vadd.f32 %v17677_v31, %v18478_v60  ;;  %v13174_v31 = vld [vmem:[%s20108_s3 + $0x3dc] sm:$0xf0] }
 0x30c   : > { %7170 = vmatpush.bf16.msrb.mxu2 %v11312_v52  ;;  %v11088_v52 = vor.u32 %v12969_v23, %v11087_v14  ;;  %v4909_v33 = vpop.f32.mrf.mxu1  ;;  %v11441_v48 = vld [vmem:[%s20108_s3 + $0x4d8] sm:$0xf0]  ;;  %v13142_v23 = vld [vmem:[%s20108_s3 + $0xfbc] sm:$0xf0]  ;;  %v11769_v51 = vld [vmem:[%s20108_s3 + $0xfc0] sm:$0xf0] }
 0x30d   : > { %v11444_v14 = vor.u32 %v13053_v37, %v11441_v48  ;;  %v11768_v18 = vor.u32 %v13142_v23, %v11767_v62  ;;  %v11772_v38 = vor.u32 %v13138_v9, %v11769_v51  ;;  %v13037_v37 = vld [vmem:[%s20108_s3 + $0x25c] sm:$0xf]  ;;  %v13126_v62 = vld [vmem:[%s20108_s3 + $0xdbc] sm:$0xf0]  ;;  %v13122_v23 = vld [vmem:[%s20108_s3 + $0xd44] sm:$0xf] }
 0x30e   : > { %7201 = vmatpush.bf16.msra.mxu0 %v11540_v16  ;;  %v4822_v16 = vadd.f32 %v17616_v19, %v18246_v8  ;;  %v12961_v19 = vld [vmem:[%s20108_s3 + $0x8b4] sm:$0xf0]  ;;  %v12957_v8 = vld [vmem:[%s20108_s3 + $0x83c] sm:$0xf]  ;;  %v11705_v51 = vld [vmem:[%s20108_s3 + $0xdc0] sm:$0xf0] }
 0x30f   : > { %6066 = vmatpush.bf16.msrb.mxu3 %v11088_v52  ;;  %v11056_v21 = vor.u32 %v12961_v19, %v11055_v54  ;;  %6104 = vmatpush.bf16.msra.mxu1 %v11092_v63  ;;  %v11060_v32 = vor.u32 %v12957_v8, %v11057_v10  ;;  %v11895_v63 = vld [vmem:[%s20108_s3 + $0x360] sm:$0xf]  ;;  %v13130_v19 = vld [vmem:[%s20108_s3 + $0xe44] sm:$0xf]  ;;  %v11377_v48 = vld [vmem:[%s20108_s3 + $0x2d8] sm:$0xf0] }
 0x310   : > { %8057 = vmatpush.bf16.msra.mxu2 %v12024_v61  ;;  %v11960_v61 = vor.u32 %v13190_v11, %v11959_v6  ;;  %v4841_v29 = vadd.f32 %v4840_v13, %v4822_v16  ;;  %v11927_v13 = vld [vmem:[%s20108_s3 + $0x460] sm:$0xf]  ;;  %v13045_v6 = vld [vmem:[%s20108_s3 + $0x35c] sm:$0xf]  ;;  %v4910_v11 = vadd.f32 %v4909_v33, %v4891_v56  ;;  %7133 = vmatmul.bf16.vlgmr.msrb.gmra.mxu0 %v15980_v1 }
 0x311   : > { %v11928_v52 = vor.u32 %v13182_v4, %v11927_v13  ;;  %v11409_v16 = vld [vmem:[%s20108_s3 + $0x3d8] sm:$0xf0]  ;;  %v4871_v34 = vpop.f32.mrf.mxu3  ;;  %v11735_v54 = vld [vmem:[%s20108_s3 + $0xe40] sm:$0xf]  ;;  %v11380_v4 = vor.u32 %v13037_v37, %v11377_v48  ;;  %7171 = vmatmul.bf16.vlgmr.msrb.gmra.mxu2 %v15980_v1 }
 0x312   : > { %7202 = vmatpush.bf16.msra.mxu0 %v11508_v27  ;;  %v5008_v27 = vpack.c.bf16 %v4841_v29, %v4803_v40  ;;  %v11896_v29 = vor.u32 %v13174_v31, %v11895_v63  ;;  %v11863_v13 = vld [vmem:[%s20108_s3 + $0x260] sm:$0xf]  ;;  %v4855_v63 = vadd.f32 %v17552_v49, %v18493_v53 }
 0x313   : > { %6067 = vmatpush.bf16.msrb.mxu3 %v11056_v21  ;;  %6105 = vmatpush.bf16.msra.mxu1 %v11060_v32  ;;  %v11737_v21 = vld [vmem:[%s20108_s3 + $0xec0] sm:$0xf0]  ;;  %v13166_v32 = vld [vmem:[%s20108_s3 + $0x2dc] sm:$0xf0]  ;;  %v18568_v9 = vpop.f32.mrf.mxu0 }
 0x314   : > { %8058 = vmatpush.bf16.msra.mxu2 %v11992_v43  ;;  %v18500_v43 = vpop.f32.mrf.mxu2  ;;  %5024 = vst [vmem:[%s18069_s27 + $0x188] sm:$0xff] %v5008_v27  ;;  %v4911_v10 = vpop.f32.mrf.mxu1  ;;  %v11740_v33 = vor.u32 %v13130_v19, %v11737_v21  ;;  %v11831_v31 = vld [vmem:[%s20108_s3 + $0x160] sm:$0xf]  ;;  %5997 = vmatmul.bf16.gmra.mxu3 %v17214_v57 }
 0x315   : > { %v13118_v49 = vld [vmem:[%s20108_s3 + $0xcbc] sm:$0xf0]  ;;  %6035 = vmatmul.bf16.gmra.mxu1 %v17214_v57 }
 0x316   : > { %7203 = vmatpush.bf16.msra.mxu0 %v11476_v0  ;;  %v4853_v0 = vadd.f32 %v17500_v35, %v18493_v53  ;;  %v13134_v35 = vld [vmem:[%s20108_s3 + $0xebc] sm:$0xf0] }
 0x317   : > { %6954 = vmatpush.bf16.msra.mxu3 %v11768_v18  ;;  %v11736_v40 = vor.u32 %v13134_v35, %v11735_v54  ;;  %6992 = vmatpush.bf16.msrb.mxu1 %v11772_v38  ;;  %v11708_v38 = vor.u32 %v13122_v23, %v11705_v51  ;;  %v11671_v54 = vld [vmem:[%s20108_s3 + $0xc40] sm:$0xf]  ;;  %v11641_v23 = vld [vmem:[%s20108_s3 + $0xbc0] sm:$0xf0] }
 0x318   : > { %8059 = vmatpush.bf16.msra.mxu2 %v11960_v61  ;;  %v11412_v61 = vor.u32 %v13045_v6, %v11409_v16  ;;  %v4872_v8 = vadd.f32 %v4871_v34, %v4853_v0  ;;  %v13029_v6 = vld [vmem:[%s20108_s3 + $0x15c] sm:$0xf]  ;;  %v4893_v0 = vadd.f32 %v17751_v47, %v18478_v60  ;;  %v13114_v47 = vld [vmem:[%s20108_s3 + $0xc44] sm:$0xf]  ;;  %v11672_v21 = vor.u32 %v13118_v49, %v11671_v54  ;;  %v13102_v49 = vld [vmem:[%s20108_s3 + $0xabc] sm:$0xf0] }
 0x319   : > { %v11345_v16 = vld [vmem:[%s20108_s3 + $0x1d8] sm:$0xf0]  ;;  %v4873_v34 = vpop.f32.mrf.mxu3 }
 0x31a   : > { %7204 = vmatpush.bf16.msra.mxu0 %v11444_v14  ;;  %v4997_v27 = vpack.c.bf16 %v4910_v11, %v4872_v8  ;;  %v11703_v14 = vld [vmem:[%s20108_s3 + $0xd40] sm:$0xf]  ;;  %v4912_v35 = vadd.f32 %v4911_v10, %v4893_v0  ;;  %v4874_v19 = vadd.f32 %v4873_v34, %v4855_v63  ;;  %v11673_v8 = vld [vmem:[%s20108_s3 + $0xcc0] sm:$0xf0]  ;;  %v11313_v10 = vld [vmem:[%s20108_s3 + $0xd8] sm:$0xf0]  ;;  %v4896_v63 = vadd.f32 %v17819_v59, %v18478_v60 }
 0x31b   : > { %6955 = vmatpush.bf16.msra.mxu3 %v11736_v40  ;;  %v11704_v18 = vor.u32 %v13126_v62, %v11703_v14  ;;  %6993 = vmatpush.bf16.msrb.mxu1 %v11740_v33  ;;  %v13158_v11 = vld [vmem:[%s20108_s3 + $0x1dc] sm:$0xf0]  ;;  %v13021_v33 = vld [vmem:[%s20108_s3 + $0x5c] sm:$0xf]  ;;  %v11676_v48 = vor.u32 %v13114_v47, %v11673_v8  ;;  %v13106_v62 = vld [vmem:[%s20108_s3 + $0xb44] sm:$0xf] }
 0x31c   : > { %8060 = vmatpush.bf16.msra.mxu2 %v11928_v52  ;;  %5013 = vst [vmem:[%s18069_s27 + $0x10] sm:$0xff] %v4997_v27  ;;  %v11864_v52 = vor.u32 %v13166_v32, %v11863_v13  ;;  %v18574_v56 = vpop.f32.mrf.mxu2  ;;  %v11832_v40 = vor.u32 %v13158_v11, %v11831_v31  ;;  %v5001_v37 = vpack.c.bf16 %v4912_v35, %v4874_v19  ;;  %v11799_v13 = vld [vmem:[%s20108_s3 + $0x60] sm:$0xf]  ;;  %v13207_v11 = vld [vmem:[%s20108_s3 + $0x7e4] sm:$0xf0] }
 0x31d   : > { %v13150_v27 = vld [vmem:[%s20108_s3 + $0xdc] sm:$0xf0]  ;;  %v11316_v32 = vor.u32 %v13021_v33, %v11313_v10  ;;  %v11644_v0 = vor.u32 %v13106_v62, %v11641_v23  ;;  %v13098_v47 = vld [vmem:[%s20108_s3 + $0xa44] sm:$0xf] }
 0x31e   : > { %7205 = vmatpush.bf16.msra.mxu0 %v11412_v61  ;;  %v11348_v61 = vor.u32 %v13029_v6, %v11345_v16  ;;  %v13110_v14 = vld [vmem:[%s20108_s3 + $0xbbc] sm:$0xf0]  ;;  %5017 = vst [vmem:[%s18069_s27 + $0x90] sm:$0xff] %v5001_v37  ;;  %v12025_v6 = vld [vmem:[%s20108_s3 + $0x7e0] sm:$0xf0] }
 0x31f   : > { %6956 = vmatpush.bf16.msra.mxu3 %v11704_v18  ;;  %6994 = vmatpush.bf16.msrb.mxu1 %v11708_v38  ;;  %v11800_v18 = vor.u32 %v13150_v27, %v11799_v13  ;;  %v13202_v38 = vld [vmem:[%s20108_s3 + $0x764] sm:$0xf]  ;;  %v12031_v16 = vld [vmem:[%s20108_s3 + $0x768] sm:$0xf]  ;;  %v11607_v59 = vld [vmem:[%s20108_s3 + $0xa40] sm:$0xf] }
 0x320   : > { %8061 = vmatpush.bf16.msra.mxu2 %v11896_v29  ;;  %v4914_v29 = vpop.f32.mrf.mxu1  ;;  %v12028_v31 = vor.u32 %v13202_v38, %v12025_v6  ;;  %v12032_v54 = vor.u32 %v13207_v11, %v12031_v16  ;;  %v11609_v8 = vld [vmem:[%s20108_s3 + $0xac0] sm:$0xf0]  ;;  %v11999_v13 = vld [vmem:[%s20108_s3 + $0x668] sm:$0xf]  ;;  %v4898_v16 = vadd.f32 %v17877_v50, %v18478_v60  ;;  %v11543_v11 = vld [vmem:[%s20108_s3 + $0x840] sm:$0xf]  ;;  %7138 = vmatmul.bf16.gmra.mxu0 %v16090_v12 }
 0x321   : > { %v4915_v35 = vadd.f32 %v4914_v29, %v4896_v63  ;;  %v13194_v33 = vld [vmem:[%s20108_s3 + $0x664] sm:$0xf]  ;;  %v11612_v37 = vor.u32 %v13098_v47, %v11609_v8  ;;  %v13199_v27 = vld [vmem:[%s20108_s3 + $0x6e4] sm:$0xf0]  ;;  %7176 = vmatmul.bf16.gmra.mxu2 %v16090_v12 }
 0x322   : > { %7206 = vmatpush.bf16.msra.mxu0 %v11380_v4  ;;  %v11639_v4 = vld [vmem:[%s20108_s3 + $0xb40] sm:$0xf]  ;;  %v11993_v10 = vld [vmem:[%s20108_s3 + $0x6e0] sm:$0xf0]  ;;  %v11967_v6 = vld [vmem:[%s20108_s3 + $0x568] sm:$0xf] }
 0x323   : > { %6957 = vmatpush.bf16.msra.mxu3 %v11672_v21  ;;  %v11640_v51 = vor.u32 %v13110_v14, %v11639_v4  ;;  %6995 = vmatpush.bf16.msrb.mxu1 %v11676_v48  ;;  %v11608_v21 = vor.u32 %v13102_v49, %v11607_v59  ;;  %v11996_v48 = vor.u32 %v13194_v33, %v11993_v10  ;;  %v11575_v4 = vld [vmem:[%s20108_s3 + $0x940] sm:$0xf]  ;;  %v13090_v62 = vld [vmem:[%s20108_s3 + $0x944] sm:$0xf]  ;;  %v13191_v63 = vld [vmem:[%s20108_s3 + $0x5e4] sm:$0xf0] }
 0x324   : > { %8062 = vmatpush.bf16.msra.mxu2 %v11864_v52  ;;  %v4858_v52 = vadd.f32 %v17608_v30, %v18493_v53  ;;  %v18644_v30 = vpop.f32.mrf.mxu0  ;;  %v18650_v34 = vpop.f32.mrf.mxu2  ;;  %v13094_v14 = vld [vmem:[%s20108_s3 + $0x9bc] sm:$0xf0]  ;;  %v11577_v23 = vld [vmem:[%s20108_s3 + $0x9c0] sm:$0xf0]  ;;  %v11935_v10 = vld [vmem:[%s20108_s3 + $0x468] sm:$0xf]  ;;  %6068 = vmatmul.bf16.vlgmr.msrb.gmra.mxu3 %v17106_v45 }
 0x325   : > { %v11961_v38 = vld [vmem:[%s20108_s3 + $0x5e0] sm:$0xf0]  ;;  %6106 = vmatmul.bf16.vlgmr.msra.gmra.mxu1 %v17106_v45 }
 0x326   : > { %7207 = vmatpush.bf16.msra.mxu0 %v11348_v61  ;;  %v4876_v61 = vpop.f32.mrf.mxu3  ;;  %v13082_v50 = vld [vmem:[%s20108_s3 + $0x844] sm:$0xf] }
 0x327   : > { %v4877_v19 = vadd.f32 %v4876_v61, %v4858_v52  ;;  %6958 = vmatpush.bf16.msra.mxu3 %v11640_v51  ;;  %6996 = vmatpush.bf16.msrb.mxu1 %v11644_v0  ;;  %v4860_v52 = vadd.f32 %v17660_v7, %v18493_v53  ;;  %v13186_v51 = vld [vmem:[%s20108_s3 + $0x564] sm:$0xf]  ;;  %v11580_v7 = vor.u32 %v13090_v62, %v11577_v23  ;;  %v13086_v61 = vld [vmem:[%s20108_s3 + $0x8bc] sm:$0xf0] }
 0x328   : > { %8063 = vmatpush.bf16.msra.mxu2 %v11832_v40  ;;  %v4916_v40 = vpop.f32.mrf.mxu1  ;;  %v11964_v53 = vor.u32 %v13186_v51, %v11961_v38  ;;  %v13300_v60 = vld [vmem:[%s20109_s4] sm:$0xff] }
 0x329   : > { %v5005_v29 = vpack.c.bf16 %v4915_v35, %v4877_v19  ;;  %v4917_v49 = vadd.f32 %v4916_v40, %v4898_v16  ;;  %v11545_v35 = vld [vmem:[%s20108_s3 + $0x8c0] sm:$0xf0]  ;;  %v11903_v16 = vld [vmem:[%s20108_s3 + $0x368] sm:$0xf] }
 0x32a   : > { %7208 = vmatpush.bf16.msra.mxu0 %v11316_v32  ;;  %v12000_v32 = vor.u32 %v13199_v27, %v11999_v13  ;;  %v13178_v33 = vld [vmem:[%s20108_s3 + $0x464] sm:$0xf]  ;;  %v13183_v27 = vld [vmem:[%s20108_s3 + $0x4e4] sm:$0xf0] }
 0x32b   : > { %5021 = vst [vmem:[%s18069_s27 + $0x110] sm:$0xff] %v5005_v29  ;;  %6959 = vmatpush.bf16.msra.mxu3 %v11608_v21  ;;  %6997 = vmatpush.bf16.msrb.mxu1 %v11612_v37  ;;  %v11544_v21 = vor.u32 %v13086_v61, %v11543_v11  ;;  %v11929_v40 = vld [vmem:[%s20108_s3 + $0x4e0] sm:$0xf0]  ;;  %v18736_v29 = vperm.slane %v13300_v60, 6  ;;  %v11936_v62 = vor.u32 %v13183_v27, %v11935_v10  ;;  %v13131_v11 = vld [vmem:[%s20108_s3 + $0xe4c] sm:$0xf] }
 0x32c   : > { %8064 = vmatpush.bf16.msra.mxu2 %v11800_v18  ;;  %v11576_v18 = vor.u32 %v13094_v14, %v11575_v4  ;;  %v18720_v59 = vpop.f32.mrf.mxu0  ;;  %v18725_v19 = vpop.f32.mrf.mxu2  ;;  %v11932_v13 = vor.u32 %v13178_v33, %v11929_v40  ;;  %v13143_v4 = vld [vmem:[%s20108_s3 + $0xfc4] sm:$0xf0]  ;;  %v13139_v14 = vld [vmem:[%s20108_s3 + $0xf4c] sm:$0xf]  ;;  %v13170_v38 = vld [vmem:[%s20108_s3 + $0x364] sm:$0xf] }
 0x32d   : > { %v11871_v33 = vld [vmem:[%s20108_s3 + $0x268] sm:$0xf] }
 0x32e   : > { %8095 = vmatpush.bf16.msrb.mxu0 %v12028_v31  ;;  %v4878_v0 = vpop.f32.mrf.mxu3  ;;  %v11968_v31 = vor.u32 %v13191_v63, %v11967_v6  ;;  %v11897_v6 = vld [vmem:[%s20108_s3 + $0x3e0] sm:$0xf0]  ;;  %v11711_v27 = vld [vmem:[%s20108_s3 + $0xd48] sm:$0xf] }
 0x32f   : > { %v4879_v47 = vadd.f32 %v4878_v0, %v4860_v52  ;;  %6960 = vmatpush.bf16.msra.mxu3 %v11576_v18  ;;  %6998 = vmatpush.bf16.msrb.mxu1 %v11580_v7  ;;  %v11777_v52 = vld [vmem:[%s20108_s3 + $0xfc8] sm:$0xf0]  ;;  %v4929_v7 = vadd.f32 %v17728_v41, %v18736_v29  ;;  %v13135_v41 = vld [vmem:[%s20108_s3 + $0xec4] sm:$0xf0] }
 0x330   : > { %8133 = vmatpush.bf16.msrb.mxu2 %v12032_v54  ;;  %v18718_v54 = vperm.slane %v13300_v60, 7  ;;  %v4985_v8 = vpop.f32.mrf.mxu1  ;;  %v11780_v51 = vor.u32 %v13139_v14, %v11777_v52  ;;  %7209 = vmatmul.bf16.vlgmr.msra.gmra.mxu0 %v15980_v1 }
 0x331   : > { %v5009_v37 = vpack.c.bf16 %v4917_v49, %v4879_v47  ;;  %v11745_v49 = vld [vmem:[%s20108_s3 + $0xec8] sm:$0xf0]  ;;  %8065 = vmatmul.bf16.vlgmr.msra.gmra.mxu2 %v15980_v1 }
 0x332   : > { %8096 = vmatpush.bf16.msrb.mxu0 %v11996_v48  ;;  %v11548_v48 = vor.u32 %v13082_v50, %v11545_v35  ;;  %v4967_v18 = vadd.f32 %v17960_v28, %v18718_v54  ;;  %v11900_v28 = vor.u32 %v13170_v38, %v11897_v6  ;;  %v11748_v35 = vor.u32 %v13131_v11, %v11745_v49  ;;  %v11681_v11 = vld [vmem:[%s20108_s3 + $0xcc8] sm:$0xf0]  ;;  %v13146_v49 = vld [vmem:[%s20108_s3 + $0x64] sm:$0xf] }
 0x333   : > { %5025 = vst [vmem:[%s18069_s27 + $0x190] sm:$0xff] %v5009_v37  ;;  %6961 = vmatpush.bf16.msra.mxu3 %v11544_v21  ;;  %v11865_v21 = vld [vmem:[%s20108_s3 + $0x2e0] sm:$0xf0]  ;;  %v4931_v38 = vadd.f32 %v17774_v20, %v18736_v29  ;;  %v4969_v6 = vadd.f32 %v18035_v42, %v18718_v54  ;;  %v13119_v20 = vld [vmem:[%s20108_s3 + $0xcc4] sm:$0xf0] }
 0x334   : > { %8134 = vmatpush.bf16.msrb.mxu2 %v12000_v32  ;;  %v11775_v32 = vld [vmem:[%s20108_s3 + $0xf48] sm:$0xf]  ;;  %6999 = vmatpush.bf16.msrb.mxu1 %v11548_v48  ;;  %v4986_v63 = vadd.f32 %v4985_v8, %v4967_v18  ;;  %v13162_v8 = vld [vmem:[%s20108_s3 + $0x264] sm:$0xf]  ;;  %v18795_v40 = vpop.f32.mrf.mxu0  ;;  %v13115_v42 = vld [vmem:[%s20108_s3 + $0xc4c] sm:$0xf] }
 0x335   : > { %v11776_v23 = vor.u32 %v13143_v4, %v11775_v32  ;;  %v11868_v37 = vor.u32 %v13162_v8, %v11865_v21  ;;  %v13167_v48 = vld [vmem:[%s20108_s3 + $0x2e4] sm:$0xf0]  ;;  %v13123_v4 = vld [vmem:[%s20108_s3 + $0xd4c] sm:$0xf]  ;;  %v13154_v18 = vld [vmem:[%s20108_s3 + $0x164] sm:$0xf]  ;;  %6073 = vmatmul.bf16.gmra.mxu3 %v17214_v57  ;;  %6111 = vmatmul.bf16.gmra.mxu1 %v17214_v57 }
 0x336   : > { %8097 = vmatpush.bf16.msrb.mxu0 %v11964_v53  ;;  %v13175_v53 = vld [vmem:[%s20108_s3 + $0x3e4] sm:$0xf0]  ;;  %v4947_v0 = vpop.f32.mrf.mxu3  ;;  %v11872_v14 = vor.u32 %v13167_v48, %v11871_v33 }
 0x337   : > { %7030 = vmatpush.bf16.msrb.mxu3 %v11776_v23  ;;  %v4948_v61 = vadd.f32 %v4947_v0, %v4929_v7  ;;  %v11904_v50 = vor.u32 %v13175_v53, %v11903_v16  ;;  %v13127_v32 = vld [vmem:[%s20108_s3 + $0xdc4] sm:$0xf0]  ;;  %v11713_v23 = vld [vmem:[%s20108_s3 + $0xdc8] sm:$0xf0] }
 0x338   : > { %8135 = vmatpush.bf16.msrb.mxu2 %v11968_v31  ;;  %v11743_v31 = vld [vmem:[%s20108_s3 + $0xe48] sm:$0xf]  ;;  %7068 = vmatpush.bf16.msra.mxu1 %v11780_v51  ;;  %v4987_v47 = vpop.f32.mrf.mxu1  ;;  %v11716_v52 = vor.u32 %v13123_v4, %v11713_v23  ;;  %v11833_v51 = vld [vmem:[%s20108_s3 + $0x1e0] sm:$0xf0]  ;;  %v11649_v4 = vld [vmem:[%s20108_s3 + $0xbc8] sm:$0xf0] }
 0x339   : > { %v11744_v60 = vor.u32 %v13135_v41, %v11743_v31  ;;  %v4998_v10 = vpack.c.bf16 %v4986_v63, %v4948_v61  ;;  %v11836_v16 = vor.u32 %v13154_v18, %v11833_v51  ;;  %v11839_v7 = vld [vmem:[%s20108_s3 + $0x168] sm:$0xf]  ;;  %v4988_v0 = vadd.f32 %v4987_v47, %v4969_v6  ;;  %v11801_v47 = vld [vmem:[%s20108_s3 + $0xe0] sm:$0xf0]  ;;  %v12033_v18 = vld [vmem:[%s20108_s3 + $0x7e8] sm:$0xf0] }
 0x33a   : > { %8098 = vmatpush.bf16.msrb.mxu0 %v11932_v13  ;;  %v18800_v13 = vpop.f32.mrf.mxu2  ;;  %v11679_v63 = vld [vmem:[%s20108_s3 + $0xc48] sm:$0xf]  ;;  %v11804_v33 = vor.u32 %v13146_v49, %v11801_v47  ;;  %v12039_v51 = vld [vmem:[%s20108_s3 + $0x770] sm:$0xf]  ;;  %v4972_v6 = vadd.f32 %v18115_v55, %v18718_v54  ;;  %v13099_v55 = vld [vmem:[%s20108_s3 + $0xa4c] sm:$0xf] }
 0x33b   : > { %7031 = vmatpush.bf16.msrb.mxu3 %v11744_v60  ;;  %5014 = vst [vmem:[%s18069_s27 + $0x18] sm:$0xff] %v4998_v10  ;;  %v11680_v41 = vor.u32 %v13119_v20, %v11679_v63  ;;  %v11684_v60 = vor.u32 %v13115_v42, %v11681_v11  ;;  %v11807_v8 = vld [vmem:[%s20108_s3 + $0x68] sm:$0xf]  ;;  %v12007_v47 = vld [vmem:[%s20108_s3 + $0x670] sm:$0xf] }
 0x33c   : > { %8136 = vmatpush.bf16.msrb.mxu2 %v11936_v62  ;;  %7069 = vmatpush.bf16.msra.mxu1 %v11748_v35  ;;  %v11712_v62 = vor.u32 %v13127_v32, %v11711_v27  ;;  %v13151_v21 = vld [vmem:[%s20108_s3 + $0xe4] sm:$0xf0]  ;;  %v18861_v48 = vpop.f32.mrf.mxu0  ;;  %v13107_v32 = vld [vmem:[%s20108_s3 + $0xb4c] sm:$0xf] }
 0x33d   : > { %v11647_v10 = vld [vmem:[%s20108_s3 + $0xb48] sm:$0xf]  ;;  %v11652_v23 = vor.u32 %v13107_v32, %v11649_v4  ;;  %v13187_v4 = vld [vmem:[%s20108_s3 + $0x56c] sm:$0xf] }
 0x33e   : > { %8099 = vmatpush.bf16.msrb.mxu0 %v11900_v28  ;;  %v13159_v28 = vld [vmem:[%s20108_s3 + $0x1e4] sm:$0xf0]  ;;  %v4949_v53 = vpop.f32.mrf.mxu3 }
 0x33f   : > { %7032 = vmatpush.bf16.msrb.mxu3 %v11712_v62  ;;  %v4950_v31 = vadd.f32 %v4949_v53, %v4931_v38  ;;  %v11808_v62 = vor.u32 %v13151_v21, %v11807_v8  ;;  %v4934_v38 = vadd.f32 %v17830_v25, %v18736_v29  ;;  %v11615_v63 = vld [vmem:[%s20108_s3 + $0xa48] sm:$0xf] }
 0x340   : > { %8137 = vmatpush.bf16.msrb.mxu2 %v11904_v50  ;;  %7070 = vmatpush.bf16.msra.mxu1 %v11716_v52  ;;  %v4990_v61 = vpop.f32.mrf.mxu1  ;;  %v11840_v50 = vor.u32 %v13159_v28, %v11839_v7  ;;  %v13203_v52 = vld [vmem:[%s20108_s3 + $0x76c] sm:$0xf]  ;;  %v13208_v7 = vld [vmem:[%s20108_s3 + $0x7ec] sm:$0xf0]  ;;  %v13103_v25 = vld [vmem:[%s20108_s3 + $0xac4] sm:$0xf0] }
 0x341   : > { %v5002_v35 = vpack.c.bf16 %v4988_v0, %v4950_v31  ;;  %v12040_v53 = vor.u32 %v13208_v7, %v12039_v51  ;;  %v4991_v20 = vadd.f32 %v4990_v61, %v4972_v6  ;;  %v11616_v0 = vor.u32 %v13103_v25, %v11615_v63  ;;  %v11617_v31 = vld [vmem:[%s20108_s3 + $0xac8] sm:$0xf0]  ;;  %v11583_v21 = vld [vmem:[%s20108_s3 + $0x948] sm:$0xf]  ;;  %7214 = vmatmul.bf16.gmra.mxu0 %v16090_v12 }
 0x342   : > { %8100 = vmatpush.bf16.msrb.mxu0 %v11868_v37  ;;  %v13111_v37 = vld [vmem:[%s20108_s3 + $0xbc4] sm:$0xf0]  ;;  %v11620_v11 = vor.u32 %v13099_v55, %v11617_v31  ;;  %v12001_v61 = vld [vmem:[%s20108_s3 + $0x6e8] sm:$0xf0]  ;;  %v4974_v51 = vadd.f32 %v18191_v46, %v18718_v54  ;;  %8070 = vmatmul.bf16.gmra.mxu2 %v16090_v12 }
 0x343   : > { %7033 = vmatpush.bf16.msrb.mxu3 %v11680_v41  ;;  %5018 = vst [vmem:[%s18069_s27 + $0x98] sm:$0xff] %v5002_v35  ;;  %v11648_v27 = vor.u32 %v13111_v37, %v11647_v10  ;;  %v13200_v35 = vld [vmem:[%s20108_s3 + $0x6ec] sm:$0xf0]  ;;  %v13091_v10 = vld [vmem:[%s20108_s3 + $0x94c] sm:$0xf] }
 0x344   : > { %8138 = vmatpush.bf16.msrb.mxu2 %v11872_v14  ;;  %v18872_v14 = vpop.f32.mrf.mxu2  ;;  %7071 = vmatpush.bf16.msra.mxu1 %v11684_v60  ;;  %v12008_v8 = vor.u32 %v13200_v35, %v12007_v47  ;;  %v13087_v46 = vld [vmem:[%s20108_s3 + $0x8c4] sm:$0xf0]  ;;  %v13083_v54 = vld [vmem:[%s20108_s3 + $0x84c] sm:$0xf]  ;;  %v11783_v35 = vld [vmem:[%s20108_s3 + $0xf50] sm:$0xf] }
 0x345   : > { %v11553_v25 = vld [vmem:[%s20108_s3 + $0x8c8] sm:$0xf0]  ;;  %6962 = vmatmul.bf16.vlgmr.msra.gmra.mxu3 %v17106_v45  ;;  %7000 = vmatmul.bf16.vlgmr.msrb.gmra.mxu1 %v17106_v45 }
 0x346   : > { %8101 = vmatpush.bf16.msrb.mxu0 %v11836_v16  ;;  %v12036_v16 = vor.u32 %v13203_v52, %v12033_v18  ;;  %v4952_v28 = vpop.f32.mrf.mxu3  ;;  %v4936_v52 = vadd.f32 %v17888_v17, %v18736_v29  ;;  %v18943_v18 = vld [vmem:[%s20109_s4 + $0x8] sm:$0xff] }
 0x347   : > { %v4953_v42 = vadd.f32 %v4952_v28, %v4934_v38  ;;  %7034 = vmatpush.bf16.msrb.mxu3 %v11648_v27  ;;  %v11585_v27 = vld [vmem:[%s20108_s3 + $0x9c8] sm:$0xf0]  ;;  %v18947_v38 = vpop.f32.mrf.mxu0  ;;  %v11551_v29 = vld [vmem:[%s20108_s3 + $0x848] sm:$0xf] }
 0x348   : > { %8139 = vmatpush.bf16.msrb.mxu2 %v11840_v50  ;;  %v4992_v41 = vpop.f32.mrf.mxu1  ;;  %7072 = vmatpush.bf16.msra.mxu1 %v11652_v23  ;;  %v13195_v50 = vld [vmem:[%s20108_s3 + $0x66c] sm:$0xf]  ;;  %v11588_v32 = vor.u32 %v13091_v10, %v11585_v27  ;;  %v11975_v23 = vld [vmem:[%s20108_s3 + $0x570] sm:$0xf]  ;;  %v11785_v10 = vld [vmem:[%s20108_s3 + $0xfd0] sm:$0xf0] }
 0x349   : > { %v5006_v60 = vpack.c.bf16 %v4991_v20, %v4953_v42  ;;  %v12004_v49 = vor.u32 %v13195_v50, %v12001_v61  ;;  %v11552_v20 = vor.u32 %v13087_v46, %v11551_v29  ;;  %v11556_v42 = vor.u32 %v13083_v54, %v11553_v25  ;;  %v11937_v31 = vld [vmem:[%s20108_s3 + $0x4e8] sm:$0xf0] }
 0x34a   : > { %8102 = vmatpush.bf16.msrb.mxu0 %v11804_v33  ;;  %v13095_v33 = vld [vmem:[%s20108_s3 + $0x9c4] sm:$0xf0]  ;;  %v18979_v50 = vperm.slane %v18943_v18, 1  ;;  %v13171_v27 = vld [vmem:[%s20108_s3 + $0x36c] sm:$0xf] }
 0x34b   : > { %5022 = vst [vmem:[%s18069_s27 + $0x118] sm:$0xff] %v5006_v60  ;;  %7035 = vmatpush.bf16.msrb.mxu3 %v11616_v0  ;;  %v11584_v37 = vor.u32 %v13095_v33, %v11583_v21  ;;  %v13179_v0 = vld [vmem:[%s20108_s3 + $0x46c] sm:$0xf]  ;;  %v13184_v60 = vld [vmem:[%s20108_s3 + $0x4ec] sm:$0xf0] }
 0x34c   : > { %8140 = vmatpush.bf16.msrb.mxu2 %v11808_v62  ;;  %7073 = vmatpush.bf16.msra.mxu1 %v11620_v11  ;;  %v11969_v62 = vld [vmem:[%s20108_s3 + $0x5e8] sm:$0xf0]  ;;  %v18952_v7 = vpop.f32.mrf.mxu2  ;;  %v18976_v11 = vperm.slane %v18943_v18, 0  ;;  %v13140_v21 = vld [vmem:[%s20108_s3 + $0xf54] sm:$0xf] }
 0x34d   : > { %v11972_v6 = vor.u32 %v13187_v4, %v11969_v62  ;;  %v11911_v4 = vld [vmem:[%s20108_s3 + $0x370] sm:$0xf] }
 0x34e   : > { %8171 = vmatpush.bf16.msra.mxu0 %v12036_v16  ;;  %v13192_v16 = vld [vmem:[%s20108_s3 + $0x5ec] sm:$0xf0]  ;;  %v4954_v28 = vpop.f32.mrf.mxu3  ;;  %v5823_v62 = vadd.f32 %v17968_v24, %v18976_v11 }
 0x34f   : > { %v11976_v17 = vor.u32 %v13192_v16, %v11975_v23  ;;  %v4955_v63 = vadd.f32 %v4954_v28, %v4936_v52  ;;  %7036 = vmatpush.bf16.msrb.mxu3 %v11584_v37  ;;  %v11788_v37 = vor.u32 %v13140_v21, %v11785_v10  ;;  %v5861_v23 = vadd.f32 %v18269_v44, %v18979_v50  ;;  %v13176_v52 = vld [vmem:[%s20108_s3 + $0x3ec] sm:$0xf0]  ;;  %v13132_v28 = vld [vmem:[%s20108_s3 + $0xe54] sm:$0xf]  ;;  %v13155_v10 = vld [vmem:[%s20108_s3 + $0x16c] sm:$0xf] }
 0x350   : > { %8209 = vmatpush.bf16.msra.mxu2 %v12040_v53  ;;  %v4993_v53 = vadd.f32 %v4992_v41, %v4974_v51  ;;  %v5879_v55 = vpop.f32.mrf.mxu1  ;;  %7074 = vmatpush.bf16.msra.mxu1 %v11588_v32  ;;  %v11943_v41 = vld [vmem:[%s20108_s3 + $0x470] sm:$0xf]  ;;  %v11905_v32 = vld [vmem:[%s20108_s3 + $0x3e8] sm:$0xf0]  ;;  %v11912_v16 = vor.u32 %v13176_v52, %v11911_v4  ;;  %v11721_v21 = vld [vmem:[%s20108_s3 + $0xdd0] sm:$0xf0]  ;;  %v5863_v4 = vadd.f32 %v18341_v3, %v18979_v50 }
 0x351   : > { %v11944_v47 = vor.u32 %v13184_v60, %v11943_v41  ;;  %v11751_v24 = vld [vmem:[%s20108_s3 + $0xe50] sm:$0xf]  ;;  %v5880_v29 = vadd.f32 %v5879_v55, %v5861_v23  ;;  %v11873_v55 = vld [vmem:[%s20108_s3 + $0x2e8] sm:$0xf0]  ;;  %v13116_v3 = vld [vmem:[%s20108_s3 + $0xc54] sm:$0xf]  ;;  %8103 = vmatmul.bf16.vlgmr.msrb.gmra.mxu0 %v15980_v1 }
 0x352   : > { %8172 = vmatpush.bf16.msra.mxu0 %v12004_v49  ;;  %v5010_v61 = vpack.c.bf16 %v4993_v53, %v4955_v63  ;;  %v11940_v49 = vor.u32 %v13179_v0, %v11937_v31  ;;  %v13136_v44 = vld [vmem:[%s20108_s3 + $0xecc] sm:$0xf0]  ;;  %v11753_v53 = vld [vmem:[%s20108_s3 + $0xed0] sm:$0xf0]  ;;  %8141 = vmatmul.bf16.vlgmr.msrb.gmra.mxu2 %v15980_v1 }
 0x353   : > { %7037 = vmatpush.bf16.msrb.mxu3 %v11552_v20  ;;  %v11752_v54 = vor.u32 %v13136_v44, %v11751_v24  ;;  %v11756_v20 = vor.u32 %v13132_v28, %v11753_v53  ;;  %v11879_v0 = vld [vmem:[%s20108_s3 + $0x270] sm:$0xf]  ;;  %v11689_v44 = vld [vmem:[%s20108_s3 + $0xcd0] sm:$0xf0]  ;;  %v11809_v53 = vld [vmem:[%s20108_s3 + $0xe8] sm:$0xf0] }
 0x354   : > { %8210 = vmatpush.bf16.msra.mxu2 %v12008_v8  ;;  %v13144_v8 = vld [vmem:[%s20108_s3 + $0xfcc] sm:$0xf0]  ;;  %5026 = vst [vmem:[%s18069_s27 + $0x198] sm:$0xff] %v5010_v61  ;;  %7075 = vmatpush.bf16.msra.mxu1 %v11556_v42  ;;  %v19031_v63 = vpop.f32.mrf.mxu2  ;;  %v13163_v42 = vld [vmem:[%s20108_s3 + $0x26c] sm:$0xf] }
 0x355   : > { %v11784_v33 = vor.u32 %v13144_v8, %v11783_v35  ;;  %v13168_v41 = vld [vmem:[%s20108_s3 + $0x2ec] sm:$0xf0]  ;;  %v11876_v61 = vor.u32 %v13163_v42, %v11873_v55  ;;  %v13124_v35 = vld [vmem:[%s20108_s3 + $0xd54] sm:$0xf]  ;;  %6967 = vmatmul.bf16.gmra.mxu3 %v17214_v57  ;;  %7005 = vmatmul.bf16.gmra.mxu1 %v17214_v57 }
 0x356   : > { %8173 = vmatpush.bf16.msra.mxu0 %v11972_v6  ;;  %v5841_v51 = vpop.f32.mrf.mxu3  ;;  %v11908_v6 = vor.u32 %v13171_v27, %v11905_v32  ;;  %v11880_v60 = vor.u32 %v13168_v41, %v11879_v0  ;;  %v11847_v27 = vld [vmem:[%s20108_s3 + $0x170] sm:$0xf]  ;;  %v5825_v32 = vadd.f32 %v18045_v22, %v18976_v11 }
 0x357   : > { %v5842_v46 = vadd.f32 %v5841_v51, %v5823_v62  ;;  %7106 = vmatpush.bf16.msra.mxu3 %v11784_v33  ;;  %v11724_v33 = vor.u32 %v13124_v35, %v11721_v21  ;;  %v13160_v62 = vld [vmem:[%s20108_s3 + $0x1ec] sm:$0xf0]  ;;  %v13204_v21 = vld [vmem:[%s20108_s3 + $0x774] sm:$0xf] }
 0x358   : > { %8211 = vmatpush.bf16.msra.mxu2 %v11976_v17  ;;  %v19026_v17 = vpop.f32.mrf.mxu0  ;;  %7144 = vmatpush.bf16.msrb.mxu1 %v11788_v37  ;;  %v5881_v25 = vpop.f32.mrf.mxu1  ;;  %v11841_v37 = vld [vmem:[%s20108_s3 + $0x1e8] sm:$0xf0]  ;;  %v11848_v51 = vor.u32 %v13160_v62, %v11847_v27  ;;  %v13120_v22 = vld [vmem:[%s20108_s3 + $0xccc] sm:$0xf0]  ;;  %v5866_v27 = vadd.f32 %v18420_v36, %v18979_v50 }
 0x359   : > { %v6117_v31 = vpack.c.bf16 %v5880_v29, %v5842_v46  ;;  %v11844_v52 = vor.u32 %v13155_v10, %v11841_v37  ;;  %v11692_v46 = vor.u32 %v13116_v3, %v11689_v44  ;;  %v13152_v55 = vld [vmem:[%s20108_s3 + $0xec] sm:$0xf0]  ;;  %v12047_v10 = vld [vmem:[%s20108_s3 + $0x778] sm:$0xf]  ;;  %v5828_v37 = vadd.f32 %v18126_v2, %v18976_v11  ;;  %v13196_v44 = vld [vmem:[%s20108_s3 + $0x674] sm:$0xf] }
 0x35a   : > { %8174 = vmatpush.bf16.msra.mxu0 %v11940_v49  ;;  %v11719_v49 = vld [vmem:[%s20108_s3 + $0xd50] sm:$0xf] }
 0x35b   : > { %6133 = vst [vmem:[%s18069_s27 + $0x20] sm:$0xff] %v6117_v31  ;;  %7107 = vmatpush.bf16.msra.mxu3 %v11752_v54  ;;  %v13147_v54 = vld [vmem:[%s20108_s3 + $0x6c] sm:$0xf]  ;;  %v11623_v2 = vld [vmem:[%s20108_s3 + $0xa50] sm:$0xf] }
 0x35c   : > { %8212 = vmatpush.bf16.msra.mxu2 %v11944_v47  ;;  %v13128_v47 = vld [vmem:[%s20108_s3 + $0xdcc] sm:$0xf0]  ;;  %7145 = vmatpush.bf16.msrb.mxu1 %v11756_v20  ;;  %v19100_v0 = vpop.f32.mrf.mxu2  ;;  %v11812_v31 = vor.u32 %v13147_v54, %v11809_v53  ;;  %v12015_v54 = vld [vmem:[%s20108_s3 + $0x678] sm:$0xf] }
 0x35d   : > { %v11720_v8 = vor.u32 %v13128_v47, %v11719_v49  ;;  %v13108_v49 = vld [vmem:[%s20108_s3 + $0xb54] sm:$0xf]  ;;  %v13104_v36 = vld [vmem:[%s20108_s3 + $0xacc] sm:$0xf0]  ;;  %v13201_v53 = vld [vmem:[%s20108_s3 + $0x6f4] sm:$0xf0] }
 0x35e   : > { %8175 = vmatpush.bf16.msra.mxu0 %v11908_v6  ;;  %v5843_v23 = vpop.f32.mrf.mxu3  ;;  %v11687_v6 = vld [vmem:[%s20108_s3 + $0xc50] sm:$0xf]  ;;  %v11657_v47 = vld [vmem:[%s20108_s3 + $0xbd0] sm:$0xf0] }
 0x35f   : > { %v5844_v24 = vadd.f32 %v5843_v23, %v5825_v32  ;;  %7108 = vmatpush.bf16.msra.mxu3 %v11720_v8  ;;  %v11688_v29 = vor.u32 %v13120_v22, %v11687_v6  ;;  %v11660_v8 = vor.u32 %v13108_v49, %v11657_v47  ;;  %v11625_v22 = vld [vmem:[%s20108_s3 + $0xad0] sm:$0xf0] }
 0x360   : > { %8213 = vmatpush.bf16.msra.mxu2 %v11912_v16  ;;  %v5882_v16 = vadd.f32 %v5881_v25, %v5863_v4  ;;  %7146 = vmatpush.bf16.msrb.mxu1 %v11724_v33  ;;  %v5884_v28 = vpop.f32.mrf.mxu1  ;;  %v11815_v25 = vld [vmem:[%s20108_s3 + $0x70] sm:$0xf]  ;;  %v19095_v20 = vpop.f32.mrf.mxu0  ;;  %v12041_v33 = vld [vmem:[%s20108_s3 + $0x7f0] sm:$0xf0]  ;;  %v13209_v4 = vld [vmem:[%s20108_s3 + $0x7f4] sm:$0xf0] }
 0x361   : > { %v11816_v41 = vor.u32 %v13152_v55, %v11815_v25  ;;  %v12044_v32 = vor.u32 %v13204_v21, %v12041_v33  ;;  %v12048_v23 = vor.u32 %v13209_v4, %v12047_v10  ;;  %v12016_v25 = vor.u32 %v13201_v53, %v12015_v54  ;;  %v13096_v55 = vld [vmem:[%s20108_s3 + $0x9cc] sm:$0xf0]  ;;  %v11983_v21 = vld [vmem:[%s20108_s3 + $0x578] sm:$0xf]  ;;  %v13141_v53 = vld [vmem:[%s20108_s3 + $0xf5c] sm:$0xf]  ;;  %8108 = vmatmul.bf16.gmra.mxu0 %v16090_v12 }
 0x362   : > { %8176 = vmatpush.bf16.msra.mxu0 %v11876_v61  ;;  %v6121_v42 = vpack.c.bf16 %v5882_v16, %v5844_v24  ;;  %v11655_v61 = vld [vmem:[%s20108_s3 + $0xb50] sm:$0xf]  ;;  %v11624_v16 = vor.u32 %v13104_v36, %v11623_v2  ;;  %v5830_v33 = vadd.f32 %v18199_v39, %v18976_v11  ;;  %v5868_v10 = vadd.f32 %v18495_v15, %v18979_v50  ;;  %v13084_v39 = vld [vmem:[%s20108_s3 + $0x854] sm:$0xf]  ;;  %v13145_v54 = vld [vmem:[%s20108_s3 + $0xfd4] sm:$0xf0] }
 0x363   : > { %7109 = vmatpush.bf16.msra.mxu3 %v11688_v29  ;;  %v11561_v50 = vld [vmem:[%s20108_s3 + $0x8d0] sm:$0xf0]  ;;  %8146 = vmatmul.bf16.gmra.mxu2 %v16090_v12 }
 0x364   : > { %8214 = vmatpush.bf16.msra.mxu2 %v11880_v60  ;;  %v13112_v60 = vld [vmem:[%s20108_s3 + $0xbcc] sm:$0xf0]  ;;  %6137 = vst [vmem:[%s18069_s27 + $0xa0] sm:$0xff] %v6121_v42  ;;  %7147 = vmatpush.bf16.msrb.mxu1 %v11692_v46 }
 0x365   : > { %v11656_v35 = vor.u32 %v13112_v60, %v11655_v61  ;;  %v11591_v42 = vld [vmem:[%s20108_s3 + $0x950] sm:$0xf]  ;;  %v11593_v61 = vld [vmem:[%s20108_s3 + $0x9d0] sm:$0xf0]  ;;  %v19174_v60 = vpop.f32.mrf.mxu2  ;;  %7038 = vmatmul.bf16.vlgmr.msrb.gmra.mxu3 %v17106_v45  ;;  %7076 = vmatmul.bf16.vlgmr.msra.gmra.mxu1 %v17106_v45 }
 0x366   : > { %8177 = vmatpush.bf16.msra.mxu0 %v11844_v52  ;;  %v5846_v62 = vpop.f32.mrf.mxu3  ;;  %v13100_v52 = vld [vmem:[%s20108_s3 + $0xa54] sm:$0xf]  ;;  %v11592_v49 = vor.u32 %v13096_v55, %v11591_v42  ;;  %v11793_v42 = vld [vmem:[%s20108_s3 + $0xfd8] sm:$0xf0] }
 0x367   : > { %v5847_v6 = vadd.f32 %v5846_v62, %v5828_v37  ;;  %7110 = vmatpush.bf16.msra.mxu3 %v11656_v35  ;;  %v11628_v24 = vor.u32 %v13100_v52, %v11625_v22  ;;  %v13188_v35 = vld [vmem:[%s20108_s3 + $0x574] sm:$0xf]  ;;  %v11559_v62 = vld [vmem:[%s20108_s3 + $0x850] sm:$0xf]  ;;  %v11564_v52 = vor.u32 %v13084_v39, %v11561_v50  ;;  %v11951_v22 = vld [vmem:[%s20108_s3 + $0x478] sm:$0xf]  ;;  %v11796_v55 = vor.u32 %v13141_v53, %v11793_v42 }
 0x368   : > { %8215 = vmatpush.bf16.msra.mxu2 %v11848_v51  ;;  %v5885_v51 = vadd.f32 %v5884_v28, %v5866_v27  ;;  %v5886_v3 = vpop.f32.mrf.mxu1  ;;  %7148 = vmatpush.bf16.msrb.mxu1 %v11660_v8  ;;  %v12009_v28 = vld [vmem:[%s20108_s3 + $0x6f0] sm:$0xf0]  ;;  %v13193_v27 = vld [vmem:[%s20108_s3 + $0x5f4] sm:$0xf0]  ;;  %v11761_v39 = vld [vmem:[%s20108_s3 + $0xed8] sm:$0xf0] }
 0x369   : > { %v12012_v46 = vor.u32 %v13196_v44, %v12009_v28  ;;  %v11977_v8 = vld [vmem:[%s20108_s3 + $0x5f0] sm:$0xf0]  ;;  %v11984_v4 = vor.u32 %v13193_v27, %v11983_v21  ;;  %v5887_v15 = vadd.f32 %v5886_v3, %v5868_v10  ;;  %v19214_v3 = vperm.slane %v18943_v18, 2  ;;  %v13185_v44 = vld [vmem:[%s20108_s3 + $0x4f4] sm:$0xf0] }
 0x36a   : > { %8178 = vmatpush.bf16.msra.mxu0 %v11812_v31  ;;  %v6125_v29 = vpack.c.bf16 %v5885_v51, %v5847_v6  ;;  %v13092_v31 = vld [vmem:[%s20108_s3 + $0x954] sm:$0xf]  ;;  %v11980_v37 = vor.u32 %v13188_v35, %v11977_v8  ;;  %v13177_v21 = vld [vmem:[%s20108_s3 + $0x3f4] sm:$0xf0] }
 0x36b   : > { %7111 = vmatpush.bf16.msra.mxu3 %v11624_v16  ;;  %v11596_v47 = vor.u32 %v13092_v31, %v11593_v61  ;;  %v13180_v51 = vld [vmem:[%s20108_s3 + $0x474] sm:$0xf]  ;;  %v19217_v16 = vperm.slane %v18943_v18, 3  ;;  %v13137_v27 = vld [vmem:[%s20108_s3 + $0xed4] sm:$0xf0] }
 0x36c   : > { %8216 = vmatpush.bf16.msra.mxu2 %v11816_v41  ;;  %v19168_v41 = vpop.f32.mrf.mxu0  ;;  %6141 = vst [vmem:[%s18069_s27 + $0x120] sm:$0xff] %v6125_v29  ;;  %7149 = vmatpush.bf16.msrb.mxu1 %v11628_v24  ;;  %v11945_v6 = vld [vmem:[%s20108_s3 + $0x4f0] sm:$0xf0]  ;;  %v11952_v29 = vor.u32 %v13185_v44, %v11951_v22  ;;  %v13129_v44 = vld [vmem:[%s20108_s3 + $0xdd4] sm:$0xf0] }
 0x36d   : > { %v11948_v28 = vor.u32 %v13180_v51, %v11945_v6  ;;  %v13172_v31 = vld [vmem:[%s20108_s3 + $0x374] sm:$0xf]  ;;  %v5937_v35 = vadd.f32 %v18568_v9, %v19217_v16  ;;  %v11759_v9 = vld [vmem:[%s20108_s3 + $0xe58] sm:$0xf] }
 0x36e   : > { %8247 = vmatpush.bf16.msrb.mxu0 %v12044_v32  ;;  %v5848_v32 = vpop.f32.mrf.mxu3  ;;  %v11913_v61 = vld [vmem:[%s20108_s3 + $0x3f0] sm:$0xf0]  ;;  %v13169_v51 = vld [vmem:[%s20108_s3 + $0x2f4] sm:$0xf0] }
 0x36f   : > { %v5849_v11 = vadd.f32 %v5848_v32, %v5830_v33  ;;  %7112 = vmatpush.bf16.msra.mxu3 %v11592_v49  ;;  %v11919_v49 = vld [vmem:[%s20108_s3 + $0x378] sm:$0xf]  ;;  %v19256_v33 = vpop.f32.mrf.mxu2  ;;  %v13133_v32 = vld [vmem:[%s20108_s3 + $0xe5c] sm:$0xf]  ;;  %v13164_v50 = vld [vmem:[%s20108_s3 + $0x274] sm:$0xf] }
 0x370   : > { %8285 = vmatpush.bf16.msrb.mxu2 %v12048_v23  ;;  %v13088_v23 = vld [vmem:[%s20108_s3 + $0x8cc] sm:$0xf0]  ;;  %v5955_v2 = vpop.f32.mrf.mxu1  ;;  %7150 = vmatpush.bf16.msrb.mxu1 %v11596_v47  ;;  %v5899_v47 = vadd.f32 %v18279_v58, %v19214_v3  ;;  %v11920_v58 = vor.u32 %v13177_v21, %v11919_v49  ;;  %v13156_v53 = vld [vmem:[%s20108_s3 + $0x174] sm:$0xf]  ;;  %v11855_v42 = vld [vmem:[%s20108_s3 + $0x178] sm:$0xf] }
 0x371   : > { %v11560_v36 = vor.u32 %v13088_v23, %v11559_v62  ;;  %v6129_v24 = vpack.c.bf16 %v5887_v15, %v5849_v11  ;;  %v11760_v23 = vor.u32 %v13137_v27, %v11759_v9  ;;  %v11764_v11 = vor.u32 %v13133_v32, %v11761_v39  ;;  %v11695_v21 = vld [vmem:[%s20108_s3 + $0xc58] sm:$0xf]  ;;  %v11697_v9 = vld [vmem:[%s20108_s3 + $0xcd8] sm:$0xf0]  ;;  %v11817_v39 = vld [vmem:[%s20108_s3 + $0xf0] sm:$0xf0] }
 0x372   : > { %8248 = vmatpush.bf16.msrb.mxu0 %v12012_v46  ;;  %v11791_v46 = vld [vmem:[%s20108_s3 + $0xf58] sm:$0xf] }
 0x373   : > { %6145 = vst [vmem:[%s18069_s27 + $0x1a0] sm:$0xff] %v6129_v24  ;;  %7113 = vmatpush.bf16.msra.mxu3 %v11560_v36  ;;  %v11881_v36 = vld [vmem:[%s20108_s3 + $0x2f0] sm:$0xf0]  ;;  %v11727_v24 = vld [vmem:[%s20108_s3 + $0xd58] sm:$0xf]  ;;  %8217 = vmatmul.bf16.vlgmr.msra.gmra.mxu2 %v15980_v1 }
 0x374   : > { %8286 = vmatpush.bf16.msrb.mxu2 %v12016_v25  ;;  %v11792_v25 = vor.u32 %v13145_v54, %v11791_v46  ;;  %7151 = vmatpush.bf16.msrb.mxu1 %v11564_v52  ;;  %v19250_v8 = vpop.f32.mrf.mxu0  ;;  %v11884_v6 = vor.u32 %v13164_v50, %v11881_v36  ;;  %v11729_v46 = vld [vmem:[%s20108_s3 + $0xdd8] sm:$0xf0]  ;;  %v13153_v50 = vld [vmem:[%s20108_s3 + $0xf4] sm:$0xf0] }
 0x375   : > { %7043 = vmatmul.bf16.gmra.mxu3 %v17214_v57  ;;  %7081 = vmatmul.bf16.gmra.mxu1 %v17214_v57 }
 0x376   : > { %8249 = vmatpush.bf16.msrb.mxu0 %v11980_v37  ;;  %v5917_v10 = vpop.f32.mrf.mxu3  ;;  %v11916_v37 = vor.u32 %v13172_v31, %v11913_v61  ;;  %v5939_v31 = vadd.f32 %v18644_v30, %v19217_v16  ;;  %v13161_v61 = vld [vmem:[%s20108_s3 + $0x1f4] sm:$0xf0]  ;;  %v13117_v30 = vld [vmem:[%s20108_s3 + $0xc5c] sm:$0xf] }
 0x377   : > { %v5918_v62 = vadd.f32 %v5917_v10, %v5899_v47  ;;  %7182 = vmatpush.bf16.msrb.mxu3 %v11792_v25  ;;  %v11849_v25 = vld [vmem:[%s20108_s3 + $0x1f0] sm:$0xf0]  ;;  %v19326_v27 = vpop.f32.mrf.mxu2  ;;  %8179 = vmatmul.bf16.vlgmr.msra.gmra.mxu0 %v15980_v1 }
 0x378   : > { %8287 = vmatpush.bf16.msrb.mxu2 %v11984_v4  ;;  %v5956_v4 = vadd.f32 %v5955_v2, %v5937_v35  ;;  %7220 = vmatpush.bf16.msra.mxu1 %v11796_v55  ;;  %v5957_v15 = vpop.f32.mrf.mxu1  ;;  %v11887_v2 = vld [vmem:[%s20108_s3 + $0x278] sm:$0xf]  ;;  %v5901_v55 = vadd.f32 %v18352_v26, %v19214_v3  ;;  %v11852_v47 = vor.u32 %v13156_v53, %v11849_v25 }
 0x379   : > { %v11888_v22 = vor.u32 %v13169_v51, %v11887_v2  ;;  %v11856_v35 = vor.u32 %v13161_v61, %v11855_v42  ;;  %v13121_v26 = vld [vmem:[%s20108_s3 + $0xcd4] sm:$0xf0]  ;;  %v11633_v61 = vld [vmem:[%s20108_s3 + $0xad8] sm:$0xf0] }
 0x37a   : > { %8250 = vmatpush.bf16.msrb.mxu0 %v11948_v28  ;;  %v6118_v52 = vpack.c.bf16 %v5956_v4, %v5918_v62  ;;  %v13125_v28 = vld [vmem:[%s20108_s3 + $0xd5c] sm:$0xf]  ;;  %v11696_v4 = vor.u32 %v13121_v26, %v11695_v21  ;;  %v11700_v62 = vor.u32 %v13117_v30, %v11697_v9  ;;  %v13113_v51 = vld [vmem:[%s20108_s3 + $0xbd4] sm:$0xf0] }
 0x37b   : > { %7183 = vmatpush.bf16.msrb.mxu3 %v11760_v23  ;;  %v11732_v54 = vor.u32 %v13125_v28, %v11729_v46  ;;  %v13148_v23 = vld [vmem:[%s20108_s3 + $0x74] sm:$0xf]  ;;  %v13205_v28 = vld [vmem:[%s20108_s3 + $0x77c] sm:$0xf]  ;;  %v5904_v46 = vadd.f32 %v18425_v5, %v19214_v3  ;;  %v11631_v42 = vld [vmem:[%s20108_s3 + $0xa58] sm:$0xf] }
 0x37c   : > { %8288 = vmatpush.bf16.msrb.mxu2 %v11952_v29  ;;  %6134 = vst [vmem:[%s18069_s27 + $0x28] sm:$0xff] %v6118_v52  ;;  %7221 = vmatpush.bf16.msra.mxu1 %v11764_v11  ;;  %v11728_v29 = vor.u32 %v13129_v44, %v11727_v24  ;;  %v19321_v10 = vpop.f32.mrf.mxu0  ;;  %v11820_v36 = vor.u32 %v13148_v23, %v11817_v39  ;;  %v11663_v52 = vld [vmem:[%s20108_s3 + $0xb58] sm:$0xf]  ;;  %v13101_v5 = vld [vmem:[%s20108_s3 + $0xa5c] sm:$0xf] }
 0x37d   : > { %v11664_v24 = vor.u32 %v13113_v51, %v11663_v52  ;;  %v13197_v21 = vld [vmem:[%s20108_s3 + $0x67c] sm:$0xf] }
 0x37e   : > { %8251 = vmatpush.bf16.msrb.mxu0 %v11916_v37  ;;  %v5919_v49 = vpop.f32.mrf.mxu3  ;;  %v5958_v37 = vadd.f32 %v5957_v15, %v5939_v31  ;;  %v11823_v15 = vld [vmem:[%s20108_s3 + $0x78] sm:$0xf]  ;;  %v12017_v26 = vld [vmem:[%s20108_s3 + $0x6f8] sm:$0xf0] }
 0x37f   : > { %7184 = vmatpush.bf16.msrb.mxu3 %v11728_v29  ;;  %v11824_v2 = vor.u32 %v13153_v50, %v11823_v15  ;;  %v12049_v29 = vld [vmem:[%s20108_s3 + $0x7f8] sm:$0xf0]  ;;  %v19387_v9 = vpop.f32.mrf.mxu2 }
 0x380   : > { %8289 = vmatpush.bf16.msrb.mxu2 %v11920_v58  ;;  %v5920_v58 = vadd.f32 %v5919_v49, %v5901_v55  ;;  %7222 = vmatpush.bf16.msra.mxu1 %v11732_v54  ;;  %v5960_v32 = vpop.f32.mrf.mxu1  ;;  %v5942_v54 = vadd.f32 %v18720_v59, %v19217_v16  ;;  %v12052_v53 = vor.u32 %v13205_v28, %v12049_v29  ;;  %v13105_v55 = vld [vmem:[%s20108_s3 + $0xad4] sm:$0xf0]  ;;  %v11601_v23 = vld [vmem:[%s20108_s3 + $0x9d8] sm:$0xf0] }
 0x381   : > { %v11985_v50 = vld [vmem:[%s20108_s3 + $0x5f8] sm:$0xf0] }
 0x382   : > { %8252 = vmatpush.bf16.msrb.mxu0 %v11884_v6  ;;  %v6122_v11 = vpack.c.bf16 %v5958_v37, %v5920_v58  ;;  %v13109_v6 = vld [vmem:[%s20108_s3 + $0xb5c] sm:$0xf]  ;;  %v5961_v59 = vadd.f32 %v5960_v32, %v5942_v54  ;;  %v12020_v58 = vor.u32 %v13197_v21, %v12017_v26  ;;  %v11599_v32 = vld [vmem:[%s20108_s3 + $0x958] sm:$0xf]  ;;  %v19431_v54 = vperm.slane %v18943_v18, 4 }
 0x383   : > { %7185 = vmatpush.bf16.msrb.mxu3 %v11696_v4  ;;  %v13097_v4 = vld [vmem:[%s20108_s3 + $0x9d4] sm:$0xf0]  ;;  %v13181_v29 = vld [vmem:[%s20108_s3 + $0x47c] sm:$0xf]  ;;  %8222 = vmatmul.bf16.gmra.mxu2 %v16090_v12 }
 0x384   : > { %8290 = vmatpush.bf16.msrb.mxu2 %v11888_v22  ;;  %6138 = vst [vmem:[%s18069_s27 + $0xa8] sm:$0xff] %v6122_v11  ;;  %v11665_v22 = vld [vmem:[%s20108_s3 + $0xbd8] sm:$0xf0]  ;;  %7223 = vmatpush.bf16.msra.mxu1 %v11700_v62  ;;  %v19385_v30 = vpop.f32.mrf.mxu0  ;;  %v11600_v39 = vor.u32 %v13097_v4, %v11599_v32 }
 0x385   : > { %v11668_v44 = vor.u32 %v13109_v6, %v11665_v22  ;;  %v13093_v62 = vld [vmem:[%s20108_s3 + $0x95c] sm:$0xf]  ;;  %v11567_v6 = vld [vmem:[%s20108_s3 + $0x858] sm:$0xf]  ;;  %7114 = vmatmul.bf16.vlgmr.msra.gmra.mxu3 %v17106_v45  ;;  %7152 = vmatmul.bf16.vlgmr.msrb.gmra.mxu1 %v17106_v45 }
 0x386   : > { %8253 = vmatpush.bf16.msrb.mxu0 %v11852_v47  ;;  %v5922_v25 = vpop.f32.mrf.mxu3  ;;  %v11632_v47 = vor.u32 %v13105_v55, %v11631_v42  ;;  %v11604_v15 = vor.u32 %v13093_v62, %v11601_v23  ;;  %v13189_v11 = vld [vmem:[%s20108_s3 + $0x57c] sm:$0xf]  ;;  %v13089_v22 = vld [vmem:[%s20108_s3 + $0x8d4] sm:$0xf0]  ;;  %v12279_v55 = vld [vmem:[%s20108_s3 + $0xf60] sm:$0xf] }
 0x387   : > { %v5923_v31 = vadd.f32 %v5922_v25, %v5904_v46  ;;  %7186 = vmatpush.bf16.msrb.mxu3 %v11664_v24  ;;  %v11988_v52 = vor.u32 %v13189_v11, %v11985_v50  ;;  %v13085_v24 = vld [vmem:[%s20108_s3 + $0x85c] sm:$0xf]  ;;  %8184 = vmatmul.bf16.gmra.mxu0 %v16090_v12  ;;  %v12247_v62 = vld [vmem:[%s20108_s3 + $0xe60] sm:$0xf]  ;;  %v12249_v11 = vld [vmem:[%s20108_s3 + $0xee0] sm:$0xf0] }
 0x388   : > { %8291 = vmatpush.bf16.msrb.mxu2 %v11856_v35  ;;  %v5962_v49 = vpop.f32.mrf.mxu1  ;;  %7224 = vmatpush.bf16.msra.mxu1 %v11668_v44  ;;  %v11636_v35 = vor.u32 %v13101_v5, %v11633_v61  ;;  %v11953_v46 = vld [vmem:[%s20108_s3 + $0x4f8] sm:$0xf0]  ;;  %v13270_v5 = vld [vmem:[%s20108_s3 + $0xfdc] sm:$0xf0] }
 0x389   : > { %v6126_v37 = vpack.c.bf16 %v5961_v59, %v5923_v31  ;;  %v11956_v42 = vor.u32 %v13181_v29, %v11953_v46  ;;  %v13266_v59 = vld [vmem:[%s20108_s3 + $0xf64] sm:$0xf]  ;;  %v12280_v61 = vor.u32 %v13270_v5, %v12279_v55  ;;  %v13173_v21 = vld [vmem:[%s20108_s3 + $0x37c] sm:$0xf]  ;;  %v13262_v23 = vld [vmem:[%s20108_s3 + $0xedc] sm:$0xf0]  ;;  %v5977_v29 = vadd.f32 %v18650_v34, %v19431_v54 }
 0x38a   : > { %8254 = vmatpush.bf16.msrb.mxu0 %v11820_v36  ;;  %v5906_v36 = vadd.f32 %v18500_v43, %v19214_v3  ;;  %v11569_v43 = vld [vmem:[%s20108_s3 + $0x8d8] sm:$0xf0]  ;;  %v11568_v3 = vor.u32 %v13089_v22, %v11567_v6  ;;  %v12215_v22 = vld [vmem:[%s20108_s3 + $0xd60] sm:$0xf]  ;;  %v13242_v34 = vld [vmem:[%s20108_s3 + $0xc64] sm:$0xf] }
 0x38b   : > { %6142 = vst [vmem:[%s18069_s27 + $0x128] sm:$0xff] %v6126_v37  ;;  %7187 = vmatpush.bf16.msrb.mxu3 %v11632_v47  ;;  %v19453_v47 = vpop.f32.mrf.mxu2  ;;  %v11921_v26 = vld [vmem:[%s20108_s3 + $0x3f8] sm:$0xf0]  ;;  %v5975_v37 = vadd.f32 %v18574_v56, %v19431_v54  ;;  %v13258_v56 = vld [vmem:[%s20108_s3 + $0xe64] sm:$0xf] }
 0x38c   : > { %8292 = vmatpush.bf16.msrb.mxu2 %v11824_v2  ;;  %7225 = vmatpush.bf16.msra.mxu1 %v11636_v35  ;;  %v5944_v2 = vadd.f32 %v18795_v40, %v19217_v16  ;;  %v11572_v16 = vor.u32 %v13085_v24, %v11569_v43  ;;  %v19445_v31 = vpop.f32.mrf.mxu0  ;;  %v11924_v32 = vor.u32 %v13173_v21, %v11921_v26  ;;  %v13254_v24 = vld [vmem:[%s20108_s3 + $0xddc] sm:$0xf0]  ;;  %v12217_v43 = vld [vmem:[%s20108_s3 + $0xde0] sm:$0xf0] }
 0x38e   : > { %8323 = vmatpush.bf16.msra.mxu0 %v12052_v53  ;;  %v5924_v51 = vpop.f32.mrf.mxu3  ;;  %v5963_v44 = vadd.f32 %v5962_v49, %v5944_v2  ;;  %v12281_v49 = vld [vmem:[%s20108_s3 + $0xfe0] sm:$0xf0]  ;;  %v13165_v2 = vld [vmem:[%s20108_s3 + $0x27c] sm:$0xf] }
 0x38f   : > { %v5925_v28 = vadd.f32 %v5924_v51, %v5906_v36  ;;  %7188 = vmatpush.bf16.msrb.mxu3 %v11600_v39  ;;  %v12284_v35 = vor.u32 %v13266_v59, %v12281_v49  ;;  %v12252_v36 = vor.u32 %v13258_v56, %v12249_v11  ;;  %v12183_v59 = vld [vmem:[%s20108_s3 + $0xc60] sm:$0xf] }
 0x390   : > { %13274 = vmatpush.bf16.msra.mxu2 %v12052_v53  ;;  %v6031_v40 = vpop.f32.mrf.mxu1  ;;  %7226 = vmatpush.bf16.msra.mxu1 %v11604_v15  ;;  %v19434_v53 = vperm.slane %v18943_v18, 5  ;;  %v12248_v15 = vor.u32 %v13262_v23, %v12247_v62  ;;  %v12151_v23 = vld [vmem:[%s20108_s3 + $0xb60] sm:$0xf] }
 0x391   : > { %v6130_v25 = vpack.c.bf16 %v5963_v44, %v5925_v28  ;;  %v13250_v44 = vld [vmem:[%s20108_s3 + $0xd64] sm:$0xf]  ;;  %v12216_v28 = vor.u32 %v13254_v24, %v12215_v22  ;;  %v13238_v56 = vld [vmem:[%s20108_s3 + $0xbdc] sm:$0xf0] }
 0x392   : > { %8324 = vmatpush.bf16.msra.mxu0 %v12020_v58  ;;  %v6015_v46 = vadd.f32 %v18947_v38, %v19434_v53  ;;  %v12121_v24 = vld [vmem:[%s20108_s3 + $0xae0] sm:$0xf0] }
 0x393   : > { %6146 = vst [vmem:[%s18069_s27 + $0x1a8] sm:$0xff] %v6130_v25  ;;  %7189 = vmatpush.bf16.msrb.mxu3 %v11568_v3  ;;  %v13157_v3 = vld [vmem:[%s20108_s3 + $0x17c] sm:$0xf]  ;;  %v19510_v55 = vpop.f32.mrf.mxu2  ;;  %8293 = vmatmul.bf16.vlgmr.msrb.gmra.mxu2 %v15980_v1 }
 0x394   : > { %13275 = vmatpush.bf16.msra.mxu2 %v12020_v58  ;;  %7227 = vmatpush.bf16.msra.mxu1 %v11572_v16  ;;  %v6013_v58 = vadd.f32 %v18861_v48, %v19434_v53  ;;  %v11857_v16 = vld [vmem:[%s20108_s3 + $0x1f8] sm:$0xf0]  ;;  %v19508_v25 = vpop.f32.mrf.mxu0 }
 0x395   : > { %7119 = vmatmul.bf16.gmra.mxu3 %v17214_v57  ;;  %7157 = vmatmul.bf16.gmra.mxu1 %v17214_v57 }
 0x396   : > { %8325 = vmatpush.bf16.msra.mxu0 %v11988_v52  ;;  %v5993_v4 = vpop.f32.mrf.mxu3  ;;  %v6032_v48 = vadd.f32 %v6031_v40, %v6013_v58  ;;  %v12220_v40 = vor.u32 %v13250_v44, %v12217_v43  ;;  %v13149_v58 = vld [vmem:[%s20108_s3 + $0x7c] sm:$0xf] }
 0x397   : > { %v5994_v39 = vadd.f32 %v5993_v4, %v5975_v37  ;;  %8076 = vmatpush.bf16.msra.mxu3 %v12280_v61  ;;  %v13246_v61 = vld [vmem:[%s20108_s3 + $0xcdc] sm:$0xf0]  ;;  %8255 = vmatmul.bf16.vlgmr.msrb.gmra.mxu0 %v15980_v1 }
 0x398   : > { %13276 = vmatpush.bf16.msra.mxu2 %v11988_v52  ;;  %8114 = vmatpush.bf16.msrb.mxu1 %v12284_v35  ;;  %v6033_v50 = vpop.f32.mrf.mxu1  ;;  %v11889_v52 = vld [vmem:[%s20108_s3 + $0x2f8] sm:$0xf0]  ;;  %v12185_v35 = vld [vmem:[%s20108_s3 + $0xce0] sm:$0xf0]  ;;  %v12184_v26 = vor.u32 %v13246_v61, %v12183_v59  ;;  %v5982_v61 = vadd.f32 %v18800_v13, %v19431_v54 }
 0x399   : > { %v6119_v51 = vpack.c.bf16 %v6032_v48, %v5994_v39  ;;  %v11892_v6 = vor.u32 %v13165_v2, %v11889_v52  ;;  %v6034_v38 = vadd.f32 %v6033_v50, %v6015_v46  ;;  %v12188_v37 = vor.u32 %v13242_v34, %v12185_v35  ;;  %v13234_v48 = vld [vmem:[%s20108_s3 + $0xb64] sm:$0xf]  ;;  %v12119_v52 = vld [vmem:[%s20108_s3 + $0xa60] sm:$0xf] }
 0x39a   : > { %8326 = vmatpush.bf16.msra.mxu0 %v11956_v42  ;;  %v12153_v39 = vld [vmem:[%s20108_s3 + $0xbe0] sm:$0xf0]  ;;  %v5980_v50 = vadd.f32 %v18725_v19, %v19431_v54  ;;  %v6020_v34 = vadd.f32 %v19095_v20, %v19434_v53  ;;  %v13214_v35 = vld [vmem:[%s20108_s3 + $0x8dc] sm:$0xf0] }
 0x39b   : > { %6135 = vst [vmem:[%s18069_s27 + $0x30] sm:$0xff] %v6119_v51  ;;  %8077 = vmatpush.bf16.msra.mxu3 %v12248_v15  ;;  %v12152_v15 = vor.u32 %v13238_v56, %v12151_v23  ;;  %v12156_v11 = vor.u32 %v13234_v48, %v12153_v39  ;;  %v13230_v51 = vld [vmem:[%s20108_s3 + $0xadc] sm:$0xf0]  ;;  %v13226_v19 = vld [vmem:[%s20108_s3 + $0xa64] sm:$0xf]  ;;  %v19565_v44 = vpop.f32.mrf.mxu2 }
 0x39c   : > { %13277 = vmatpush.bf16.msra.mxu2 %v11956_v42  ;;  %8115 = vmatpush.bf16.msrb.mxu1 %v12252_v36  ;;  %v11860_v42 = vor.u32 %v13157_v3, %v11857_v16  ;;  %v6018_v36 = vadd.f32 %v19026_v17, %v19434_v53  ;;  %v19560_v17 = vpop.f32.mrf.mxu0  ;;  %v12120_v43 = vor.u32 %v13230_v51, %v12119_v52  ;;  %v12087_v16 = vld [vmem:[%s20108_s3 + $0x960] sm:$0xf]  ;;  %v13218_v46 = vld [vmem:[%s20108_s3 + $0x964] sm:$0xf]  ;;  %v12287_v56 = vld [vmem:[%s20108_s3 + $0xf68] sm:$0xf] }
 0x39d   : > { %v12057_v13 = vld [vmem:[%s20108_s3 + $0x8e0] sm:$0xf0]  ;;  %v13271_v48 = vld [vmem:[%s20108_s3 + $0xfe4] sm:$0xf0]  ;;  %v13267_v39 = vld [vmem:[%s20108_s3 + $0xf6c] sm:$0xf] }
 0x39e   : > { %8327 = vmatpush.bf16.msra.mxu0 %v11924_v32  ;;  %v5995_v5 = vpop.f32.mrf.mxu3  ;;  %v12255_v52 = vld [vmem:[%s20108_s3 + $0xe68] sm:$0xf] }
 0x39f   : > { %v5996_v49 = vadd.f32 %v5995_v5, %v5977_v29  ;;  %8078 = vmatpush.bf16.msra.mxu3 %v12216_v28  ;;  %v13222_v29 = vld [vmem:[%s20108_s3 + $0x9dc] sm:$0xf0]  ;;  %v13263_v51 = vld [vmem:[%s20108_s3 + $0xee4] sm:$0xf0] }
 0x3a0   : > { %13278 = vmatpush.bf16.msra.mxu2 %v11924_v32  ;;  %8116 = vmatpush.bf16.msrb.mxu1 %v12220_v40  ;;  %v6036_v21 = vpop.f32.mrf.mxu1  ;;  %v11825_v32 = vld [vmem:[%s20108_s3 + $0xf8] sm:$0xf0]  ;;  %v12124_v40 = vor.u32 %v13226_v19, %v12121_v24  ;;  %v12088_v5 = vor.u32 %v13222_v29, %v12087_v16  ;;  %v13251_v16 = vld [vmem:[%s20108_s3 + $0xd6c] sm:$0xf] }
 0x3a1   : > { %v6123_v4 = vpack.c.bf16 %v6034_v38, %v5996_v49  ;;  %v11828_v62 = vor.u32 %v13149_v58, %v11825_v32  ;;  %v12055_v49 = vld [vmem:[%s20108_s3 + $0x860] sm:$0xf]  ;;  %v19597_v58 = vperm.slane %v18943_v18, 6  ;;  %v19600_v32 = vperm.slane %v18943_v18, 7 }
 0x3a2   : > { %8328 = vmatpush.bf16.msra.mxu0 %v11892_v6  ;;  %v12056_v54 = vor.u32 %v13214_v35, %v12055_v49  ;;  %v12288_v18 = vor.u32 %v13271_v48, %v12287_v56  ;;  %v12191_v49 = vld [vmem:[%s20108_s3 + $0xc68] sm:$0xf]  ;;  %v13235_v48 = vld [vmem:[%s20108_s3 + $0xb6c] sm:$0xf] }
 0x3a3   : > { %6139 = vst [vmem:[%s18069_s27 + $0xb0] sm:$0xff] %v6123_v4  ;;  %8079 = vmatpush.bf16.msra.mxu3 %v12184_v26  ;;  %v19604_v23 = vpop.f32.mrf.mxu2  ;;  %8298 = vmatmul.bf16.gmra.mxu2 %v16090_v12  ;;  %v13247_v35 = vld [vmem:[%s20108_s3 + $0xce4] sm:$0xf0] }
 0x3a4   : > { %13279 = vmatpush.bf16.msra.mxu2 %v11892_v6  ;;  %8117 = vmatpush.bf16.msrb.mxu1 %v12188_v37  ;;  %v6037_v6 = vadd.f32 %v6036_v21, %v6018_v36  ;;  %v13210_v21 = vld [vmem:[%s20108_s3 + $0x864] sm:$0xf]  ;;  %v19602_v4 = vpop.f32.mrf.mxu0  ;;  %v6089_v36 = vadd.f32 %v19168_v41, %v19600_v32 }
 0x3a5   : > { %v12060_v53 = vor.u32 %v13210_v21, %v12057_v13  ;;  %7190 = vmatmul.bf16.vlgmr.msrb.gmra.mxu3 %v17106_v45  ;;  %7228 = vmatmul.bf16.vlgmr.msra.gmra.mxu1 %v17106_v45  ;;  %v13243_v21 = vld [vmem:[%s20108_s3 + $0xc6c] sm:$0xf] }
 0x3a6   : > { %8329 = vmatpush.bf16.msra.mxu0 %v11860_v42  ;;  %v5998_v2 = vpop.f32.mrf.mxu3 }
 0x3a7   : > { %v5999_v22 = vadd.f32 %v5998_v2, %v5980_v50  ;;  %8080 = vmatpush.bf16.msra.mxu3 %v12152_v15  ;;  %v12289_v15 = vld [vmem:[%s20108_s3 + $0xfe8] sm:$0xf0]  ;;  %v6051_v50 = vadd.f32 %v18872_v14, %v19597_v58  ;;  %8260 = vmatmul.bf16.gmra.mxu0 %v16090_v12 }
 0x3a8   : > { %13280 = vmatpush.bf16.msra.mxu2 %v11860_v42  ;;  %v6038_v28 = vpop.f32.mrf.mxu1  ;;  %8118 = vmatpush.bf16.msrb.mxu1 %v12156_v11  ;;  %v12089_v42 = vld [vmem:[%s20108_s3 + $0x9e0] sm:$0xf0]  ;;  %v12292_v11 = vor.u32 %v13267_v39, %v12289_v15  ;;  %v13259_v14 = vld [vmem:[%s20108_s3 + $0xe6c] sm:$0xf]  ;;  %v6056_v15 = vadd.f32 %v19031_v63, %v19597_v58  ;;  %v13231_v63 = vld [vmem:[%s20108_s3 + $0xae4] sm:$0xf0] }
 0x3a9   : > { %v6127_v3 = vpack.c.bf16 %v6037_v6, %v5999_v22  ;;  %v12092_v59 = vor.u32 %v13218_v46, %v12089_v42  ;;  %v6039_v26 = vadd.f32 %v6038_v28, %v6020_v34  ;;  %v12256_v6 = vor.u32 %v13263_v51, %v12255_v52  ;;  %v12257_v22 = vld [vmem:[%s20108_s3 + $0xee8] sm:$0xf0]  ;;  %v12127_v52 = vld [vmem:[%s20108_s3 + $0xa68] sm:$0xf] }
 0x3aa   : > { %8330 = vmatpush.bf16.msra.mxu0 %v11828_v62  ;;  %v12260_v28 = vor.u32 %v13259_v14, %v12257_v22  ;;  %v12225_v42 = vld [vmem:[%s20108_s3 + $0xde8] sm:$0xf0]  ;;  %v6091_v34 = vadd.f32 %v19250_v8, %v19600_v32  ;;  %v12128_v14 = vor.u32 %v13231_v63, %v12127_v52  ;;  %v12095_v22 = vld [vmem:[%s20108_s3 + $0x968] sm:$0xf] }
 0x3ab   : > { %6143 = vst [vmem:[%s18069_s27 + $0x130] sm:$0xff] %v6127_v3  ;;  %8081 = vmatpush.bf16.msra.mxu3 %v12120_v43  ;;  %v13255_v3 = vld [vmem:[%s20108_s3 + $0xde4] sm:$0xf0]  ;;  %v12193_v8 = vld [vmem:[%s20108_s3 + $0xce8] sm:$0xf0] }
 0x3ac   : > { %13281 = vmatpush.bf16.msra.mxu2 %v11828_v62  ;;  %8119 = vmatpush.bf16.msrb.mxu1 %v12124_v40  ;;  %v12223_v40 = vld [vmem:[%s20108_s3 + $0xd68] sm:$0xf]  ;;  %v19648_v29 = vpop.f32.mrf.mxu0  ;;  %v12161_v39 = vld [vmem:[%s20108_s3 + $0xbe8] sm:$0xf0] }
 0x3ad   : > { %v12224_v46 = vor.u32 %v13255_v3, %v12223_v40  ;;  %v12097_v40 = vld [vmem:[%s20108_s3 + $0x9e8] sm:$0xf0] }
 0x3ae   : > { %v6000_v38 = vpop.f32.mrf.mxu3 }
 0x3af   : > { %v6001_v37 = vadd.f32 %v6000_v38, %v5982_v61  ;;  %8082 = vmatpush.bf16.msra.mxu3 %v12088_v5  ;;  %v19654_v5 = vpop.f32.mrf.mxu2  ;;  %v6053_v61 = vadd.f32 %v18952_v7, %v19597_v58 }
 0x3b0   : > { %v6107_v20 = vpop.f32.mrf.mxu1  ;;  %8120 = vmatpush.bf16.msrb.mxu1 %v12092_v59  ;;  %v12228_v59 = vor.u32 %v13251_v16, %v12225_v42  ;;  %v6058_v16 = vadd.f32 %v19100_v0, %v19597_v58  ;;  %v6096_v42 = vadd.f32 %v19385_v30, %v19600_v32  ;;  %v13211_v0 = vld [vmem:[%s20108_s3 + $0x86c] sm:$0xf] }
 0x3b1   : > { %v6131_v62 = vpack.c.bf16 %v6039_v26, %v6001_v37  ;;  %v6108_v41 = vadd.f32 %v6107_v20, %v6089_v36  ;;  %v12192_v37 = vor.u32 %v13247_v35, %v12191_v49  ;;  %v12196_v20 = vor.u32 %v13243_v21, %v12193_v8  ;;  %v12065_v30 = vld [vmem:[%s20108_s3 + $0x8e8] sm:$0xf0]  ;;  %v13272_v8 = vld [vmem:[%s20108_s3 + $0xfec] sm:$0xf0] }
 0x3b2   : > { %v12068_v35 = vor.u32 %v13211_v0, %v12065_v30  ;;  %v13236_v30 = vld [vmem:[%s20108_s3 + $0xb74] sm:$0xf] }
 0x3b3   : > { %6147 = vst [vmem:[%s18069_s27 + $0x1b0] sm:$0xff] %v6131_v62  ;;  %8083 = vmatpush.bf16.msra.mxu3 %v12056_v54  ;;  %v13239_v62 = vld [vmem:[%s20108_s3 + $0xbe4] sm:$0xf0] }
 0x3b4   : > { %8121 = vmatpush.bf16.msrb.mxu1 %v12060_v53  ;;  %v12159_v53 = vld [vmem:[%s20108_s3 + $0xb68] sm:$0xf] }
 0x3b5   : > { %7195 = vmatmul.bf16.gmra.mxu3 %v17214_v57  ;;  %7233 = vmatmul.bf16.gmra.mxu1 %v17214_v57  ;;  %v12160_v56 = vor.u32 %v13239_v62, %v12159_v53 }
 0x3b6   : > { %v6069_v2 = vpop.f32.mrf.mxu3 }
 0x3b7   : > { %8152 = vmatpush.bf16.msrb.mxu3 %v12288_v18  ;;  %v6070_v19 = vadd.f32 %v6069_v2, %v6051_v50  ;;  %v12164_v18 = vor.u32 %v13235_v48, %v12161_v39  ;;  %v19691_v50 = vpop.f32.mrf.mxu0  ;;  %8331 = vmatmul.bf16.vlgmr.msra.gmra.mxu0 %v15980_v1  ;;  %v19694_v36 = vpop.f32.mrf.mxu2  ;;  %v13227_v1 = vld [vmem:[%s20108_s3 + $0xa6c] sm:$0xf] }
 0x3b8   : > { %8190 = vmatpush.bf16.msra.mxu1 %v12292_v11  ;;  %v6109_v24 = vpop.f32.mrf.mxu1  ;;  %v6094_v11 = vadd.f32 %v19321_v10, %v19600_v32  ;;  %8336 = vmatmul.bf16.vlgmr.msra.gmra.mxu2 %v16090_v12  ;;  %v12129_v12 = vld [vmem:[%s20108_s3 + $0xae8] sm:$0xf0] }
 0x3b9   : > { %v6120_v43 = vpack.c.bf16 %v6108_v41, %v6070_v19  ;;  %v6110_v7 = vadd.f32 %v6109_v24, %v6091_v34  ;;  %v12132_v19 = vor.u32 %v13227_v1, %v12129_v12  ;;  %v13223_v24 = vld [vmem:[%s20108_s3 + $0x9e4] sm:$0xf0]  ;;  %v13252_v12 = vld [vmem:[%s20108_s3 + $0xd74] sm:$0xf] }
 0x3ba   : > { %v13215_v34 = vld [vmem:[%s20108_s3 + $0x8e4] sm:$0xf0] }
 0x3bb   : > { %8153 = vmatpush.bf16.msrb.mxu3 %v12256_v6  ;;  %6136 = vst [vmem:[%s18069_s27 + $0x38] sm:$0xff] %v6120_v43  ;;  %v12096_v43 = vor.u32 %v13223_v24, %v12095_v22 }
 0x3bc   : > { %8191 = vmatpush.bf16.msra.mxu1 %v12260_v28  ;;  %v13219_v28 = vld [vmem:[%s20108_s3 + $0x96c] sm:$0xf] }
 0x3bd   : > { %v12100_v3 = vor.u32 %v13219_v28, %v12097_v40  ;;  %v12199_v40 = vld [vmem:[%s20108_s3 + $0xc70] sm:$0xf] }
 0x3be   : > { %v6071_v38 = vpop.f32.mrf.mxu3 }
 0x3bf   : > { %8154 = vmatpush.bf16.msrb.mxu3 %v12224_v46  ;;  %v6072_v26 = vadd.f32 %v6071_v38, %v6053_v61  ;;  %v19727_v46 = vld [vmem:[%s20109_s4 + $0x10] sm:$0xff]  ;;  %v12063_v61 = vld [vmem:[%s20108_s3 + $0x868] sm:$0xf]  ;;  %v19764_v53 = vpop.f32.mrf.mxu0 }
 0x3c0   : > { %8192 = vmatpush.bf16.msra.mxu1 %v12228_v59  ;;  %v6112_v13 = vpop.f32.mrf.mxu1  ;;  %v12064_v49 = vor.u32 %v13215_v34, %v12063_v61  ;;  %v19744_v21 = vperm.slane %v19727_v46, 0 }
 0x3c1   : > { %v6124_v54 = vpack.c.bf16 %v6110_v7, %v6072_v26  ;;  %v6113_v10 = vadd.f32 %v6112_v13, %v6094_v11  ;;  %v19747_v7 = vperm.slane %v19727_v46, 1  ;;  %v13268_v13 = vld [vmem:[%s20108_s3 + $0xf74] sm:$0xf] }
 0x3c2   : > { %v13260_v11 = vld [vmem:[%s20108_s3 + $0xe74] sm:$0xf]  ;;  %v6947_v22 = vadd.f32 %v19256_v33, %v19744_v21 }
 0x3c3   : > { %8155 = vmatpush.bf16.msrb.mxu3 %v12192_v37  ;;  %6140 = vst [vmem:[%s18069_s27 + $0xb8] sm:$0xff] %v6124_v54  ;;  %v12295_v37 = vld [vmem:[%s20108_s3 + $0xf70] sm:$0xf]  ;;  %v12297_v54 = vld [vmem:[%s20108_s3 + $0xff0] sm:$0xf0]  ;;  %v6983_v48 = vadd.f32 %v19445_v31, %v19747_v7  ;;  %v6985_v24 = vadd.f32 %v19508_v25, %v19747_v7 }
 0x3c4   : > { %8193 = vmatpush.bf16.msra.mxu1 %v12196_v20  ;;  %v12296_v20 = vor.u32 %v13272_v8, %v12295_v37  ;;  %v12300_v62 = vor.u32 %v13268_v13, %v12297_v54  ;;  %v12265_v31 = vld [vmem:[%s20108_s3 + $0xef0] sm:$0xf0]  ;;  %v6988_v37 = vadd.f32 %v19560_v17, %v19747_v7  ;;  %v12135_v13 = vld [vmem:[%s20108_s3 + $0xa70] sm:$0xf] }
 0x3c5   : > { %8084 = vmatmul.bf16.vlgmr.msra.gmra.mxu3 %v17106_v45  ;;  %8122 = vmatmul.bf16.vlgmr.msrb.gmra.mxu1 %v17106_v45  ;;  %v12268_v1 = vor.u32 %v13260_v11, %v12265_v31  ;;  %v13244_v33 = vld [vmem:[%s20108_s3 + $0xc74] sm:$0xf]  ;;  %v12103_v11 = vld [vmem:[%s20108_s3 + $0x970] sm:$0xf] }
 0x3c6   : > { %v6074_v2 = vpop.f32.mrf.mxu3  ;;  %v13228_v54 = vld [vmem:[%s20108_s3 + $0xa74] sm:$0xf] }
 0x3c7   : > { %8156 = vmatpush.bf16.msrb.mxu3 %v12160_v56  ;;  %v6075_v51 = vadd.f32 %v6074_v2, %v6056_v15  ;;  %v6945_v56 = vadd.f32 %v19174_v60, %v19744_v21  ;;  %v13264_v15 = vld [vmem:[%s20108_s3 + $0xeec] sm:$0xf0]  ;;  %v19799_v28 = vpop.f32.mrf.mxu0  ;;  %v12137_v17 = vld [vmem:[%s20108_s3 + $0xaf0] sm:$0xf0] }
 0x3c8   : > { %8194 = vmatpush.bf16.msra.mxu1 %v12164_v18  ;;  %v6114_v41 = vpop.f32.mrf.mxu1  ;;  %v12263_v18 = vld [vmem:[%s20108_s3 + $0xe70] sm:$0xf]  ;;  %v12105_v31 = vld [vmem:[%s20108_s3 + $0x9f0] sm:$0xf0] }
 0x3c9   : > { %v6128_v6 = vpack.c.bf16 %v6113_v10, %v6075_v51  ;;  %v6115_v58 = vadd.f32 %v6114_v41, %v6096_v42  ;;  %v12264_v52 = vor.u32 %v13264_v15, %v12263_v18  ;;  %v12231_v51 = vld [vmem:[%s20108_s3 + $0xd70] sm:$0xf]  ;;  %v12140_v18 = vor.u32 %v13228_v54, %v12137_v17  ;;  %v13253_v54 = vld [vmem:[%s20108_s3 + $0xd7c] sm:$0xf] }
 0x3cb   : > { %8157 = vmatpush.bf16.msrb.mxu3 %v12128_v14  ;;  %6144 = vst [vmem:[%s18069_s27 + $0x138] sm:$0xff] %v6128_v6  ;;  %v13256_v14 = vld [vmem:[%s20108_s3 + $0xdec] sm:$0xf0] }
 0x3cc   : > { %8195 = vmatpush.bf16.msra.mxu1 %v12132_v19  ;;  %v12232_v41 = vor.u32 %v13256_v14, %v12231_v51  ;;  %v12233_v19 = vld [vmem:[%s20108_s3 + $0xdf0] sm:$0xf0]  ;;  %v12071_v14 = vld [vmem:[%s20108_s3 + $0x870] sm:$0xf] }
 0x3cd   : > { %v12236_v6 = vor.u32 %v13252_v12, %v12233_v19  ;;  %v13216_v12 = vld [vmem:[%s20108_s3 + $0x8ec] sm:$0xf0] }
 0x3ce   : > { %v6076_v59 = vpop.f32.mrf.mxu3  ;;  %v12072_v19 = vor.u32 %v13216_v12, %v12071_v14  ;;  %v12175_v14 = vld [vmem:[%s20108_s3 + $0xb78] sm:$0xf] }
 0x3cf   : > { %8158 = vmatpush.bf16.msrb.mxu3 %v12096_v43  ;;  %v6077_v38 = vadd.f32 %v6076_v59, %v6058_v16  ;;  %v12201_v59 = vld [vmem:[%s20108_s3 + $0xcf0] sm:$0xf0]  ;;  %v13241_v12 = vld [vmem:[%s20108_s3 + $0xbf4] sm:$0xf0] }
 0x3d0   : > { %8196 = vmatpush.bf16.msra.mxu1 %v12100_v3  ;;  %v7001_v32 = vpop.f32.mrf.mxu1  ;;  %v13248_v3 = vld [vmem:[%s20108_s3 + $0xcec] sm:$0xf0]  ;;  %v12204_v34 = vor.u32 %v13244_v33, %v12201_v59  ;;  %v13273_v33 = vld [vmem:[%s20108_s3 + $0xff4] sm:$0xf0]  ;;  %v19898_v59 = vpop.f32.mrf.mxu2 }
 0x3d1   : > { %v6132_v26 = vpack.c.bf16 %v6115_v58, %v6077_v38  ;;  %v7002_v60 = vadd.f32 %v7001_v32, %v6983_v48  ;;  %v12200_v42 = vor.u32 %v13248_v3, %v12199_v40  ;;  %v12167_v58 = vld [vmem:[%s20108_s3 + $0xb70] sm:$0xf]  ;;  %v12169_v32 = vld [vmem:[%s20108_s3 + $0xbf0] sm:$0xf0]  ;;  %v19844_v48 = vpop.f32.mrf.mxu0  ;;  %v12303_v3 = vld [vmem:[%s20108_s3 + $0xf78] sm:$0xf] }
 0x3d2   : > { %v13240_v38 = vld [vmem:[%s20108_s3 + $0xbec] sm:$0xf0] }
 0x3d3   : > { %8159 = vmatpush.bf16.msrb.mxu3 %v12064_v49  ;;  %6148 = vst [vmem:[%s18069_s27 + $0x1b8] sm:$0xff] %v6132_v26  ;;  %v12168_v49 = vor.u32 %v13240_v38, %v12167_v58  ;;  %v6950_v26 = vadd.f32 %v19326_v27, %v19744_v21  ;;  %v12271_v38 = vld [vmem:[%s20108_s3 + $0xe78] sm:$0xf] }
 0x3d4   : > { %8197 = vmatpush.bf16.msra.mxu1 %v12068_v35  ;;  %v12172_v35 = vor.u32 %v13236_v30, %v12169_v32 }
 0x3d5   : > { %8089 = vmatmul.bf16.gmra.mxu3 %v17214_v57  ;;  %8127 = vmatmul.bf16.gmra.mxu1 %v17214_v57 }
 0x3d6   : > { %v6963_v39 = vpop.f32.mrf.mxu3 }
 0x3d7   : > { %8228 = vmatpush.bf16.msra.mxu3 %v12296_v20  ;;  %v6964_v2 = vadd.f32 %v6963_v39, %v6945_v56  ;;  %v13232_v20 = vld [vmem:[%s20108_s3 + $0xaec] sm:$0xf0] }
 0x3d8   : > { %8266 = vmatpush.bf16.msrb.mxu1 %v12300_v62  ;;  %v7003_v63 = vpop.f32.mrf.mxu1  ;;  %v12136_v56 = vor.u32 %v13232_v20, %v12135_v13  ;;  %v12239_v13 = vld [vmem:[%s20108_s3 + $0xd78] sm:$0xf] }
 0x3d9   : > { %v7239_v10 = vpack.c.bf16 %v7002_v60, %v6964_v2  ;;  %v7004_v16 = vadd.f32 %v7003_v63, %v6985_v24  ;;  %v13224_v60 = vld [vmem:[%s20108_s3 + $0x9ec] sm:$0xf0]  ;;  %v13220_v2 = vld [vmem:[%s20108_s3 + $0x974] sm:$0xf]  ;;  %v19879_v24 = vperm.slane %v19727_v46, 3  ;;  %v19881_v40 = vpop.f32.mrf.mxu0 }
 0x3da   : > { %v12108_v63 = vor.u32 %v13220_v2, %v12105_v31  ;;  %v13257_v20 = vld [vmem:[%s20108_s3 + $0xdf4] sm:$0xf0] }
 0x3db   : > { %8229 = vmatpush.bf16.msra.mxu3 %v12264_v52  ;;  %7255 = vst [vmem:[%s18069_s27 + $0x40] sm:$0xff] %v7239_v10  ;;  %v12104_v52 = vor.u32 %v13224_v60, %v12103_v11  ;;  %v6990_v10 = vadd.f32 %v19602_v4, %v19747_v7  ;;  %v12073_v4 = vld [vmem:[%s20108_s3 + $0x8f0] sm:$0xf0]  ;;  %v12207_v60 = vld [vmem:[%s20108_s3 + $0xc78] sm:$0xf] }
 0x3dc   : > { %8267 = vmatpush.bf16.msrb.mxu1 %v12268_v1  ;;  %v6952_v1 = vadd.f32 %v19387_v9, %v19744_v21  ;;  %v13249_v2 = vld [vmem:[%s20108_s3 + $0xcf4] sm:$0xf0] }
 0x3dd   : > { %v12208_v31 = vor.u32 %v13249_v2, %v12207_v60  ;;  %v6284_v60 = vperm.slane %v19727_v46, 5 }
 0x3de   : > { %v6965_v43 = vpop.f32.mrf.mxu3 }
 0x3df   : > { %8230 = vmatpush.bf16.msra.mxu3 %v12232_v41  ;;  %v6966_v25 = vadd.f32 %v6965_v43, %v6947_v22  ;;  %v13212_v41 = vld [vmem:[%s20108_s3 + $0x874] sm:$0xf]  ;;  %v19876_v22 = vperm.slane %v19727_v46, 2 }
 0x3e0   : > { %8268 = vmatpush.bf16.msrb.mxu1 %v12236_v6  ;;  %v7006_v61 = vpop.f32.mrf.mxu1  ;;  %v12076_v6 = vor.u32 %v13212_v41, %v12073_v4  ;;  %v12176_v41 = vor.u32 %v13241_v12, %v12175_v14 }
 0x3e1   : > { %v7243_v0 = vpack.c.bf16 %v7004_v16, %v6966_v25  ;;  %v7007_v27 = vadd.f32 %v7006_v61, %v6988_v37  ;;  %v13269_v16 = vld [vmem:[%s20108_s3 + $0xf7c] sm:$0xf]  ;;  %v12304_v25 = vor.u32 %v13273_v33, %v12303_v3  ;;  %v7026_v4 = vadd.f32 %v19565_v44, %v19876_v22  ;;  %v12143_v3 = vld [vmem:[%s20108_s3 + $0xa78] sm:$0xf] }
 0x3e2   : > { %v13233_v33 = vld [vmem:[%s20108_s3 + $0xaf4] sm:$0xf0]  ;;  %v13229_v44 = vld [vmem:[%s20108_s3 + $0xa7c] sm:$0xf] }
 0x3e3   : > { %8231 = vmatpush.bf16.msra.mxu3 %v12200_v42  ;;  %7259 = vst [vmem:[%s18069_s27 + $0xc0] sm:$0xff] %v7243_v0  ;;  %v12305_v42 = vld [vmem:[%s20108_s3 + $0xff8] sm:$0xf0]  ;;  %v7059_v0 = vadd.f32 %v19648_v29, %v19879_v24 }
 0x3e4   : > { %8269 = vmatpush.bf16.msrb.mxu1 %v12204_v34  ;;  %v19900_v61 = vor.u32 %v13269_v16, %v12305_v42  ;;  %v7021_v34 = vadd.f32 %v19453_v47, %v19876_v22  ;;  %v13261_v47 = vld [vmem:[%s20108_s3 + $0xe7c] sm:$0xf] }
 0x3e5   : > { %8160 = vmatmul.bf16.vlgmr.msrb.gmra.mxu3 %v17106_v45  ;;  %8198 = vmatmul.bf16.vlgmr.msra.gmra.mxu1 %v17106_v45  ;;  %v12145_v42 = vld [vmem:[%s20108_s3 + $0xaf8] sm:$0xf0] }
 0x3e6   : > { %v6968_v8 = vpop.f32.mrf.mxu3 }
 0x3e7   : > { %8232 = vmatpush.bf16.msra.mxu3 %v12168_v49  ;;  %v6969_v62 = vadd.f32 %v6968_v8, %v6950_v26  ;;  %v13265_v49 = vld [vmem:[%s20108_s3 + $0xef4] sm:$0xf0] }
 0x3e8   : > { %8270 = vmatpush.bf16.msrb.mxu1 %v12172_v35  ;;  %v7008_v39 = vpop.f32.mrf.mxu1  ;;  %v12272_v29 = vor.u32 %v13265_v49, %v12271_v38  ;;  %v12273_v35 = vld [vmem:[%s20108_s3 + $0xef8] sm:$0xf0]  ;;  %v12111_v49 = vld [vmem:[%s20108_s3 + $0x978] sm:$0xf] }
 0x3e9   : > { %v7247_v15 = vpack.c.bf16 %v7007_v27, %v6969_v62  ;;  %v7009_v9 = vadd.f32 %v7008_v39, %v6990_v10  ;;  %v19919_v37 = vor.u32 %v13261_v47, %v12273_v35  ;;  %v12240_v27 = vor.u32 %v13257_v20, %v12239_v13  ;;  %v12241_v62 = vld [vmem:[%s20108_s3 + $0xdf8] sm:$0xf0]  ;;  %v13225_v47 = vld [vmem:[%s20108_s3 + $0x9f4] sm:$0xf0] }
 0x3ea   : > { %v19937_v17 = vor.u32 %v13253_v54, %v12241_v62  ;;  %v7023_v39 = vadd.f32 %v19510_v55, %v19876_v22  ;;  %v13245_v55 = vld [vmem:[%s20108_s3 + $0xc7c] sm:$0xf]  ;;  %v12079_v20 = vld [vmem:[%s20108_s3 + $0x878] sm:$0xf] }
 0x3eb   : > { %8233 = vmatpush.bf16.msra.mxu3 %v12136_v56  ;;  %7263 = vst [vmem:[%s18069_s27 + $0x140] sm:$0xff] %v7247_v15  ;;  %v19935_v56 = vpop.f32.mrf.mxu0  ;;  %v19943_v15 = vpop.f32.mrf.mxu2  ;;  %v13217_v54 = vld [vmem:[%s20108_s3 + $0x8f4] sm:$0xf0] }
 0x3ec   : > { %8271 = vmatpush.bf16.msrb.mxu1 %v12140_v18  ;;  %v7061_v18 = vadd.f32 %v19691_v50, %v19879_v24  ;;  %v12080_v62 = vor.u32 %v13217_v54, %v12079_v20 }
 0x3ee   : > { %v6970_v51 = vpop.f32.mrf.mxu3 }
 0x3ef   : > { %8234 = vmatpush.bf16.msra.mxu3 %v12104_v52  ;;  %v6971_v21 = vadd.f32 %v6970_v51, %v6952_v1 }
 0x3f0   : > { %8272 = vmatpush.bf16.msrb.mxu1 %v12108_v63  ;;  %v7077_v7 = vpop.f32.mrf.mxu1  ;;  %v12209_v63 = vld [vmem:[%s20108_s3 + $0xcf8] sm:$0xf0] }
 0x3f1   : > { %v7251_v43 = vpack.c.bf16 %v7009_v9, %v6971_v21  ;;  %v7078_v30 = vadd.f32 %v7077_v7, %v7059_v0  ;;  %v19958_v10 = vor.u32 %v13245_v55, %v12209_v63  ;;  %v13237_v9 = vld [vmem:[%s20108_s3 + $0xb7c] sm:$0xf]  ;;  %v7064_v7 = vadd.f32 %v19764_v53, %v19879_v24 }
 0x3f2   : > { %v12177_v21 = vld [vmem:[%s20108_s3 + $0xbf8] sm:$0xf0] }
 0x3f3   : > { %8235 = vmatpush.bf16.msra.mxu3 %v12072_v19  ;;  %7267 = vst [vmem:[%s18069_s27 + $0x1c0] sm:$0xff] %v7251_v43  ;;  %v19976_v19 = vor.u32 %v13237_v9, %v12177_v21 }
 0x3f4   : > { %8273 = vmatpush.bf16.msrb.mxu1 %v12076_v6  ;;  %v19982_v6 = vpop.f32.mrf.mxu0 }
 0x3f5   : > { %8165 = vmatmul.bf16.gmra.mxu3 %v17214_v57  ;;  %8203 = vmatmul.bf16.gmra.mxu1 %v17214_v57 }
 0x3f6   : > { %v7039_v58 = vpop.f32.mrf.mxu3 }
 0x3f7   : > { %8304 = vmatpush.bf16.msrb.mxu3 %v12304_v25  ;;  %v7040_v32 = vadd.f32 %v7039_v58, %v7021_v34  ;;  %v12144_v25 = vor.u32 %v13233_v33, %v12143_v3  ;;  %v19997_v34 = vpop.f32.mrf.mxu2  ;;  %v19999_v58 = vor.u32 %v13229_v44, %v12145_v42 }
 0x3f8   : > { %8342 = vmatpush.bf16.msra.mxu1 %v19900_v61  ;;  %v7079_v26 = vpop.f32.mrf.mxu1 }
 0x3f9   : > { %v7240_v8 = vpack.c.bf16 %v7078_v30, %v7040_v32  ;;  %v7080_v50 = vadd.f32 %v7079_v26, %v7061_v18  ;;  %v13221_v30 = vld [vmem:[%s20108_s3 + $0x97c] sm:$0xf]  ;;  %v12112_v32 = vor.u32 %v13225_v47, %v12111_v49  ;;  %v7028_v26 = vadd.f32 %v19604_v23, %v19876_v22 }
 0x3fb   : > { %8305 = vmatpush.bf16.msrb.mxu3 %v12272_v29  ;;  %7256 = vst [vmem:[%s18069_s27 + $0x48] sm:$0xff] %v7240_v8  ;;  %v12113_v29 = vld [vmem:[%s20108_s3 + $0x9f8] sm:$0xf0]  ;;  %v7066_v8 = vadd.f32 %v19799_v28, %v19879_v24 }
 0x3fc   : > { %8343 = vmatpush.bf16.msra.mxu1 %v19919_v37  ;;  %v12116_v35 = vor.u32 %v13221_v30, %v12113_v29  ;;  %v12081_v28 = vld [vmem:[%s20108_s3 + $0x8f8] sm:$0xf0]  ;;  %v20031_v24 = vpop.f32.mrf.mxu0 }
 0x3fe   : > { %v7041_v11 = vpop.f32.mrf.mxu3 }
 0x3ff   : > { %8306 = vmatpush.bf16.msrb.mxu3 %v12240_v27  ;;  %v7042_v52 = vadd.f32 %v7041_v11, %v7023_v39  ;;  %v13213_v27 = vld [vmem:[%s20108_s3 + $0x87c] sm:$0xf]  ;;  %v6283_v11 = vperm.slane %v19727_v46, 4  ;;  %v20035_v55 = vpop.f32.mrf.mxu2 }
 0x400   : > { %8344 = vmatpush.bf16.msra.mxu1 %v19937_v17  ;;  %v7082_v1 = vpop.f32.mrf.mxu1  ;;  %v12084_v18 = vor.u32 %v13213_v27, %v12081_v28 }
 0x401   : > { %v7244_v51 = vpack.c.bf16 %v7080_v50, %v7042_v52  ;;  %v7083_v53 = vadd.f32 %v7082_v1, %v7064_v7  ;;  %v7097_v50 = vadd.f32 %v19654_v5, %v6283_v11  ;;  %v7135_v52 = vadd.f32 %v19844_v48, %v6284_v60 }
 0x402   : > { %v7099_v9 = vadd.f32 %v19694_v36, %v6283_v11  ;;  %v7102_v36 = vadd.f32 %v19898_v59, %v6283_v11 }
 0x403   : > { %8307 = vmatpush.bf16.msrb.mxu3 %v12208_v31  ;;  %7260 = vst [vmem:[%s18069_s27 + $0xc8] sm:$0xff] %v7244_v51 }
 0x404   : > { %8345 = vmatpush.bf16.msra.mxu1 %v19958_v10  ;;  %v7212_v12 = vpop.f32.mrf.mxu0 }
 0x405   : > { %8236 = vmatmul.bf16.vlgmr.msra.gmra.mxu3 %v17106_v45  ;;  %8274 = vmatmul.bf16.vlgmr.msrb.gmra.mxu1 %v17106_v45 }
 0x406   : > { %v7044_v43 = vpop.f32.mrf.mxu3 }
 0x407   : > { %8308 = vmatpush.bf16.msrb.mxu3 %v12176_v41  ;;  %v7045_v16 = vadd.f32 %v7044_v43, %v7026_v4  ;;  %v7177_v41 = vpop.f32.mrf.mxu2 }
 0x408   : > { %8346 = vmatpush.bf16.msra.mxu1 %v19976_v19  ;;  %v7084_v0 = vpop.f32.mrf.mxu1 }
 0x409   : > { %v7248_v38 = vpack.c.bf16 %v7083_v53, %v7045_v16  ;;  %v7085_v23 = vadd.f32 %v7084_v0, %v7066_v8  ;;  %v7104_v53 = vadd.f32 %v19943_v15, %v6283_v11  ;;  %v7142_v16 = vadd.f32 %v19982_v6, %v6284_v60 }
 0x40b   : > { %8309 = vmatpush.bf16.msrb.mxu3 %v12144_v25  ;;  %7264 = vst [vmem:[%s18069_s27 + $0x148] sm:$0xff] %v7248_v38  ;;  %v6285_v38 = vperm.slane %v19727_v46, 6 }
 0x40c   : > { %8347 = vmatpush.bf16.msra.mxu1 %v19999_v58 }
 0x40d   : > { %v7173_v15 = vadd.f32 %v19997_v34, %v6285_v38 }
 0x40e   : > { %v7046_v13 = vpop.f32.mrf.mxu3 }
 0x40f   : > { %8310 = vmatpush.bf16.msrb.mxu3 %v12112_v32  ;;  %v7047_v22 = vadd.f32 %v7046_v13, %v7028_v26 }
 0x410   : > { %8348 = vmatpush.bf16.msra.mxu1 %v12116_v35  ;;  %v7153_v39 = vpop.f32.mrf.mxu1 }
 0x411   : > { %v7252_v2 = vpack.c.bf16 %v7085_v23, %v7047_v22  ;;  %v7154_v63 = vadd.f32 %v7153_v39, %v7135_v52  ;;  %v20074_v52 = vld [vmem:[%s20109_s4 + $0x18] sm:$0xff] }
 0x413   : > { %8311 = vmatpush.bf16.msrb.mxu3 %v12080_v62  ;;  %7268 = vst [vmem:[%s18069_s27 + $0x1c8] sm:$0xff] %v7252_v2  ;;  %v7178_v62 = vadd.f32 %v7177_v41, %v6285_v38  ;;  %v7402_v41 = vperm.slane %v20074_v52, 1 }
 0x414   : > { %8349 = vmatpush.bf16.msra.mxu1 %v12084_v18 }
 0x415   : > { %8241 = vmatmul.bf16.gmra.mxu3 %v17214_v57  ;;  %8279 = vmatmul.bf16.gmra.mxu1 %v17214_v57 }
 0x416   : > { %v7115_v31 = vpop.f32.mrf.mxu3 }
 0x417   : > { %13282 = vmatpush.bf16.msra.mxu3 %v19900_v61  ;;  %v7116_v1 = vadd.f32 %v7115_v31, %v7097_v50  ;;  %v7137_v61 = vadd.f32 %v19881_v40, %v6284_v60  ;;  %v7140_v40 = vadd.f32 %v19935_v56, %v6284_v60 }
 0x418   : > { %v7155_v51 = vpop.f32.mrf.mxu1 }
 0x419   : > { %v7241_v14 = vpack.c.bf16 %v7154_v63, %v7116_v1  ;;  %v7156_v21 = vadd.f32 %v7155_v51, %v7137_v61 }
 0x41b   : > { %13283 = vmatpush.bf16.msra.mxu3 %v19919_v37  ;;  %7257 = vst [vmem:[%s18069_s27 + $0x50] sm:$0xff] %v7241_v14  ;;  %v7215_v37 = vpop.f32.mrf.mxu0 }
 0x41e   : > { %v7117_v5 = vpop.f32.mrf.mxu3 }
 0x41f   : > { %13284 = vmatpush.bf16.msra.mxu3 %v19937_v17  ;;  %v7118_v48 = vadd.f32 %v7117_v5, %v7099_v9  ;;  %v7179_v17 = vpop.f32.mrf.mxu2 }
 0x420   : > { %v7158_v4 = vpop.f32.mrf.mxu1 }
 0x421   : > { %v7245_v7 = vpack.c.bf16 %v7156_v21, %v7118_v48  ;;  %v7159_v3 = vadd.f32 %v7158_v4, %v7140_v40 }
 0x423   : > { %13285 = vmatpush.bf16.msra.mxu3 %v19958_v10  ;;  %7261 = vst [vmem:[%s18069_s27 + $0xd0] sm:$0xff] %v7245_v7 }
 0x425   : > { %8312 = vmatmul.bf16.vlgmr.msrb.gmra.mxu3 %v17106_v45  ;;  %8350 = vmatmul.bf16.vlgmr.msra.gmra.mxu1 %v17106_v45 }
 0x426   : > { %v7120_v43 = vpop.f32.mrf.mxu3 }
 0x427   : > { %13286 = vmatpush.bf16.msra.mxu3 %v19976_v19  ;;  %v7121_v33 = vadd.f32 %v7120_v43, %v7102_v36  ;;  %v7217_v19 = vpop.f32.mrf.mxu0  ;;  %v8066_v56 = vpop.f32.mrf.mxu2 }
 0x428   : > { %v7160_v44 = vpop.f32.mrf.mxu1 }
 0x429   : > { %v7249_v10 = vpack.c.bf16 %v7159_v3, %v7121_v33  ;;  %v7161_v59 = vadd.f32 %v7160_v44, %v7142_v16 }
 0x42b   : > { %13287 = vmatpush.bf16.msra.mxu3 %v19999_v58  ;;  %7265 = vst [vmem:[%s18069_s27 + $0x150] sm:$0xff] %v7249_v10  ;;  %v6286_v58 = vperm.slane %v19727_v46, 7  ;;  %v7175_v46 = vadd.f32 %v20035_v55, %v6285_v38  ;;  %v7180_v55 = vadd.f32 %v7179_v17, %v6285_v38 }
 0x42d   : > { %v7211_v6 = vadd.f32 %v20031_v24, %v6286_v58  ;;  %v7213_v13 = vadd.f32 %v7212_v12, %v6286_v58  ;;  %v7216_v28 = vadd.f32 %v7215_v37, %v6286_v58  ;;  %v7218_v50 = vadd.f32 %v7217_v19, %v6286_v58 }
 0x42e   : > { %v7122_v25 = vpop.f32.mrf.mxu3  ;;  %v7401_v12 = vperm.slane %v20074_v52, 0 }
 0x42f   : > { %13288 = vmatpush.bf16.msra.mxu3 %v12116_v35  ;;  %v7123_v42 = vadd.f32 %v7122_v25, %v7104_v53  ;;  %v8104_v29 = vpop.f32.mrf.mxu0  ;;  %v8068_v8 = vpop.f32.mrf.mxu2 }
 0x430   : > { %v7229_v0 = vpop.f32.mrf.mxu1  ;;  %v8067_v61 = vadd.f32 %v8066_v56, %v7401_v12  ;;  %v8105_v5 = vadd.f32 %v8104_v29, %v7402_v41  ;;  %v8069_v17 = vadd.f32 %v8068_v8, %v7401_v12 }
 0x431   : > { %v7253_v49 = vpack.c.bf16 %v7161_v59, %v7123_v42  ;;  %v7230_v30 = vadd.f32 %v7229_v0, %v7211_v6 }
 0x433   : > { %13289 = vmatpush.bf16.msra.mxu3 %v12084_v18  ;;  %7269 = vst [vmem:[%s18069_s27 + $0x1d0] sm:$0xff] %v7253_v49 }
 0x435   : > { %8317 = vmatmul.bf16.gmra.mxu3 %v17214_v57 }
 0x436   : > { %v7191_v47 = vpop.f32.mrf.mxu3 }
 0x437   : > { %v7192_v32 = vadd.f32 %v7191_v47, %v7173_v15  ;;  %v8106_v23 = vpop.f32.mrf.mxu0  ;;  %v8071_v22 = vpop.f32.mrf.mxu2 }
 0x438   : > { %v7231_v35 = vpop.f32.mrf.mxu1  ;;  %v8107_v43 = vadd.f32 %v8106_v23, %v7402_v41  ;;  %v8072_v19 = vadd.f32 %v8071_v22, %v7401_v12 }
 0x439   : > { %v7242_v26 = vpack.c.bf16 %v7230_v30, %v7192_v32  ;;  %v7232_v54 = vadd.f32 %v7231_v35, %v7213_v13  ;;  %v7403_v35 = vperm.slane %v20074_v52, 2 }
 0x43b   : > { %7258 = vst [vmem:[%s18069_s27 + $0x58] sm:$0xff] %v7242_v26  ;;  %v7404_v26 = vperm.slane %v20074_v52, 3 }
 0x43e   : > { %v7193_v20 = vpop.f32.mrf.mxu3 }
 0x43f   : > { %v7194_v45 = vadd.f32 %v7193_v20, %v7175_v46  ;;  %v8109_v2 = vpop.f32.mrf.mxu0  ;;  %v8073_v31 = vpop.f32.mrf.mxu2 }
 0x440   : > { %v7234_v27 = vpop.f32.mrf.mxu1  ;;  %v8110_v25 = vadd.f32 %v8109_v2, %v7402_v41  ;;  %v8074_v15 = vadd.f32 %v8073_v31, %v7401_v12 }
 0x441   : > { %v7246_v34 = vpack.c.bf16 %v7232_v54, %v7194_v45  ;;  %v7235_v39 = vadd.f32 %v7234_v27, %v7216_v28 }
 0x443   : > { %7262 = vst [vmem:[%s18069_s27 + $0xd8] sm:$0xff] %v7246_v34 }
 0x445   : > { %8355 = vmatmul.bf16.vlgmr.msra.gmra.mxu3 %v17214_v57 }
 0x446   : > { %v7196_v24 = vpop.f32.mrf.mxu3 }
 0x447   : > { %v7197_v18 = vadd.f32 %v7196_v24, %v7178_v62  ;;  %v8111_v21 = vpop.f32.mrf.mxu0  ;;  %v8142_v37 = vpop.f32.mrf.mxu2 }
 0x448   : > { %v7236_v11 = vpop.f32.mrf.mxu1  ;;  %v8112_v6 = vadd.f32 %v8111_v21, %v7402_v41  ;;  %v8143_v13 = vadd.f32 %v8142_v37, %v7403_v35  ;;  %v7405_v37 = vperm.slane %v20074_v52, 4 }
 0x449   : > { %v7250_v60 = vpack.c.bf16 %v7235_v39, %v7197_v18  ;;  %v7237_v1 = vadd.f32 %v7236_v11, %v7218_v50 }
 0x44b   : > { %7266 = vst [vmem:[%s18069_s27 + $0x158] sm:$0xff] %v7250_v60 }
 0x44e   : > { %v7198_v63 = vpop.f32.mrf.mxu3 }
 0x44f   : > { %v7199_v51 = vadd.f32 %v7198_v63, %v7180_v55  ;;  %v8180_v10 = vpop.f32.mrf.mxu0  ;;  %v8144_v16 = vpop.f32.mrf.mxu2 }
 0x450   : > { %v8123_v14 = vpop.f32.mrf.mxu1  ;;  %v8181_v20 = vadd.f32 %v8180_v10, %v7404_v26  ;;  %v8145_v62 = vadd.f32 %v8144_v16, %v7403_v35 }
 0x451   : > { %v7254_v9 = vpack.c.bf16 %v7237_v1, %v7199_v51  ;;  %v8124_v4 = vadd.f32 %v8123_v14, %v8105_v5 }
 0x453   : > { %7270 = vst [vmem:[%s18069_s27 + $0x1d8] sm:$0xff] %v7254_v9 }
 0x456   : > { %v8085_v48 = vpop.f32.mrf.mxu3 }
 0x457   : > { %v8086_v7 = vadd.f32 %v8085_v48, %v8067_v61  ;;  %v8182_v58 = vpop.f32.mrf.mxu0  ;;  %v8147_v49 = vpop.f32.mrf.mxu2 }
 0x458   : > { %v8125_v36 = vpop.f32.mrf.mxu1  ;;  %v8183_v28 = vadd.f32 %v8182_v58, %v7404_v26  ;;  %v8148_v50 = vadd.f32 %v8147_v49, %v7403_v35 }
 0x459   : > { %v8361_v40 = vpack.c.bf16 %v8124_v4, %v8086_v7  ;;  %v8126_v33 = vadd.f32 %v8125_v36, %v8107_v43  ;;  %v7406_v36 = vperm.slane %v20074_v52, 5 }
 0x45b   : > { %8377 = vst [vmem:[%s18069_s27 + $0x60] sm:$0xff] %v8361_v40 }
 0x45e   : > { %v8087_v3 = vpop.f32.mrf.mxu3 }
 0x45f   : > { %v8088_v44 = vadd.f32 %v8087_v3, %v8069_v17  ;;  %v8185_v46 = vpop.f32.mrf.mxu0  ;;  %v8149_v54 = vpop.f32.mrf.mxu2 }
 0x460   : > { %v8128_v53 = vpop.f32.mrf.mxu1  ;;  %v8186_v31 = vadd.f32 %v8185_v46, %v7404_v26  ;;  %v8150_v61 = vadd.f32 %v8149_v54, %v7403_v35 }
 0x461   : > { %v8365_v57 = vpack.c.bf16 %v8126_v33, %v8088_v44  ;;  %v8129_v42 = vadd.f32 %v8128_v53, %v8110_v25 }
 0x463   : > { %8381 = vst [vmem:[%s18069_s27 + $0xe0] sm:$0xff] %v8365_v57 }
 0x466   : > { %v8090_v59 = vpop.f32.mrf.mxu3 }
 0x467   : > { %v8091_v56 = vadd.f32 %v8090_v59, %v8072_v19  ;;  %v8187_v24 = vpop.f32.mrf.mxu0  ;;  %v8218_v60 = vpop.f32.mrf.mxu2 }
 0x468   : > { %v8130_v0 = vpop.f32.mrf.mxu1  ;;  %v8188_v5 = vadd.f32 %v8187_v24, %v7404_v26  ;;  %v8219_v3 = vadd.f32 %v8218_v60, %v7405_v37 }
 0x469   : > { %v8369_v38 = vpack.c.bf16 %v8129_v42, %v8091_v56  ;;  %v8131_v30 = vadd.f32 %v8130_v0, %v8112_v6 }
 0x46b   : > { %8385 = vst [vmem:[%s18069_s27 + $0x160] sm:$0xff] %v8369_v38 }
 0x46e   : > { %v8092_v47 = vpop.f32.mrf.mxu3 }
 0x46f   : > { %v8093_v32 = vadd.f32 %v8092_v47, %v8074_v15  ;;  %v8256_v14 = vpop.f32.mrf.mxu0  ;;  %v8220_v9 = vpop.f32.mrf.mxu2 }
 0x470   : > { %v8199_v29 = vpop.f32.mrf.mxu1  ;;  %v8257_v33 = vadd.f32 %v8256_v14, %v7406_v36  ;;  %v8221_v25 = vadd.f32 %v8220_v9, %v7405_v37 }
 0x471   : > { %v8373_v8 = vpack.c.bf16 %v8131_v30, %v8093_v32  ;;  %v8200_v27 = vadd.f32 %v8199_v29, %v8181_v20 }
 0x473   : > { %8389 = vst [vmem:[%s18069_s27 + $0x1e0] sm:$0xff] %v8373_v8 }
 0x476   : > { %v8161_v45 = vpop.f32.mrf.mxu3 }
 0x477   : > { %v8162_v34 = vadd.f32 %v8161_v45, %v8143_v13  ;;  %v8258_v17 = vpop.f32.mrf.mxu0  ;;  %v8223_v43 = vpop.f32.mrf.mxu2 }
 0x478   : > { %v8201_v23 = vpop.f32.mrf.mxu1  ;;  %v8259_v59 = vadd.f32 %v8258_v17, %v7406_v36  ;;  %v8224_v15 = vadd.f32 %v8223_v43, %v7405_v37 }
 0x479   : > { %v8362_v22 = vpack.c.bf16 %v8200_v27, %v8162_v34  ;;  %v8202_v18 = vadd.f32 %v8201_v23, %v8183_v28  ;;  %v7407_v34 = vperm.slane %v20074_v52, 6  ;;  %v7408_v23 = vperm.slane %v20074_v52, 7 }
 0x47b   : > { %8378 = vst [vmem:[%s18069_s27 + $0x68] sm:$0xff] %v8362_v22 }
 0x47e   : > { %v8163_v39 = vpop.f32.mrf.mxu3 }
 0x47f   : > { %v8164_v11 = vadd.f32 %v8163_v39, %v8145_v62  ;;  %v8261_v19 = vpop.f32.mrf.mxu0  ;;  %v8225_v42 = vpop.f32.mrf.mxu2 }
 0x480   : > { %v8204_v2 = vpop.f32.mrf.mxu1  ;;  %v8262_v6 = vadd.f32 %v8261_v19, %v7406_v36  ;;  %v8226_v46 = vadd.f32 %v8225_v42, %v7405_v37 }
 0x481   : > { %v8366_v55 = vpack.c.bf16 %v8202_v18, %v8164_v11  ;;  %v8205_v1 = vadd.f32 %v8204_v2, %v8186_v31 }
 0x483   : > { %8382 = vst [vmem:[%s18069_s27 + $0xe8] sm:$0xff] %v8366_v55 }
 0x486   : > { %v8166_v63 = vpop.f32.mrf.mxu3 }
 0x487   : > { %v8167_v51 = vadd.f32 %v8166_v63, %v8148_v50  ;;  %v8263_v47 = vpop.f32.mrf.mxu0  ;;  %v8294_v35 = vpop.f32.mrf.mxu2 }
 0x488   : > { %v8206_v12 = vpop.f32.mrf.mxu1  ;;  %v8264_v13 = vadd.f32 %v8263_v47, %v7406_v36  ;;  %v8295_v24 = vadd.f32 %v8294_v35, %v7407_v34 }
 0x489   : > { %v8370_v41 = vpack.c.bf16 %v8205_v1, %v8167_v51  ;;  %v8207_v48 = vadd.f32 %v8206_v12, %v8188_v5 }
 0x48b   : > { %8386 = vst [vmem:[%s18069_s27 + $0x168] sm:$0xff] %v8370_v41 }
 0x48e   : > { %v8168_v21 = vpop.f32.mrf.mxu3 }
 0x48f   : > { %v8169_v4 = vadd.f32 %v8168_v21, %v8150_v61  ;;  %v8332_v27 = vpop.f32.mrf.mxu0  ;;  %v8296_v62 = vpop.f32.mrf.mxu2 }
 0x490   : > { %v8275_v7 = vpop.f32.mrf.mxu1  ;;  %v8333_v39 = vadd.f32 %v8332_v27, %v7408_v23  ;;  %v8297_v63 = vadd.f32 %v8296_v62, %v7407_v34 }
 0x491   : > { %v8374_v40 = vpack.c.bf16 %v8207_v48, %v8169_v4  ;;  %v8276_v10 = vadd.f32 %v8275_v7, %v8257_v33 }
 0x493   : > { %8390 = vst [vmem:[%s18069_s27 + $0x1e8] sm:$0xff] %v8374_v40 }
 0x496   : > { %v8237_v44 = vpop.f32.mrf.mxu3 }
 0x497   : > { %v8238_v53 = vadd.f32 %v8237_v44, %v8219_v3  ;;  %v8334_v55 = vpop.f32.mrf.mxu0  ;;  %v8299_v50 = vpop.f32.mrf.mxu2 }
 0x498   : > { %v8277_v57 = vpop.f32.mrf.mxu1  ;;  %v8335_v1 = vadd.f32 %v8334_v55, %v7408_v23  ;;  %v8300_v21 = vadd.f32 %v8299_v50, %v7407_v34 }
 0x499   : > { %v8363_v16 = vpack.c.bf16 %v8276_v10, %v8238_v53  ;;  %v8278_v0 = vadd.f32 %v8277_v57, %v8259_v59 }
 0x49b   : > { %8379 = vst [vmem:[%s18069_s27 + $0x70] sm:$0xff] %v8363_v16 }
 0x49e   : > { %v8239_v56 = vpop.f32.mrf.mxu3 }
 0x49f   : > { %v8240_v38 = vadd.f32 %v8239_v56, %v8221_v25  ;;  %v8301_v41 = vpop.f32.mrf.mxu2 }
 0x4a0   : > { %v8280_v58 = vpop.f32.mrf.mxu1  ;;  %v8302_v17 = vadd.f32 %v8301_v41, %v7407_v34 }
 0x4a1   : > { %v8367_v49 = vpack.c.bf16 %v8278_v0, %v8240_v38  ;;  %v8281_v32 = vadd.f32 %v8280_v58, %v8262_v6 }
 0x4a3   : > { %8383 = vst [vmem:[%s18069_s27 + $0xf0] sm:$0xff] %v8367_v49 }
 0x4a6   : > { %v8242_v30 = vpop.f32.mrf.mxu3 }
 0x4a7   : > { %v8243_v29 = vadd.f32 %v8242_v30, %v8224_v15  ;;  %v8337_v5 = vpop.f32.mrf.mxu2 }
 0x4a8   : > { %v8282_v26 = vpop.f32.mrf.mxu1  ;;  %v8338_v48 = vadd.f32 %v8337_v5, %v7408_v23 }
 0x4a9   : > { %v8371_v8 = vpack.c.bf16 %v8281_v32, %v8243_v29  ;;  %v8283_v54 = vadd.f32 %v8282_v26, %v8264_v13 }
 0x4ab   : > { %8387 = vst [vmem:[%s18069_s27 + $0x170] sm:$0xff] %v8371_v8 }
 0x4ae   : > { %v8244_v20 = vpop.f32.mrf.mxu3 }
 0x4af   : > { %v8245_v45 = vadd.f32 %v8244_v20, %v8226_v46  ;;  %v8339_v40 = vpop.f32.mrf.mxu2 }
 0x4b0   : > { %v8351_v28 = vpop.f32.mrf.mxu1  ;;  %v8340_v43 = vadd.f32 %v8339_v40, %v7408_v23 }
 0x4b1   : > { %v8375_v22 = vpack.c.bf16 %v8283_v54, %v8245_v45  ;;  %v8352_v11 = vadd.f32 %v8351_v28, %v8333_v39 }
 0x4b3   : > { %8391 = vst [vmem:[%s18069_s27 + $0x1f0] sm:$0xff] %v8375_v22 }
 0x4b6   : > { %v8313_v18 = vpop.f32.mrf.mxu3 }
 0x4b7   : > { %v8314_v60 = vadd.f32 %v8313_v18, %v8295_v24 }
 0x4b8   : > { %v8353_v31 = vpop.f32.mrf.mxu1 }
 0x4b9   : > { %v8364_v2 = vpack.c.bf16 %v8352_v11, %v8314_v60  ;;  %v8354_v52 = vadd.f32 %v8353_v31, %v8335_v1 }
 0x4bb   : > { %8380 = vst [vmem:[%s18069_s27 + $0x78] sm:$0xff] %v8364_v2 }
 0x4be   : > { %v8315_v51 = vpop.f32.mrf.mxu3 }
 0x4bf   : > { %v8316_v14 = vadd.f32 %v8315_v51, %v8297_v63 }
 0x4c1   : > { %v8368_v12 = vpack.c.bf16 %v8354_v52, %v8316_v14 }
 0x4c3   : > { %8384 = vst [vmem:[%s18069_s27 + $0xf8] sm:$0xff] %v8368_v12 }
 0x4c6   : > { %v8318_v9 = vpop.f32.mrf.mxu3 }
 0x4c7   : > { %v8319_v7 = vadd.f32 %v8318_v9, %v8300_v21 }
 0x4ce   : > { %v8320_v61 = vpop.f32.mrf.mxu3 }
 0x4cf   : > { %v8321_v33 = vadd.f32 %v8320_v61, %v8302_v17 }
 0x4d6   : > { %v8356_v4 = vpop.f32.mrf.mxu3 }
 0x4d7   : > { %v8357_v37 = vadd.f32 %v8356_v4, %v8338_v48 }
 0x4d9   : > { %v8372_v36 = vpack.c.bf16 %v8357_v37, %v8319_v7 }
 0x4db   : > { %8388 = vst [vmem:[%s18069_s27 + $0x178] sm:$0xff] %v8372_v36 }
 0x4de   : > { %v8358_v3 = vpop.f32.mrf.mxu3 }
 0x4df   : > { %v8359_v44 = vadd.f32 %v8358_v3, %v8340_v43 }
 0x4e1   : > { %v8376_v10 = vpack.c.bf16 %v8359_v44, %v8321_v33 }
 0x4e3   : > { %8392 = vst [vmem:[%s18069_s27 + $0x1f8] sm:$0xff] %v8376_v10 }
 0x4e4 PF: > { %s15_s18 = sadd.s32 1, %s13307_s18  }
 0x4e5   : > { %p12_p4 = scmp.ge.s32.totalorder %s15_s18, 4  }
 0x4e7   :  { %14 = sbr.rel (!%p12_p4) target bundleno = 1 (0x1), region = 70 }

// kernel: end2end_forward.3
= control target key start
LH: loop header
LB: loop body
LE: loop exit
PB: predicated region body
PF: predicated region fallthrough
CT: control target
= control target key end

     0   :  { %9 = vsyncpa [#allocation3], 0  ;;  %s7466_s0 = inlined_call_operand.vmem [shape: bf16[2,320,384], index: 0, kind: input, shape index: {}]   ;;  %s7467_s1 = inlined_call_operand.vmem [shape: bf16[384,256], index: 1, kind: input, shape index: {}]   ;;  %s7468_s2 = inlined_call_operand.vmem [shape: f32[256,256], index: 2, kind: input, shape index: {}]   ;;  %s7469_s3 = inlined_call_operand.vmem [shape: f32[256,256], index: 3, kind: input, shape index: {}]   ;;  %s7470_s4 = inlined_call_operand.hbm [shape: f32[2,256,256], index: 4, kind: output, shape index: {}]  }
   0x1   :  { %11 = vsyncpa [#allocation3 + $0x1], 0  ;;  %s4985_s15 = smov 0   ;;  %s4987_s16 = smov 0  }
   0x2   :  { %s4989_s17 = smov 0   ;;  %s4991_s18 = smov 0  }
   0x3 LB: > { %s5006_s19 = sadd.s32 4294967295, %s4956_s18   ;;  %s3324_s20 = sadd.s32 4294967294, %s4956_s18   ;;  %s4956_s18 = sphi %s4991_s18, %s7476_s18   ;;  %s4952_s17 = sphi %s4989_s17, %s7475_s17   ;;  %s4948_s16 = sphi %s4987_s16, %s7474_s16   ;;  %s4944_s15 = sphi %s4985_s15, %s7473_s15  }
   0x4   : > { %s5010_s21 = sadd.s32 1, %s4956_s18   ;;  %s113_s22 = sadd.s32 1, %s4952_s17 }
   0x5   : > { %s110_s23 = ssub.s32 %s4956_s18, %s5010_s21  ;;  %p123_p0 = scmp.ne.s32.totalorder %s4952_s17, %s4948_s16 }
   0x6   : > { %p111_p1 = scmp.eq.s32.totalorder %s110_s23, 0  ;;  %p124_p2 = scmp.eq.s32.totalorder %s5006_s19, 1 }
   0x7   : > { %p129_p3 = scmp.ne.s32.totalorder %s4948_s16, %s4944_s15  ;;  %p130_p4 = scmp.eq.s32.totalorder %s3324_s20, 1 }
   0x8   : > { %s5021_s24 = scalar_select %p111_p1, %s4952_s17, %s113_s22  }
   0x9   : > { %p5023_p5 = por %p124_p2, %p123_p0  ;;  %p5027_p6 = por %p130_p4, %p129_p3 }
   0xa   : > { %p3327_p7 = scmp.ge.s32.totalorder %s4956_s18, 1  ;;  %p165_p8 = scmp.lt.s32.totalorder %s4956_s18, 3 }
   0xc   : > { %p166_p9 = pnand %p3327_p7, %p165_p8 }
   0xd   : > { %p191_p10 = scmp.lt.s32.totalorder (!%p166_p9), %s5006_s19, 1  ;;  %s188_s10 = sand.u32 (!%p166_p9), 1, %s4948_s16  }
   0xe   : > { %169 = sbr.rel (%p166_p9) target bundleno = 672 (0x2a0), region = 36  ;;  %s3328_s14 = sshll.u32 (!%p166_p9), %s188_s10, 9 }
   0xf   : > { %s5983_s6 = scalar_lea.vmem (!%p166_p9), [#allocation2], %s3328_s14  ;;  %s4835_s9 = sshll.u32 (!%p166_p9), %s5006_s19, 9 }
  0x10   : > { %s3258_s23 = scalar_lea.hbm (!%p166_p9), %s7470_s4, %s4835_s9  ;;  %s3259_s29 = sshll.u32 (!%p166_p9), %s5983_s6, 4  ;;  %s3260_s29 = int_to_ptr.vmem [resolvable:$true] %s3259_s29 }
  0x11   : > { %s3247_s8 = scalar_lea.sflag (!%p166_p9), [#allocation3], %s188_s10  ;;  %s4914_s13 = scalar_lea.hbm (!%p166_p9), %s7470_s4, 1024 }
  0x13   : > { %v3436_v0 = vld [vmem:[%s7467_s1 + $0x70] sm:$0xf]  ;;  %v4562_v1 = vld [vmem:[%s7467_s1 + $0x74] sm:$0xf0]  ;;  %v3428_v5 = vld [vmem:[%s7467_s1 + $0x60] sm:$0xf] }
  0x14   : > { %v3500_v2 = vld [vmem:[%s7467_s1 + $0xf0] sm:$0xf]  ;;  %v3437_v3 = vor.u32 %v4562_v1, %v3436_v0  ;;  %v4578_v4 = vld [vmem:[%s7467_s1 + $0xf4] sm:$0xf0]  ;;  %v4560_v6 = vld [vmem:[%s7467_s1 + $0x64] sm:$0xf0] }
  0x15   : > { %v3501_v7 = vor.u32 %v4578_v4, %v3500_v2  ;;  %v3492_v8 = vld [vmem:[%s7467_s1 + $0xe0] sm:$0xf]  ;;  %v4576_v9 = vld [vmem:[%s7467_s1 + $0xe4] sm:$0xf0]  ;;  %v3429_v10 = vor.u32 %v4560_v6, %v3428_v5  ;;  %v3420_v12 = vld [vmem:[%s7467_s1 + $0x50] sm:$0xf] }
  0x16   : > { %564 = vmatpush.bf16.msra.mxu0 %v3437_v3  ;;  %4836 = vmatpush.bf16.msra.mxu2 %v3437_v3  ;;  %v3493_v11 = vor.u32 %v4576_v9, %v3492_v8  ;;  %v4558_v13 = vld [vmem:[%s7467_s1 + $0x54] sm:$0xf0]  ;;  %v3484_v14 = vld [vmem:[%s7467_s1 + $0xd0] sm:$0xf]  ;;  %v3412_v18 = vld [vmem:[%s7467_s1 + $0x40] sm:$0xf] }
  0x17   : > { %593 = vmatpush.bf16.msra.mxu1 %v3501_v7  ;;  %4844 = vmatpush.bf16.msra.mxu3 %v3501_v7  ;;  %v4574_v15 = vld [vmem:[%s7467_s1 + $0xd4] sm:$0xf0]  ;;  %v3421_v16 = vor.u32 %v4558_v13, %v3420_v12  ;;  %v4556_v19 = vld [vmem:[%s7467_s1 + $0x44] sm:$0xf0]  ;;  %v3476_v20 = vld [vmem:[%s7467_s1 + $0xc0] sm:$0xf] }
  0x18   : > { %v3485_v17 = vor.u32 %v4574_v15, %v3484_v14  ;;  %v4572_v21 = vld [vmem:[%s7467_s1 + $0xc4] sm:$0xf0]  ;;  %v3413_v22 = vor.u32 %v4556_v19, %v3412_v18  ;;  %v3404_v24 = vld [vmem:[%s7467_s1 + $0x30] sm:$0xf]  ;;  %v4554_v25 = vld [vmem:[%s7467_s1 + $0x34] sm:$0xf0] }
  0x19   : > { %v3477_v23 = vor.u32 %v4572_v21, %v3476_v20  ;;  %v3468_v26 = vld [vmem:[%s7467_s1 + $0xb0] sm:$0xf]  ;;  %v4570_v27 = vld [vmem:[%s7467_s1 + $0xb4] sm:$0xf0]  ;;  %v3405_v28 = vor.u32 %v4554_v25, %v3404_v24  ;;  %s192_s7 = scalar_select %p191_p10, %s5006_s19, 1 }
  0x1a   : > { %565 = vmatpush.bf16.msra.mxu0 %v3429_v10  ;;  %4837 = vmatpush.bf16.msra.mxu2 %v3429_v10  ;;  %v3469_v29 = vor.u32 %v4570_v27, %v3468_v26  ;;  %v3396_v30 = vld [vmem:[%s7467_s1 + $0x20] sm:$0xf]  ;;  %v4552_v31 = vld [vmem:[%s7467_s1 + $0x24] sm:$0xf0]  ;;  %v3388_v36 = vld [vmem:[%s7467_s1 + $0x10] sm:$0xf] }
  0x1b   : > { %594 = vmatpush.bf16.msra.mxu1 %v3493_v11  ;;  %4845 = vmatpush.bf16.msra.mxu3 %v3493_v11  ;;  %v3460_v32 = vld [vmem:[%s7467_s1 + $0xa0] sm:$0xf]  ;;  %v4568_v33 = vld [vmem:[%s7467_s1 + $0xa4] sm:$0xf0]  ;;  %v3397_v34 = vor.u32 %v4552_v31, %v3396_v30  ;;  %s4852_s22 = smul.u32 480, %s192_s7 }
  0x1c   : > { %v3461_v35 = vor.u32 %v4568_v33, %v3460_v32  ;;  %v4550_v37 = vld [vmem:[%s7467_s1 + $0x14] sm:$0xf0]  ;;  %v3452_v38 = vld [vmem:[%s7467_s1 + $0x90] sm:$0xf]  ;;  %v3380_v41 = vld [vmem:[%s7467_s1] sm:$0xf] }
  0x1d   : > { %v4566_v39 = vld [vmem:[%s7467_s1 + $0x94] sm:$0xf0]  ;;  %v3389_v40 = vor.u32 %v4550_v37, %v3388_v36  ;;  %s5125_s12 = scalar_lea.vmem %s7466_s0, %s4852_s22  ;;  %v4548_v43 = vld [vmem:[%s7467_s1 + $0x4] sm:$0xf0]  ;;  %v3444_v44 = vld [vmem:[%s7467_s1 + $0x80] sm:$0xf] }
  0x1e   : > { %566 = vmatpush.bf16.msra.mxu0 %v3421_v16  ;;  %4838 = vmatpush.bf16.msra.mxu2 %v3421_v16  ;;  %v3453_v42 = vor.u32 %v4566_v39, %v3452_v38  ;;  %v4564_v45 = vld [vmem:[%s7467_s1 + $0x84] sm:$0xf0]  ;;  %v4561_v46 = vld [vmem:[%s7467_s1 + $0x74] sm:$0xf]  ;;  %v3438_v47 = vld [vmem:[%s7467_s1 + $0x78] sm:$0xf0]  ;;  %v3381_v52 = vor.u32 %v4548_v43, %v3380_v41 }
  0x1f   : > { %595 = vmatpush.bf16.msra.mxu1 %v3485_v17  ;;  %4846 = vmatpush.bf16.msra.mxu3 %v3485_v17  ;;  %v3564_v48 = vld [vmem:[%s7467_s1 + $0x170] sm:$0xf]  ;;  %v3332_v49 = vld [vmem:[%s5125_s12] sm:$0xf]  ;;  %v4536_v50 = vld [vmem:[%s5125_s12 + $0x8] sm:$0xf0]  ;;  %v3445_v58 = vor.u32 %v4564_v45, %v3444_v44  ;;  %v3441_v62 = vor.u32 %v4561_v46, %v3438_v47 }
  0x20   : > { %v4594_v51 = vld [vmem:[%s7467_s1 + $0x174] sm:$0xf0]  ;;  %v3356_v53 = vld [vmem:[%s5125_s12 + $0x30] sm:$0xf]  ;;  %v4542_v54 = vld [vmem:[%s5125_s12 + $0x38] sm:$0xf0]  ;;  %v5171_v3 = vor.u32 %v4536_v50, %v3332_v49 }
  0x21   : > { %v4535_v55 = vld [vmem:[%s5125_s12 + $0x4] sm:$0xf]  ;;  %v4577_v56 = vld [vmem:[%s7467_s1 + $0xf4] sm:$0xf]  ;;  %v3502_v57 = vld [vmem:[%s7467_s1 + $0xf8] sm:$0xf0]  ;;  %v3565_v63 = vor.u32 %v4594_v51, %v3564_v48  ;;  %v5173_v4 = vor.u32 %v4542_v54, %v3356_v53 }
  0x22   : > { %567 = vmatpush.bf16.msra.mxu0 %v3413_v22  ;;  %4839 = vmatpush.bf16.msra.mxu2 %v3413_v22  ;;  %v3334_v59 = vld [vmem:[%s5125_s12 + $0xc] sm:$0xf0]  ;;  %v4541_v60 = vld [vmem:[%s5125_s12 + $0x34] sm:$0xf]  ;;  %v3358_v61 = vld [vmem:[%s5125_s12 + $0x3c] sm:$0xf0]  ;;  %v3505_v10 = vor.u32 %v4577_v56, %v3502_v57 }
  0x23   : > { %596 = vmatpush.bf16.msra.mxu1 %v3477_v23  ;;  %4847 = vmatpush.bf16.msra.mxu3 %v3477_v23  ;;  %v4593_v0 = vld [vmem:[%s7467_s1 + $0x174] sm:$0xf]  ;;  %v3566_v1 = vld [vmem:[%s7467_s1 + $0x178] sm:$0xf0]  ;;  %v4559_v2 = vld [vmem:[%s7467_s1 + $0x64] sm:$0xf]  ;;  %v5184_v8 = vor.u32 %v4535_v55, %v3334_v59  ;;  %v5186_v9 = vor.u32 %v4541_v60, %v3358_v61 }
  0x24   : > { %v3430_v5 = vld [vmem:[%s7467_s1 + $0x68] sm:$0xf0]  ;;  %v3556_v6 = vld [vmem:[%s7467_s1 + $0x160] sm:$0xf]  ;;  %v4592_v7 = vld [vmem:[%s7467_s1 + $0x164] sm:$0xf0]  ;;  %v3569_v11 = vor.u32 %v4593_v0, %v3566_v1 }
  0x25   : > { %v4575_v12 = vld [vmem:[%s7467_s1 + $0xe4] sm:$0xf]  ;;  %v3494_v13 = vld [vmem:[%s7467_s1 + $0xe8] sm:$0xf0]  ;;  %v3433_v14 = vor.u32 %v4559_v2, %v3430_v5  ;;  %v3557_v15 = vor.u32 %v4592_v7, %v3556_v6  ;;  %v4557_v18 = vld [vmem:[%s7467_s1 + $0x54] sm:$0xf] }
  0x26   : > { %568 = vmatpush.bf16.msra.mxu0 %v3405_v28  ;;  %4840 = vmatpush.bf16.msra.mxu2 %v3405_v28  ;;  %v4591_v16 = vld [vmem:[%s7467_s1 + $0x164] sm:$0xf]  ;;  %v3558_v17 = vld [vmem:[%s7467_s1 + $0x168] sm:$0xf0]  ;;  %v3422_v19 = vld [vmem:[%s7467_s1 + $0x58] sm:$0xf0]  ;;  %v3497_v22 = vor.u32 %v4575_v12, %v3494_v13 }
  0x27   : > { %597 = vmatpush.bf16.msra.mxu1 %v3469_v29  ;;  %4848 = vmatpush.bf16.msra.mxu3 %v3469_v29  ;;  %v3548_v20 = vld [vmem:[%s7467_s1 + $0x150] sm:$0xf]  ;;  %v4590_v21 = vld [vmem:[%s7467_s1 + $0x154] sm:$0xf0]  ;;  %v3561_v23 = vor.u32 %v4591_v16, %v3558_v17  ;;  %v4573_v24 = vld [vmem:[%s7467_s1 + $0xd4] sm:$0xf]  ;;  %v3425_v26 = vor.u32 %v4557_v18, %v3422_v19 }
  0x28   : > { %v3486_v25 = vld [vmem:[%s7467_s1 + $0xd8] sm:$0xf0]  ;;  %v3549_v27 = vor.u32 %v4590_v21, %v3548_v20  ;;  %v4589_v28 = vld [vmem:[%s7467_s1 + $0x154] sm:$0xf]  ;;  %v4555_v30 = vld [vmem:[%s7467_s1 + $0x44] sm:$0xf] }
  0x29   : > { %v3550_v29 = vld [vmem:[%s7467_s1 + $0x158] sm:$0xf0]  ;;  %v3414_v31 = vld [vmem:[%s7467_s1 + $0x48] sm:$0xf0]  ;;  %v3540_v32 = vld [vmem:[%s7467_s1 + $0x140] sm:$0xf] }
  0x2a   : > { %569 = vmatpush.bf16.msra.mxu0 %v3397_v34  ;;  %4841 = vmatpush.bf16.msra.mxu2 %v3397_v34  ;;  %v4588_v33 = vld [vmem:[%s7467_s1 + $0x144] sm:$0xf0]  ;;  %v4571_v34 = vld [vmem:[%s7467_s1 + $0xc4] sm:$0xf]  ;;  %v3553_v36 = vor.u32 %v4589_v28, %v3550_v29  ;;  %v3478_v37 = vld [vmem:[%s7467_s1 + $0xc8] sm:$0xf0] }
  0x2b   : > { %598 = vmatpush.bf16.msra.mxu1 %v3461_v35  ;;  %4849 = vmatpush.bf16.msra.mxu3 %v3461_v35  ;;  %v3489_v35 = vor.u32 %v4573_v24, %v3486_v25  ;;  %v4587_v38 = vld [vmem:[%s7467_s1 + $0x144] sm:$0xf]  ;;  %v3542_v39 = vld [vmem:[%s7467_s1 + $0x148] sm:$0xf0]  ;;  %v3541_v41 = vor.u32 %v4588_v33, %v3540_v32  ;;  %v3368_v44 = vld [vmem:[%s5125_s12 + $0x48] sm:$0xf]  ;;  %v3481_v53 = vor.u32 %v4571_v34, %v3478_v37 }
  0x2c   : > { %v4539_v43 = vld [vmem:[%s5125_s12 + $0x20] sm:$0xf0]  ;;  %v4545_v45 = vld [vmem:[%s5125_s12 + $0x50] sm:$0xf0]  ;;  %v3406_v47 = vld [vmem:[%s7467_s1 + $0x38] sm:$0xf0]  ;;  %v3545_v54 = vor.u32 %v4587_v38, %v3542_v39 }
  0x2d   : > { %v4553_v46 = vld [vmem:[%s7467_s1 + $0x34] sm:$0xf]  ;;  %v3532_v48 = vld [vmem:[%s7467_s1 + $0x130] sm:$0xf]  ;;  %v4586_v49 = vld [vmem:[%s7467_s1 + $0x134] sm:$0xf0]  ;;  %v5289_v0 = vor.u32 %v4545_v45, %v3368_v44 }
  0x2e   : > { %570 = vmatpush.bf16.msra.mxu0 %v3389_v40  ;;  %4842 = vmatpush.bf16.msra.mxu2 %v3389_v40  ;;  %v3417_v40 = vor.u32 %v4555_v30, %v3414_v31  ;;  %v4538_v50 = vld [vmem:[%s5125_s12 + $0x1c] sm:$0xf]  ;;  %v3346_v51 = vld [vmem:[%s5125_s12 + $0x24] sm:$0xf0]  ;;  %v3370_v55 = vld [vmem:[%s5125_s12 + $0x54] sm:$0xf0]  ;;  %v3533_v59 = vor.u32 %v4586_v49, %v3532_v48 }
  0x2f   : > { %599 = vmatpush.bf16.msra.mxu1 %v3453_v42  ;;  %4850 = vmatpush.bf16.msra.mxu3 %v3453_v42  ;;  %v3344_v42 = vld [vmem:[%s5125_s12 + $0x18] sm:$0xf]  ;;  %v4569_v56 = vld [vmem:[%s7467_s1 + $0xb4] sm:$0xf]  ;;  %v3470_v57 = vld [vmem:[%s7467_s1 + $0xb8] sm:$0xf0]  ;;  %v5300_v6 = vor.u32 %v4538_v50, %v3346_v51 }
  0x30   : > { %v4585_v60 = vld [vmem:[%s7467_s1 + $0x134] sm:$0xf]  ;;  %v3534_v61 = vld [vmem:[%s7467_s1 + $0x138] sm:$0xf0]  ;;  %v3398_v1 = vld [vmem:[%s7467_s1 + $0x28] sm:$0xf0] }
  0x31   : > { %v3524_v2 = vld [vmem:[%s7467_s1 + $0x120] sm:$0xf]  ;;  %v4584_v5 = vld [vmem:[%s7467_s1 + $0x124] sm:$0xf0]  ;;  %v4567_v12 = vld [vmem:[%s7467_s1 + $0xa4] sm:$0xf] }
  0x32   : > { %571 = vmatpush.bf16.msra.mxu0 %v3381_v52  ;;  %4843 = vmatpush.bf16.msra.mxu2 %v3381_v52  ;;  %v4544_v52 = vld [vmem:[%s5125_s12 + $0x4c] sm:$0xf]  ;;  %v4583_v16 = vld [vmem:[%s7467_s1 + $0x124] sm:$0xf]  ;;  %v4549_v18 = vld [vmem:[%s7467_s1 + $0x14] sm:$0xf] }
  0x33   : > { %600 = vmatpush.bf16.msra.mxu1 %v3445_v58  ;;  %4851 = vmatpush.bf16.msra.mxu3 %v3445_v58  ;;  %v3409_v58 = vor.u32 %v4553_v46, %v3406_v47  ;;  %v5302_v7 = vor.u32 %v4544_v52, %v3370_v55  ;;  %v3462_v13 = vld [vmem:[%s7467_s1 + $0xa8] sm:$0xf0]  ;;  %v3390_v19 = vld [vmem:[%s7467_s1 + $0x18] sm:$0xf0]  ;;  %v3516_v20 = vld [vmem:[%s7467_s1 + $0x110] sm:$0xf] }
  0x34   : > { %v3526_v17 = vld [vmem:[%s7467_s1 + $0x128] sm:$0xf0]  ;;  %v4582_v21 = vld [vmem:[%s7467_s1 + $0x114] sm:$0xf0]  ;;  %v4565_v24 = vld [vmem:[%s7467_s1 + $0x94] sm:$0xf] }
  0x35   : > { %572 = vmatmul.bf16.vlgmr.msra.gmra.mxu0 %v5171_v3  ;;  %582 = vmatmul.bf16.vlgmr.msra.gmra.mxu2 %v5173_v4  ;;  %v3454_v25 = vld [vmem:[%s7467_s1 + $0x98] sm:$0xf0]  ;;  %v3517_v28 = vor.u32 %v4582_v21, %v3516_v20  ;;  %v4547_v30 = vld [vmem:[%s7467_s1 + $0x4] sm:$0xf]  ;;  %v3382_v31 = vld [vmem:[%s7467_s1 + $0x8] sm:$0xf0] }
  0x36   : > { %622 = vmatpush.bf16.msrb.mxu2 %v3565_v63  ;;  %601 = vmatmul.bf16.vlgmr.msra.gmra.mxu1 %v5184_v8  ;;  %v5287_v63 = vor.u32 %v4539_v43, %v3344_v42  ;;  %v3518_v29 = vld [vmem:[%s7467_s1 + $0x118] sm:$0xf0]  ;;  %v3508_v32 = vld [vmem:[%s7467_s1 + $0x100] sm:$0xf]  ;;  %v4580_v33 = vld [vmem:[%s7467_s1 + $0x104] sm:$0xf0]  ;;  %v3457_v38 = vor.u32 %v4565_v24, %v3454_v25  ;;  %v3385_v43 = vor.u32 %v4547_v30, %v3382_v31 }
  0x37   : > { %651 = vmatpush.bf16.msrb.mxu3 %v3441_v62  ;;  %680 = vmatpush.bf16.msrb.mxu0 %v3505_v10  ;;  %v4551_v62 = vld [vmem:[%s7467_s1 + $0x24] sm:$0xf]  ;;  %v3473_v10 = vor.u32 %v4569_v56, %v3470_v57  ;;  %v3740_v34 = vld [vmem:[%s7467_s1 + $0xf0] sm:$0xf]  ;;  %v4622_v37 = vld [vmem:[%s7467_s1 + $0x74] sm:$0xf0]  ;;  %v3509_v44 = vor.u32 %v4580_v33, %v3508_v32 }
  0x38   : > { %611 = vmatmul.bf16.vlgmr.msra.gmra.mxu3 %v5186_v9  ;;  %709 = vmatpush.bf16.msrb.mxu1 %v3569_v11  ;;  %v3537_v11 = vor.u32 %v4585_v60, %v3534_v61  ;;  %v4579_v42 = vld [vmem:[%s7467_s1 + $0x104] sm:$0xf]  ;;  %v3510_v45 = vld [vmem:[%s7467_s1 + $0x108] sm:$0xf0]  ;;  %v3340_v46 = vld [vmem:[%s5125_s12 + $0x8] sm:$0xf] }
  0x39   : > { %v3804_v47 = vld [vmem:[%s7467_s1 + $0x170] sm:$0xf]  ;;  %v4654_v50 = vld [vmem:[%s7467_s1 + $0x174] sm:$0xf0]  ;;  %v4621_v51 = vld [vmem:[%s7467_s1 + $0x74] sm:$0xf]  ;;  %v3513_v57 = vor.u32 %v4579_v42, %v3510_v45 }
  0x3a   : > { %623 = vmatpush.bf16.msrb.mxu2 %v3557_v15  ;;  %v3525_v15 = vor.u32 %v4584_v5, %v3524_v2  ;;  %v3678_v52 = vld [vmem:[%s7467_s1 + $0x78] sm:$0xf0]  ;;  %v4636_v55 = vld [vmem:[%s7467_s1 + $0xe4] sm:$0xf0]  ;;  %v3668_v60 = vld [vmem:[%s7467_s1 + $0x60] sm:$0xf] }
  0x3b   : > { %652 = vmatpush.bf16.msrb.mxu3 %v3433_v14  ;;  %681 = vmatpush.bf16.msrb.mxu0 %v3497_v22  ;;  %v3401_v14 = vor.u32 %v4551_v62, %v3398_v1  ;;  %v3465_v22 = vor.u32 %v4567_v12, %v3462_v13  ;;  %v4620_v61 = vld [vmem:[%s7467_s1 + $0x64] sm:$0xf0]  ;;  %v3796_v62 = vld [vmem:[%s7467_s1 + $0x160] sm:$0xf]  ;;  %v3724_v12 = vld [vmem:[%s7467_s1 + $0xd0] sm:$0xf] }
  0x3c   : > { %710 = vmatpush.bf16.msrb.mxu1 %v3561_v23  ;;  %v3529_v23 = vor.u32 %v4583_v16, %v3526_v17  ;;  %v4652_v5 = vld [vmem:[%s7467_s1 + $0x164] sm:$0xf0]  ;;  %v4634_v13 = vld [vmem:[%s7467_s1 + $0xd4] sm:$0xf0]  ;;  %v3660_v17 = vld [vmem:[%s7467_s1 + $0x50] sm:$0xf] }
  0x3d   : > { %v3725_v20 = vor.u32 %v4634_v13, %v3724_v12  ;;  %v4650_v21 = vld [vmem:[%s7467_s1 + $0x154] sm:$0xf0]  ;;  %v3716_v24 = vld [vmem:[%s7467_s1 + $0xc0] sm:$0xf]  ;;  %v4632_v25 = vld [vmem:[%s7467_s1 + $0xc4] sm:$0xf0] }
  0x3e   : > { %624 = vmatpush.bf16.msrb.mxu2 %v3549_v27  ;;  %v3393_v27 = vor.u32 %v4549_v18, %v3390_v19  ;;  %v4618_v18 = vld [vmem:[%s7467_s1 + $0x54] sm:$0xf0]  ;;  %v3788_v19 = vld [vmem:[%s7467_s1 + $0x150] sm:$0xf]  ;;  %v3717_v30 = vor.u32 %v4632_v25, %v3716_v24  ;;  %v4648_v31 = vld [vmem:[%s7467_s1 + $0x144] sm:$0xf0] }
  0x3f   : > { %653 = vmatpush.bf16.msrb.mxu3 %v3425_v26  ;;  %682 = vmatpush.bf16.msrb.mxu0 %v3489_v35  ;;  %v4581_v26 = vld [vmem:[%s7467_s1 + $0x114] sm:$0xf]  ;;  %v4638_v35 = vld [vmem:[%s7467_s1 + $0xf4] sm:$0xf0]  ;;  %v4615_v32 = vld [vmem:[%s7467_s1 + $0x44] sm:$0xf] }
  0x40   : > { %711 = vmatpush.bf16.msrb.mxu1 %v3553_v36  ;;  %v3676_v36 = vld [vmem:[%s7467_s1 + $0x70] sm:$0xf]  ;;  %v3521_v39 = vor.u32 %v4581_v26, %v3518_v29  ;;  %v3741_v48 = vor.u32 %v4638_v35, %v3740_v34  ;;  %v3661_v26 = vor.u32 %v4618_v18, %v3660_v17  ;;  %v3780_v29 = vld [vmem:[%s7467_s1 + $0x140] sm:$0xf]  ;;  %v3654_v33 = vld [vmem:[%s7467_s1 + $0x48] sm:$0xf0] }
  0x41   : > { %v3677_v49 = vor.u32 %v4622_v37, %v3676_v36  ;;  %v3708_v34 = vld [vmem:[%s7467_s1 + $0xb0] sm:$0xf]  ;;  %v4630_v35 = vld [vmem:[%s7467_s1 + $0xb4] sm:$0xf0]  ;;  %v3352_v37 = vld [vmem:[%s5125_s12 + $0x20] sm:$0xf] }
  0x42   : > { %625 = vmatpush.bf16.msrb.mxu2 %v3541_v41  ;;  %v3446_v41 = vld [vmem:[%s7467_s1 + $0x88] sm:$0xf0]  ;;  %v3772_v42 = vld [vmem:[%s7467_s1 + $0x130] sm:$0xf]  ;;  %v4613_v45 = vld [vmem:[%s7467_s1 + $0x34] sm:$0xf] }
  0x43   : > { %654 = vmatpush.bf16.msrb.mxu3 %v3417_v40  ;;  %683 = vmatpush.bf16.msrb.mxu0 %v3481_v53  ;;  %v4563_v40 = vld [vmem:[%s7467_s1 + $0x84] sm:$0xf]  ;;  %v4537_v53 = vld [vmem:[%s5125_s12 + $0x10] sm:$0xf0]  ;;  %v3756_v12 = vld [vmem:[%s7467_s1 + $0x110] sm:$0xf] }
  0x44   : > { %712 = vmatpush.bf16.msrb.mxu1 %v3545_v54  ;;  %v3732_v54 = vld [vmem:[%s7467_s1 + $0xe0] sm:$0xf]  ;;  %v3449_v56 = vor.u32 %v4563_v40, %v3446_v41  ;;  %v3341_v1 = vor.u32 %v4537_v53, %v3340_v46  ;;  %v3644_v40 = vld [vmem:[%s7467_s1 + $0x30] sm:$0xf]  ;;  %v4614_v41 = vld [vmem:[%s7467_s1 + $0x34] sm:$0xf0] }
  0x45   : > { %577 = vmatmul.bf16.gmra.mxu0 %v5287_v63  ;;  %587 = vmatmul.bf16.gmra.mxu2 %v5289_v0  ;;  %v3733_v2 = vor.u32 %v4636_v55, %v3732_v54  ;;  %v3646_v46 = vld [vmem:[%s7467_s1 + $0x38] sm:$0xf0]  ;;  %v3636_v53 = vld [vmem:[%s7467_s1 + $0x20] sm:$0xf]  ;;  %v4612_v54 = vld [vmem:[%s7467_s1 + $0x24] sm:$0xf0] }
  0x46   : > { %626 = vmatpush.bf16.msrb.mxu2 %v3533_v59  ;;  %606 = vmatmul.bf16.gmra.mxu1 %v5300_v6  ;;  %v3681_v59 = vor.u32 %v4621_v51, %v3678_v52  ;;  %v3649_v52 = vor.u32 %v4613_v45, %v3646_v46  ;;  %v4642_v13 = vld [vmem:[%s7467_s1 + $0x114] sm:$0xf0]  ;;  %v4609_v17 = vld [vmem:[%s7467_s1 + $0x14] sm:$0xf]  ;;  %v3630_v18 = vld [vmem:[%s7467_s1 + $0x18] sm:$0xf0] }
  0x47   : > { %655 = vmatpush.bf16.msrb.mxu3 %v3409_v58  ;;  %684 = vmatpush.bf16.msrb.mxu0 %v3473_v10  ;;  %v3805_v58 = vor.u32 %v4654_v50, %v3804_v47  ;;  %v4619_v10 = vld [vmem:[%s7467_s1 + $0x64] sm:$0xf]  ;;  %v4540_v47 = vld [vmem:[%s5125_s12 + $0x28] sm:$0xf0]  ;;  %v3645_v50 = vor.u32 %v4614_v41, %v3644_v40  ;;  %v4640_v25 = vld [vmem:[%s7467_s1 + $0x104] sm:$0xf0] }
  0x48   : > { %616 = vmatmul.bf16.gmra.mxu3 %v5302_v7  ;;  %713 = vmatpush.bf16.msrb.mxu1 %v3537_v11  ;;  %v3670_v11 = vld [vmem:[%s7467_s1 + $0x68] sm:$0xf0]  ;;  %v3353_v55 = vor.u32 %v4540_v47, %v3352_v37  ;;  %v3980_v40 = vld [vmem:[%s7467_s1 + $0xf0] sm:$0xf]  ;;  %v3908_v47 = vld [vmem:[%s7467_s1 + $0x60] sm:$0xf] }
  0x49   : > { %v3673_v16 = vor.u32 %v4619_v10, %v3670_v11 }
  0x4a   : > { %627 = vmatpush.bf16.msrb.mxu2 %v3525_v15  ;;  %v3797_v15 = vor.u32 %v4652_v5, %v3796_v62  ;;  %v4626_v62 = vld [vmem:[%s7467_s1 + $0x94] sm:$0xf0] }
  0x4b   : > { %656 = vmatpush.bf16.msrb.mxu3 %v3401_v14  ;;  %685 = vmatpush.bf16.msrb.mxu0 %v3465_v22  ;;  %v3669_v14 = vor.u32 %v4620_v61, %v3668_v60  ;;  %v4617_v22 = vld [vmem:[%s7467_s1 + $0x54] sm:$0xf]  ;;  %v3692_v61 = vld [vmem:[%s7467_s1 + $0x90] sm:$0xf]  ;;  %v4610_v5 = vld [vmem:[%s7467_s1 + $0x14] sm:$0xf0] }
  0x4c   : > { %714 = vmatpush.bf16.msrb.mxu1 %v3529_v23  ;;  %v3662_v23 = vld [vmem:[%s7467_s1 + $0x58] sm:$0xf0] }
  0x4e   : > { %628 = vmatpush.bf16.msrb.mxu2 %v3517_v28  ;;  %v3665_v28 = vor.u32 %v4617_v22, %v3662_v23  ;;  %v4608_v22 = vld [vmem:[%s7467_s1 + $0x4] sm:$0xf0]  ;;  %v3748_v23 = vld [vmem:[%s7467_s1 + $0x100] sm:$0xf] }
  0x4f   : > { %657 = vmatpush.bf16.msrb.mxu3 %v3393_v27  ;;  %686 = vmatpush.bf16.msrb.mxu0 %v3457_v38  ;;  %v3789_v27 = vor.u32 %v4650_v21, %v3788_v19  ;;  %v3781_v38 = vor.u32 %v4648_v31, %v3780_v29  ;;  %v3620_v21 = vld [vmem:[%s7467_s1] sm:$0xf]  ;;  %v4653_v31 = vld [vmem:[%s7467_s1 + $0x174] sm:$0xf] }
  0x50   : > { %715 = vmatpush.bf16.msrb.mxu1 %v3521_v39  ;;  %v3657_v39 = vor.u32 %v4615_v32, %v3654_v33  ;;  %v3621_v24 = vor.u32 %v4608_v22, %v3620_v21  ;;  %v3806_v32 = vld [vmem:[%s7467_s1 + $0x178] sm:$0xf0]  ;;  %v4637_v33 = vld [vmem:[%s7467_s1 + $0xf4] sm:$0xf] }
  0x52   : > { %629 = vmatpush.bf16.msrb.mxu2 %v3509_v44  ;;  %v4646_v44 = vld [vmem:[%s7467_s1 + $0x134] sm:$0xf0] }
  0x53   : > { %658 = vmatpush.bf16.msrb.mxu3 %v3385_v43  ;;  %687 = vmatpush.bf16.msrb.mxu0 %v3449_v56  ;;  %v3709_v43 = vor.u32 %v4630_v35, %v3708_v34  ;;  %v3773_v51 = vor.u32 %v4646_v44, %v3772_v42  ;;  %v3809_v34 = vor.u32 %v4653_v31, %v3806_v32  ;;  %v4682_v35 = vld [vmem:[%s7467_s1 + $0x74] sm:$0xf0]  ;;  %v3734_v44 = vld [vmem:[%s7467_s1 + $0xe8] sm:$0xf0] }
  0x54   : > { %716 = vmatpush.bf16.msrb.mxu1 %v3513_v57  ;;  %v3764_v57 = vld [vmem:[%s7467_s1 + $0x120] sm:$0xf]  ;;  %v4698_v42 = vld [vmem:[%s7467_s1 + $0xf4] sm:$0xf0] }
  0x55   : > { %630 = vmatmul.bf16.vlgmr.msrb.gmra.mxu2 %v3341_v1  ;;  %v3981_v45 = vor.u32 %v4698_v42, %v3980_v40  ;;  %v4598_v40 = vld [vmem:[%s5125_s12 + $0x7c] sm:$0xf] }
  0x56   : > { %1170 = vmatpush.bf16.msra.mxu2 %v3677_v49  ;;  %688 = vmatmul.bf16.vlgmr.msrb.gmra.mxu0 %v5184_v8  ;;  %v4616_v8 = vld [vmem:[%s7467_s1 + $0x44] sm:$0xf0] }
  0x57   : > { %1199 = vmatpush.bf16.msra.mxu3 %v3741_v48  ;;  %1228 = vmatpush.bf16.msra.mxu0 %v3805_v58  ;;  %v3700_v48 = vld [vmem:[%s7467_s1 + $0xa0] sm:$0xf]  ;;  %v4628_v49 = vld [vmem:[%s7467_s1 + $0xa4] sm:$0xf0] }
  0x58   : > { %1257 = vmatpush.bf16.msra.mxu1 %v3681_v59  ;;  %659 = vmatmul.bf16.vlgmr.msrb.gmra.mxu3 %v5171_v3  ;;  %v3652_v3 = vld [vmem:[%s7467_s1 + $0x40] sm:$0xf]  ;;  %v3701_v56 = vor.u32 %v4628_v49, %v3700_v48  ;;  %v4644_v58 = vld [vmem:[%s7467_s1 + $0x124] sm:$0xf0]  ;;  %v3637_v59 = vor.u32 %v4612_v54, %v3636_v53  ;;  %v4649_v53 = vld [vmem:[%s7467_s1 + $0x154] sm:$0xf] }
  0x59   : > { %717 = vmatmul.bf16.vlgmr.msrb.gmra.mxu1 %v3341_v1  ;;  %v3653_v36 = vor.u32 %v4616_v8, %v3652_v3  ;;  %v3765_v60 = vor.u32 %v4644_v58, %v3764_v57  ;;  %v4611_v1 = vld [vmem:[%s7467_s1 + $0x24] sm:$0xf]  ;;  %v3364_v3 = vld [vmem:[%s5125_s12 + $0x38] sm:$0xf]  ;;  %v4680_v48 = vld [vmem:[%s7467_s1 + $0x64] sm:$0xf0] }
  0x5a   : > { %1171 = vmatpush.bf16.msra.mxu2 %v3669_v14  ;;  %v3684_v14 = vld [vmem:[%s7467_s1 + $0x80] sm:$0xf]  ;;  %v4543_v8 = vld [vmem:[%s5125_s12 + $0x40] sm:$0xf0]  ;;  %v3909_v49 = vor.u32 %v4680_v48, %v3908_v47  ;;  %v3790_v54 = vld [vmem:[%s7467_s1 + $0x158] sm:$0xf0] }
  0x5b   : > { %1200 = vmatpush.bf16.msra.mxu3 %v3733_v2  ;;  %1229 = vmatpush.bf16.msra.mxu0 %v3797_v15  ;;  %v3693_v2 = vor.u32 %v4626_v62, %v3692_v61  ;;  %v3757_v15 = vor.u32 %v4642_v13, %v3756_v12  ;;  %v3726_v57 = vld [vmem:[%s7467_s1 + $0xd8] sm:$0xf0]  ;;  %v4678_v61 = vld [vmem:[%s7467_s1 + $0x54] sm:$0xf0]  ;;  %v4647_v62 = vld [vmem:[%s7467_s1 + $0x144] sm:$0xf] }
  0x5c   : > { %1258 = vmatpush.bf16.msra.mxu1 %v3673_v16  ;;  %v4624_v16 = vld [vmem:[%s7467_s1 + $0x84] sm:$0xf0]  ;;  %v3718_v12 = vld [vmem:[%s7467_s1 + $0xc8] sm:$0xf0] }
  0x5d   : > { %v3685_v19 = vor.u32 %v4624_v16, %v3684_v14  ;;  %v3572_v14 = vld [vmem:[%s5125_s12 + $0x60] sm:$0xf]  ;;  %v4595_v16 = vld [vmem:[%s5125_s12 + $0x64] sm:$0xf]  ;;  %v4600_v47 = vld [vmem:[%s5125_s12 + $0x88] sm:$0xf0] }
  0x5e   : > { %1172 = vmatpush.bf16.msra.mxu2 %v3661_v26  ;;  %v4607_v26 = vld [vmem:[%s7467_s1 + $0x4] sm:$0xf] }
  0x5f   : > { %1201 = vmatpush.bf16.msra.mxu3 %v3725_v20  ;;  %1230 = vmatpush.bf16.msra.mxu0 %v3789_v27  ;;  %v3633_v20 = vor.u32 %v4609_v17, %v3630_v18  ;;  %v3622_v27 = vld [vmem:[%s7467_s1 + $0x8] sm:$0xf0]  ;;  %v3574_v17 = vld [vmem:[%s5125_s12 + $0x6c] sm:$0xf0]  ;;  %v3580_v18 = vld [vmem:[%s5125_s12 + $0x68] sm:$0xf] }
  0x60   : > { %1259 = vmatpush.bf16.msra.mxu1 %v3665_v28  ;;  %v3749_v28 = vor.u32 %v4640_v25, %v3748_v23  ;;  %v3625_v29 = vor.u32 %v4607_v26, %v3622_v27  ;;  %v5666_v21 = vor.u32 %v4595_v16, %v3574_v17  ;;  %v3892_v23 = vld [vmem:[%s7467_s1 + $0x40] sm:$0xf]  ;;  %v4645_v26 = vld [vmem:[%s7467_s1 + $0x134] sm:$0xf]  ;;  %v3774_v27 = vld [vmem:[%s7467_s1 + $0x138] sm:$0xf0] }
  0x61   : > { %v4623_v16 = vld [vmem:[%s7467_s1 + $0x84] sm:$0xf]  ;;  %v3686_v17 = vld [vmem:[%s7467_s1 + $0x88] sm:$0xf0] }
  0x62   : > { %1173 = vmatpush.bf16.msra.mxu2 %v3653_v36 }
  0x63   : > { %1202 = vmatpush.bf16.msra.mxu3 %v3717_v30  ;;  %1231 = vmatpush.bf16.msra.mxu0 %v3781_v38  ;;  %v3365_v30 = vor.u32 %v4543_v8, %v3364_v3  ;;  %v4651_v38 = vld [vmem:[%s7467_s1 + $0x164] sm:$0xf]  ;;  %v3777_v3 = vor.u32 %v4645_v26, %v3774_v27  ;;  %v4692_v8 = vld [vmem:[%s7467_s1 + $0xc4] sm:$0xf0]  ;;  %v3924_v27 = vld [vmem:[%s7467_s1 + $0x80] sm:$0xf] }
  0x64   : > { %1260 = vmatpush.bf16.msra.mxu1 %v3657_v39  ;;  %v3798_v39 = vld [vmem:[%s7467_s1 + $0x168] sm:$0xf0]  ;;  %v4668_v26 = vld [vmem:[%s7467_s1 + $0x4] sm:$0xf0] }
  0x65   : > { %635 = vmatmul.bf16.gmra.mxu2 %v3353_v55  ;;  %v3801_v41 = vor.u32 %v4651_v38, %v3798_v39  ;;  %v3948_v38 = vld [vmem:[%s7467_s1 + $0xb0] sm:$0xf]  ;;  %v4690_v39 = vld [vmem:[%s7467_s1 + $0xb4] sm:$0xf0] }
  0x66   : > { %1174 = vmatpush.bf16.msra.mxu2 %v3645_v50  ;;  %693 = vmatmul.bf16.gmra.mxu0 %v5300_v6  ;;  %v3628_v6 = vld [vmem:[%s7467_s1 + $0x10] sm:$0xf]  ;;  %v3949_v42 = vor.u32 %v4690_v39, %v3948_v38 }
  0x67   : > { %1203 = vmatpush.bf16.msra.mxu3 %v3709_v43  ;;  %1232 = vmatpush.bf16.msra.mxu0 %v3773_v51  ;;  %v3629_v11 = vor.u32 %v4610_v5, %v3628_v6  ;;  %v4635_v43 = vld [vmem:[%s7467_s1 + $0xe4] sm:$0xf]  ;;  %v3376_v50 = vld [vmem:[%s5125_s12 + $0x50] sm:$0xf]  ;;  %v4546_v51 = vld [vmem:[%s5125_s12 + $0x58] sm:$0xf0] }
  0x68   : > { %1261 = vmatpush.bf16.msra.mxu1 %v3649_v52  ;;  %664 = vmatmul.bf16.gmra.mxu3 %v5287_v63  ;;  %v3638_v63 = vld [vmem:[%s7467_s1 + $0x28] sm:$0xf0]  ;;  %v3737_v46 = vor.u32 %v4635_v43, %v3734_v44  ;;  %v3377_v52 = vor.u32 %v4546_v51, %v3376_v50  ;;  %v4694_v6 = vld [vmem:[%s7467_s1 + $0xd4] sm:$0xf0]  ;;  %v4627_v43 = vld [vmem:[%s7467_s1 + $0xa4] sm:$0xf] }
  0x69   : > { %722 = vmatmul.bf16.gmra.mxu1 %v3353_v55  ;;  %v3641_v10 = vor.u32 %v4611_v1, %v3638_v63  ;;  %v3972_v55 = vld [vmem:[%s7467_s1 + $0xe0] sm:$0xf]  ;;  %v3964_v63 = vld [vmem:[%s7467_s1 + $0xd0] sm:$0xf]  ;;  %v3702_v44 = vld [vmem:[%s7467_s1 + $0xa8] sm:$0xf0] }
  0x6a   : > { %1175 = vmatpush.bf16.msra.mxu2 %v3637_v59  ;;  %v3705_v48 = vor.u32 %v4627_v43, %v3702_v44  ;;  %v4604_v43 = vld [vmem:[%s5125_s12 + $0xac] sm:$0xf]  ;;  %v3610_v44 = vld [vmem:[%s5125_s12 + $0xb4] sm:$0xf0] }
  0x6b   : > { %1204 = vmatpush.bf16.msra.mxu3 %v3701_v56  ;;  %1233 = vmatpush.bf16.msra.mxu0 %v3765_v60  ;;  %v3793_v56 = vor.u32 %v4649_v53, %v3790_v54  ;;  %v3900_v60 = vld [vmem:[%s7467_s1 + $0x50] sm:$0xf]  ;;  %v4672_v53 = vld [vmem:[%s7467_s1 + $0x24] sm:$0xf0] }
  0x6c   : > { %1262 = vmatpush.bf16.msra.mxu1 %v3641_v10  ;;  %v3901_v1 = vor.u32 %v4678_v61, %v3900_v60  ;;  %v3965_v10 = vor.u32 %v4694_v6, %v3964_v63  ;;  %v4670_v63 = vld [vmem:[%s7467_s1 + $0x14] sm:$0xf0]  ;;  %v4639_v6 = vld [vmem:[%s7467_s1 + $0x104] sm:$0xf] }
  0x6e   : > { %1176 = vmatpush.bf16.msra.mxu2 %v3629_v11  ;;  %v4631_v11 = vld [vmem:[%s7467_s1 + $0xc4] sm:$0xf] }
  0x6f   : > { %1205 = vmatpush.bf16.msra.mxu3 %v3693_v2  ;;  %1234 = vmatpush.bf16.msra.mxu0 %v3757_v15  ;;  %v3782_v2 = vld [vmem:[%s7467_s1 + $0x148] sm:$0xf0]  ;;  %v3721_v13 = vor.u32 %v4631_v11, %v3718_v12  ;;  %v3932_v11 = vld [vmem:[%s7467_s1 + $0x90] sm:$0xf]  ;;  %v4686_v12 = vld [vmem:[%s7467_s1 + $0x94] sm:$0xf0] }
  0x70   : > { %1263 = vmatpush.bf16.msra.mxu1 %v3633_v20  ;;  %v3785_v5 = vor.u32 %v4647_v62, %v3782_v2  ;;  %v4596_v15 = vld [vmem:[%s5125_s12 + $0x68] sm:$0xf0]  ;;  %v3596_v62 = vld [vmem:[%s5125_s12 + $0x90] sm:$0xf] }
  0x71   : > { %v3573_v20 = vor.u32 %v4596_v15, %v3572_v14  ;;  %v3868_v2 = vld [vmem:[%s7467_s1 + $0x10] sm:$0xf]  ;;  %v3933_v15 = vor.u32 %v4686_v12, %v3932_v11  ;;  %v4695_v12 = vld [vmem:[%s7467_s1 + $0xe4] sm:$0xf] }
  0x72   : > { %1177 = vmatpush.bf16.msra.mxu2 %v3621_v24  ;;  %v4676_v24 = vld [vmem:[%s7467_s1 + $0x44] sm:$0xf0] }
  0x73   : > { %1206 = vmatpush.bf16.msra.mxu3 %v3685_v19  ;;  %1235 = vmatpush.bf16.msra.mxu0 %v3749_v28  ;;  %v4597_v19 = vld [vmem:[%s5125_s12 + $0x70] sm:$0xf0]  ;;  %v3893_v25 = vor.u32 %v4676_v24, %v3892_v23  ;;  %v3956_v28 = vld [vmem:[%s7467_s1 + $0xc0] sm:$0xf]  ;;  %v3689_v23 = vor.u32 %v4623_v16, %v3686_v17  ;;  %v3902_v17 = vld [vmem:[%s7467_s1 + $0x58] sm:$0xf0] }
  0x74   : > { %1264 = vmatpush.bf16.msra.mxu1 %v3625_v29  ;;  %v5668_v22 = vor.u32 %v4597_v19, %v3580_v18  ;;  %v4629_v29 = vld [vmem:[%s7467_s1 + $0xb4] sm:$0xf]  ;;  %v3957_v31 = vor.u32 %v4692_v8, %v3956_v28  ;;  %v3598_v18 = vld [vmem:[%s5125_s12 + $0x9c] sm:$0xf0]  ;;  %v3604_v19 = vld [vmem:[%s5125_s12 + $0x98] sm:$0xf] }
  0x75   : > { %640 = vmatmul.bf16.gmra.mxu2 %v3365_v30 }
  0x76   : > { %698 = vmatmul.bf16.gmra.mxu0 %v5186_v9  ;;  %v3916_v9 = vld [vmem:[%s7467_s1 + $0x70] sm:$0xf] }
  0x77   : > { %v3917_v37 = vor.u32 %v4682_v35, %v3916_v9  ;;  %1315 = vmatpush.bf16.msrb.mxu3 %v3809_v34  ;;  %v4599_v34 = vld [vmem:[%s5125_s12 + $0x80] sm:$0xf0]  ;;  %v4674_v9 = vld [vmem:[%s7467_s1 + $0x34] sm:$0xf0] }
  0x78   : > { %669 = vmatmul.bf16.gmra.mxu3 %v5173_v4  ;;  %v3742_v4 = vld [vmem:[%s7467_s1 + $0xf8] sm:$0xf0]  ;;  %1805 = vmatpush.bf16.msrb.mxu1 %v3981_v45  ;;  %v4643_v35 = vld [vmem:[%s7467_s1 + $0x124] sm:$0xf]  ;;  %v3586_v45 = vld [vmem:[%s5125_s12 + $0x84] sm:$0xf0] }
  0x79   : > { %727 = vmatmul.bf16.gmra.mxu1 %v3365_v30  ;;  %v3745_v36 = vor.u32 %v4637_v33, %v3742_v4  ;;  %1776 = vmatpush.bf16.msrb.mxu0 %v3917_v37  ;;  %v3710_v30 = vld [vmem:[%s7467_s1 + $0xb8] sm:$0xf0]  ;;  %v3584_v33 = vld [vmem:[%s5125_s12 + $0x78] sm:$0xf]  ;;  %v3884_v4 = vld [vmem:[%s7467_s1 + $0x30] sm:$0xf]  ;;  %v5726_v50 = vor.u32 %v4598_v40, %v3586_v45 }
  0x7a   : > { %v3713_v32 = vor.u32 %v4629_v29, %v3710_v30  ;;  %v3766_v37 = vld [vmem:[%s7467_s1 + $0x128] sm:$0xf0]  ;;  %v4684_v30 = vld [vmem:[%s7467_s1 + $0x84] sm:$0xf0]  ;;  %v3616_v45 = vld [vmem:[%s5125_s12 + $0xb0] sm:$0xf] }
  0x7b   : > { %1286 = vmatpush.bf16.msrb.mxu2 %v3745_v36  ;;  %1316 = vmatpush.bf16.msrb.mxu3 %v3801_v41  ;;  %v3885_v36 = vor.u32 %v4674_v9, %v3884_v4  ;;  %v3769_v41 = vor.u32 %v4643_v35, %v3766_v37  ;;  %v4044_v4 = vld [vmem:[%s7467_s1 + $0x170] sm:$0xf] }
  0x7d   : > { %1777 = vmatpush.bf16.msrb.mxu0 %v3909_v49  ;;  %v3585_v49 = vor.u32 %v4599_v34, %v3584_v33  ;;  %v4681_v33 = vld [vmem:[%s7467_s1 + $0x74] sm:$0xf]  ;;  %v3918_v34 = vld [vmem:[%s7467_s1 + $0x78] sm:$0xf0] }
  0x7e   : > { %v3921_v35 = vor.u32 %v4681_v33, %v3918_v34  ;;  %v3814_v33 = vld [vmem:[%s5125_s12 + $0xcc] sm:$0xf0] }
  0x7f   : > { %1287 = vmatpush.bf16.msrb.mxu2 %v3737_v46  ;;  %1317 = vmatpush.bf16.msrb.mxu3 %v3793_v56  ;;  %v3592_v46 = vld [vmem:[%s5125_s12 + $0x80] sm:$0xf]  ;;  %v3758_v56 = vld [vmem:[%s7467_s1 + $0x118] sm:$0xf0] }
  0x80   : > { %v5728_v51 = vor.u32 %v4600_v47, %v3592_v46  ;;  %v4606_v46 = vld [vmem:[%s5125_s12 + $0xb8] sm:$0xf0] }
  0x81   : > { %1778 = vmatpush.bf16.msrb.mxu0 %v3901_v1  ;;  %v4602_v1 = vld [vmem:[%s5125_s12 + $0x98] sm:$0xf0] }
  0x82   : > { %v3597_v24 = vor.u32 %v4602_v1, %v3596_v62  ;;  %v4036_v1 = vld [vmem:[%s7467_s1 + $0x160] sm:$0xf] }
  0x83   : > { %1318 = vmatpush.bf16.msrb.mxu3 %v3785_v5  ;;  %v3869_v5 = vor.u32 %v4670_v63, %v3868_v2  ;;  %v4712_v2 = vld [vmem:[%s7467_s1 + $0x164] sm:$0xf0] }
  0x84   : > { %v4037_v63 = vor.u32 %v4712_v2, %v4036_v1  ;;  %v4691_v2 = vld [vmem:[%s7467_s1 + $0xc4] sm:$0xf] }
  0x85   : > { %645 = vmatmul.bf16.gmra.mxu2 %v3377_v52  ;;  %1779 = vmatpush.bf16.msrb.mxu0 %v3893_v25  ;;  %v3860_v25 = vld [vmem:[%s7467_s1] sm:$0xf] }
  0x86   : > { %703 = vmatmul.bf16.gmra.mxu0 %v5302_v7  ;;  %v4633_v7 = vld [vmem:[%s7467_s1 + $0xd4] sm:$0xf]  ;;  %v3861_v29 = vor.u32 %v4668_v26, %v3860_v25  ;;  %v4710_v25 = vld [vmem:[%s7467_s1 + $0x154] sm:$0xf0] }
  0x87   : > { %v3729_v59 = vor.u32 %v4633_v7, %v3726_v57  ;;  %1319 = vmatpush.bf16.msrb.mxu3 %v3777_v3  ;;  %v4688_v57 = vld [vmem:[%s7467_s1 + $0xa4] sm:$0xf0] }
  0x88   : > { %674 = vmatmul.bf16.gmra.mxu3 %v5289_v0  ;;  %v4696_v0 = vld [vmem:[%s7467_s1 + $0xe4] sm:$0xf0] }
  0x89   : > { %732 = vmatmul.bf16.gmra.mxu1 %v3377_v52  ;;  %v3973_v58 = vor.u32 %v4696_v0, %v3972_v55  ;;  %1288 = vmatpush.bf16.msrb.mxu2 %v3729_v59  ;;  %v3876_v52 = vld [vmem:[%s7467_s1 + $0x20] sm:$0xf]  ;;  %v4641_v55 = vld [vmem:[%s7467_s1 + $0x114] sm:$0xf]  ;;  %v3694_v59 = vld [vmem:[%s7467_s1 + $0x98] sm:$0xf0] }
  0x8a   : > { %1780 = vmatpush.bf16.msrb.mxu0 %v3885_v36  ;;  %v3877_v54 = vor.u32 %v4672_v53, %v3876_v52  ;;  %v3940_v0 = vld [vmem:[%s7467_s1 + $0xa0] sm:$0xf]  ;;  %v3761_v7 = vor.u32 %v4641_v55, %v3758_v56  ;;  %v4714_v36 = vld [vmem:[%s7467_s1 + $0x174] sm:$0xf0]  ;;  %v5840_v53 = vor.u32 %v4604_v43, %v3610_v44  ;;  %v4697_v55 = vld [vmem:[%s7467_s1 + $0xf4] sm:$0xf] }
  0x8b   : > { %1806 = vmatpush.bf16.msrb.mxu1 %v3973_v58  ;;  %1320 = vmatpush.bf16.msrb.mxu3 %v3769_v41  ;;  %v4625_v58 = vld [vmem:[%s7467_s1 + $0x94] sm:$0xf]  ;;  %v3941_v60 = vor.u32 %v4688_v57, %v3940_v0  ;;  %v4045_v38 = vor.u32 %v4714_v36, %v4044_v4  ;;  %v3608_v41 = vld [vmem:[%s5125_s12 + $0xa8] sm:$0xf]  ;;  %v3982_v56 = vld [vmem:[%s7467_s1 + $0xf8] sm:$0xf0] }
  0x8c   : > { %v3697_v61 = vor.u32 %v4625_v58, %v3694_v59  ;;  %v4679_v0 = vld [vmem:[%s7467_s1 + $0x64] sm:$0xf]  ;;  %v3985_v57 = vor.u32 %v4697_v55, %v3982_v56  ;;  %v3910_v58 = vld [vmem:[%s7467_s1 + $0x68] sm:$0xf0]  ;;  %v4713_v59 = vld [vmem:[%s7467_s1 + $0x174] sm:$0xf] }
  0x8d   : > { %1289 = vmatpush.bf16.msrb.mxu2 %v3721_v13  ;;  %v4601_v13 = vld [vmem:[%s5125_s12 + $0x94] sm:$0xf] }
  0x8e   : > { %1781 = vmatpush.bf16.msrb.mxu0 %v3877_v54  ;;  %v5797_v3 = vor.u32 %v4601_v13, %v3598_v18  ;;  %v5842_v54 = vor.u32 %v4606_v46, %v3616_v45  ;;  %v3974_v13 = vld [vmem:[%s7467_s1 + $0xe8] sm:$0xf0]  ;;  %v4711_v18 = vld [vmem:[%s7467_s1 + $0x164] sm:$0xf]  ;;  %v4693_v36 = vld [vmem:[%s7467_s1 + $0xd4] sm:$0xf] }
  0x8f   : > { %1807 = vmatpush.bf16.msrb.mxu1 %v3965_v10  ;;  %1321 = vmatpush.bf16.msrb.mxu3 %v3761_v7  ;;  %v3750_v10 = vld [vmem:[%s7467_s1 + $0x108] sm:$0xf0]  ;;  %v3977_v16 = vor.u32 %v4695_v12, %v3974_v13  ;;  %v4709_v46 = vld [vmem:[%s7467_s1 + $0x154] sm:$0xf] }
  0x90   : > { %v3753_v14 = vor.u32 %v4639_v6, %v3750_v10  ;;  %v3894_v45 = vld [vmem:[%s7467_s1 + $0x48] sm:$0xf0] }
  0x91   : > { %1290 = vmatpush.bf16.msrb.mxu2 %v3713_v32  ;;  %v3925_v32 = vor.u32 %v4684_v30, %v3924_v27  ;;  %v3812_v27 = vld [vmem:[%s5125_s12 + $0xc0] sm:$0xf] }
  0x92   : > { %1782 = vmatpush.bf16.msrb.mxu0 %v3869_v5 }
  0x93   : > { %1808 = vmatpush.bf16.msrb.mxu1 %v3957_v31  ;;  %1322 = vmatpush.bf16.msrb.mxu3 %v3753_v14  ;;  %v4677_v14 = vld [vmem:[%s7467_s1 + $0x54] sm:$0xf] }
  0x95   : > { %1178 = vmatmul.bf16.vlgmr.msra.gmra.mxu2 %v3573_v20 }
  0x96   : > { %1236 = vmatmul.bf16.vlgmr.msra.gmra.mxu0 %v5668_v22  ;;  %1291 = vmatpush.bf16.msrb.mxu2 %v3705_v48 }
  0x97   : > { %1809 = vmatpush.bf16.msrb.mxu1 %v3949_v42  ;;  %1783 = vmatpush.bf16.msrb.mxu0 %v3861_v29  ;;  %v4605_v42 = vld [vmem:[%s5125_s12 + $0xb0] sm:$0xf0]  ;;  %v4656_v29 = vld [vmem:[%s5125_s12 + $0xc8] sm:$0xf0] }
  0x98   : > { %1207 = vmatmul.bf16.vlgmr.msra.gmra.mxu3 %v5666_v21 }
  0x99   : > { %1265 = vmatmul.bf16.vlgmr.msra.gmra.mxu1 %v3573_v20  ;;  %v4603_v20 = vld [vmem:[%s5125_s12 + $0xa0] sm:$0xf0]  ;;  %1863 = vmatpush.bf16.msra.mxu3 %v3921_v35  ;;  %v5908_v35 = vor.u32 %v4656_v29, %v3812_v27  ;;  %v751_v27 = vld [vmem:[%s7469_s3 + $0x8] sm:$0xff] }
  0x9a   : > { %1292 = vmatpush.bf16.msrb.mxu2 %v3697_v61  ;;  %v5799_v8 = vor.u32 %v4603_v20, %v3604_v19  ;;  %v3913_v61 = vor.u32 %v4679_v0, %v3910_v58  ;;  %v4038_v19 = vld [vmem:[%s7467_s1 + $0x168] sm:$0xf0]  ;;  %v3905_v20 = vor.u32 %v4677_v14, %v3902_v17  ;;  %v4708_v58 = vld [vmem:[%s7467_s1 + $0x144] sm:$0xf0]  ;;  %v3886_v14 = vld [vmem:[%s7467_s1 + $0x38] sm:$0xf0] }
  0x9b   : > { %1810 = vmatpush.bf16.msrb.mxu1 %v3941_v60  ;;  %v4046_v60 = vld [vmem:[%s7467_s1 + $0x178] sm:$0xf0]  ;;  %1892 = vmatpush.bf16.msra.mxu0 %v3985_v57  ;;  %v4020_v57 = vld [vmem:[%s7467_s1 + $0x140] sm:$0xf]  ;;  %v4022_v17 = vld [vmem:[%s7467_s1 + $0x148] sm:$0xf0] }
  0x9c   : > { %v4049_v62 = vor.u32 %v4713_v59, %v4046_v60  ;;  %v4021_v59 = vor.u32 %v4708_v58, %v4020_v57 }
  0x9d   : > { %1864 = vmatpush.bf16.msra.mxu3 %v3913_v61 }
  0x9e   : > { %1293 = vmatpush.bf16.msrb.mxu2 %v3689_v23  ;;  %v4041_v23 = vor.u32 %v4711_v18, %v4038_v19 }
  0x9f   : > { %1811 = vmatpush.bf16.msrb.mxu1 %v3933_v15  ;;  %1893 = vmatpush.bf16.msra.mxu0 %v3977_v16  ;;  %v4707_v16 = vld [vmem:[%s7467_s1 + $0x144] sm:$0xf] }
  0xa1   : > { %1865 = vmatpush.bf16.msra.mxu3 %v3905_v20 }
  0xa2   : > { %1834 = vmatpush.bf16.msra.mxu2 %v4045_v38  ;;  %v3966_v38 = vld [vmem:[%s7467_s1 + $0xd8] sm:$0xf0] }
  0xa3   : > { %1812 = vmatpush.bf16.msrb.mxu1 %v3925_v32  ;;  %v4655_v32 = vld [vmem:[%s5125_s12 + $0xc4] sm:$0xf]  ;;  %v3969_v44 = vor.u32 %v4693_v36, %v3966_v38 }
  0xa4   : > { %v5919_v43 = vor.u32 %v4655_v32, %v3814_v33  ;;  %v3824_v33 = vld [vmem:[%s5125_s12 + $0xd8] sm:$0xf] }
  0xa5   : > { %1183 = vmatmul.bf16.gmra.mxu2 %v3585_v49  ;;  %1894 = vmatpush.bf16.msra.mxu0 %v3969_v44  ;;  %v3826_v44 = vld [vmem:[%s5125_s12 + $0xe4] sm:$0xf0] }
  0xa6   : > { %1241 = vmatmul.bf16.gmra.mxu0 %v5728_v51  ;;  %1835 = vmatpush.bf16.msra.mxu2 %v4037_v63  ;;  %v3958_v63 = vld [vmem:[%s7467_s1 + $0xc8] sm:$0xf0] }
  0xa7   : > { %1921 = vmatpush.bf16.msra.mxu1 %v4049_v62  ;;  %v742_v62 = vld [vmem:[%s7468_s2] sm:$0xff]  ;;  %v3961_v13 = vor.u32 %v4691_v2, %v3958_v63  ;;  %v4704_v63 = vld [vmem:[%s7467_s1 + $0x124] sm:$0xf0] }
  0xa8   : > { %1212 = vmatmul.bf16.gmra.mxu3 %v5726_v50  ;;  %v4004_v2 = vld [vmem:[%s7467_s1 + $0x120] sm:$0xf] }
  0xa9   : > { %1270 = vmatmul.bf16.gmra.mxu1 %v3585_v49  ;;  %v3609_v49 = vor.u32 %v4605_v42, %v3608_v41  ;;  %v4675_v41 = vld [vmem:[%s7467_s1 + $0x44] sm:$0xf]  ;;  %1895 = vmatpush.bf16.msra.mxu0 %v3961_v13  ;;  %v4005_v13 = vor.u32 %v4704_v63, %v4004_v2  ;;  %v4662_v2 = vld [vmem:[%s5125_s12 + $0xf8] sm:$0xf0] }
  0xaa   : > { %v3897_v56 = vor.u32 %v4675_v41, %v3894_v45  ;;  %v744_v41 = vld [vmem:[%s7468_s2 + $0x10] sm:$0xff] }
  0xab   : > { %1922 = vmatpush.bf16.msra.mxu1 %v4041_v23  ;;  %v4025_v23 = vor.u32 %v4707_v16, %v4022_v17 }
  0xac   : > { %1866 = vmatpush.bf16.msra.mxu3 %v3897_v56  ;;  %v4689_v56 = vld [vmem:[%s7467_s1 + $0xb4] sm:$0xf] }
  0xb2   : > { %v5795_v28 = vpop.f32.mrf.mxu0 }
  0xb3   : > { %v5804_v31 = vpop.f32.mrf.mxu1 }
  0xb4   : > { %v603_v60 = vadd.f32 %v5804_v31, %v5795_v28  ;;  %v743_v28 = vld [vmem:[%s7468_s2 + $0x8] sm:$0xff] }
  0xb5   : > { %1188 = vmatmul.bf16.gmra.mxu2 %v3597_v24 }
  0xb6   : > { %1246 = vmatmul.bf16.gmra.mxu0 %v5799_v8 }
  0xb8   : > { %1217 = vmatmul.bf16.gmra.mxu3 %v5797_v3  ;;  %v5817_v9 = vpop.f32.mrf.mxu2 }
  0xb9   : > { %1275 = vmatmul.bf16.gmra.mxu1 %v3597_v24  ;;  %v4028_v24 = vld [vmem:[%s7467_s1 + $0x150] sm:$0xf] }
  0xba   : > { %v5824_v39 = vpop.f32.mrf.mxu0  ;;  %v4029_v26 = vor.u32 %v4710_v25, %v4028_v24  ;;  %v4012_v24 = vld [vmem:[%s7467_s1 + $0x130] sm:$0xf]  ;;  %v4706_v25 = vld [vmem:[%s7467_s1 + $0x134] sm:$0xf0] }
  0xbb   : > { %v5822_v37 = vpop.f32.mrf.mxu3  ;;  %v5826_v40 = vpop.f32.mrf.mxu1  ;;  %v4013_v29 = vor.u32 %v4706_v25, %v4012_v24  ;;  %v763_v25 = vld [vmem:[%s7468_s2 + $0x28] sm:$0xff] }
  0xbc   : > { %1836 = vmatpush.bf16.msra.mxu2 %v4029_v26  ;;  %v605_v32 = vadd.f32 %v5826_v40, %v5824_v39  ;;  %v752_v39 = vld [vmem:[%s7469_s3 + $0x10] sm:$0xff] }
  0xc0   : > { %v5834_v47 = vpop.f32.mrf.mxu2  ;;  %1837 = vmatpush.bf16.msra.mxu2 %v4021_v59 }
  0xc2   : > { %v5838_v52 = vpop.f32.mrf.mxu0 }
  0xc3   : > { %v5836_v48 = vpop.f32.mrf.mxu3  ;;  %v5853_v7 = vpop.f32.mrf.mxu1 }
  0xc4   : > { %1838 = vmatpush.bf16.msra.mxu2 %v4013_v29  ;;  %v608_v16 = vadd.f32 %v5853_v7, %v5838_v52  ;;  %v4687_v52 = vld [vmem:[%s7467_s1 + $0xa4] sm:$0xf]  ;;  %v3942_v7 = vld [vmem:[%s7467_s1 + $0xa8] sm:$0xf0]  ;;  %v3870_v29 = vld [vmem:[%s7467_s1 + $0x18] sm:$0xf0] }
  0xc5   : > { %1193 = vmatmul.bf16.gmra.mxu2 %v3609_v49 }
  0xc6   : > { %1251 = vmatmul.bf16.gmra.mxu0 %v5842_v54 }
  0xc8   : > { %1222 = vmatmul.bf16.gmra.mxu3 %v5840_v53  ;;  %v588_v6 = vpop.f32.mrf.mxu2  ;;  %1839 = vmatpush.bf16.msra.mxu2 %v4005_v13  ;;  %v4661_v13 = vld [vmem:[%s5125_s12 + $0xf4] sm:$0xf] }
  0xc9   : > { %1280 = vmatmul.bf16.gmra.mxu1 %v3609_v49  ;;  %v4030_v49 = vld [vmem:[%s7467_s1 + $0x158] sm:$0xf0] }
  0xca   : > { %v5874_v11 = vpop.f32.mrf.mxu0  ;;  %v4033_v0 = vor.u32 %v4709_v46, %v4030_v49  ;;  %v745_v49 = vld [vmem:[%s7468_s2 + $0x18] sm:$0xff] }
  0xcb   : > { %v617_v5 = vpop.f32.mrf.mxu3  ;;  %v5885_v15 = vpop.f32.mrf.mxu1 }
  0xcc   : > { %v5872_v10 = vadd.f32 %v617_v5, %v588_v6  ;;  %1923 = vmatpush.bf16.msra.mxu1 %v4033_v0  ;;  %v4673_v6 = vld [vmem:[%s7467_s1 + $0x34] sm:$0xf]  ;;  %v3950_v0 = vld [vmem:[%s7467_s1 + $0xb8] sm:$0xf0] }
  0xcd   : > { %v3889_v20 = vor.u32 %v4673_v6, %v3886_v14 }
  0xcf   : > { %1867 = vmatpush.bf16.msra.mxu3 %v3889_v20 }
  0xd0   : > { %v590_v30 = vpop.f32.mrf.mxu2  ;;  %1924 = vmatpush.bf16.msra.mxu1 %v4025_v23  ;;  %v4703_v23 = vld [vmem:[%s7467_s1 + $0x124] sm:$0xf] }
  0xd3   : > { %v619_v34 = vpop.f32.mrf.mxu3  ;;  %v689_v42 = vpop.f32.mrf.mxu0 }
  0xd4   : > { %v5906_v4 = vadd.f32 %v619_v34, %v590_v30  ;;  %v4659_v34 = vld [vmem:[%s5125_s12 + $0xe0] sm:$0xf0] }
  0xd5   : > { %1294 = vmatmul.bf16.vlgmr.msrb.gmra.mxu2 %v5666_v21 }
  0xd6   : > { %v718_v55 = vpop.f32.mrf.mxu1  ;;  %1784 = vmatmul.bf16.vlgmr.msrb.gmra.mxu0 %v5908_v35 }
  0xd8   : > { %1323 = vmatmul.bf16.vlgmr.msrb.gmra.mxu3 %v5668_v22  ;;  %v631_v61 = vpop.f32.mrf.mxu2  ;;  %v750_v22 = vld [vmem:[%s7469_s3] sm:$0xff] }
  0xd9   : > { %1813 = vmatmul.bf16.vlgmr.msrb.gmra.mxu1 %v5919_v43  ;;  %v632_v21 = vadd.f32 %v631_v61, %v603_v60  ;;  %v3953_v60 = vor.u32 %v4689_v56, %v3950_v0  ;;  %v4671_v61 = vld [vmem:[%s7467_s1 + $0x24] sm:$0xf] }
  0xdb   : > { %v660_v1 = vpop.f32.mrf.mxu3  ;;  %v746_v5 = vmul.f32 %v742_v62, %v632_v21  ;;  %v691_v12 = vpop.f32.mrf.mxu0  ;;  %v3878_v62 = vld [vmem:[%s7467_s1 + $0x28] sm:$0xf0]  ;;  %v4705_v21 = vld [vmem:[%s7467_s1 + $0x134] sm:$0xf]  ;;  %1896 = vmatpush.bf16.msra.mxu0 %v3953_v60  ;;  %v3998_v60 = vld [vmem:[%s7467_s1 + $0x118] sm:$0xf0] }
  0xdc   : > { %v690_v31 = vadd.f32 %v689_v42, %v660_v1  ;;  %v4658_v42 = vld [vmem:[%s5125_s12 + $0xdc] sm:$0xf] }
  0xdd   : > { %v754_v26 = vadd.f32 %v750_v22, %v746_v5  ;;  %v6008_v59 = vor.u32 %v4658_v42, %v3826_v44  ;;  %v753_v5 = vld [vmem:[%s7469_s3 + $0x18] sm:$0xff] }
  0xde   : > { %v719_v18 = vadd.f32 %v718_v55, %v690_v31  ;;  %v720_v19 = vpop.f32.mrf.mxu1  ;;  %v6000_v55 = vor.u32 %v4659_v34, %v3824_v33  ;;  %v4014_v31 = vld [vmem:[%s7467_s1 + $0x138] sm:$0xf0] }
  0xdf   : > { %758 = vst [vmem:[%s5983_s6] sm:$0xff] %v754_v26  ;;  %v3945_v26 = vor.u32 %v4687_v52, %v3942_v7  ;;  %v3990_v52 = vld [vmem:[%s7467_s1 + $0x108] sm:$0xf0] }
  0xe0   : > { %v747_v30 = vmul.f32 %v743_v28, %v719_v18  ;;  %v633_v38 = vpop.f32.mrf.mxu2  ;;  %v3881_v28 = vor.u32 %v4671_v61, %v3878_v62 }
  0xe1   : > { %v634_v45 = vadd.f32 %v633_v38, %v605_v32  ;;  %v779_v32 = vld [vmem:[%s7469_s3 + $0x28] sm:$0xff]  ;;  %v3996_v38 = vld [vmem:[%s7467_s1 + $0x110] sm:$0xf]  ;;  %1897 = vmatpush.bf16.msra.mxu0 %v3945_v26 }
  0xe2   : > { %v755_v36 = vadd.f32 %v751_v27, %v747_v30  ;;  %1868 = vmatpush.bf16.msra.mxu3 %v3881_v28  ;;  %v4669_v27 = vld [vmem:[%s7467_s1 + $0x14] sm:$0xf]  ;;  %v610_v28 = vadd.f32 %v5885_v15, %v5874_v11  ;;  %v4683_v11 = vld [vmem:[%s7467_s1 + $0x84] sm:$0xf]  ;;  %v3926_v15 = vld [vmem:[%s7467_s1 + $0x88] sm:$0xf0] }
  0xe3   : > { %v662_v40 = vpop.f32.mrf.mxu3  ;;  %v748_v57 = vmul.f32 %v744_v41, %v634_v45  ;;  %v694_v58 = vpop.f32.mrf.mxu0  ;;  %v3873_v34 = vor.u32 %v4669_v27, %v3870_v29  ;;  %v4702_v41 = vld [vmem:[%s7467_s1 + $0x114] sm:$0xf0] }
  0xe4   : > { %759 = vst [vmem:[%s5983_s6 + $0x8] sm:$0xff] %v755_v36  ;;  %v692_v46 = vadd.f32 %v691_v12, %v662_v40  ;;  %v4017_v12 = vor.u32 %v4705_v21, %v4014_v31  ;;  %v4006_v36 = vld [vmem:[%s7467_s1 + $0x128] sm:$0xf0]  ;;  %v4685_v40 = vld [vmem:[%s7467_s1 + $0x94] sm:$0xf] }
  0xe5   : > { %v756_v6 = vadd.f32 %v752_v39, %v748_v57  ;;  %1299 = vmatmul.bf16.gmra.mxu2 %v5726_v50  ;;  %v762_v50 = vld [vmem:[%s7468_s2 + $0x20] sm:$0xff]  ;;  %v4009_v45 = vor.u32 %v4703_v23, %v4006_v36  ;;  %v3997_v39 = vor.u32 %v4702_v41, %v3996_v38  ;;  %v3862_v57 = vld [vmem:[%s7467_s1 + $0x8] sm:$0xf0]  ;;  %v3836_v31 = vld [vmem:[%s5125_s12 + $0xf0] sm:$0xf] }
  0xe6   : > { %v721_v22 = vadd.f32 %v720_v19, %v692_v46  ;;  %v723_v1 = vpop.f32.mrf.mxu1  ;;  %1789 = vmatmul.bf16.gmra.mxu0 %v6000_v55  ;;  %1925 = vmatpush.bf16.msra.mxu1 %v4017_v12  ;;  %v3934_v46 = vld [vmem:[%s7467_s1 + $0x98] sm:$0xf0]  ;;  %v764_v12 = vld [vmem:[%s7468_s2 + $0x30] sm:$0xff] }
  0xe7   : > { %760 = vst [vmem:[%s5983_s6 + $0x10] sm:$0xff] %v756_v6  ;;  %1869 = vmatpush.bf16.msra.mxu3 %v3873_v34  ;;  %v3937_v0 = vor.u32 %v4685_v40, %v3934_v46  ;;  %1840 = vmatpush.bf16.msra.mxu2 %v3997_v39  ;;  %v765_v23 = vld [vmem:[%s7468_s2 + $0x38] sm:$0xff]  ;;  %v613_v34 = vadd.f32 %v5822_v37, %v5817_v9  ;;  %v4220_v36 = vld [vmem:[%s7467_s1 + $0xf0] sm:$0xf]  ;;  %v782_v40 = vld [vmem:[%s7469_s3 + $0x40] sm:$0xff] }
  0xe8   : > { %v749_v14 = vmul.f32 %v745_v49, %v721_v22  ;;  %1328 = vmatmul.bf16.gmra.mxu3 %v5728_v51  ;;  %v636_v18 = vpop.f32.mrf.mxu2  ;;  %v778_v51 = vld [vmem:[%s7469_s3 + $0x20] sm:$0xff]  ;;  %v4156_v9 = vld [vmem:[%s7467_s1 + $0x70] sm:$0xf]  ;;  %v4742_v37 = vld [vmem:[%s7467_s1 + $0x74] sm:$0xf0] }
  0xe9   : > { %1818 = vmatmul.bf16.gmra.mxu1 %v6008_v59  ;;  %v637_v19 = vadd.f32 %v636_v18, %v608_v16  ;;  %v4667_v49 = vld [vmem:[%s7467_s1 + $0x4] sm:$0xf]  ;;  %v3988_v22 = vld [vmem:[%s7467_s1 + $0x100] sm:$0xf]  ;;  %1898 = vmatpush.bf16.msra.mxu0 %v3937_v0  ;;  %v4157_v39 = vor.u32 %v4742_v37, %v4156_v9  ;;  %v3820_v9 = vld [vmem:[%s5125_s12 + $0xc8] sm:$0xf] }
  0xea   : > { %v757_v17 = vadd.f32 %v753_v5, %v749_v14  ;;  %1926 = vmatpush.bf16.msra.mxu1 %v4009_v45  ;;  %v3865_v62 = vor.u32 %v4667_v49, %v3862_v57  ;;  %v3838_v14 = vld [vmem:[%s5125_s12 + $0xfc] sm:$0xf0]  ;;  %v4699_v18 = vld [vmem:[%s7467_s1 + $0x104] sm:$0xf] }
  0xeb   : > { %v665_v20 = vpop.f32.mrf.mxu3  ;;  %v770_v30 = vmul.f32 %v762_v50, %v637_v19  ;;  %v696_v33 = vpop.f32.mrf.mxu0  ;;  %v780_v50 = vld [vmem:[%s7469_s3 + $0x30] sm:$0xff]  ;;  %v6122_v19 = vor.u32 %v4662_v2, %v3836_v31  ;;  %v3993_v29 = vor.u32 %v4699_v18, %v3990_v52  ;;  %v4212_v52 = vld [vmem:[%s7467_s1 + $0xe0] sm:$0xf] }
  0xec   : > { %761 = vst [vmem:[%s5983_s6 + $0x18] sm:$0xff] %v757_v17  ;;  %v695_v24 = vadd.f32 %v694_v58, %v665_v20  ;;  %v4701_v58 = vld [vmem:[%s7467_s1 + $0x114] sm:$0xf]  ;;  %1870 = vmatpush.bf16.msra.mxu3 %v3865_v62  ;;  %v3929_v20 = vor.u32 %v4683_v11, %v3926_v15  ;;  %v4276_v37 = vld [vmem:[%s7467_s1 + $0x160] sm:$0xf] }
  0xed   : > { %v786_v56 = vadd.f32 %v778_v51, %v770_v30  ;;  %v4001_v21 = vor.u32 %v4701_v58, %v3998_v60  ;;  %v768_v2 = vld [vmem:[%s7468_s2 + $0x50] sm:$0xff] }
  0xee   : > { %v724_v42 = vadd.f32 %v723_v1, %v695_v24  ;;  %v725_v44 = vpop.f32.mrf.mxu1  ;;  %v4700_v1 = vld [vmem:[%s7467_s1 + $0x104] sm:$0xf0]  ;;  %1899 = vmatpush.bf16.msra.mxu0 %v3929_v20  ;;  %v4774_v20 = vld [vmem:[%s7467_s1 + $0x174] sm:$0xf0] }
  0xef   : > { %794 = vst [vmem:[%s5983_s6 + $0x20] sm:$0xff] %v786_v56  ;;  %v3989_v63 = vor.u32 %v4700_v1, %v3988_v22  ;;  %1927 = vmatpush.bf16.msra.mxu1 %v4001_v21  ;;  %v767_v56 = vld [vmem:[%s7468_s2 + $0x48] sm:$0xff]  ;;  %v615_v21 = vadd.f32 %v5836_v48, %v5834_v47  ;;  %v4665_v1 = vld [vmem:[%s5125_s12 + $0x110] sm:$0xf0] }
  0xf0   : > { %v771_v61 = vmul.f32 %v763_v25, %v724_v42  ;;  %v638_v5 = vpop.f32.mrf.mxu2  ;;  %v6130_v25 = vor.u32 %v4661_v13, %v3838_v14  ;;  %v3848_v22 = vld [vmem:[%s5125_s12 + $0x108] sm:$0xf]  ;;  %v784_v13 = vld [vmem:[%s7469_s3 + $0x50] sm:$0xff] }
  0xf1   : > { %v639_v16 = vadd.f32 %v638_v5, %v610_v28  ;;  %1841 = vmatpush.bf16.msra.mxu2 %v3989_v63  ;;  %v4664_v63 = vld [vmem:[%s5125_s12 + $0x10c] sm:$0xf]  ;;  %v6181_v47 = vor.u32 %v4665_v1, %v3848_v22 }
  0xf2   : > { %v787_v6 = vadd.f32 %v779_v32, %v771_v61  ;;  %v781_v32 = vld [vmem:[%s7469_s3 + $0x38] sm:$0xff]  ;;  %v783_v61 = vld [vmem:[%s7469_s3 + $0x48] sm:$0xff] }
  0xf3   : > { %v667_v17 = vpop.f32.mrf.mxu3  ;;  %v772_v7 = vmul.f32 %v764_v12, %v639_v16  ;;  %v699_v24 = vpop.f32.mrf.mxu0  ;;  %1928 = vmatpush.bf16.msra.mxu1 %v3993_v29  ;;  %v769_v16 = vld [vmem:[%s7468_s2 + $0x58] sm:$0xff] }
  0xf4   : > { %795 = vst [vmem:[%s5983_s6 + $0x28] sm:$0xff] %v787_v6  ;;  %v697_v51 = vadd.f32 %v696_v33, %v667_v17  ;;  %v3850_v6 = vld [vmem:[%s5125_s12 + $0x114] sm:$0xf0] }
  0xf5   : > { %v788_v30 = vadd.f32 %v780_v50, %v772_v7  ;;  %1304 = vmatmul.bf16.gmra.mxu2 %v5797_v3  ;;  %v4758_v3 = vld [vmem:[%s7467_s1 + $0xf4] sm:$0xf0]  ;;  %v6189_v15 = vor.u32 %v4664_v63, %v3850_v6 }
  0xf6   : > { %v726_v26 = vadd.f32 %v725_v44, %v697_v51  ;;  %v728_v27 = vpop.f32.mrf.mxu1  ;;  %1794 = vmatmul.bf16.gmra.mxu0 %v6122_v19  ;;  %v4221_v42 = vor.u32 %v4758_v3, %v4220_v36  ;;  %2382 = vmatpush.bf16.msrb.mxu2 %v4157_v39  ;;  %v785_v17 = vld [vmem:[%s7469_s3 + $0x58] sm:$0xff]  ;;  %v4284_v51 = vld [vmem:[%s7467_s1 + $0x170] sm:$0xf] }
  0xf7   : > { %796 = vst [vmem:[%s5983_s6 + $0x30] sm:$0xff] %v788_v30 }
  0xf8   : > { %v773_v33 = vmul.f32 %v765_v23, %v726_v26  ;;  %1333 = vmatmul.bf16.gmra.mxu3 %v5799_v8  ;;  %v641_v41 = vpop.f32.mrf.mxu2  ;;  %v766_v8 = vld [vmem:[%s7468_s2 + $0x40] sm:$0xff]  ;;  %v4285_v23 = vor.u32 %v4774_v20, %v4284_v51  ;;  %v4741_v26 = vld [vmem:[%s7467_s1 + $0x74] sm:$0xf] }
  0xf9   : > { %1823 = vmatmul.bf16.gmra.mxu1 %v6130_v25  ;;  %v642_v44 = vadd.f32 %v641_v41, %v613_v34  ;;  %2411 = vmatpush.bf16.msrb.mxu3 %v4221_v42 }
  0xfa   : > { %v789_v38 = vadd.f32 %v781_v32, %v773_v33  ;;  %v4148_v32 = vld [vmem:[%s7467_s1 + $0x60] sm:$0xf]  ;;  %v4740_v33 = vld [vmem:[%s7467_s1 + $0x64] sm:$0xf0]  ;;  %2440 = vmatpush.bf16.msrb.mxu0 %v4285_v23 }
  0xfb   : > { %v670_v45 = vpop.f32.mrf.mxu3  ;;  %v774_v49 = vmul.f32 %v766_v8, %v642_v44  ;;  %v701_v0 = vpop.f32.mrf.mxu0  ;;  %v4149_v34 = vor.u32 %v4740_v33, %v4148_v32  ;;  %v4772_v44 = vld [vmem:[%s7467_s1 + $0x164] sm:$0xf0] }
  0xfc   : > { %797 = vst [vmem:[%s5983_s6 + $0x38] sm:$0xff] %v789_v38  ;;  %v700_v46 = vadd.f32 %v699_v24, %v670_v45  ;;  %v4756_v24 = vld [vmem:[%s7467_s1 + $0xe4] sm:$0xf0]  ;;  %v4204_v45 = vld [vmem:[%s7467_s1 + $0xd0] sm:$0xf]  ;;  %v4277_v39 = vor.u32 %v4772_v44, %v4276_v37 }
  0xfd   : > { %v790_v60 = vadd.f32 %v782_v40, %v774_v49  ;;  %2383 = vmatpush.bf16.msrb.mxu2 %v4149_v34  ;;  %v4754_v40 = vld [vmem:[%s7467_s1 + $0xd4] sm:$0xf0]  ;;  %v4150_v49 = vld [vmem:[%s7467_s1 + $0x68] sm:$0xf0]  ;;  %v4768_v23 = vld [vmem:[%s7467_s1 + $0x144] sm:$0xf0] }
  0xfe   : > { %v729_v57 = vadd.f32 %v728_v27, %v700_v46  ;;  %v730_v58 = vpop.f32.mrf.mxu1  ;;  %v4158_v27 = vld [vmem:[%s7467_s1 + $0x78] sm:$0xf0]  ;;  %v4739_v46 = vld [vmem:[%s7467_s1 + $0x64] sm:$0xf]  ;;  %2441 = vmatpush.bf16.msrb.mxu0 %v4277_v39 }
  0xff   : > { %798 = vst [vmem:[%s5983_s6 + $0x40] sm:$0xff] %v790_v60  ;;  %v4161_v30 = vor.u32 %v4741_v26, %v4158_v27  ;;  %v4738_v60 = vld [vmem:[%s7467_s1 + $0x54] sm:$0xf0]  ;;  %v4735_v27 = vld [vmem:[%s7467_s1 + $0x44] sm:$0xf] }
 0x100   : > { %v775_v62 = vmul.f32 %v767_v56, %v729_v57  ;;  %v643_v31 = vpop.f32.mrf.mxu2  ;;  %v4657_v56 = vld [vmem:[%s5125_s12 + $0xd0] sm:$0xf0]  ;;  %v4153_v57 = vor.u32 %v4739_v46, %v4150_v49  ;;  %v4750_v26 = vld [vmem:[%s7467_s1 + $0xb4] sm:$0xf0]  ;;  %v4252_v49 = vld [vmem:[%s7467_s1 + $0x130] sm:$0xf] }
 0x101   : > { %v644_v5 = vadd.f32 %v643_v31, %v615_v21  ;;  %2469 = vmatpush.bf16.msrb.mxu1 %v4161_v30  ;;  %v3821_v22 = vor.u32 %v4657_v56, %v3820_v9  ;;  %v4770_v31 = vld [vmem:[%s7467_s1 + $0x154] sm:$0xf0]  ;;  %v1356_v9 = vld [vmem:[%s7469_s3 + $0x60] sm:$0xff] }
 0x102   : > { %v791_v28 = vadd.f32 %v783_v61, %v775_v62  ;;  %v4766_v56 = vld [vmem:[%s7467_s1 + $0x134] sm:$0xf0] }
 0x103   : > { %v672_v12 = vpop.f32.mrf.mxu3  ;;  %v776_v48 = vmul.f32 %v768_v2, %v644_v5  ;;  %v704_v11 = vpop.f32.mrf.mxu0  ;;  %v4196_v2 = vld [vmem:[%s7467_s1 + $0xc0] sm:$0xf]  ;;  %v4752_v5 = vld [vmem:[%s7467_s1 + $0xc4] sm:$0xf0] }
 0x104   : > { %799 = vst [vmem:[%s5983_s6 + $0x48] sm:$0xff] %v791_v28  ;;  %v702_v14 = vadd.f32 %v701_v0, %v672_v12  ;;  %v4205_v0 = vor.u32 %v4754_v40, %v4204_v45  ;;  %v4268_v28 = vld [vmem:[%s7467_s1 + $0x150] sm:$0xf]  ;;  %v4737_v12 = vld [vmem:[%s7467_s1 + $0x54] sm:$0xf] }
 0x105   : > { %v792_v7 = vadd.f32 %v784_v13, %v776_v48  ;;  %1309 = vmatmul.bf16.gmra.mxu2 %v5840_v53  ;;  %v4213_v53 = vor.u32 %v4756_v24, %v4212_v52  ;;  %2470 = vmatpush.bf16.msrb.mxu1 %v4153_v57  ;;  %v4269_v6 = vor.u32 %v4770_v31, %v4268_v28  ;;  %v4142_v13 = vld [vmem:[%s7467_s1 + $0x58] sm:$0xf0] }
 0x106   : > { %v731_v18 = vadd.f32 %v730_v58, %v702_v14  ;;  %v733_v50 = vpop.f32.mrf.mxu1  ;;  %1799 = vmatmul.bf16.gmra.mxu0 %v6181_v47  ;;  %v4140_v58 = vld [vmem:[%s7467_s1 + $0x50] sm:$0xf] }
 0x107   : > { %800 = vst [vmem:[%s5983_s6 + $0x50] sm:$0xff] %v792_v7  ;;  %2412 = vmatpush.bf16.msrb.mxu3 %v4213_v53  ;;  %v4141_v61 = vor.u32 %v4738_v60, %v4140_v58  ;;  %2442 = vmatpush.bf16.msrb.mxu0 %v4269_v6  ;;  %v4260_v7 = vld [vmem:[%s7467_s1 + $0x140] sm:$0xf]  ;;  %v4253_v58 = vor.u32 %v4766_v56, %v4252_v49  ;;  %v4748_v60 = vld [vmem:[%s7467_s1 + $0xa4] sm:$0xf0] }
 0x108   : > { %v777_v29 = vmul.f32 %v769_v16, %v731_v18  ;;  %1338 = vmatmul.bf16.gmra.mxu3 %v5842_v54  ;;  %v6220_v36 = vpop.f32.mrf.mxu2  ;;  %v4197_v16 = vor.u32 %v4752_v5, %v4196_v2  ;;  %v4736_v18 = vld [vmem:[%s7467_s1 + $0x44] sm:$0xf0]  ;;  %v4261_v24 = vor.u32 %v4768_v23, %v4260_v7  ;;  %v1350_v5 = vld [vmem:[%s7468_s2 + $0x70] sm:$0xff]  ;;  %v4118_v7 = vld [vmem:[%s7467_s1 + $0x28] sm:$0xf0] }
 0x109   : > { %1828 = vmatmul.bf16.gmra.mxu1 %v6189_v15  ;;  %2384 = vmatpush.bf16.msrb.mxu2 %v4141_v61  ;;  %v647_v53 = vadd.f32 %v6220_v36, %v5872_v10  ;;  %v3832_v36 = vld [vmem:[%s5125_s12 + $0xe0] sm:$0xf]  ;;  %v4733_v61 = vld [vmem:[%s7467_s1 + $0x34] sm:$0xf]  ;;  %v4732_v6 = vld [vmem:[%s7467_s1 + $0x24] sm:$0xf0] }
 0x10a   : > { %v793_v54 = vadd.f32 %v785_v17, %v777_v29  ;;  %v4145_v17 = vor.u32 %v4737_v12, %v4142_v13  ;;  %v4134_v29 = vld [vmem:[%s7467_s1 + $0x48] sm:$0xf0]  ;;  %v1358_v12 = vld [vmem:[%s7469_s3 + $0x70] sm:$0xff]  ;;  %v1368_v23 = vld [vmem:[%s7468_s2 + $0x80] sm:$0xff] }
 0x10b   : > { %v675_v3 = vpop.f32.mrf.mxu3  ;;  %v706_v41 = vpop.f32.mrf.mxu0  ;;  %2413 = vmatpush.bf16.msrb.mxu3 %v4205_v0  ;;  %v4137_v34 = vor.u32 %v4735_v27, %v4134_v29  ;;  %2443 = vmatpush.bf16.msrb.mxu0 %v4261_v24  ;;  %v4180_v0 = vld [vmem:[%s7467_s1 + $0xa0] sm:$0xf]  ;;  %v4730_v27 = vld [vmem:[%s7467_s1 + $0x14] sm:$0xf0] }
 0x10c   : > { %801 = vst [vmem:[%s5983_s6 + $0x58] sm:$0xff] %v793_v54  ;;  %v705_v38 = vadd.f32 %v704_v11, %v675_v3  ;;  %v4132_v11 = vld [vmem:[%s7467_s1 + $0x40] sm:$0xf]  ;;  %2471 = vmatpush.bf16.msrb.mxu1 %v4145_v17  ;;  %v4124_v54 = vld [vmem:[%s7467_s1 + $0x30] sm:$0xf]  ;;  %v4181_v31 = vor.u32 %v4748_v60, %v4180_v0 }
 0x10d   : > { %v4734_v3 = vld [vmem:[%s7467_s1 + $0x34] sm:$0xf0]  ;;  %v4760_v60 = vld [vmem:[%s7467_s1 + $0x104] sm:$0xf0] }
 0x10e   : > { %v6223_v8 = vadd.f32 %v733_v50, %v705_v38  ;;  %v735_v42 = vpop.f32.mrf.mxu1  ;;  %v4133_v50 = vor.u32 %v4736_v18, %v4132_v11  ;;  %v1348_v38 = vld [vmem:[%s7468_s2 + $0x60] sm:$0xff] }
 0x10f   : > { %2414 = vmatpush.bf16.msrb.mxu3 %v4197_v16  ;;  %2444 = vmatpush.bf16.msrb.mxu0 %v4253_v58  ;;  %v4244_v11 = vld [vmem:[%s7467_s1 + $0x120] sm:$0xf] }
 0x110   : > { %v6251_v62 = vpop.f32.mrf.mxu2  ;;  %2385 = vmatpush.bf16.msrb.mxu2 %v4133_v50  ;;  %2472 = vmatpush.bf16.msrb.mxu1 %v4137_v34  ;;  %v4663_v34 = vld [vmem:[%s5125_s12 + $0x100] sm:$0xf0]  ;;  %v4228_v58 = vld [vmem:[%s7467_s1 + $0x100] sm:$0xf] }
 0x113   : > { %v677_v21 = vpop.f32.mrf.mxu3  ;;  %v1237_v63 = vpop.f32.mrf.mxu0 }
 0x114   : > { %v707_v1 = vadd.f32 %v706_v41, %v677_v21  ;;  %v4125_v41 = vor.u32 %v4734_v3, %v4124_v54  ;;  %v4126_v21 = vld [vmem:[%s7467_s1 + $0x38] sm:$0xf0]  ;;  %v4236_v3 = vld [vmem:[%s7467_s1 + $0x110] sm:$0xf] }
 0x115   : > { %1842 = vmatmul.bf16.vlgmr.msra.gmra.mxu2 %v3821_v22  ;;  %v4129_v2 = vor.u32 %v4733_v61, %v4126_v21  ;;  %v4727_v61 = vld [vmem:[%s7467_s1 + $0x4] sm:$0xf] }
 0x116   : > { %v6271_v14 = vadd.f32 %v735_v42, %v707_v1  ;;  %v6273_v48 = vpop.f32.mrf.mxu1  ;;  %1900 = vmatmul.bf16.vlgmr.msra.gmra.mxu0 %v5919_v43  ;;  %v4660_v42 = vld [vmem:[%s5125_s12 + $0xe8] sm:$0xf0]  ;;  %2386 = vmatpush.bf16.msrb.mxu2 %v4125_v41 }
 0x117   : > { %v3833_v39 = vor.u32 %v4660_v42, %v3832_v36  ;;  %2473 = vmatpush.bf16.msrb.mxu1 %v4129_v2  ;;  %v4744_v36 = vld [vmem:[%s7467_s1 + $0x84] sm:$0xf0]  ;;  %v4729_v42 = vld [vmem:[%s7467_s1 + $0x14] sm:$0xf] }
 0x118   : > { %1871 = vmatmul.bf16.vlgmr.msra.gmra.mxu3 %v5908_v35  ;;  %v1179_v51 = vpop.f32.mrf.mxu2  ;;  %v4188_v35 = vld [vmem:[%s7467_s1 + $0xb0] sm:$0xf] }
 0x119   : > { %1929 = vmatmul.bf16.vlgmr.msra.gmra.mxu1 %v3821_v22  ;;  %v4189_v33 = vor.u32 %v4750_v26, %v4188_v35  ;;  %v649_v22 = vadd.f32 %v6251_v62, %v5906_v4  ;;  %v4108_v26 = vld [vmem:[%s7467_s1 + $0x10] sm:$0xf] }
 0x11a   : > { %v4109_v54 = vor.u32 %v4730_v27, %v4108_v26 }
 0x11b   : > { %v1208_v20 = vpop.f32.mrf.mxu3  ;;  %v1239_v43 = vpop.f32.mrf.mxu0  ;;  %2415 = vmatpush.bf16.msrb.mxu3 %v4189_v33  ;;  %v3844_v33 = vld [vmem:[%s5125_s12 + $0xf8] sm:$0xf] }
 0x11c   : > { %v1209_v52 = vadd.f32 %v1208_v20, %v1179_v51  ;;  %v4172_v20 = vld [vmem:[%s7467_s1 + $0x90] sm:$0xf] }
 0x11e   : > { %v1238_v30 = vadd.f32 %v1237_v63, %v1209_v52  ;;  %v6303_v32 = vpop.f32.mrf.mxu1  ;;  %v4116_v63 = vld [vmem:[%s7467_s1 + $0x20] sm:$0xf]  ;;  %v4746_v52 = vld [vmem:[%s7467_s1 + $0x94] sm:$0xf0] }
 0x11f   : > { %v4117_v4 = vor.u32 %v4732_v6, %v4116_v63  ;;  %2416 = vmatpush.bf16.msrb.mxu3 %v4181_v31  ;;  %v1370_v31 = vld [vmem:[%s7468_s2 + $0x90] sm:$0xff] }
 0x120   : > { %v1344_v10 = vadd.f32 %v1238_v30, %v647_v53  ;;  %v1181_v44 = vpop.f32.mrf.mxu2  ;;  %v1384_v53 = vld [vmem:[%s7469_s3 + $0x80] sm:$0xff] }
 0x121   : > { %2387 = vmatpush.bf16.msrb.mxu2 %v4117_v4  ;;  %v1386_v4 = vld [vmem:[%s7469_s3 + $0x90] sm:$0xff] }
 0x122   : > { %v1352_v37 = vmul.f32 %v1348_v38, %v1344_v10  ;;  %v4762_v38 = vld [vmem:[%s7467_s1 + $0x114] sm:$0xf0]  ;;  %v4164_v10 = vld [vmem:[%s7467_s1 + $0x80] sm:$0xf] }
 0x123   : > { %v1210_v45 = vpop.f32.mrf.mxu3  ;;  %v1242_v57 = vpop.f32.mrf.mxu0  ;;  %v4237_v41 = vor.u32 %v4762_v38, %v4236_v3  ;;  %v4802_v3 = vld [vmem:[%s7467_s1 + $0x74] sm:$0xf0]  ;;  %v4771_v38 = vld [vmem:[%s7467_s1 + $0x164] sm:$0xf] }
 0x124   : > { %v1360_v40 = vadd.f32 %v1356_v9, %v1352_v37  ;;  %v1211_v46 = vadd.f32 %v1210_v45, %v1181_v44  ;;  %v4165_v37 = vor.u32 %v4744_v36, %v4164_v10  ;;  %v4110_v44 = vld [vmem:[%s7467_s1 + $0x18] sm:$0xf0]  ;;  %v4100_v45 = vld [vmem:[%s7467_s1] sm:$0xf] }
 0x125   : > { %1847 = vmatmul.bf16.gmra.mxu2 %v3833_v39 }
 0x126   : > { %1364 = vst [vmem:[%s5983_s6 + $0x60] sm:$0xff] %v1360_v40  ;;  %v1240_v1 = vadd.f32 %v1239_v43, %v1211_v46  ;;  %v6340_v28 = vpop.f32.mrf.mxu1  ;;  %1905 = vmatmul.bf16.gmra.mxu0 %v6008_v59  ;;  %v4731_v59 = vld [vmem:[%s7467_s1 + $0x24] sm:$0xf]  ;;  %v4173_v43 = vor.u32 %v4746_v52, %v4172_v20  ;;  %2388 = vmatpush.bf16.msrb.mxu2 %v4109_v54  ;;  %v4396_v54 = vld [vmem:[%s7467_s1 + $0x70] sm:$0xf] }
 0x127   : > { %v4121_v24 = vor.u32 %v4731_v59, %v4118_v7  ;;  %v4113_v40 = vor.u32 %v4729_v42, %v4110_v44  ;;  %v1388_v7 = vld [vmem:[%s7469_s3 + $0xa0] sm:$0xff]  ;;  %v4397_v36 = vor.u32 %v4802_v3, %v4396_v54  ;;  %v4278_v42 = vld [vmem:[%s7467_s1 + $0x168] sm:$0xf0]  ;;  %v1390_v44 = vld [vmem:[%s7469_s3 + $0xb0] sm:$0xff] }
 0x128   : > { %v1346_v62 = vadd.f32 %v1240_v1, %v649_v22  ;;  %1876 = vmatmul.bf16.gmra.mxu3 %v6000_v55  ;;  %v1184_v16 = vpop.f32.mrf.mxu2  ;;  %v4764_v55 = vld [vmem:[%s7467_s1 + $0x124] sm:$0xf0]  ;;  %v4229_v22 = vor.u32 %v4760_v60, %v4228_v58  ;;  %v4102_v1 = vld [vmem:[%s7467_s1 + $0x8] sm:$0xf0]  ;;  %v4751_v54 = vld [vmem:[%s7467_s1 + $0xc4] sm:$0xf] }
 0x129   : > { %1934 = vmatmul.bf16.gmra.mxu1 %v3833_v39  ;;  %v4245_v51 = vor.u32 %v4764_v55, %v4244_v11  ;;  %2417 = vmatpush.bf16.msrb.mxu3 %v4173_v43  ;;  %v4728_v39 = vld [vmem:[%s7467_s1 + $0x4] sm:$0xf0]  ;;  %v4105_v63 = vor.u32 %v4727_v61, %v4102_v1  ;;  %v4666_v43 = vld [vmem:[%s5125_s12 + $0x118] sm:$0xf0]  ;;  %v4198_v3 = vld [vmem:[%s7467_s1 + $0xc8] sm:$0xf0] }
 0x12a   : > { %v1354_v13 = vmul.f32 %v1350_v5, %v1346_v62  ;;  %2474 = vmatpush.bf16.msrb.mxu1 %v4121_v24  ;;  %v4101_v46 = vor.u32 %v4728_v39, %v4100_v45  ;;  %v4281_v45 = vor.u32 %v4771_v38, %v4278_v42  ;;  %v4201_v42 = vor.u32 %v4751_v54, %v4198_v3  ;;  %v1351_v54 = vld [vmem:[%s7468_s2 + $0x78] sm:$0xff] }
 0x12b   : > { %v1213_v17 = vpop.f32.mrf.mxu3  ;;  %v1244_v35 = vpop.f32.mrf.mxu0  ;;  %2445 = vmatpush.bf16.msrb.mxu0 %v4245_v51 }
 0x12c   : > { %v1362_v18 = vadd.f32 %v1358_v12, %v1354_v13  ;;  %v1214_v50 = vadd.f32 %v1213_v17, %v1184_v16  ;;  %2389 = vmatpush.bf16.msrb.mxu2 %v4101_v46  ;;  %v4773_v12 = vld [vmem:[%s7467_s1 + $0x174] sm:$0xf]  ;;  %v4286_v13 = vld [vmem:[%s7467_s1 + $0x178] sm:$0xf0]  ;;  %v4214_v46 = vld [vmem:[%s7467_s1 + $0xe8] sm:$0xf0] }
 0x12d   : > { %2418 = vmatpush.bf16.msrb.mxu3 %v4165_v37  ;;  %v4757_v16 = vld [vmem:[%s7467_s1 + $0xf4] sm:$0xf]  ;;  %v4818_v37 = vld [vmem:[%s7467_s1 + $0xf4] sm:$0xf0] }
 0x12e   : > { %1366 = vst [vmem:[%s5983_s6 + $0x70] sm:$0xff] %v1362_v18  ;;  %v1243_v29 = vadd.f32 %v1242_v57, %v1214_v50  ;;  %v6387_v30 = vpop.f32.mrf.mxu1  ;;  %v3845_v57 = vor.u32 %v4663_v34, %v3844_v33  ;;  %2475 = vmatpush.bf16.msrb.mxu1 %v4113_v40  ;;  %v1372_v50 = vld [vmem:[%s7468_s2 + $0xa0] sm:$0xff]  ;;  %v1374_v33 = vld [vmem:[%s7468_s2 + $0xb0] sm:$0xff] }
 0x12f   : > { %2446 = vmatpush.bf16.msrb.mxu0 %v4237_v41  ;;  %v4755_v40 = vld [vmem:[%s7467_s1 + $0xe4] sm:$0xf] }
 0x130   : > { %v1376_v9 = vmul.f32 %v1368_v23, %v1243_v29  ;;  %v1186_v56 = vpop.f32.mrf.mxu2 }
 0x132   : > { %v1392_v49 = vadd.f32 %v1384_v53, %v1376_v9  ;;  %2476 = vmatpush.bf16.msrb.mxu1 %v4105_v63  ;;  %v4460_v9 = vld [vmem:[%s7467_s1 + $0xf0] sm:$0xf]  ;;  %v4452_v63 = vld [vmem:[%s7467_s1 + $0xe0] sm:$0xf] }
 0x133   : > { %v1215_v0 = vpop.f32.mrf.mxu3  ;;  %v1247_v2 = vpop.f32.mrf.mxu0  ;;  %2447 = vmatpush.bf16.msrb.mxu0 %v4229_v22  ;;  %v4461_v39 = vor.u32 %v4818_v37, %v4460_v9 }
 0x134   : > { %1400 = vst [vmem:[%s5983_s6 + $0x80] sm:$0xff] %v1392_v49  ;;  %v1216_v21 = vadd.f32 %v1215_v0, %v1186_v56  ;;  %v4217_v56 = vor.u32 %v4755_v40, %v4214_v46  ;;  %v4765_v40 = vld [vmem:[%s7467_s1 + $0x134] sm:$0xf] }
 0x135   : > { %1852 = vmatmul.bf16.gmra.mxu2 %v3845_v57 }
 0x136   : > { %v1245_v6 = vadd.f32 %v1244_v35, %v1216_v21  ;;  %v6431_v5 = vpop.f32.mrf.mxu1  ;;  %1910 = vmatmul.bf16.gmra.mxu0 %v6130_v25  ;;  %v4222_v25 = vld [vmem:[%s7467_s1 + $0xf8] sm:$0xf0]  ;;  %v3856_v35 = vld [vmem:[%s5125_s12 + $0x110] sm:$0xf]  ;;  %3017 = vmatpush.bf16.msra.mxu1 %v4461_v39  ;;  %v4769_v21 = vld [vmem:[%s7467_s1 + $0x154] sm:$0xf] }
 0x137   : > { %v4225_v59 = vor.u32 %v4757_v16, %v4222_v25  ;;  %v3857_v29 = vor.u32 %v4666_v43, %v3856_v35  ;;  %2988 = vmatpush.bf16.msra.mxu0 %v4397_v36  ;;  %v4052_v16 = vld [vmem:[%s5125_s12 + $0x120] sm:$0xf]  ;;  %v4054_v25 = vld [vmem:[%s5125_s12 + $0x12c] sm:$0xf0]  ;;  %v4796_v39 = vld [vmem:[%s7467_s1 + $0x44] sm:$0xf0] }
 0x138   : > { %v1378_v62 = vmul.f32 %v1370_v31, %v1245_v6  ;;  %1881 = vmatmul.bf16.gmra.mxu3 %v6122_v19  ;;  %v1189_v11 = vpop.f32.mrf.mxu2  ;;  %v4289_v19 = vor.u32 %v4773_v12, %v4286_v13  ;;  %v4816_v6 = vld [vmem:[%s7467_s1 + $0xe4] sm:$0xf0]  ;;  %v4753_v12 = vld [vmem:[%s7467_s1 + $0xd4] sm:$0xf]  ;;  %v4206_v13 = vld [vmem:[%s7467_s1 + $0xd8] sm:$0xf0] }
 0x139   : > { %1939 = vmatmul.bf16.gmra.mxu1 %v3845_v57  ;;  %2498 = vmatpush.bf16.msra.mxu2 %v4225_v59  ;;  %v4717_v59 = vld [vmem:[%s5125_s12 + $0x130] sm:$0xf0] }
 0x13a   : > { %v1394_v17 = vadd.f32 %v1386_v4, %v1378_v62  ;;  %2527 = vmatpush.bf16.msra.mxu3 %v4289_v19  ;;  %v4453_v62 = vor.u32 %v4816_v6, %v4452_v63  ;;  %v4209_v19 = vor.u32 %v4753_v12, %v4206_v13  ;;  %v1357_v63 = vld [vmem:[%s7469_s3 + $0x68] sm:$0xff]  ;;  %v4064_v6 = vld [vmem:[%s5125_s12 + $0x138] sm:$0xf] }
 0x13b   : > { %v1218_v55 = vpop.f32.mrf.mxu3  ;;  %v1249_v51 = vpop.f32.mrf.mxu0  ;;  %v4066_v13 = vld [vmem:[%s5125_s12 + $0x144] sm:$0xf0] }
 0x13c   : > { %1402 = vst [vmem:[%s5983_s6 + $0x90] sm:$0xff] %v1394_v17  ;;  %v1219_v18 = vadd.f32 %v1218_v55, %v1189_v11  ;;  %v4716_v17 = vld [vmem:[%s5125_s12 + $0x128] sm:$0xf0]  ;;  %v4715_v11 = vld [vmem:[%s5125_s12 + $0x124] sm:$0xf]  ;;  %3018 = vmatpush.bf16.msra.mxu1 %v4453_v62 }
 0x13d   : > { %2499 = vmatpush.bf16.msra.mxu2 %v4217_v56  ;;  %v4060_v55 = vld [vmem:[%s5125_s12 + $0x128] sm:$0xf]  ;;  %v6540_v43 = vor.u32 %v4715_v11, %v4054_v25  ;;  %v4718_v62 = vld [vmem:[%s5125_s12 + $0x13c] sm:$0xf] }
 0x13e   : > { %v1248_v20 = vadd.f32 %v1247_v2, %v1219_v18  ;;  %v6454_v52 = vpop.f32.mrf.mxu1  ;;  %2528 = vmatpush.bf16.msra.mxu3 %v4281_v45  ;;  %v4270_v2 = vld [vmem:[%s7467_s1 + $0x158] sm:$0xf0]  ;;  %v4372_v45 = vld [vmem:[%s7467_s1 + $0x40] sm:$0xf]  ;;  %v4812_v56 = vld [vmem:[%s7467_s1 + $0xc4] sm:$0xf0] }
 0x13f   : > { %v4273_v4 = vor.u32 %v4769_v21, %v4270_v2  ;;  %v4373_v46 = vor.u32 %v4796_v39, %v4372_v45  ;;  %v1369_v39 = vld [vmem:[%s7468_s2 + $0x88] sm:$0xff] }
 0x140   : > { %v1380_v23 = vmul.f32 %v1372_v50, %v1248_v20  ;;  %v1191_v26 = vpop.f32.mrf.mxu2  ;;  %v4380_v20 = vld [vmem:[%s7467_s1 + $0x50] sm:$0xf] }
 0x141   : > { %2500 = vmatpush.bf16.msra.mxu2 %v4209_v19 }
 0x142   : > { %v1396_v24 = vadd.f32 %v1388_v7, %v1380_v23  ;;  %2529 = vmatpush.bf16.msra.mxu3 %v4273_v4  ;;  %v4798_v7 = vld [vmem:[%s7467_s1 + $0x54] sm:$0xf0]  ;;  %v4767_v23 = vld [vmem:[%s7467_s1 + $0x144] sm:$0xf] }
 0x143   : > { %v1220_v27 = vpop.f32.mrf.mxu3  ;;  %v1252_v34 = vpop.f32.mrf.mxu0  ;;  %v4719_v4 = vld [vmem:[%s5125_s12 + $0x140] sm:$0xf0] }
 0x144   : > { %1404 = vst [vmem:[%s5983_s6 + $0xa0] sm:$0xff] %v1396_v24  ;;  %v1221_v53 = vadd.f32 %v1220_v27, %v1191_v26  ;;  %v6542_v24 = vor.u32 %v4717_v59, %v4060_v55  ;;  %v4381_v26 = vor.u32 %v4798_v7, %v4380_v20  ;;  %v4262_v27 = vld [vmem:[%s7467_s1 + $0x148] sm:$0xf0]  ;;  %v4065_v55 = vor.u32 %v4719_v4, %v4064_v6  ;;  %v4364_v59 = vld [vmem:[%s7467_s1 + $0x30] sm:$0xf] }
 0x145   : > { %1857 = vmatmul.bf16.gmra.mxu2 %v3857_v29  ;;  %v1385_v6 = vld [vmem:[%s7469_s3 + $0x88] sm:$0xff] }
 0x146   : > { %v1250_v41 = vadd.f32 %v1249_v51, %v1221_v53  ;;  %v6474_v10 = vpop.f32.mrf.mxu1  ;;  %1915 = vmatmul.bf16.gmra.mxu0 %v6189_v15  ;;  %v4800_v15 = vld [vmem:[%s7467_s1 + $0x64] sm:$0xf0]  ;;  %v4053_v51 = vor.u32 %v4716_v17, %v4052_v16  ;;  %v4814_v53 = vld [vmem:[%s7467_s1 + $0xd4] sm:$0xf0]  ;;  %2501 = vmatpush.bf16.msra.mxu2 %v4201_v42  ;;  %v4072_v16 = vld [vmem:[%s5125_s12 + $0x140] sm:$0xf] }
 0x147   : > { %v4720_v17 = vld [vmem:[%s5125_s12 + $0x148] sm:$0xf0] }
 0x148   : > { %v1382_v49 = vmul.f32 %v1374_v33, %v1250_v41  ;;  %1886 = vmatmul.bf16.gmra.mxu3 %v6181_v47  ;;  %v1194_v57 = vpop.f32.mrf.mxu2  ;;  %v4388_v47 = vld [vmem:[%s7467_s1 + $0x60] sm:$0xf]  ;;  %v6621_v20 = vor.u32 %v4720_v17, %v4072_v16  ;;  %v4721_v17 = vld [vmem:[%s5125_s12 + $0x154] sm:$0xf] }
 0x149   : > { %1944 = vmatmul.bf16.gmra.mxu1 %v3857_v29  ;;  %v4389_v31 = vor.u32 %v4800_v15, %v4388_v47  ;;  %v4444_v29 = vld [vmem:[%s7467_s1 + $0xd0] sm:$0xf]  ;;  %v4190_v47 = vld [vmem:[%s7467_s1 + $0xb8] sm:$0xf0]  ;;  %v1349_v15 = vld [vmem:[%s7468_s2 + $0x68] sm:$0xff] }
 0x14a   : > { %v1398_v0 = vadd.f32 %v1390_v44, %v1382_v49  ;;  %v4445_v36 = vor.u32 %v4814_v53, %v4444_v29  ;;  %v4254_v49 = vld [vmem:[%s7467_s1 + $0x138] sm:$0xf0]  ;;  %v4747_v53 = vld [vmem:[%s7467_s1 + $0xa4] sm:$0xf] }
 0x14b   : > { %v1223_v58 = vpop.f32.mrf.mxu3  ;;  %v1254_v61 = vpop.f32.mrf.mxu0  ;;  %2989 = vmatpush.bf16.msra.mxu0 %v4389_v31 }
 0x14c   : > { %1406 = vst [vmem:[%s5983_s6 + $0xb0] sm:$0xff] %v1398_v0  ;;  %v1224_v60 = vadd.f32 %v1223_v58, %v1194_v57  ;;  %3019 = vmatpush.bf16.msra.mxu1 %v4445_v36  ;;  %v4257_v58 = vor.u32 %v4765_v40, %v4254_v49  ;;  %v4356_v49 = vld [vmem:[%s7467_s1 + $0x20] sm:$0xf] }
 0x14e   : > { %v6506_v22 = vadd.f32 %v1252_v34, %v1224_v60  ;;  %v6508_v1 = vpop.f32.mrf.mxu1  ;;  %v4265_v34 = vor.u32 %v4767_v23, %v4262_v27  ;;  %v4428_v23 = vld [vmem:[%s7467_s1 + $0xb0] sm:$0xf] }
 0x14f   : > { %2990 = vmatpush.bf16.msra.mxu0 %v4381_v26 }
 0x150   : > { %v1196_v18 = vpop.f32.mrf.mxu2  ;;  %2530 = vmatpush.bf16.msra.mxu3 %v4265_v34  ;;  %v4182_v34 = vld [vmem:[%s7467_s1 + $0xa8] sm:$0xf0] }
 0x151   : > { %v4185_v42 = vor.u32 %v4747_v53, %v4182_v34  ;;  %v4166_v53 = vld [vmem:[%s7467_s1 + $0x88] sm:$0xf0] }
 0x153   : > { %v1225_v50 = vpop.f32.mrf.mxu3  ;;  %v6553_v33 = vpop.f32.mrf.mxu0  ;;  %2991 = vmatpush.bf16.msra.mxu0 %v4373_v46 }
 0x154   : > { %v1226_v35 = vadd.f32 %v1225_v50, %v1196_v18  ;;  %2531 = vmatpush.bf16.msra.mxu3 %v4257_v58  ;;  %v4794_v18 = vld [vmem:[%s7467_s1 + $0x34] sm:$0xf0]  ;;  %v4763_v50 = vld [vmem:[%s7467_s1 + $0x124] sm:$0xf]  ;;  %v4420_v58 = vld [vmem:[%s7467_s1 + $0xa0] sm:$0xf] }
 0x155   : > { %2390 = vmatmul.bf16.vlgmr.msrb.gmra.mxu2 %v4053_v51  ;;  %v4365_v7 = vor.u32 %v4794_v18, %v4364_v59  ;;  %v4230_v18 = vld [vmem:[%s7467_s1 + $0x108] sm:$0xf0] }
 0x156   : > { %v6561_v38 = vadd.f32 %v1254_v61, %v1226_v35  ;;  %v6563_v41 = vpop.f32.mrf.mxu1  ;;  %2448 = vmatmul.bf16.vlgmr.msrb.gmra.mxu0 %v6542_v24  ;;  %v4749_v61 = vld [vmem:[%s7467_s1 + $0xb4] sm:$0xf]  ;;  %v4810_v35 = vld [vmem:[%s7467_s1 + $0xb4] sm:$0xf0] }
 0x157   : > { %v4193_v31 = vor.u32 %v4749_v61, %v4190_v47  ;;  %2992 = vmatpush.bf16.msra.mxu0 %v4365_v7  ;;  %v4429_v36 = vor.u32 %v4810_v35, %v4428_v23  ;;  %v4806_v7 = vld [vmem:[%s7467_s1 + $0x94] sm:$0xf0]  ;;  %v4723_v23 = vld [vmem:[%s5125_s12 + $0x160] sm:$0xf0] }
 0x158   : > { %2419 = vmatmul.bf16.vlgmr.msrb.gmra.mxu3 %v6540_v43  ;;  %v1295_v9 = vpop.f32.mrf.mxu2 }
 0x159   : > { %2477 = vmatmul.bf16.vlgmr.msrb.gmra.mxu1 %v4053_v51  ;;  %v1296_v37 = vadd.f32 %v1295_v9, %v6273_v48  ;;  %v4436_v48 = vld [vmem:[%s7467_s1 + $0xc0] sm:$0xf]  ;;  %2502 = vmatpush.bf16.msra.mxu2 %v4193_v31  ;;  %v6619_v51 = vor.u32 %v4718_v62, %v4066_v13  ;;  %v4076_v62 = vld [vmem:[%s5125_s12 + $0x150] sm:$0xf] }
 0x15a   : > { %v4437_v60 = vor.u32 %v4812_v56, %v4436_v48  ;;  %v4792_v48 = vld [vmem:[%s7467_s1 + $0x24] sm:$0xf0]  ;;  %v4761_v56 = vld [vmem:[%s7467_s1 + $0x114] sm:$0xf] }
 0x15b   : > { %v1324_v44 = vpop.f32.mrf.mxu3  ;;  %v6586_v57 = vpop.f32.mrf.mxu0 }
 0x15c   : > { %v1325_v0 = vadd.f32 %v1324_v44, %v1296_v37  ;;  %3020 = vmatpush.bf16.msra.mxu1 %v4437_v60  ;;  %v1359_v37 = vld [vmem:[%s7469_s3 + $0x78] sm:$0xff]  ;;  %v4808_v60 = vld [vmem:[%s7467_s1 + $0xa4] sm:$0xf0] }
 0x15d   : > { %2503 = vmatpush.bf16.msra.mxu2 %v4185_v42  ;;  %v4421_v31 = vor.u32 %v4808_v60, %v4420_v58 }
 0x15e   : > { %v6597_v21 = vpop.f32.mrf.mxu1  ;;  %v1345_v2 = vadd.f32 %v1325_v0, %v6223_v8  ;;  %v4357_v0 = vor.u32 %v4792_v48, %v4356_v49 }
 0x160   : > { %v1353_v12 = vmul.f32 %v1349_v15, %v1345_v2  ;;  %v1297_v11 = vpop.f32.mrf.mxu2  ;;  %3021 = vmatpush.bf16.msra.mxu1 %v4429_v36  ;;  %v4745_v2 = vld [vmem:[%s7467_s1 + $0x94] sm:$0xf]  ;;  %2993 = vmatpush.bf16.msra.mxu0 %v4357_v0  ;;  %v1387_v0 = vld [vmem:[%s7469_s3 + $0x98] sm:$0xff] }
 0x161   : > { %v1298_v25 = vadd.f32 %v1297_v11, %v6303_v32  ;;  %v4246_v32 = vld [vmem:[%s7467_s1 + $0x128] sm:$0xf0]  ;;  %v4078_v11 = vld [vmem:[%s5125_s12 + $0x15c] sm:$0xf0] }
 0x162   : > { %v1361_v19 = vadd.f32 %v1357_v63, %v1353_v12  ;;  %v4249_v29 = vor.u32 %v4763_v50, %v4246_v32  ;;  %v4174_v63 = vld [vmem:[%s7467_s1 + $0x98] sm:$0xf0]  ;;  %v4412_v50 = vld [vmem:[%s7467_s1 + $0x90] sm:$0xf] }
 0x163   : > { %v1326_v8 = vpop.f32.mrf.mxu3  ;;  %v6633_v27 = vpop.f32.mrf.mxu0  ;;  %v4722_v12 = vld [vmem:[%s5125_s12 + $0x158] sm:$0xf0]  ;;  %v4177_v13 = vor.u32 %v4745_v2, %v4174_v63 }
 0x164   : > { %1365 = vst [vmem:[%s5983_s6 + $0x68] sm:$0xff] %v1361_v19  ;;  %v1327_v26 = vadd.f32 %v1326_v8, %v1298_v25  ;;  %2532 = vmatpush.bf16.msra.mxu3 %v4249_v29  ;;  %v4084_v19 = vld [vmem:[%s5125_s12 + $0x158] sm:$0xf]  ;;  %3022 = vmatpush.bf16.msra.mxu1 %v4421_v31  ;;  %v4348_v25 = vld [vmem:[%s7467_s1 + $0x10] sm:$0xf] }
 0x165   : > { %2395 = vmatmul.bf16.gmra.mxu2 %v4065_v55  ;;  %v4790_v8 = vld [vmem:[%s7467_s1 + $0x14] sm:$0xf0]  ;;  %v4743_v29 = vld [vmem:[%s7467_s1 + $0x84] sm:$0xf]  ;;  %v4524_v31 = vld [vmem:[%s7467_s1 + $0x170] sm:$0xf] }
 0x166   : > { %v6644_v3 = vpop.f32.mrf.mxu1  ;;  %v1347_v9 = vadd.f32 %v1327_v26, %v6271_v14  ;;  %2453 = vmatmul.bf16.gmra.mxu0 %v6621_v20  ;;  %2504 = vmatpush.bf16.msra.mxu2 %v4177_v13  ;;  %v4349_v59 = vor.u32 %v4790_v8, %v4348_v25  ;;  %v4413_v26 = vor.u32 %v4806_v7, %v4412_v50  ;;  %v4088_v8 = vld [vmem:[%s5125_s12 + $0x168] sm:$0xf]  ;;  %v4090_v50 = vld [vmem:[%s5125_s12 + $0x174] sm:$0xf0]  ;;  %v4096_v7 = vld [vmem:[%s5125_s12 + $0x170] sm:$0xf] }
 0x168   : > { %2424 = vmatmul.bf16.gmra.mxu3 %v6619_v51  ;;  %v1355_v44 = vmul.f32 %v1351_v54, %v1347_v9  ;;  %v1300_v45 = vpop.f32.mrf.mxu2  ;;  %2994 = vmatpush.bf16.msra.mxu0 %v4349_v59  ;;  %v4169_v54 = vor.u32 %v4743_v29, %v4166_v53  ;;  %v4077_v9 = vor.u32 %v4722_v12, %v4076_v62  ;;  %v4724_v59 = vld [vmem:[%s5125_s12 + $0x16c] sm:$0xf]  ;;  %v1375_v53 = vld [vmem:[%s7468_s2 + $0xb8] sm:$0xff] }
 0x169   : > { %2482 = vmatmul.bf16.gmra.mxu1 %v4065_v55  ;;  %v1301_v40 = vadd.f32 %v1300_v45, %v6340_v28  ;;  %v4238_v28 = vld [vmem:[%s7467_s1 + $0x118] sm:$0xf0]  ;;  %v4759_v55 = vld [vmem:[%s7467_s1 + $0x104] sm:$0xf] }
 0x16a   : > { %v1363_v14 = vadd.f32 %v1359_v37, %v1355_v44  ;;  %v4241_v15 = vor.u32 %v4761_v56, %v4238_v28  ;;  %v4233_v35 = vor.u32 %v4759_v55, %v4230_v18  ;;  %3023 = vmatpush.bf16.msra.mxu1 %v4413_v26  ;;  %v4340_v37 = vld [vmem:[%s7467_s1] sm:$0xf]  ;;  %v4788_v44 = vld [vmem:[%s7467_s1 + $0x4] sm:$0xf0]  ;;  %v1371_v45 = vld [vmem:[%s7468_s2 + $0x98] sm:$0xff]  ;;  %2505 = vmatpush.bf16.msra.mxu2 %v4169_v54 }
 0x16b   : > { %v1329_v46 = vpop.f32.mrf.mxu3  ;;  %v6675_v47 = vpop.f32.mrf.mxu0  ;;  %v4725_v55 = vld [vmem:[%s5125_s12 + $0x170] sm:$0xf0] }
 0x16c   : > { %1367 = vst [vmem:[%s5983_s6 + $0x78] sm:$0xff] %v1363_v14  ;;  %v1330_v61 = vadd.f32 %v1329_v46, %v1301_v40  ;;  %2533 = vmatpush.bf16.msra.mxu3 %v4241_v15  ;;  %v6731_v14 = vor.u32 %v4723_v23, %v4084_v19  ;;  %v4404_v40 = vld [vmem:[%s7467_s1 + $0x80] sm:$0xf]  ;;  %v4804_v46 = vld [vmem:[%s7467_s1 + $0x84] sm:$0xf0]  ;;  %v4089_v29 = vor.u32 %v4725_v55, %v4088_v8 }
 0x16d   : > { %v4405_v56 = vor.u32 %v4804_v46, %v4404_v40  ;;  %v4398_v15 = vld [vmem:[%s7467_s1 + $0x78] sm:$0xf0]  ;;  %v1389_v19 = vld [vmem:[%s7469_s3 + $0xa8] sm:$0xff]  ;;  %v4831_v55 = vld [vmem:[%s7467_s1 + $0x164] sm:$0xf] }
 0x16e   : > { %v6686_v4 = vpop.f32.mrf.mxu1  ;;  %v1377_v16 = vmul.f32 %v1369_v39, %v1330_v61  ;;  %v6729_v39 = vor.u32 %v4721_v17, %v4078_v11  ;;  %v4801_v61 = vld [vmem:[%s7467_s1 + $0x74] sm:$0xf]  ;;  %v4382_v8 = vld [vmem:[%s7467_s1 + $0x58] sm:$0xf0] }
 0x16f   : > { %3024 = vmatpush.bf16.msra.mxu1 %v4405_v56  ;;  %v4401_v63 = vor.u32 %v4801_v61, %v4398_v15  ;;  %v4833_v56 = vld [vmem:[%s7467_s1 + $0x174] sm:$0xf]  ;;  %v4516_v61 = vld [vmem:[%s7467_s1 + $0x160] sm:$0xf]  ;;  %v4832_v15 = vld [vmem:[%s7467_s1 + $0x164] sm:$0xf0] }
 0x170   : > { %v1393_v32 = vadd.f32 %v1385_v6, %v1377_v16  ;;  %v1302_v34 = vpop.f32.mrf.mxu2  ;;  %2534 = vmatpush.bf16.msra.mxu3 %v4233_v35  ;;  %v4834_v6 = vld [vmem:[%s7467_s1 + $0x174] sm:$0xf0]  ;;  %v1373_v16 = vld [vmem:[%s7468_s2 + $0xa8] sm:$0xff] }
 0x171   : > { %v1303_v36 = vadd.f32 %v1302_v34, %v6387_v30  ;;  %v4341_v30 = vor.u32 %v4788_v44, %v4340_v37  ;;  %v4525_v13 = vor.u32 %v4834_v6, %v4524_v31  ;;  %v6783_v34 = vor.u32 %v4724_v59, %v4090_v50  ;;  %v4462_v44 = vld [vmem:[%s7467_s1 + $0xf8] sm:$0xf0]  ;;  %v4518_v59 = vld [vmem:[%s7467_s1 + $0x168] sm:$0xf0] }
 0x172   : > { %1401 = vst [vmem:[%s5983_s6 + $0x88] sm:$0xff] %v1393_v32  ;;  %v4726_v32 = vld [vmem:[%s5125_s12 + $0x178] sm:$0xf0]  ;;  %v4521_v50 = vor.u32 %v4831_v55, %v4518_v59  ;;  %v4827_v59 = vld [vmem:[%s7467_s1 + $0x144] sm:$0xf] }
 0x173   : > { %v1331_v42 = vpop.f32.mrf.mxu3  ;;  %v6739_v48 = vpop.f32.mrf.mxu0  ;;  %2995 = vmatpush.bf16.msra.mxu0 %v4341_v30  ;;  %3046 = vmatpush.bf16.msrb.mxu2 %v4525_v13  ;;  %v6785_v54 = vor.u32 %v4726_v32, %v4096_v7  ;;  %v4815_v13 = vld [vmem:[%s7467_s1 + $0xe4] sm:$0xf]  ;;  %v4508_v7 = vld [vmem:[%s7467_s1 + $0x150] sm:$0xf]  ;;  %v4830_v32 = vld [vmem:[%s7467_s1 + $0x154] sm:$0xf0] }
 0x174   : > { %v1332_v49 = vadd.f32 %v1331_v42, %v1303_v36  ;;  %3075 = vmatpush.bf16.msrb.mxu3 %v4401_v63  ;;  %v1391_v42 = vld [vmem:[%s7469_s3 + $0xb8] sm:$0xff] }
 0x175   : > { %2400 = vmatmul.bf16.gmra.mxu2 %v4077_v9  ;;  %v4366_v55 = vld [vmem:[%s7467_s1 + $0x38] sm:$0xf0] }
 0x176   : > { %v6744_v28 = vpop.f32.mrf.mxu1  ;;  %v1379_v58 = vmul.f32 %v1371_v45, %v1332_v49  ;;  %2458 = vmatmul.bf16.gmra.mxu0 %v6731_v14  ;;  %v4799_v45 = vld [vmem:[%s7467_s1 + $0x64] sm:$0xf]  ;;  %v4390_v49 = vld [vmem:[%s7467_s1 + $0x68] sm:$0xf0] }
 0x178   : > { %2429 = vmatmul.bf16.gmra.mxu3 %v6729_v39  ;;  %v1395_v60 = vadd.f32 %v1387_v0, %v1379_v58  ;;  %v1305_v2 = vpop.f32.mrf.mxu2  ;;  %v4526_v0 = vld [vmem:[%s7467_s1 + $0x178] sm:$0xf0]  ;;  %v4393_v58 = vor.u32 %v4799_v45, %v4390_v49  ;;  %v4374_v49 = vld [vmem:[%s7467_s1 + $0x48] sm:$0xf0] }
 0x179   : > { %2487 = vmatmul.bf16.gmra.mxu1 %v4077_v9  ;;  %v1306_v62 = vadd.f32 %v1305_v2, %v6431_v5  ;;  %v4517_v2 = vor.u32 %v4832_v15, %v4516_v61  ;;  %v4500_v15 = vld [vmem:[%s7467_s1 + $0x140] sm:$0xf] }
 0x17a   : > { %1403 = vst [vmem:[%s5983_s6 + $0x98] sm:$0xff] %v1395_v60  ;;  %v4529_v60 = vor.u32 %v4833_v56, %v4526_v0  ;;  %3076 = vmatpush.bf16.msrb.mxu3 %v4393_v58  ;;  %v4829_v56 = vld [vmem:[%s7467_s1 + $0x154] sm:$0xf]  ;;  %v4510_v0 = vld [vmem:[%s7467_s1 + $0x158] sm:$0xf0] }
 0x17b   : > { %v1334_v12 = vpop.f32.mrf.mxu3  ;;  %v6765_v11 = vpop.f32.mrf.mxu0  ;;  %3047 = vmatpush.bf16.msrb.mxu2 %v4517_v2  ;;  %v4513_v61 = vor.u32 %v4829_v56, %v4510_v0  ;;  %v4779_v56 = vld [vmem:[%s5125_s12 + $0x1a0] sm:$0xf0] }
 0x17c   : > { %v1335_v17 = vadd.f32 %v1334_v12, %v1306_v62  ;;  %3133 = vmatpush.bf16.msrb.mxu1 %v4529_v60 }
 0x17e   : > { %v6770_v25 = vpop.f32.mrf.mxu1  ;;  %v1381_v5 = vmul.f32 %v1373_v16, %v1335_v17  ;;  %v4454_v16 = vld [vmem:[%s7467_s1 + $0xe8] sm:$0xf0]  ;;  %v4797_v17 = vld [vmem:[%s7467_s1 + $0x54] sm:$0xf] }
 0x180   : > { %v1397_v18 = vadd.f32 %v1389_v19, %v1381_v5  ;;  %v1307_v23 = vpop.f32.mrf.mxu2  ;;  %v4457_v5 = vor.u32 %v4815_v13, %v4454_v16  ;;  %3134 = vmatpush.bf16.msrb.mxu1 %v4521_v50 }
 0x181   : > { %v1308_v35 = vadd.f32 %v1307_v23, %v6454_v52  ;;  %v4817_v52 = vld [vmem:[%s7467_s1 + $0xf4] sm:$0xf]  ;;  %v4292_v23 = vld [vmem:[%s5125_s12 + $0x180] sm:$0xf] }
 0x182   : > { %1405 = vst [vmem:[%s5983_s6 + $0xa8] sm:$0xff] %v1397_v18  ;;  %v4465_v46 = vor.u32 %v4817_v52, %v4462_v44  ;;  %v4385_v18 = vor.u32 %v4797_v17, %v4382_v8  ;;  %v4446_v52 = vld [vmem:[%s7467_s1 + $0xd8] sm:$0xf0]  ;;  %v4795_v44 = vld [vmem:[%s7467_s1 + $0x44] sm:$0xf] }
 0x183   : > { %v1336_v26 = vpop.f32.mrf.mxu3  ;;  %v1800_v9 = vpop.f32.mrf.mxu0  ;;  %v4377_v60 = vor.u32 %v4795_v44, %v4374_v49  ;;  %v1817_v44 = vadd.f32 %v6597_v21, %v6586_v57  ;;  %v4304_v49 = vld [vmem:[%s5125_s12 + $0x198] sm:$0xf]  ;;  %v1956_v57 = vld [vmem:[%s7468_s2 + $0xd0] sm:$0xff] }
 0x184   : > { %v1337_v36 = vadd.f32 %v1336_v26, %v1308_v35  ;;  %3104 = vmatpush.bf16.msrb.mxu0 %v4465_v46  ;;  %v4776_v35 = vld [vmem:[%s5125_s12 + $0x188] sm:$0xf0]  ;;  %v4509_v26 = vor.u32 %v4830_v32, %v4508_v7  ;;  %3077 = vmatpush.bf16.msrb.mxu3 %v4385_v18 }
 0x185   : > { %2405 = vmatmul.bf16.gmra.mxu2 %v4089_v29  ;;  %3135 = vmatpush.bf16.msrb.mxu1 %v4513_v61  ;;  %v4502_v18 = vld [vmem:[%s7467_s1 + $0x148] sm:$0xf0]  ;;  %v4778_v61 = vld [vmem:[%s5125_s12 + $0x19c] sm:$0xf] }
 0x186   : > { %v1829_v37 = vpop.f32.mrf.mxu1  ;;  %v1383_v30 = vmul.f32 %v1375_v53, %v1337_v36  ;;  %2463 = vmatmul.bf16.gmra.mxu0 %v6785_v54  ;;  %v4775_v53 = vld [vmem:[%s5125_s12 + $0x184] sm:$0xf]  ;;  %v4294_v36 = vld [vmem:[%s5125_s12 + $0x18c] sm:$0xf0]  ;;  %3048 = vmatpush.bf16.msrb.mxu2 %v4509_v26 }
 0x187   : > { %v6799_v40 = vadd.f32 %v1829_v37, %v1800_v9  ;;  %v6855_v9 = vor.u32 %v4776_v35, %v4292_v23  ;;  %v4813_v37 = vld [vmem:[%s7467_s1 + $0xd4] sm:$0xf]  ;;  %v4505_v35 = vor.u32 %v4827_v59, %v4502_v18  ;;  %v4492_v26 = vld [vmem:[%s7467_s1 + $0x130] sm:$0xf]  ;;  %v4484_v18 = vld [vmem:[%s7467_s1 + $0x120] sm:$0xf] }
 0x188   : > { %2434 = vmatmul.bf16.gmra.mxu3 %v6783_v34  ;;  %v1399_v31 = vadd.f32 %v1391_v42, %v1383_v30  ;;  %v1310_v63 = vpop.f32.mrf.mxu2  ;;  %3105 = vmatpush.bf16.msrb.mxu0 %v4457_v5  ;;  %v6866_v30 = vor.u32 %v4775_v53, %v4294_v36  ;;  %v4449_v46 = vor.u32 %v4813_v37, %v4446_v52  ;;  %v4811_v5 = vld [vmem:[%s7467_s1 + $0xc4] sm:$0xf]  ;;  %v4826_v53 = vld [vmem:[%s7467_s1 + $0x134] sm:$0xf0] }
 0x189   : > { %2492 = vmatmul.bf16.gmra.mxu1 %v4089_v29  ;;  %3078 = vmatpush.bf16.msrb.mxu3 %v4377_v60  ;;  %v4493_v37 = vor.u32 %v4826_v53, %v4492_v26  ;;  %v1965_v26 = vld [vmem:[%s7469_s3 + $0xd8] sm:$0xff] }
 0x18a   : > { %1407 = vst [vmem:[%s5983_s6 + $0xb8] sm:$0xff] %v1399_v31  ;;  %v4828_v31 = vld [vmem:[%s7467_s1 + $0x144] sm:$0xf0]  ;;  %3136 = vmatpush.bf16.msrb.mxu1 %v4505_v35 }
 0x18b   : > { %v6819_v6 = vpop.f32.mrf.mxu3  ;;  %v1802_v62 = vpop.f32.mrf.mxu0  ;;  %v4501_v2 = vor.u32 %v4828_v31, %v4500_v15  ;;  %v4306_v15 = vld [vmem:[%s5125_s12 + $0x1a4] sm:$0xf0] }
 0x18c   : > { %3106 = vmatpush.bf16.msrb.mxu0 %v4449_v46  ;;  %v1963_v46 = vld [vmem:[%s7469_s3 + $0xc8] sm:$0xff] }
 0x18d   : > { %3049 = vmatpush.bf16.msrb.mxu2 %v4501_v2 }
 0x18e   : > { %v1831_v12 = vpop.f32.mrf.mxu1 }
 0x18f   : > { %v6830_v19 = vadd.f32 %v1831_v12, %v1802_v62  ;;  %v1815_v62 = vadd.f32 %v6563_v41, %v6553_v33  ;;  %v1311_v12 = vadd.f32 %v1310_v63, %v6474_v10  ;;  %v4438_v33 = vld [vmem:[%s7467_s1 + $0xc8] sm:$0xf0]  ;;  %v4793_v10 = vld [vmem:[%s7467_s1 + $0x34] sm:$0xf] }
 0x190   : > { %v6849_v29 = vpop.f32.mrf.mxu2  ;;  %v4441_v8 = vor.u32 %v4811_v5, %v4438_v33  ;;  %v4369_v23 = vor.u32 %v4793_v10, %v4366_v55  ;;  %v4358_v5 = vld [vmem:[%s7467_s1 + $0x28] sm:$0xf0]  ;;  %v4825_v33 = vld [vmem:[%s7467_s1 + $0x134] sm:$0xf]  ;;  %v4494_v10 = vld [vmem:[%s7467_s1 + $0x138] sm:$0xf0] }
 0x191   : > { %v1340_v50 = vadd.f32 %v6819_v6, %v1311_v12  ;;  %v1955_v6 = vld [vmem:[%s7468_s2 + $0xc8] sm:$0xff]  ;;  %3050 = vmatpush.bf16.msrb.mxu2 %v4493_v37  ;;  %v1313_v0 = vadd.f32 %v6849_v29, %v6508_v1  ;;  %v6940_v12 = vor.u32 %v4779_v56, %v4304_v49  ;;  %v4809_v1 = vld [vmem:[%s7467_s1 + $0xb4] sm:$0xf]  ;;  %v4430_v29 = vld [vmem:[%s7467_s1 + $0xb8] sm:$0xf0]  ;;  %v4497_v59 = vor.u32 %v4825_v33, %v4494_v10 }
 0x192   : > { %3107 = vmatpush.bf16.msrb.mxu0 %v4441_v8  ;;  %3079 = vmatpush.bf16.msrb.mxu3 %v4369_v23  ;;  %v1820_v23 = vadd.f32 %v6644_v3, %v6633_v27  ;;  %v4807_v37 = vld [vmem:[%s7467_s1 + $0xa4] sm:$0xf]  ;;  %v4789_v49 = vld [vmem:[%s7467_s1 + $0x14] sm:$0xf]  ;;  %v4350_v56 = vld [vmem:[%s7467_s1 + $0x18] sm:$0xf0] }
 0x193   : > { %v6853_v42 = vpop.f32.mrf.mxu3  ;;  %v1901_v45 = vpop.f32.mrf.mxu0  ;;  %3137 = vmatpush.bf16.msrb.mxu1 %v4497_v59  ;;  %v4342_v33 = vld [vmem:[%s7467_s1 + $0x8] sm:$0xf0]  ;;  %v4821_v10 = vld [vmem:[%s7467_s1 + $0x114] sm:$0xf]  ;;  %v1822_v59 = vadd.f32 %v6686_v4, %v6675_v47  ;;  %v4803_v47 = vld [vmem:[%s7467_s1 + $0x84] sm:$0xf] }
 0x194   : > { %v4406_v4 = vld [vmem:[%s7467_s1 + $0x88] sm:$0xf0] }
 0x195   : > { %2506 = vmatmul.bf16.vlgmr.msra.gmra.mxu2 %v6540_v43  ;;  %v1954_v43 = vld [vmem:[%s7468_s2 + $0xc0] sm:$0xff] }
 0x196   : > { %v1930_v58 = vpop.f32.mrf.mxu1  ;;  %2996 = vmatmul.bf16.vlgmr.msra.gmra.mxu0 %v6855_v9 }
 0x198   : > { %2535 = vmatmul.bf16.vlgmr.msra.gmra.mxu3 %v6542_v24  ;;  %v1843_v13 = vpop.f32.mrf.mxu2 }
 0x199   : > { %3025 = vmatmul.bf16.vlgmr.msra.gmra.mxu1 %v6866_v30  ;;  %v1844_v16 = vadd.f32 %v1843_v13, %v1815_v62  ;;  %v4791_v13 = vld [vmem:[%s7467_s1 + $0x24] sm:$0xf] }
 0x19a   : > { %v4361_v55 = vor.u32 %v4791_v13, %v4358_v5  ;;  %v4805_v13 = vld [vmem:[%s7467_s1 + $0x94] sm:$0xf]  ;;  %v4787_v5 = vld [vmem:[%s7467_s1 + $0x4] sm:$0xf] }
 0x19b   : > { %v1872_v17 = vpop.f32.mrf.mxu3  ;;  %v1950_v41 = vadd.f32 %v1844_v16, %v6506_v22  ;;  %v1903_v63 = vpop.f32.mrf.mxu0  ;;  %v1962_v22 = vld [vmem:[%s7469_s3 + $0xc0] sm:$0xff] }
 0x19c   : > { %v1902_v24 = vadd.f32 %v1901_v45, %v1872_v17  ;;  %v6952_v17 = vor.u32 %v4778_v61, %v4306_v15  ;;  %3080 = vmatpush.bf16.msrb.mxu3 %v4361_v55  ;;  %v4353_v61 = vor.u32 %v4789_v49, %v4350_v56  ;;  %v4486_v15 = vld [vmem:[%s7467_s1 + $0x128] sm:$0xf0]  ;;  %v4820_v55 = vld [vmem:[%s7467_s1 + $0x104] sm:$0xf0] }
 0x19d   : > { %v1958_v36 = vmul.f32 %v1954_v43, %v1950_v41  ;;  %v1342_v41 = vadd.f32 %v6853_v42, %v1313_v0  ;;  %v1957_v42 = vld [vmem:[%s7468_s2 + $0xd8] sm:$0xff]  ;;  %v4823_v0 = vld [vmem:[%s7467_s1 + $0x124] sm:$0xf] }
 0x19e   : > { %v1931_v7 = vadd.f32 %v1930_v58, %v1902_v24  ;;  %v1932_v32 = vpop.f32.mrf.mxu1  ;;  %v4433_v24 = vor.u32 %v4809_v1, %v4430_v29  ;;  %v4489_v1 = vor.u32 %v4823_v0, %v4486_v15  ;;  %v1825_v15 = vadd.f32 %v6744_v28, %v6739_v48  ;;  %v1994_v48 = vld [vmem:[%s7469_s3 + $0x100] sm:$0xff] }
 0x19f   : > { %v1966_v45 = vadd.f32 %v1962_v22, %v1958_v36  ;;  %v1974_v36 = vld [vmem:[%s7468_s2 + $0xe0] sm:$0xff] }
 0x1a0   : > { %v1951_v52 = vadd.f32 %v1931_v7, %v1340_v50  ;;  %v1845_v60 = vpop.f32.mrf.mxu2  ;;  %v4824_v50 = vld [vmem:[%s7467_s1 + $0x124] sm:$0xf0]  ;;  %3108 = vmatpush.bf16.msrb.mxu0 %v4433_v24  ;;  %3081 = vmatpush.bf16.msrb.mxu3 %v4353_v61 }
 0x1a1   : > { %1970 = vst [vmem:[%s5983_s6 + $0xc0] sm:$0xff] %v1966_v45  ;;  %v1846_v31 = vadd.f32 %v1845_v60, %v1817_v44  ;;  %v4485_v7 = vor.u32 %v4824_v50, %v4484_v18  ;;  %3138 = vmatpush.bf16.msrb.mxu1 %v4489_v1  ;;  %v4316_v18 = vld [vmem:[%s5125_s12 + $0x1b0] sm:$0xf]  ;;  %v4782_v50 = vld [vmem:[%s5125_s12 + $0x1b8] sm:$0xf0] }
 0x1a2   : > { %v1959_v58 = vmul.f32 %v1955_v6, %v1951_v52  ;;  %v1975_v6 = vld [vmem:[%s7468_s2 + $0xe8] sm:$0xff] }
 0x1a3   : > { %v1874_v21 = vpop.f32.mrf.mxu3  ;;  %v1952_v16 = vadd.f32 %v1846_v31, %v6561_v38  ;;  %v1906_v43 = vpop.f32.mrf.mxu0  ;;  %v1964_v38 = vld [vmem:[%s7469_s3 + $0xd0] sm:$0xff]  ;;  %3051 = vmatpush.bf16.msrb.mxu2 %v4485_v7  ;;  %v4422_v52 = vld [vmem:[%s7467_s1 + $0xa8] sm:$0xf0] }
 0x1a4   : > { %v1967_v2 = vadd.f32 %v1963_v46, %v1959_v58  ;;  %v1904_v62 = vadd.f32 %v1903_v63, %v1874_v21  ;;  %v4425_v46 = vor.u32 %v4807_v37, %v4422_v52  ;;  %v4476_v31 = vld [vmem:[%s7467_s1 + $0x110] sm:$0xf]  ;;  %v4470_v37 = vld [vmem:[%s7467_s1 + $0x108] sm:$0xf0] }
 0x1a5   : > { %v1960_v22 = vmul.f32 %v1956_v57, %v1952_v16  ;;  %2511 = vmatmul.bf16.gmra.mxu2 %v6619_v51  ;;  %v4822_v57 = vld [vmem:[%s7467_s1 + $0x114] sm:$0xf0]  ;;  %v4414_v16 = vld [vmem:[%s7467_s1 + $0x98] sm:$0xf0] }
 0x1a6   : > { %1971 = vst [vmem:[%s5983_s6 + $0xc8] sm:$0xff] %v1967_v2  ;;  %v1933_v63 = vadd.f32 %v1932_v32, %v1904_v62  ;;  %v1935_v8 = vpop.f32.mrf.mxu1  ;;  %3001 = vmatmul.bf16.gmra.mxu0 %v6940_v12  ;;  %v1991_v2 = vld [vmem:[%s7469_s3 + $0xe8] sm:$0xff]  ;;  %v4477_v29 = vor.u32 %v4822_v57, %v4476_v31  ;;  %v4417_v24 = vor.u32 %v4805_v13, %v4414_v16 }
 0x1a7   : > { %v1968_v35 = vadd.f32 %v1964_v38, %v1960_v22  ;;  %3109 = vmatpush.bf16.msrb.mxu0 %v4425_v46  ;;  %v4345_v38 = vor.u32 %v4787_v5, %v4342_v33  ;;  %v1827_v5 = vadd.f32 %v6770_v25, %v6765_v11  ;;  %v4328_v33 = vld [vmem:[%s5125_s12 + $0x1c8] sm:$0xf] }
 0x1a8   : > { %v1953_v32 = vadd.f32 %v1933_v63, %v1342_v41  ;;  %2540 = vmatmul.bf16.gmra.mxu3 %v6621_v20  ;;  %v1848_v53 = vpop.f32.mrf.mxu2  ;;  %v1990_v20 = vld [vmem:[%s7469_s3 + $0xe0] sm:$0xff]  ;;  %3052 = vmatpush.bf16.msrb.mxu2 %v4477_v29  ;;  %v4478_v63 = vld [vmem:[%s7467_s1 + $0x118] sm:$0xf0] }
 0x1a9   : > { %3030 = vmatmul.bf16.gmra.mxu1 %v6952_v17  ;;  %1972 = vst [vmem:[%s5983_s6 + $0xd0] sm:$0xff] %v1968_v35  ;;  %v1849_v27 = vadd.f32 %v1848_v53, %v1820_v23  ;;  %v4481_v22 = vor.u32 %v4821_v10, %v4478_v63  ;;  %v1976_v23 = vld [vmem:[%s7468_s2 + $0xf0] sm:$0xff]  ;;  %3082 = vmatpush.bf16.msrb.mxu3 %v4345_v38 }
 0x1aa   : > { %v1961_v51 = vmul.f32 %v1957_v42, %v1953_v32  ;;  %v4781_v35 = vld [vmem:[%s5125_s12 + $0x1b4] sm:$0xf] }
 0x1ab   : > { %v1877_v3 = vpop.f32.mrf.mxu3  ;;  %v1982_v58 = vmul.f32 %v1974_v36, %v1849_v27  ;;  %v1908_v60 = vpop.f32.mrf.mxu0  ;;  %3110 = vmatpush.bf16.msrb.mxu0 %v4417_v24  ;;  %v4819_v36 = vld [vmem:[%s7467_s1 + $0x104] sm:$0xf]  ;;  %3139 = vmatpush.bf16.msrb.mxu1 %v4481_v22  ;;  %v4785_v10 = vld [vmem:[%s5125_s12 + $0x1d0] sm:$0xf0] }
 0x1ac   : > { %v1969_v44 = vadd.f32 %v1965_v26, %v1961_v51  ;;  %v1907_v45 = vadd.f32 %v1906_v43, %v1877_v3  ;;  %v4318_v26 = vld [vmem:[%s5125_s12 + $0x1bc] sm:$0xf0]  ;;  %v7071_v3 = vor.u32 %v4782_v50, %v4316_v18  ;;  %v4473_v0 = vor.u32 %v4819_v36, %v4470_v37  ;;  %v1980_v63 = vld [vmem:[%s7468_s2 + $0x110] sm:$0xff] }
 0x1ad   : > { %v1998_v43 = vadd.f32 %v1990_v20, %v1982_v58  ;;  %v1992_v20 = vld [vmem:[%s7469_s3 + $0xf0] sm:$0xff]  ;;  %v7079_v46 = vor.u32 %v4781_v35, %v4318_v26  ;;  %v7118_v25 = vor.u32 %v4785_v10, %v4328_v33 }
 0x1ae   : > { %1973 = vst [vmem:[%s5983_s6 + $0xd8] sm:$0xff] %v1969_v44  ;;  %v1936_v21 = vadd.f32 %v1935_v8, %v1907_v45  ;;  %v1937_v62 = vpop.f32.mrf.mxu1  ;;  %v4468_v8 = vld [vmem:[%s7467_s1 + $0x100] sm:$0xf]  ;;  %v1977_v44 = vld [vmem:[%s7468_s2 + $0xf8] sm:$0xff]  ;;  %v1996_v50 = vld [vmem:[%s7469_s3 + $0x110] sm:$0xff] }
 0x1af   : > { %2006 = vst [vmem:[%s5983_s6 + $0xe0] sm:$0xff] %v1998_v43  ;;  %v4469_v42 = vor.u32 %v4820_v55, %v4468_v8  ;;  %3140 = vmatpush.bf16.msrb.mxu1 %v4473_v0  ;;  %v1995_v43 = vld [vmem:[%s7469_s3 + $0x108] sm:$0xff]  ;;  %v4330_v55 = vld [vmem:[%s5125_s12 + $0x1d4] sm:$0xf0]  ;;  %v2562_v33 = vld [vmem:[%s7468_s2 + $0x130] sm:$0xff] }
 0x1b0   : > { %v1983_v41 = vmul.f32 %v1975_v6, %v1936_v21  ;;  %v1850_v32 = vpop.f32.mrf.mxu2  ;;  %v4409_v6 = vor.u32 %v4803_v47, %v4406_v4  ;;  %v1978_v21 = vld [vmem:[%s7468_s2 + $0x100] sm:$0xff]  ;;  %v4784_v8 = vld [vmem:[%s5125_s12 + $0x1cc] sm:$0xf] }
 0x1b1   : > { %v1851_v51 = vadd.f32 %v1850_v32, %v1822_v59  ;;  %3053 = vmatpush.bf16.msrb.mxu2 %v4469_v42  ;;  %v1981_v42 = vld [vmem:[%s7468_s2 + $0x118] sm:$0xff]  ;;  %v7123_v32 = vor.u32 %v4784_v8, %v4330_v55 }
 0x1b2   : > { %v1999_v7 = vadd.f32 %v1991_v2, %v1983_v41  ;;  %3111 = vmatpush.bf16.msrb.mxu0 %v4409_v6 }
 0x1b3   : > { %v1879_v53 = vpop.f32.mrf.mxu3  ;;  %v1984_v52 = vmul.f32 %v1976_v23, %v1851_v51  ;;  %v1911_v45 = vpop.f32.mrf.mxu0  ;;  %v1997_v51 = vld [vmem:[%s7469_s3 + $0x118] sm:$0xff] }
 0x1b4   : > { %2007 = vst [vmem:[%s5983_s6 + $0xe8] sm:$0xff] %v1999_v7  ;;  %v1909_v27 = vadd.f32 %v1908_v60, %v1879_v53  ;;  %v1993_v60 = vld [vmem:[%s7469_s3 + $0xf8] sm:$0xff] }
 0x1b5   : > { %v2000_v58 = vadd.f32 %v1992_v20, %v1984_v52  ;;  %2516 = vmatmul.bf16.gmra.mxu2 %v6729_v39  ;;  %v4300_v52 = vld [vmem:[%s5125_s12 + $0x188] sm:$0xf] }
 0x1b6   : > { %v1938_v49 = vadd.f32 %v1937_v62, %v1909_v27  ;;  %v1940_v56 = vpop.f32.mrf.mxu1  ;;  %3006 = vmatmul.bf16.gmra.mxu0 %v7071_v3  ;;  %v1979_v62 = vld [vmem:[%s7468_s2 + $0x108] sm:$0xff] }
 0x1b7   : > { %2008 = vst [vmem:[%s5983_s6 + $0xf0] sm:$0xff] %v2000_v58 }
 0x1b8   : > { %v1985_v61 = vmul.f32 %v1977_v44, %v1938_v49  ;;  %2545 = vmatmul.bf16.gmra.mxu3 %v6731_v14  ;;  %v1853_v57 = vpop.f32.mrf.mxu2  ;;  %v4777_v44 = vld [vmem:[%s5125_s12 + $0x190] sm:$0xf0] }
 0x1b9   : > { %3035 = vmatmul.bf16.gmra.mxu1 %v7079_v46  ;;  %v1854_v39 = vadd.f32 %v1853_v57, %v1825_v15  ;;  %v4301_v49 = vor.u32 %v4777_v44, %v4300_v52 }
 0x1ba   : > { %v2001_v31 = vadd.f32 %v1993_v60, %v1985_v61 }
 0x1bb   : > { %v1882_v14 = vpop.f32.mrf.mxu3  ;;  %v1986_v2 = vmul.f32 %v1978_v21, %v1854_v39  ;;  %v1913_v1 = vpop.f32.mrf.mxu0 }
 0x1bc   : > { %2009 = vst [vmem:[%s5983_s6 + $0xf8] sm:$0xff] %v2001_v31  ;;  %v1912_v28 = vadd.f32 %v1911_v45, %v1882_v14  ;;  %v2560_v14 = vld [vmem:[%s7468_s2 + $0x120] sm:$0xff] }
 0x1bd   : > { %v2002_v16 = vadd.f32 %v1994_v48, %v1986_v2 }
 0x1be   : > { %v1941_v29 = vadd.f32 %v1940_v56, %v1912_v28  ;;  %v1942_v13 = vpop.f32.mrf.mxu1  ;;  %v4312_v28 = vld [vmem:[%s5125_s12 + $0x1a0] sm:$0xf] }
 0x1bf   : > { %2010 = vst [vmem:[%s5983_s6 + $0x100] sm:$0xff] %v2002_v16 }
 0x1c0   : > { %v1987_v24 = vmul.f32 %v1979_v62, %v1941_v29  ;;  %v1855_v38 = vpop.f32.mrf.mxu2 }
 0x1c1   : > { %v1856_v59 = vadd.f32 %v1855_v38, %v1827_v5 }
 0x1c2   : > { %v2003_v41 = vadd.f32 %v1995_v43, %v1987_v24 }
 0x1c3   : > { %v1884_v18 = vpop.f32.mrf.mxu3  ;;  %v1988_v22 = vmul.f32 %v1980_v63, %v1856_v59  ;;  %v1916_v7 = vpop.f32.mrf.mxu0  ;;  %v2580_v59 = vld [vmem:[%s7468_s2 + $0x140] sm:$0xff] }
 0x1c4   : > { %2011 = vst [vmem:[%s5983_s6 + $0x108] sm:$0xff] %v2003_v41  ;;  %v1914_v11 = vadd.f32 %v1913_v1, %v1884_v18 }
 0x1c5   : > { %v2004_v26 = vadd.f32 %v1996_v50, %v1988_v22  ;;  %2521 = vmatmul.bf16.gmra.mxu2 %v6783_v34  ;;  %v2596_v50 = vld [vmem:[%s7469_s3 + $0x140] sm:$0xff]  ;;  %v4324_v22 = vld [vmem:[%s5125_s12 + $0x1b8] sm:$0xf] }
 0x1c6   : > { %v1943_v23 = vadd.f32 %v1942_v13, %v1914_v11  ;;  %v1945_v35 = vpop.f32.mrf.mxu1  ;;  %3011 = vmatmul.bf16.gmra.mxu0 %v7118_v25 }
 0x1c7   : > { %2012 = vst [vmem:[%s5983_s6 + $0x110] sm:$0xff] %v2004_v26 }
 0x1c8   : > { %v1989_v53 = vmul.f32 %v1981_v42, %v1943_v23  ;;  %2550 = vmatmul.bf16.gmra.mxu3 %v6785_v54  ;;  %v1858_v4 = vpop.f32.mrf.mxu2  ;;  %v4783_v42 = vld [vmem:[%s5125_s12 + $0x1c0] sm:$0xf0] }
 0x1c9   : > { %3040 = vmatmul.bf16.gmra.mxu1 %v7123_v32  ;;  %v1859_v57 = vadd.f32 %v1858_v4, %v6799_v40  ;;  %v4325_v26 = vor.u32 %v4783_v42, %v4324_v22 }
 0x1ca   : > { %v2005_v47 = vadd.f32 %v1997_v51, %v1989_v53  ;;  %v2582_v53 = vld [vmem:[%s7468_s2 + $0x150] sm:$0xff] }
 0x1cb   : > { %v1887_v36 = vpop.f32.mrf.mxu3  ;;  %v1918_v27 = vpop.f32.mrf.mxu0 }
 0x1cc   : > { %2013 = vst [vmem:[%s5983_s6 + $0x118] sm:$0xff] %v2005_v47  ;;  %v1917_v20 = vadd.f32 %v1916_v7, %v1887_v36 }
 0x1ce   : > { %v7134_v6 = vadd.f32 %v1945_v35, %v1917_v20  ;;  %v1947_v37 = vpop.f32.mrf.mxu1  ;;  %v2598_v20 = vld [vmem:[%s7469_s3 + $0x150] sm:$0xff] }
 0x1d0   : > { %v1860_v34 = vpop.f32.mrf.mxu2 }
 0x1d1   : > { %v1861_v43 = vadd.f32 %v1860_v34, %v6830_v19  ;;  %v2570_v19 = vld [vmem:[%s7469_s3 + $0x130] sm:$0xff] }
 0x1d3   : > { %v1889_v45 = vpop.f32.mrf.mxu3  ;;  %v2449_v56 = vpop.f32.mrf.mxu0 }
 0x1d4   : > { %v1919_v54 = vadd.f32 %v1918_v27, %v1889_v45  ;;  %v2584_v45 = vld [vmem:[%s7468_s2 + $0x160] sm:$0xff] }
 0x1d5   : > { %3054 = vmatmul.bf16.vlgmr.msrb.gmra.mxu2 %v4301_v49 }
 0x1d6   : > { %v7138_v0 = vadd.f32 %v1947_v37, %v1919_v54  ;;  %v7140_v58 = vpop.f32.mrf.mxu1  ;;  %3112 = vmatmul.bf16.vlgmr.msrb.gmra.mxu0 %v6866_v30  ;;  %v2568_v30 = vld [vmem:[%s7469_s3 + $0x120] sm:$0xff] }
 0x1d8   : > { %3083 = vmatmul.bf16.vlgmr.msrb.gmra.mxu3 %v6855_v9  ;;  %v2391_v60 = vpop.f32.mrf.mxu2  ;;  %v4780_v9 = vld [vmem:[%s5125_s12 + $0x1a8] sm:$0xf0] }
 0x1d9   : > { %3141 = vmatmul.bf16.vlgmr.msrb.gmra.mxu1 %v4301_v49  ;;  %v4313_v29 = vor.u32 %v4780_v9, %v4312_v28 }
 0x1db   : > { %v2420_v61 = vpop.f32.mrf.mxu3  ;;  %v2451_v31 = vpop.f32.mrf.mxu0 }
 0x1dc   : > { %v2421_v15 = vadd.f32 %v2420_v61, %v2391_v60  ;;  %v4336_v60 = vld [vmem:[%s5125_s12 + $0x1d0] sm:$0xf]  ;;  %v4786_v61 = vld [vmem:[%s5125_s12 + $0x1d8] sm:$0xf0]  ;;  %s3261_s12 = sshll.u32 %s3258_s23, 4  ;;  %s3262_s12 = int_to_ptr.hbm [resolvable:$true] %s3261_s12 }
 0x1dd   : > { %s4908_s7 = sshra.s32 %s3262_s12, 4  ;;  %s4909_s7 = int_to_ptr.hbm [resolvable:$true] %s4908_s7 }
 0x1de   : > { %v2450_v21 = vadd.f32 %v2449_v56, %v2421_v15  ;;  %v7145_v39 = vpop.f32.mrf.mxu1  ;;  %s4910_s9 = scalar_lea.hbm %s4909_s7, 512  ;;  %p4915_p0 = scmp.lt.s32.totalorder %s4909_s7, %s7470_s4 }
 0x1df   : > { %p4911_p11 = scmp.ne.s32.totalorder %s4909_s7, %s4910_s9  ;;  %p4916_p1 = scmp.lt.s32.totalorder %s4914_s13, %s4910_s9 }
 0x1e0   : > { %v2556_v48 = vadd.f32 %v2450_v21, %v1859_v57  ;;  %v2393_v62 = vpop.f32.mrf.mxu2  ;;  %v4337_v21 = vor.u32 %v4786_v61, %v4336_v60  ;;  %v2583_v60 = vld [vmem:[%s7468_s2 + $0x158] sm:$0xff] }
 0x1e1   : > { %p4912_p12 = pnand %p4911_p11, %p5023_p5  ;;  %p4917_p2 = por %p4916_p1, %p4915_p0 }
 0x1e2   : > { %v2564_v2 = vmul.f32 %v2560_v14, %v2556_v48  ;;  %v2586_v48 = vld [vmem:[%s7468_s2 + $0x170] sm:$0xff] }
 0x1e3   : > { %v2422_v1 = vpop.f32.mrf.mxu3  ;;  %v2454_v16 = vpop.f32.mrf.mxu0  ;;  %p4913_p13 = pneg %p4912_p12 }
 0x1e4   : > { %v2572_v40 = vadd.f32 %v2568_v30, %v2564_v2  ;;  %v2423_v13 = vadd.f32 %v2422_v1, %v2393_v62  ;;  %v2602_v2 = vld [vmem:[%s7469_s3 + $0x170] sm:$0xff] }
 0x1e5   : > { %3059 = vmatmul.bf16.gmra.mxu2 %v4313_v29  ;;  %p4918_p3 = pnand %p4917_p2, %p4913_p13 }
 0x1e6   : > { %2576 = vst [vmem:[%s5983_s6 + $0x120] sm:$0xff] %v2572_v40  ;;  %v2452_v24 = vadd.f32 %v2451_v31, %v2423_v13  ;;  %v7157_v5 = vpop.f32.mrf.mxu1  ;;  %3117 = vmatmul.bf16.gmra.mxu0 %v6952_v17 }
 0x1e8   : > { %v2558_v10 = vadd.f32 %v2452_v24, %v1861_v43  ;;  %3088 = vmatmul.bf16.gmra.mxu3 %v6940_v12  ;;  %v2396_v38 = vpop.f32.mrf.mxu2 }
 0x1e9   : > { %3146 = vmatmul.bf16.gmra.mxu1 %v4313_v29 }
 0x1ea   : > { %v2566_v41 = vmul.f32 %v2562_v33, %v2558_v10 }
 0x1eb   : > { %v2425_v63 = vpop.f32.mrf.mxu3  ;;  %v2456_v12 = vpop.f32.mrf.mxu0 }
 0x1ec   : > { %v2574_v8 = vadd.f32 %v2570_v19, %v2566_v41  ;;  %v2426_v55 = vadd.f32 %v2425_v63, %v2396_v38 }
 0x1ee   : > { %2578 = vst [vmem:[%s5983_s6 + $0x130] sm:$0xff] %v2574_v8  ;;  %v2455_v18 = vadd.f32 %v2454_v16, %v2426_v55  ;;  %v7171_v17 = vpop.f32.mrf.mxu1 }
 0x1f0   : > { %v2588_v11 = vmul.f32 %v2580_v59, %v2455_v18  ;;  %v2398_v23 = vpop.f32.mrf.mxu2 }
 0x1f2   : > { %v2604_v7 = vadd.f32 %v2596_v50, %v2588_v11  ;;  %v2569_v11 = vld [vmem:[%s7469_s3 + $0x128] sm:$0xff] }
 0x1f3   : > { %v2427_v35 = vpop.f32.mrf.mxu3  ;;  %v2459_v47 = vpop.f32.mrf.mxu0 }
 0x1f4   : > { %2612 = vst [vmem:[%s5983_s6 + $0x140] sm:$0xff] %v2604_v7  ;;  %v2428_v51 = vadd.f32 %v2427_v35, %v2398_v23 }
 0x1f5   : > { %3064 = vmatmul.bf16.gmra.mxu2 %v4325_v26 }
 0x1f6   : > { %v2457_v4 = vadd.f32 %v2456_v12, %v2428_v51  ;;  %v7182_v36 = vpop.f32.mrf.mxu1  ;;  %3122 = vmatmul.bf16.gmra.mxu0 %v7079_v46  ;;  %v2561_v12 = vld [vmem:[%s7468_s2 + $0x128] sm:$0xff]  ;;  %v2563_v51 = vld [vmem:[%s7468_s2 + $0x138] sm:$0xff] }
 0x1f8   : > { %v2590_v27 = vmul.f32 %v2582_v53, %v2457_v4  ;;  %3093 = vmatmul.bf16.gmra.mxu3 %v7071_v3  ;;  %v2401_v52 = vpop.f32.mrf.mxu2  ;;  %v2600_v3 = vld [vmem:[%s7469_s3 + $0x160] sm:$0xff] }
 0x1f9   : > { %3151 = vmatmul.bf16.gmra.mxu1 %v4325_v26 }
 0x1fa   : > { %v2606_v37 = vadd.f32 %v2598_v20, %v2590_v27 }
 0x1fb   : > { %v2430_v44 = vpop.f32.mrf.mxu3  ;;  %v2461_v49 = vpop.f32.mrf.mxu0 }
 0x1fc   : > { %2614 = vst [vmem:[%s5983_s6 + $0x150] sm:$0xff] %v2606_v37  ;;  %v2431_v34 = vadd.f32 %v2430_v44, %v2401_v52  ;;  %v2581_v52 = vld [vmem:[%s7468_s2 + $0x148] sm:$0xff] }
 0x1fe   : > { %v2460_v54 = vadd.f32 %v2459_v47, %v2431_v34  ;;  %v7193_v56 = vpop.f32.mrf.mxu1  ;;  %v2571_v47 = vld [vmem:[%s7469_s3 + $0x138] sm:$0xff] }
 0x200   : > { %v2592_v46 = vmul.f32 %v2584_v45, %v2460_v54  ;;  %v2403_v31 = vpop.f32.mrf.mxu2 }
 0x202   : > { %v2608_v15 = vadd.f32 %v2600_v3, %v2592_v46 }
 0x203   : > { %v2432_v57 = vpop.f32.mrf.mxu3  ;;  %v2464_v28 = vpop.f32.mrf.mxu0 }
 0x204   : > { %2616 = vst [vmem:[%s5983_s6 + $0x160] sm:$0xff] %v2608_v15  ;;  %v2433_v14 = vadd.f32 %v2432_v57, %v2403_v31  ;;  %v2599_v31 = vld [vmem:[%s7469_s3 + $0x158] sm:$0xff] }
 0x205   : > { %3069 = vmatmul.bf16.gmra.mxu2 %v4337_v21 }
 0x206   : > { %v2462_v9 = vadd.f32 %v2461_v49, %v2433_v14  ;;  %v7204_v30 = vpop.f32.mrf.mxu1  ;;  %3127 = vmatmul.bf16.gmra.mxu0 %v7123_v32 }
 0x208   : > { %v2594_v62 = vmul.f32 %v2586_v48, %v2462_v9  ;;  %3098 = vmatmul.bf16.gmra.mxu3 %v7118_v25  ;;  %v2406_v29 = vpop.f32.mrf.mxu2  ;;  %v2585_v9 = vld [vmem:[%s7468_s2 + $0x168] sm:$0xff] }
 0x209   : > { %3156 = vmatmul.bf16.gmra.mxu1 %v4337_v21 }
 0x20a   : > { %v2610_v1 = vadd.f32 %v2602_v2, %v2594_v62 }
 0x20b   : > { %v2435_v40 = vpop.f32.mrf.mxu3  ;;  %v2466_v16 = vpop.f32.mrf.mxu0 }
 0x20c   : > { %2618 = vst [vmem:[%s5983_s6 + $0x170] sm:$0xff] %v2610_v1  ;;  %v2436_v13 = vadd.f32 %v2435_v40, %v2406_v29  ;;  %v2601_v1 = vld [vmem:[%s7469_s3 + $0x168] sm:$0xff] }
 0x20e   : > { %v7212_v43 = vadd.f32 %v2464_v28, %v2436_v13  ;;  %v7214_v24 = vpop.f32.mrf.mxu1 }
 0x210   : > { %v2408_v33 = vpop.f32.mrf.mxu2 }
 0x213   : > { %v2437_v10 = vpop.f32.mrf.mxu3  ;;  %v7216_v41 = vpop.f32.mrf.mxu0 }
 0x214   : > { %v2438_v19 = vadd.f32 %v2437_v10, %v2408_v33  ;;  %v2587_v10 = vld [vmem:[%s7468_s2 + $0x178] sm:$0xff] }
 0x216   : > { %v7218_v38 = vadd.f32 %v2466_v16, %v2438_v19  ;;  %v7220_v25 = vpop.f32.mrf.mxu1 }
 0x218   : > { %v2507_v32 = vpop.f32.mrf.mxu2 }
 0x219   : > { %v2508_v63 = vadd.f32 %v2507_v32, %v7140_v58 }
 0x21b   : > { %v2536_v8 = vpop.f32.mrf.mxu3  ;;  %v7223_v59 = vpop.f32.mrf.mxu0 }
 0x21c   : > { %v2537_v55 = vadd.f32 %v2536_v8, %v2508_v63  ;;  %v2603_v63 = vld [vmem:[%s7469_s3 + $0x178] sm:$0xff] }
 0x21e   : > { %v7228_v18 = vpop.f32.mrf.mxu1  ;;  %v2557_v50 = vadd.f32 %v2537_v55, %v7134_v6 }
 0x220   : > { %v2565_v22 = vmul.f32 %v2561_v12, %v2557_v50  ;;  %v2509_v42 = vpop.f32.mrf.mxu2 }
 0x221   : > { %v2510_v58 = vadd.f32 %v2509_v42, %v7145_v39 }
 0x222   : > { %v2573_v7 = vadd.f32 %v2569_v11, %v2565_v22 }
 0x223   : > { %v2538_v23 = vpop.f32.mrf.mxu3  ;;  %v7236_v26 = vpop.f32.mrf.mxu0 }
 0x224   : > { %2577 = vst [vmem:[%s5983_s6 + $0x128] sm:$0xff] %v2573_v7  ;;  %v2539_v35 = vadd.f32 %v2538_v23, %v2510_v58 }
 0x226   : > { %v7241_v6 = vpop.f32.mrf.mxu1  ;;  %v2559_v53 = vadd.f32 %v2539_v35, %v7138_v0  ;;  %v2597_v0 = vld [vmem:[%s7469_s3 + $0x148] sm:$0xff]  ;;  %v3027_v35 = vadd.f32 %v7220_v25, %v7216_v41 }
 0x228   : > { %v2567_v4 = vmul.f32 %v2563_v51, %v2559_v53  ;;  %v2512_v39 = vpop.f32.mrf.mxu2 }
 0x229   : > { %v2513_v27 = vadd.f32 %v2512_v39, %v7157_v5  ;;  %v3166_v39 = vld [vmem:[%s7468_s2 + $0x180] sm:$0xff] }
 0x22a   : > { %v2575_v20 = vadd.f32 %v2571_v47, %v2567_v4 }
 0x22b   : > { %v2541_v37 = vpop.f32.mrf.mxu3  ;;  %v7252_v34 = vpop.f32.mrf.mxu0 }
 0x22c   : > { %2579 = vst [vmem:[%s5983_s6 + $0x138] sm:$0xff] %v2575_v20  ;;  %v2542_v44 = vadd.f32 %v2541_v37, %v2513_v27 }
 0x22e   : > { %v7257_v45 = vpop.f32.mrf.mxu1  ;;  %v2589_v49 = vmul.f32 %v2581_v52, %v2542_v44  ;;  %v3174_v44 = vld [vmem:[%s7469_s3 + $0x180] sm:$0xff] }
 0x230   : > { %v2605_v54 = vadd.f32 %v2597_v0, %v2589_v49  ;;  %v2514_v3 = vpop.f32.mrf.mxu2  ;;  %v3167_v0 = vld [vmem:[%s7468_s2 + $0x188] sm:$0xff] }
 0x231   : > { %v2515_v5 = vadd.f32 %v2514_v3, %v7171_v17 }
 0x232   : > { %2613 = vst [vmem:[%s5983_s6 + $0x148] sm:$0xff] %v2605_v54  ;;  %v3029_v54 = vadd.f32 %v7228_v18, %v7223_v59 }
 0x233   : > { %v2543_v46 = vpop.f32.mrf.mxu3  ;;  %v7264_v15 = vpop.f32.mrf.mxu0 }
 0x234   : > { %v2544_v61 = vadd.f32 %v2543_v46, %v2515_v5 }
 0x236   : > { %v7269_v57 = vpop.f32.mrf.mxu1  ;;  %v2591_v21 = vmul.f32 %v2583_v60, %v2544_v61 }
 0x238   : > { %v2607_v14 = vadd.f32 %v2599_v31, %v2591_v21  ;;  %v2517_v48 = vpop.f32.mrf.mxu2 }
 0x239   : > { %v2518_v17 = vadd.f32 %v2517_v48, %v7182_v36 }
 0x23a   : > { %2615 = vst [vmem:[%s5983_s6 + $0x158] sm:$0xff] %v2607_v14  ;;  %v3168_v14 = vld [vmem:[%s7468_s2 + $0x190] sm:$0xff] }
 0x23b   : > { %v2546_v28 = vpop.f32.mrf.mxu3  ;;  %v7276_v62 = vpop.f32.mrf.mxu0 }
 0x23c   : > { %v2547_v2 = vadd.f32 %v2546_v28, %v2518_v17 }
 0x23e   : > { %v7281_v29 = vpop.f32.mrf.mxu1  ;;  %v2593_v40 = vmul.f32 %v2585_v9, %v2547_v2 }
 0x240   : > { %v2609_v13 = vadd.f32 %v2601_v1, %v2593_v40  ;;  %v2519_v16 = vpop.f32.mrf.mxu2  ;;  %v3169_v1 = vld [vmem:[%s7468_s2 + $0x198] sm:$0xff] }
 0x241   : > { %v2520_v36 = vadd.f32 %v2519_v16, %v7193_v56  ;;  %v3177_v16 = vld [vmem:[%s7469_s3 + $0x198] sm:$0xff] }
 0x242   : > { %2617 = vst [vmem:[%s5983_s6 + $0x168] sm:$0xff] %v2609_v13 }
 0x243   : > { %v2548_v33 = vpop.f32.mrf.mxu3  ;;  %v7288_v32 = vpop.f32.mrf.mxu0 }
 0x244   : > { %v2549_v19 = vadd.f32 %v2548_v33, %v2520_v36 }
 0x246   : > { %v7293_v8 = vpop.f32.mrf.mxu1  ;;  %v2595_v55 = vmul.f32 %v2587_v10, %v2549_v19  ;;  %v3186_v10 = vld [vmem:[%s7468_s2 + $0x1a0] sm:$0xff] }
 0x248   : > { %v2611_v12 = vadd.f32 %v2603_v63, %v2595_v55  ;;  %v2522_v50 = vpop.f32.mrf.mxu2 }
 0x249   : > { %v2523_v51 = vadd.f32 %v2522_v50, %v7204_v30  ;;  %v3187_v50 = vld [vmem:[%s7468_s2 + $0x1a8] sm:$0xff] }
 0x24a   : > { %2619 = vst [vmem:[%s5983_s6 + $0x178] sm:$0xff] %v2611_v12 }
 0x24b   : > { %v2551_v11 = vpop.f32.mrf.mxu3  ;;  %v7296_v56 = vpop.f32.mrf.mxu0 }
 0x24c   : > { %v2552_v52 = vadd.f32 %v2551_v11, %v2523_v51  ;;  %v3034_v51 = vadd.f32 %v7257_v45, %v7252_v34  ;;  %v3189_v34 = vld [vmem:[%s7468_s2 + $0x1b8] sm:$0xff] }
 0x24e   : > { %v7298_v22 = vpop.f32.mrf.mxu1 }
 0x250   : > { %v2524_v42 = vpop.f32.mrf.mxu2 }
 0x251   : > { %v2525_v5 = vadd.f32 %v2524_v42, %v7214_v24  ;;  %v3176_v24 = vld [vmem:[%s7469_s3 + $0x190] sm:$0xff] }
 0x253   : > { %v2553_v7 = vpop.f32.mrf.mxu3  ;;  %v3113_v58 = vpop.f32.mrf.mxu0 }
 0x254   : > { %v2554_v17 = vadd.f32 %v2553_v7, %v2525_v5 }
 0x256   : > { %v3142_v23 = vpop.f32.mrf.mxu1 }
 0x258   : > { %v3055_v53 = vpop.f32.mrf.mxu2 }
 0x259   : > { %v3056_v47 = vadd.f32 %v3055_v53, %v3027_v35 }
 0x25b   : > { %v3084_v4 = vpop.f32.mrf.mxu3  ;;  %v3162_v27 = vadd.f32 %v3056_v47, %v7212_v43  ;;  %v3115_v37 = vpop.f32.mrf.mxu0  ;;  %v3175_v43 = vld [vmem:[%s7469_s3 + $0x188] sm:$0xff] }
 0x25c   : > { %v3114_v20 = vadd.f32 %v3113_v58, %v3084_v4  ;;  %v3188_v4 = vld [vmem:[%s7468_s2 + $0x1b0] sm:$0xff] }
 0x25d   : > { %v3170_v30 = vmul.f32 %v3166_v39, %v3162_v27  ;;  %v3212_v27 = vld [vmem:[%s7469_s3 + $0x1b0] sm:$0xff] }
 0x25e   : > { %v3143_v41 = vadd.f32 %v3142_v23, %v3114_v20  ;;  %v3144_v25 = vpop.f32.mrf.mxu1  ;;  %v3211_v23 = vld [vmem:[%s7469_s3 + $0x1a8] sm:$0xff] }
 0x25f   : > { %v3178_v3 = vadd.f32 %v3174_v44, %v3170_v30 }
 0x260   : > { %v3163_v49 = vadd.f32 %v3143_v41, %v2552_v52  ;;  %v3057_v60 = vpop.f32.mrf.mxu2 }
 0x261   : > { %3182 = vst [vmem:[%s5983_s6 + $0x180] sm:$0xff] %v3178_v3  ;;  %v3058_v61 = vadd.f32 %v3057_v60, %v3029_v54  ;;  %v3214_v60 = vld [vmem:[%s7469_s3 + $0x1c0] sm:$0xff] }
 0x262   : > { %v3171_v46 = vmul.f32 %v3167_v0, %v3163_v49  ;;  %v3037_v49 = vadd.f32 %v7269_v57, %v7264_v15  ;;  %v3191_v15 = vld [vmem:[%s7468_s2 + $0x1c8] sm:$0xff] }
 0x263   : > { %v3086_v31 = vpop.f32.mrf.mxu3  ;;  %v3164_v59 = vadd.f32 %v3058_v61, %v7218_v38  ;;  %v3118_v18 = vpop.f32.mrf.mxu0  ;;  %v3032_v38 = vadd.f32 %v7241_v6, %v7236_v26  ;;  %v3210_v26 = vld [vmem:[%s7469_s3 + $0x1a0] sm:$0xff] }
 0x264   : > { %v3179_v21 = vadd.f32 %v3175_v43, %v3171_v46  ;;  %v3116_v48 = vadd.f32 %v3115_v37, %v3086_v31  ;;  %v3190_v43 = vld [vmem:[%s7468_s2 + $0x1c0] sm:$0xff] }
 0x265   : > { %v3172_v2 = vmul.f32 %v3168_v14, %v3164_v59  ;;  %v3215_v14 = vld [vmem:[%s7469_s3 + $0x1c8] sm:$0xff] }
 0x266   : > { %3183 = vst [vmem:[%s5983_s6 + $0x188] sm:$0xff] %v3179_v21  ;;  %v3145_v28 = vadd.f32 %v3144_v25, %v3116_v48  ;;  %v3147_v9 = vpop.f32.mrf.mxu1  ;;  %v3213_v25 = vld [vmem:[%s7469_s3 + $0x1b8] sm:$0xff] }
 0x267   : > { %v3180_v13 = vadd.f32 %v3176_v24, %v3172_v2 }
 0x268   : > { %v3165_v40 = vadd.f32 %v3145_v28, %v2554_v17  ;;  %v3060_v33 = vpop.f32.mrf.mxu2 }
 0x269   : > { %3184 = vst [vmem:[%s5983_s6 + $0x190] sm:$0xff] %v3180_v13  ;;  %v3061_v19 = vadd.f32 %v3060_v33, %v3032_v38 }
 0x26a   : > { %v3173_v36 = vmul.f32 %v3169_v1, %v3165_v40  ;;  %v3216_v40 = vld [vmem:[%s7469_s3 + $0x1d0] sm:$0xff] }
 0x26b   : > { %v3089_v63 = vpop.f32.mrf.mxu3  ;;  %v3198_v12 = vmul.f32 %v3186_v10, %v3061_v19  ;;  %v3120_v11 = vpop.f32.mrf.mxu0  ;;  %v3042_v10 = vadd.f32 %v7293_v8, %v7288_v32  ;;  %v3195_v8 = vld [vmem:[%s7468_s2 + $0x1e8] sm:$0xff] }
 0x26c   : > { %v3181_v55 = vadd.f32 %v3177_v16, %v3173_v36  ;;  %v3119_v6 = vadd.f32 %v3118_v18, %v3089_v63  ;;  %v3039_v18 = vadd.f32 %v7281_v29, %v7276_v62  ;;  %v3193_v62 = vld [vmem:[%s7468_s2 + $0x1d8] sm:$0xff] }
 0x26d   : > { %v3222_v58 = vadd.f32 %v3210_v26, %v3198_v12  ;;  %v3217_v36 = vld [vmem:[%s7469_s3 + $0x1d8] sm:$0xff]  ;;  %v3194_v26 = vld [vmem:[%s7468_s2 + $0x1e0] sm:$0xff] }
 0x26e   : > { %3185 = vst [vmem:[%s5983_s6 + $0x198] sm:$0xff] %v3181_v55  ;;  %v3148_v42 = vadd.f32 %v3147_v9, %v3119_v6  ;;  %v3149_v7 = vpop.f32.mrf.mxu1  ;;  %v3192_v9 = vld [vmem:[%s7468_s2 + $0x1d0] sm:$0xff] }
 0x26f   : > { %3234 = vst [vmem:[%s5983_s6 + $0x1a0] sm:$0xff] %v3222_v58 }
 0x270   : > { %v3199_v35 = vmul.f32 %v3187_v50, %v3148_v42  ;;  %v3062_v47 = vpop.f32.mrf.mxu2 }
 0x271   : > { %v3063_v39 = vadd.f32 %v3062_v47, %v3034_v51  ;;  %v3044_v51 = vadd.f32 %v7298_v22, %v7296_v56  ;;  %v3220_v56 = vld [vmem:[%s7469_s3 + $0x1f0] sm:$0xff] }
 0x272   : > { %v3223_v53 = vadd.f32 %v3211_v23, %v3199_v35  ;;  %v3219_v23 = vld [vmem:[%s7469_s3 + $0x1e8] sm:$0xff] }
 0x273   : > { %v3091_v20 = vpop.f32.mrf.mxu3  ;;  %v3200_v52 = vmul.f32 %v3188_v4, %v3063_v39  ;;  %v3123_v45 = vpop.f32.mrf.mxu0  ;;  %v3196_v4 = vld [vmem:[%s7468_s2 + $0x1f0] sm:$0xff] }
 0x274   : > { %3235 = vst [vmem:[%s5983_s6 + $0x1a8] sm:$0xff] %v3223_v53  ;;  %v3121_v37 = vadd.f32 %v3120_v11, %v3091_v20  ;;  %v3218_v11 = vld [vmem:[%s7469_s3 + $0x1e0] sm:$0xff] }
 0x275   : > { %v3224_v41 = vadd.f32 %v3212_v27, %v3200_v52 }
 0x276   : > { %v3150_v44 = vadd.f32 %v3149_v7, %v3121_v37  ;;  %v3152_v30 = vpop.f32.mrf.mxu1 }
 0x277   : > { %3236 = vst [vmem:[%s5983_s6 + $0x1b0] sm:$0xff] %v3224_v41  ;;  %v3221_v41 = vld [vmem:[%s7469_s3 + $0x1f8] sm:$0xff] }
 0x278   : > { %v3201_v0 = vmul.f32 %v3189_v34, %v3150_v44  ;;  %v3065_v3 = vpop.f32.mrf.mxu2  ;;  %v3197_v34 = vld [vmem:[%s7468_s2 + $0x1f8] sm:$0xff] }
 0x279   : > { %v3066_v5 = vadd.f32 %v3065_v3, %v3037_v49 }
 0x27a   : > { %v3225_v54 = vadd.f32 %v3213_v25, %v3201_v0 }
 0x27b   : > { %v3094_v46 = vpop.f32.mrf.mxu3  ;;  %v3202_v31 = vmul.f32 %v3190_v43, %v3066_v5  ;;  %v3125_v48 = vpop.f32.mrf.mxu0 }
 0x27c   : > { %3237 = vst [vmem:[%s5983_s6 + $0x1b8] sm:$0xff] %v3225_v54  ;;  %v3124_v61 = vadd.f32 %v3123_v45, %v3094_v46 }
 0x27d   : > { %v3226_v21 = vadd.f32 %v3214_v60, %v3202_v31 }
 0x27e   : > { %v3153_v57 = vadd.f32 %v3152_v30, %v3124_v61  ;;  %v3154_v17 = vpop.f32.mrf.mxu1 }
 0x27f   : > { %3238 = vst [vmem:[%s5983_s6 + $0x1c0] sm:$0xff] %v3226_v21 }
 0x280   : > { %v3203_v59 = vmul.f32 %v3191_v15, %v3153_v57  ;;  %v3067_v28 = vpop.f32.mrf.mxu2 }
 0x281   : > { %v3068_v2 = vadd.f32 %v3067_v28, %v3039_v18 }
 0x282   : > { %v3227_v24 = vadd.f32 %v3215_v14, %v3203_v59 }
 0x283   : > { %v3096_v1 = vpop.f32.mrf.mxu3  ;;  %v3204_v13 = vmul.f32 %v3192_v9, %v3068_v2  ;;  %v3128_v19 = vpop.f32.mrf.mxu0 }
 0x284   : > { %3239 = vst [vmem:[%s5983_s6 + $0x1c8] sm:$0xff] %v3227_v24  ;;  %v3126_v38 = vadd.f32 %v3125_v48, %v3096_v1 }
 0x285   : > { %v3228_v16 = vadd.f32 %v3216_v40, %v3204_v13 }
 0x286   : > { %v3155_v29 = vadd.f32 %v3154_v17, %v3126_v38  ;;  %v3157_v6 = vpop.f32.mrf.mxu1 }
 0x287   : > { %3240 = vst [vmem:[%s5983_s6 + $0x1d0] sm:$0xff] %v3228_v16 }
 0x288   : > { %v3205_v33 = vmul.f32 %v3193_v62, %v3155_v29  ;;  %v3070_v55 = vpop.f32.mrf.mxu2 }
 0x289   : > { %v3071_v12 = vadd.f32 %v3070_v55, %v3042_v10 }
 0x28a   : > { %v3229_v63 = vadd.f32 %v3217_v36, %v3205_v33 }
 0x28b   : > { %v3099_v50 = vpop.f32.mrf.mxu3  ;;  %v3206_v32 = vmul.f32 %v3194_v26, %v3071_v12  ;;  %v3130_v39 = vpop.f32.mrf.mxu0 }
 0x28c   : > { %3241 = vst [vmem:[%s5983_s6 + $0x1d8] sm:$0xff] %v3229_v63  ;;  %v3129_v42 = vadd.f32 %v3128_v19, %v3099_v50 }
 0x28d   : > { %v3230_v58 = vadd.f32 %v3218_v11, %v3206_v32 }
 0x28e   : > { %v3158_v7 = vadd.f32 %v3157_v6, %v3129_v42  ;;  %v3159_v37 = vpop.f32.mrf.mxu1 }
 0x28f   : > { %3242 = vst [vmem:[%s5983_s6 + $0x1e0] sm:$0xff] %v3230_v58 }
 0x290   : > { %v3207_v35 = vmul.f32 %v3195_v8, %v3158_v7  ;;  %v3072_v47 = vpop.f32.mrf.mxu2 }
 0x291   : > { %v3073_v20 = vadd.f32 %v3072_v47, %v3044_v51 }
 0x292   : > { %v3231_v53 = vadd.f32 %v3219_v23, %v3207_v35 }
 0x293   : > { %v3101_v27 = vpop.f32.mrf.mxu3  ;;  %v3208_v52 = vmul.f32 %v3196_v4, %v3073_v20 }
 0x294   : > { %3243 = vst [vmem:[%s5983_s6 + $0x1e8] sm:$0xff] %v3231_v53  ;;  %v3131_v22 = vadd.f32 %v3130_v39, %v3101_v27 }
 0x295   : > { %v3232_v44 = vadd.f32 %v3220_v56, %v3208_v52 }
 0x296   : > { %v3160_v45 = vadd.f32 %v3159_v37, %v3131_v22 }
 0x297   : > { %3244 = vst [vmem:[%s5983_s6 + $0x1f0] sm:$0xff] %v3232_v44 }
 0x298   : > { %v3209_v25 = vmul.f32 %v3197_v34, %v3160_v45 }
 0x29a   : > { %v3233_v30 = vadd.f32 %v3221_v41, %v3209_v25 }
 0x29c   : > { %3245 = vst [vmem:[%s5983_s6 + $0x1f8] sm:$0xff] %v3233_v30 }
 0x29d   : > { %4921 = shalt.err (!%p4918_p3)
}
 0x29e   : > { %s4958_s10 = smov 256   ;;  %s4959_s6 = smov 16  }
 0x29f   : > { %4853 = dma.vmem_to_hbm [thread:$0]  (%p5023_p5), %s3260_s29, 8192, %s3262_s12, %s3247_s8, %s4958_s10, %s4958_s10, %s4959_s6  }
 0x2a0 PF: > { %p4859_p4 = scmp.ge.s32.totalorder %s4956_s18, 2  ;;  %s3276_s19 = sand.u32 1, %s4944_s15  }
 0x2a1   : > { %s3277_s27 = scalar_lea.sflag [#allocation3], %s3276_s19 }
 0x2a2   : > { %p4856_p7 = pnand %p4859_p4, %p5027_p6 }
 0x2a4   : > { %p4857_p8 = pneg %p4856_p7 }
 0x2a6   : > { %4939 = dma.done.wait (%p4857_p8), %s3277_s27, 8192  }
 0x2a7   : > { %4941 = vsyncadd (%p4857_p8), %s3277_s27, 4294959104  ;;  %p14_p9 = scmp.ge.s32.totalorder %s5010_s21, 4   ;;  %s7473_s15 = smov %s4948_s16 }
 0x2a8   : > { %s7474_s16 = smov %s4952_s17  ;;  %s7475_s17 = smov %s5021_s24 }
 0x2a9   : > { %s7476_s18 = smov %s5010_s21  ;;  %16 = sbr.rel (!%p14_p9) target bundleno = 3 (0x3), region = 71 }
 0x2ae   :  { %3283 = vsyncpa [#allocation3], 1 }
 0x2af   :  { %3285 = vsyncpa [#allocation3 + $0x1], 1 }

</bundles_post_ra>
